<compile_context>
chip_gen: v6e
topology: v6e:2x2x1
jax: 0.10.0
libtpu: 0.0.40
codegen_flags: <defaults>
</compile_context>

<pallas_src>
import functools

import jax
import jax.numpy as jnp
from jax import lax
from jax.experimental import pallas as pl
from jax.experimental.pallas import tpu as pltpu


# ----------------------------------------------------------------------------
# glue: build_grid (same semantics as the uORF/uOCF build_grid used upstream)
# ----------------------------------------------------------------------------
def build_grid(h, w):
    xs = jnp.linspace(-1.0 + 1.0 / w, 1.0 - 1.0 / w, w, dtype=jnp.float32)
    ys = jnp.linspace(-1.0 + 1.0 / h, 1.0 - 1.0 / h, h, dtype=jnp.float32)
    y_t, x_t = jnp.meshgrid(ys, xs, indexing="ij")            # (h, w) each
    grid = jnp.stack([x_t, y_t], axis=-1)                      # (h, w, 2)
    return grid[None]                                          # (1, h, w, 2)


# ----------------------------------------------------------------------------
# Pallas kernel: one batch element per grid step; all slots + k/v in-body.
# ----------------------------------------------------------------------------
def _encoder_pos_emb_fg_kernel(
    x_ref,        # (1, HW, dim)      tokens
    off_ref,      # (1, n_slots, dim) per-slot grid-embed offset  [p,-p]@Wg^T
    base_ref,     # (HW, dim)         [g,-g]@Wg^T + bg   (slot independent)
    wk_ref,       # (dim, dim)        Wk^T  (pre-transposed, (in,out))
    wv_ref,       # (dim, dim)        Wv^T
    gam_ref,      # (1, dim)          LayerNorm gamma
    bet_ref,      # (1, dim)          LayerNorm beta
    wm_ref,       # (dim, slot_dim)   Wm^T
    bm_ref,       # (1, slot_dim)     MLP bias
    k_out_ref,    # (1, n_slots, HW, slot_dim)
    v_out_ref,    # (1, n_slots, HW, slot_dim)
):
    n_slots = off_ref.shape[1]
    hw = x_ref.shape[1]
    dim = x_ref.shape[2]
    slot_dim = wm_ref.shape[1]

    x = x_ref[0]                                                     # (HW, dim)
    base = base_ref[...]                                             # (HW, dim)

    # Token projections + slot-independent grid term (2-D adds, cheap).
    kb = jnp.dot(x, wk_ref[...], preferred_element_type=jnp.float32) + base
    vb = jnp.dot(x, wv_ref[...], preferred_element_type=jnp.float32) + base

    # Stack k/v once while still 2-D, then a single per-slot broadcast-subtract:
    #   t[n, :HW]  = kb + base - off[n]   (== k path)
    #   t[n, HW:]  = vb + base - off[n]   (== v path)
    kv = jnp.concatenate([kb, vb], axis=0)                           # (2*HW, dim)
    t = kv[None, :, :] - off_ref[0][:, None, :]                      # (n, 2*HW, dim)
    t = t.reshape(n_slots * 2 * hw, dim)

    # Fused LayerNorm over the whole stack (one set of broadcasts per step).
    mu = jnp.mean(t, axis=-1, keepdims=True)
    var = jnp.mean(jnp.square(t - mu), axis=-1, keepdims=True)
    tn = (t - mu) * lax.rsqrt(var + 1e-5)
    tn = tn * gam_ref[0] + bet_ref[0]

    # One big final matmul for all slots and both k/v paths.
    out = jnp.dot(tn, wm_ref[...],
                  preferred_element_type=jnp.float32) + bm_ref[0]    # (n*2*HW, sd)
    out = out.reshape(n_slots, 2, hw, slot_dim)                      # free view

    k_out_ref[0] = out[:, 0].astype(k_out_ref.dtype)
    v_out_ref[0] = out[:, 1].astype(v_out_ref.dtype)


# ----------------------------------------------------------------------------
# Wrapper
# ----------------------------------------------------------------------------
@functools.partial(jax.jit, static_argnums=(2, 3))
def encoder_pos_embedding_fg(params, x, h, w, position_latent=None):
    """
    params: dict with wg (dim,4), bg (dim,), wk (dim,dim), wv (dim,dim),
            ln_gamma (dim,), ln_beta (dim,), wm (slot_dim,dim), bm (slot_dim,)
    x: (B, h*w, dim) float32
    position_latent: (B, n_slots, 2) or None
    returns: k, v with shape (B, n_slots, h*w, slot_dim)  (n_slots=1 if None)
    """
    B, hw, dim = x.shape
    assert hw == h * w
    slot_dim = params["wm"].shape[0]

    # --- linearity of grid_embed: base term (slot independent) + per-slot offset
    grid = build_grid(h, w).reshape(hw, 2)                             # (HW, 2)
    g4 = jnp.concatenate([grid, -grid], axis=-1)                       # (HW, 4)
    base = g4 @ params["wg"].T + params["bg"]                          # (HW, dim)

    if position_latent is not None:
        n_slots = position_latent.shape[1]
        p4 = jnp.concatenate([position_latent, -position_latent], axis=-1)  # (B,n,4)
        off = p4 @ params["wg"].T                                      # (B, n, dim)
    else:
        n_slots = 1
        off = jnp.zeros((B, 1, dim), jnp.float32)

    # --- pre-transposed weights / reshaped vectors (no in-kernel transposes)
    wk_t = params["wk"].T                                              # (dim, dim)
    wv_t = params["wv"].T                                              # (dim, dim)
    wm_t = params["wm"].T                                              # (dim, slot_dim)
    gam = params["ln_gamma"].reshape(1, dim)
    bet = params["ln_beta"].reshape(1, dim)
    bm = params["bm"].reshape(1, slot_dim)

    rep = lambda shape: pl.BlockSpec(shape, lambda b: (0,) * len(shape))

    out_shape = (
        jax.ShapeDtypeStruct((B, n_slots, hw, slot_dim), jnp.float32),
        jax.ShapeDtypeStruct((B, n_slots, hw, slot_dim), jnp.float32),
    )

    kernel = pl.pallas_call(
        _encoder_pos_emb_fg_kernel,
        out_shape=out_shape,
        grid_spec=pltpu.PrefetchScalarGridSpec(
            num_scalar_prefetch=0,
            grid=(B,),
            in_specs=[
                pl.BlockSpec((1, hw, dim), lambda b: (b, 0, 0)),        # x
                pl.BlockSpec((1, n_slots, dim), lambda b: (b, 0, 0)),   # off
                rep((hw, dim)),                                         # base
                rep((dim, dim)),                                        # wk^T
                rep((dim, dim)),                                        # wv^T
                rep((1, dim)),                                          # gamma
                rep((1, dim)),                                          # beta
                rep((dim, slot_dim)),                                   # wm^T
                rep((1, slot_dim)),                                     # bm
            ],
            out_specs=[
                pl.BlockSpec((1, n_slots, hw, slot_dim), lambda b: (b, 0, 0, 0)),
                pl.BlockSpec((1, n_slots, hw, slot_dim), lambda b: (b, 0, 0, 0)),
            ],
        ),
        compiler_params=pltpu.CompilerParams(
            dimension_semantics=("parallel",)),
    )

    k, v = kernel(x, off, base, wk_t, wv_t, gam, bet, wm_t, bm)
    return k, v


# ----------------------------------------------------------------------------
# Pure-JAX reference (mirrors the PyTorch forward exactly)
# ----------------------------------------------------------------------------
def encoder_pos_embedding_fg_ref(params, x, h, w, position_latent=None):
    B, hw, dim = x.shape
    grid = build_grid(h, w)
    if position_latent is not None:
        rel = grid[:, None] - position_latent[:, :, None, None, :]
    else:
        rel = jnp.broadcast_to(grid[:, None], (B, 1, h, w, 2))
    n_slots = rel.shape[1]
    rel4 = jnp.concatenate([rel, -rel], axis=-1).reshape(B, n_slots, hw, 4)

    grid_embed = rel4 @ params["wg"].T + params["bg"]
    k = (x @ params["wk"].T)[:, None] + grid_embed
    v = (x @ params["wv"].T)[:, None] + grid_embed

    def mlp(t):
        mu = jnp.mean(t, axis=-1, keepdims=True)
        var = jnp.mean(jnp.square(t - mu), axis=-1, keepdims=True)
        tn = (t - mu) / jnp.sqrt(var + 1e-5)
        tn = tn * params["ln_gamma"] + params["ln_beta"]
        return tn @ params["wm"].T + params["bm"]

    return mlp(k), mlp(v)


# ----------------------------------------------------------------------------
# Deterministic parameter init (PyTorch-Linear-style uniform ±1/sqrt(fan_in))
# ----------------------------------------------------------------------------
def init_params(key, dim, slot_dim):
    ks = jax.random.split(key, 6)
    u = lambda k, shape, fan_in: jax.random.uniform(
        k, shape, jnp.float32, -1.0 / jnp.sqrt(fan_in), 1.0 / jnp.sqrt(fan_in))
    return {
        "wg": u(ks[0], (dim, 4), 4.0),
        "bg": u(ks[1], (dim,), 4.0),
        "wk": u(ks[2], (dim, dim), float(dim)),
        "wv": u(ks[3], (dim, dim), float(dim)),
        "ln_gamma": jnp.ones((dim,), jnp.float32),
        "ln_beta": jnp.zeros((dim,), jnp.float32),
        "wm": u(ks[4], (slot_dim, dim), float(dim)),
        "bm": u(ks[5], (slot_dim,), float(dim)),
    }


if __name__ == "__main__":
    B, h, w, dim, slot_dim, n_slots = 2, 16, 16, 32, 32, 4
    hw = h * w

    key = jax.random.PRNGKey(0)
    kp, kx, kpos = jax.random.split(key, 3)
    params = init_params(kp, dim, slot_dim)
    x = jax.random.normal(kx, (B, hw, dim), jnp.float32)
    position_latent = jax.random.uniform(kpos, (B, n_slots, 2), jnp.float32,
                                         -1.0, 1.0)

    k_out, v_out = encoder_pos_embedding_fg(params, x, h, w, position_latent)
    jax.block_until_ready((k_out, v_out))

    k_ref, v_ref = encoder_pos_embedding_fg_ref(params, x, h, w, position_latent)
    assert k_out.shape == (B, n_slots, hw, slot_dim)
    assert v_out.shape == (B, n_slots, hw, slot_dim)
    assert jnp.allclose(k_out, k_ref, atol=2e-4, rtol=2e-4)
    assert jnp.allclose(v_out, v_ref, atol=2e-4, rtol=2e-4)

    # also exercise the position_latent=None branch (n_slots = 1)
    k1, v1 = encoder_pos_embedding_fg(params, x, h, w, None)
    jax.block_until_ready((k1, v1))
    k1r, v1r = encoder_pos_embedding_fg_ref(params, x, h, w, None)
    assert jnp.allclose(k1, k1r, atol=2e-4, rtol=2e-4)
    assert jnp.allclose(v1, v1r, atol=2e-4, rtol=2e-4)

    print("KERNEL_OK")
</pallas_src>

<mosaic_0001>
module attributes {stable_mosaic.version = 11 : i64} {
  func.func @_encoder_pos_emb_fg_kernel(%arg0: i32, %arg1: memref<1x256x32xf32, #tpu.memory_space<vmem>>, %arg2: memref<1x4x32xf32, #tpu.memory_space<vmem>>, %arg3: memref<256x32xf32, #tpu.memory_space<vmem>>, %arg4: memref<32x32xf32, #tpu.memory_space<vmem>>, %arg5: memref<32x32xf32, #tpu.memory_space<vmem>>, %arg6: memref<1x32xf32, #tpu.memory_space<vmem>>, %arg7: memref<1x32xf32, #tpu.memory_space<vmem>>, %arg8: memref<32x32xf32, #tpu.memory_space<vmem>>, %arg9: memref<1x32xf32, #tpu.memory_space<vmem>>, %arg10: memref<1x4x256x32xf32, #tpu.memory_space<vmem>>, %arg11: memref<1x4x256x32xf32, #tpu.memory_space<vmem>>) attributes {dimension_semantics = [#tpu.dimension_semantics<parallel>], iteration_bounds = array<i64: 2>, scalar_prefetch = 0 : i64, scratch_operands = 0 : i64, tpu.core_type = #tpu.core_type<tc>, window_params = [{transform_indices = @transform_0, window_bounds = array<i64: 1, 256, 32>}, {transform_indices = @transform_1, window_bounds = array<i64: 1, 4, 32>}, {pipeline_mode = #tpu.pipeline_mode<synchronous>, transform_indices = @transform_2, window_bounds = array<i64: 256, 32>}, {pipeline_mode = #tpu.pipeline_mode<synchronous>, transform_indices = @transform_3, window_bounds = array<i64: 32, 32>}, {pipeline_mode = #tpu.pipeline_mode<synchronous>, transform_indices = @transform_4, window_bounds = array<i64: 32, 32>}, {pipeline_mode = #tpu.pipeline_mode<synchronous>, transform_indices = @transform_5, window_bounds = array<i64: 1, 32>}, {pipeline_mode = #tpu.pipeline_mode<synchronous>, transform_indices = @transform_6, window_bounds = array<i64: 1, 32>}, {pipeline_mode = #tpu.pipeline_mode<synchronous>, transform_indices = @transform_7, window_bounds = array<i64: 32, 32>}, {pipeline_mode = #tpu.pipeline_mode<synchronous>, transform_indices = @transform_8, window_bounds = array<i64: 1, 32>}, {transform_indices = @transform_9, window_bounds = array<i64: 1, 4, 256, 32>}, {transform_indices = @transform_10, window_bounds = array<i64: 1, 4, 256, 32>}]} {
    %c0 = arith.constant 0 : index
    %c0_0 = arith.constant 0 : index
    %c0_1 = arith.constant 0 : index
    %0 = vector.load %arg1[%c0, %c0_0, %c0_1] : memref<1x256x32xf32, #tpu.memory_space<vmem>>, vector<1x256x32xf32>
    %1 = vector.shape_cast %0 : vector<1x256x32xf32> to vector<256x32xf32>
    %c0_2 = arith.constant 0 : index
    %c0_3 = arith.constant 0 : index
    %2 = vector.load %arg3[%c0_2, %c0_3] : memref<256x32xf32, #tpu.memory_space<vmem>>, vector<256x32xf32>
    %c0_4 = arith.constant 0 : index
    %c0_5 = arith.constant 0 : index
    %3 = vector.load %arg4[%c0_4, %c0_5] : memref<32x32xf32, #tpu.memory_space<vmem>>, vector<32x32xf32>
    %cst = arith.constant dense<0.000000e+00> : vector<256x32xf32>
    %4 = tpu.matmul %1, %3, %cst {dimension_numbers = #tpu.dot_dimension_numbers<[1], [0], [0], [1], [0, 0, 1, 1], [], []>} : vector<256x32xf32>, vector<32x32xf32>, vector<256x32xf32> -> vector<256x32xf32>
    %5 = arith.addf %4, %2 : vector<256x32xf32>
    %c0_6 = arith.constant 0 : index
    %c0_7 = arith.constant 0 : index
    %6 = vector.load %arg5[%c0_6, %c0_7] : memref<32x32xf32, #tpu.memory_space<vmem>>, vector<32x32xf32>
    %cst_8 = arith.constant dense<0.000000e+00> : vector<256x32xf32>
    %7 = tpu.matmul %1, %6, %cst_8 {dimension_numbers = #tpu.dot_dimension_numbers<[1], [0], [0], [1], [0, 0, 1, 1], [], []>} : vector<256x32xf32>, vector<32x32xf32>, vector<256x32xf32> -> vector<256x32xf32>
    %8 = arith.addf %7, %2 : vector<256x32xf32>
    %9 = tpu.concatenate %5, %8 in 0 : vector<256x32xf32>, vector<256x32xf32> -> vector<512x32xf32>
    %10 = vector.shape_cast %9 : vector<512x32xf32> to vector<1x512x32xf32>
    %c0_9 = arith.constant 0 : index
    %c0_10 = arith.constant 0 : index
    %c0_11 = arith.constant 0 : index
    %11 = vector.load %arg2[%c0_9, %c0_10, %c0_11] : memref<1x4x32xf32, #tpu.memory_space<vmem>>, vector<1x4x32xf32>
    %12 = vector.shape_cast %11 : vector<1x4x32xf32> to vector<4x32xf32>
    %13 = vector.shape_cast %12 : vector<4x32xf32> to vector<4x1x32xf32>
    %14 = vector.broadcast %10 : vector<1x512x32xf32> to vector<4x512x32xf32>
    %15 = vector.broadcast %13 : vector<4x1x32xf32> to vector<4x512x32xf32>
    %16 = arith.subf %14, %15 : vector<4x512x32xf32>
    %17 = vector.shape_cast %16 : vector<4x512x32xf32> to vector<2048x32xf32>
    %cst_12 = arith.constant dense<0.000000e+00> : vector<2048xf32>
    %18 = vector.multi_reduction <add>, %17, %cst_12 [1] : vector<2048x32xf32> to vector<2048xf32>
    %19 = vector.shape_cast %18 : vector<2048xf32> to vector<2048x1xf32>
    %cst_13 = arith.constant 3.200000e+01 : f32
    %20 = vector.broadcast %cst_13 : f32 to vector<2048x1xf32>
    %21 = arith.divf %19, %20 : vector<2048x1xf32>
    %22 = vector.broadcast %21 : vector<2048x1xf32> to vector<2048x32xf32>
    %23 = arith.subf %17, %22 : vector<2048x32xf32>
    %24 = arith.mulf %23, %23 : vector<2048x32xf32>
    %cst_14 = arith.constant dense<0.000000e+00> : vector<2048xf32>
    %25 = vector.multi_reduction <add>, %24, %cst_14 [1] : vector<2048x32xf32> to vector<2048xf32>
    %26 = vector.shape_cast %25 : vector<2048xf32> to vector<2048x1xf32>
    %cst_15 = arith.constant 3.200000e+01 : f32
    %27 = vector.broadcast %cst_15 : f32 to vector<2048x1xf32>
    %28 = arith.divf %26, %27 : vector<2048x1xf32>
    %29 = vector.broadcast %21 : vector<2048x1xf32> to vector<2048x32xf32>
    %30 = arith.subf %17, %29 : vector<2048x32xf32>
    %cst_16 = arith.constant 9.99999974E-6 : f32
    %31 = vector.broadcast %cst_16 : f32 to vector<2048x1xf32>
    %32 = arith.addf %28, %31 : vector<2048x1xf32>
    %33 = math.rsqrt %32 : vector<2048x1xf32>
    %34 = vector.broadcast %33 : vector<2048x1xf32> to vector<2048x32xf32>
    %35 = arith.mulf %30, %34 : vector<2048x32xf32>
    %c0_17 = arith.constant 0 : index
    %c0_18 = arith.constant 0 : index
    %36 = vector.load %arg6[%c0_17, %c0_18] : memref<1x32xf32, #tpu.memory_space<vmem>>, vector<1x32xf32>
    %37 = vector.shape_cast %36 : vector<1x32xf32> to vector<32xf32>
    %38 = vector.shape_cast %37 : vector<32xf32> to vector<1x32xf32>
    %39 = vector.broadcast %38 : vector<1x32xf32> to vector<2048x32xf32>
    %40 = arith.mulf %35, %39 : vector<2048x32xf32>
    %c0_19 = arith.constant 0 : index
    %c0_20 = arith.constant 0 : index
    %41 = vector.load %arg7[%c0_19, %c0_20] : memref<1x32xf32, #tpu.memory_space<vmem>>, vector<1x32xf32>
    %42 = vector.shape_cast %41 : vector<1x32xf32> to vector<32xf32>
    %43 = vector.shape_cast %42 : vector<32xf32> to vector<1x32xf32>
    %44 = vector.broadcast %43 : vector<1x32xf32> to vector<2048x32xf32>
    %45 = arith.addf %40, %44 : vector<2048x32xf32>
    %c0_21 = arith.constant 0 : index
    %c0_22 = arith.constant 0 : index
    %46 = vector.load %arg8[%c0_21, %c0_22] : memref<32x32xf32, #tpu.memory_space<vmem>>, vector<32x32xf32>
    %cst_23 = arith.constant dense<0.000000e+00> : vector<2048x32xf32>
    %47 = tpu.matmul %45, %46, %cst_23 {dimension_numbers = #tpu.dot_dimension_numbers<[1], [0], [0], [1], [0, 0, 1, 1], [], []>} : vector<2048x32xf32>, vector<32x32xf32>, vector<2048x32xf32> -> vector<2048x32xf32>
    %c0_24 = arith.constant 0 : index
    %c0_25 = arith.constant 0 : index
    %48 = vector.load %arg9[%c0_24, %c0_25] : memref<1x32xf32, #tpu.memory_space<vmem>>, vector<1x32xf32>
    %49 = vector.shape_cast %48 : vector<1x32xf32> to vector<32xf32>
    %50 = vector.shape_cast %49 : vector<32xf32> to vector<1x32xf32>
    %51 = vector.broadcast %50 : vector<1x32xf32> to vector<2048x32xf32>
    %52 = arith.addf %47, %51 : vector<2048x32xf32>
    %53 = vector.shape_cast %52 : vector<2048x32xf32> to vector<4x2x256x32xf32>
    %54 = vector.extract_strided_slice %53 {offsets = [0, 0, 0, 0], sizes = [4, 1, 256, 32], strides = [1, 1, 1, 1]} : vector<4x2x256x32xf32> to vector<4x1x256x32xf32>
    %55 = vector.shape_cast %54 : vector<4x1x256x32xf32> to vector<4x256x32xf32>
    %c0_26 = arith.constant 0 : index
    %c0_27 = arith.constant 0 : index
    %c0_28 = arith.constant 0 : index
    %c0_29 = arith.constant 0 : index
    %56 = vector.load %arg10[%c0_26, %c0_27, %c0_28, %c0_29] : memref<1x4x256x32xf32, #tpu.memory_space<vmem>>, vector<1x4x256x32xf32>
    %57 = vector.shape_cast %56 : vector<1x4x256x32xf32> to vector<4x256x32xf32>
    %58 = vector.shape_cast %55 : vector<4x256x32xf32> to vector<1x4x256x32xf32>
    tpu.vector_store %arg10[%c0_26, %c0_27, %c0_28, %c0_29], %58 {strides = array<i32>} : memref<1x4x256x32xf32, #tpu.memory_space<vmem>>, vector<1x4x256x32xf32>,
    %59 = vector.extract_strided_slice %53 {offsets = [0, 1, 0, 0], sizes = [4, 1, 256, 32], strides = [1, 1, 1, 1]} : vector<4x2x256x32xf32> to vector<4x1x256x32xf32>
    %60 = vector.shape_cast %59 : vector<4x1x256x32xf32> to vector<4x256x32xf32>
    %c0_30 = arith.constant 0 : index
    %c0_31 = arith.constant 0 : index
    %c0_32 = arith.constant 0 : index
    %c0_33 = arith.constant 0 : index
    %61 = vector.load %arg11[%c0_30, %c0_31, %c0_32, %c0_33] : memref<1x4x256x32xf32, #tpu.memory_space<vmem>>, vector<1x4x256x32xf32>
    %62 = vector.shape_cast %61 : vector<1x4x256x32xf32> to vector<4x256x32xf32>
    %63 = vector.shape_cast %60 : vector<4x256x32xf32> to vector<1x4x256x32xf32>
    tpu.vector_store %arg11[%c0_30, %c0_31, %c0_32, %c0_33], %63 {strides = array<i32>} : memref<1x4x256x32xf32, #tpu.memory_space<vmem>>, vector<1x4x256x32xf32>,
    return
  }
  func.func @transform_0(%arg0: i32) -> (i32, i32, i32) {
    %c0_i32 = arith.constant 0 : i32
    %c0_i32_0 = arith.constant 0 : i32
    %c0_i32_1 = arith.constant 0 : i32
    return %arg0, %c0_i32, %c0_i32_0 : i32, i32, i32
  }
  func.func @transform_1(%arg0: i32) -> (i32, i32, i32) {
    %c0_i32 = arith.constant 0 : i32
    %c0_i32_0 = arith.constant 0 : i32
    %c0_i32_1 = arith.constant 0 : i32
    return %arg0, %c0_i32, %c0_i32_0 : i32, i32, i32
  }
  func.func @transform_2(%arg0: i32) -> (i32, i32) {
    %c0_i32 = arith.constant 0 : i32
    %c0_i32_0 = arith.constant 0 : i32
    %c0_i32_1 = arith.constant 0 : i32
    return %c0_i32, %c0_i32_0 : i32, i32
  }
  func.func @transform_3(%arg0: i32) -> (i32, i32) {
    %c0_i32 = arith.constant 0 : i32
    %c0_i32_0 = arith.constant 0 : i32
    %c0_i32_1 = arith.constant 0 : i32
    return %c0_i32, %c0_i32_0 : i32, i32
  }
  func.func @transform_4(%arg0: i32) -> (i32, i32) {
    %c0_i32 = arith.constant 0 : i32
    %c0_i32_0 = arith.constant 0 : i32
    %c0_i32_1 = arith.constant 0 : i32
    return %c0_i32, %c0_i32_0 : i32, i32
  }
  func.func @transform_5(%arg0: i32) -> (i32, i32) {
    %c0_i32 = arith.constant 0 : i32
    %c0_i32_0 = arith.constant 0 : i32
    %c0_i32_1 = arith.constant 0 : i32
    return %c0_i32, %c0_i32_0 : i32, i32
  }
  func.func @transform_6(%arg0: i32) -> (i32, i32) {
    %c0_i32 = arith.constant 0 : i32
    %c0_i32_0 = arith.constant 0 : i32
    %c0_i32_1 = arith.constant 0 : i32
    return %c0_i32, %c0_i32_0 : i32, i32
  }
  func.func @transform_7(%arg0: i32) -> (i32, i32) {
    %c0_i32 = arith.constant 0 : i32
    %c0_i32_0 = arith.constant 0 : i32
    %c0_i32_1 = arith.constant 0 : i32
    return %c0_i32, %c0_i32_0 : i32, i32
  }
  func.func @transform_8(%arg0: i32) -> (i32, i32) {
    %c0_i32 = arith.constant 0 : i32
    %c0_i32_0 = arith.constant 0 : i32
    %c0_i32_1 = arith.constant 0 : i32
    return %c0_i32, %c0_i32_0 : i32, i32
  }
  func.func @transform_9(%arg0: i32) -> (i32, i32, i32, i32) {
    %c0_i32 = arith.constant 0 : i32
    %c0_i32_0 = arith.constant 0 : i32
    %c0_i32_1 = arith.constant 0 : i32
    %c0_i32_2 = arith.constant 0 : i32
    return %arg0, %c0_i32, %c0_i32_0, %c0_i32_1 : i32, i32, i32, i32
  }
  func.func @transform_10(%arg0: i32) -> (i32, i32, i32, i32) {
    %c0_i32 = arith.constant 0 : i32
    %c0_i32_0 = arith.constant 0 : i32
    %c0_i32_1 = arith.constant 0 : i32
    %c0_i32_2 = arith.constant 0 : i32
    return %arg0, %c0_i32, %c0_i32_0, %c0_i32_1 : i32, i32, i32, i32
  }
}

</mosaic_0001>

<bundles_post_ra>
// kernel: neg.3
= control target key start
LH: loop header
LB: loop body
LE: loop exit
PB: predicated region body
PF: predicated region fallthrough
CT: control target
= control target key end

     0   :  { %v21_v4 = vmov 0.0   ;;  %s44_s0 = inlined_call_operand.vmem [shape: f32[2,4,2], index: 0, kind: input, shape index: {}]   ;;  %s45_s1 = inlined_call_operand.vmem [shape: bf16[2,4,2], index: 1, kind: output, shape index: {}]  }
   0x1   :  { %v2_v0 = vld [vmem:[%s44_s0] sm:$0xf]  ;;  %v18_v1 = vld [vmem:[%s44_s0 + $0x4] sm:$0xf] }
   0x2   :  { %v5_v2 = vxor.u32 2147483648, %v2_v0  ;;  %v13_v3 = vxor.u32 2147483648, %v18_v1 }
   0x4   :  { %v7_v5 = vpack.c.bf16 %v21_v4, %v5_v2  ;;  %v16_v6 = vpack.c.bf16 %v21_v4, %v13_v3 }
   0x6   :  { %8 = vst [vmem:[%s45_s1] sm:$0x3] %v7_v5  ;;  %19 = vst [vmem:[%s45_s1 + $0x2] sm:$0x3] %v16_v6 }

// kernel: neg.2
= control target key start
LH: loop header
LB: loop body
LE: loop exit
PB: predicated region body
PF: predicated region fallthrough
CT: control target
= control target key end

     0   :  { %v21_v4 = vmov 0.0   ;;  %s44_s0 = inlined_call_operand.vmem [shape: f32[256,2], index: 0, kind: input, shape index: {}]   ;;  %s45_s1 = inlined_call_operand.vmem [shape: bf16[256,2], index: 1, kind: output, shape index: {}]  }
   0x1   :  { %v2_v0 = vld [vmem:[%s44_s0] sm:$0x3]  ;;  %v18_v1 = vld [vmem:[%s44_s0 + $0x2] sm:$0x3] }
   0x2   :  { %v5_v2 = vxor.u32 2147483648, %v2_v0  ;;  %v13_v3 = vxor.u32 2147483648, %v18_v1 }
   0x4   :  { %v7_v5 = vpack.c.bf16 %v21_v4, %v5_v2  ;;  %v16_v6 = vpack.c.bf16 %v21_v4, %v13_v3 }
   0x6   :  { %8 = vst [vmem:[%s45_s1] sm:$0x1] %v7_v5  ;;  %19 = vst [vmem:[%s45_s1 + $0x1] sm:$0x1] %v16_v6 }

// kernel: encoder_pos_embedding_fg.1
= control target key start
LH: loop header
LB: loop body
LE: loop exit
PB: predicated region body
PF: predicated region fallthrough
CT: control target
= control target key end

     0   :  { %s9432_s13 = smov 0   ;;  %s15995_s0 = inlined_call_operand.vmem [shape: f32[2,256,32], index: 0, kind: input, shape index: {}]   ;;  %s15996_s1 = inlined_call_operand.vmem [shape: f32[2,4,32], index: 1, kind: input, shape index: {}]   ;;  %s15997_s2 = inlined_call_operand.vmem [shape: f32[256,32], index: 2, kind: input, shape index: {}]   ;;  %s15998_s3 = inlined_call_operand.vmem [shape: f32[32,32], index: 3, kind: input, shape index: {}]   ;;  %s15999_s4 = inlined_call_operand.vmem [shape: f32[32,32], index: 4, kind: input, shape index: {}]   ;;  %s16000_s5 = inlined_call_operand.vmem [shape: f32[1,32], index: 5, kind: input, shape index: {}]   ;;  %s16001_s6 = inlined_call_operand.vmem [shape: f32[1,32], index: 6, kind: input, shape index: {}]   ;;  %s16002_s7 = inlined_call_operand.vmem [shape: f32[32,32], index: 7, kind: input, shape index: {}]   ;;  %s16003_s8 = inlined_call_operand.vmem [shape: f32[1,32], index: 8, kind: input, shape index: {}]   ;;  %s16004_s9 = inlined_call_operand.vmem [shape: f32[2,4,256,32], index: 9, kind: output, shape index: {0}]   ;;  %s16005_s10 = inlined_call_operand.vmem [shape: f32[2,4,256,32], index: 10, kind: output, shape index: {1}]  }
   0x1 LB: > { %s7646_s14 = sadd.s32 4294967295, %s9374_s13   ;;  %p7650_p0 = scmp.ge.s32.totalorder %s9374_s13, 1  ;;  %s9374_s13 = sphi %s9432_s13, %s21_s13  }
   0x2   : > { %p324_p1 = scmp.lt.s32.totalorder %s9374_s13, 3 }
   0x4   : > { %p325_p2 = pnand %p7650_p0, %p324_p1 }
   0x6   : > { %328 = sbr.rel (%p325_p2) target bundleno = 1610 (0x64a), region = 56 }
   0xb   : > { %v457_v0 = vld [vmem:[%s15998_s3 + $0x18] sm:$0xff]  ;;  %v456_v2 = vld [vmem:[%s15998_s3 + $0x10] sm:$0xff]  ;;  %p371_p3 = scmp.lt.s32.totalorder %s7646_s14, 1  ;;  %v455_v4 = vld [vmem:[%s15998_s3 + $0x8] sm:$0xff]  ;;  %vm458_vm0 = vcmask 261120   ;;  %v1022_v42 = vlaneseq }
   0xc   : > { %v783_v1 = vld [vmem:[%s15999_s4 + $0x18] sm:$0xff]  ;;  %8319 = vmatprep.subr.mxu0 %v457_v0  ;;  %v782_v3 = vld [vmem:[%s15999_s4 + $0x10] sm:$0xff]  ;;  %v781_v5 = vld [vmem:[%s15999_s4 + $0x8] sm:$0xff]  ;;  %v9376_v40 = vmov 1966171168  }
   0xd   : > { %8375 = vmatprep.subr.mxu1 %v783_v1  ;;  %8320 = vmatpush3.msra.mxu0 %v457_v0  ;;  %s17914_s14 = smov (!%p371_p3, %s7646_s14), 1  ;;  %v454_v6 = vld [vmem:[%s15998_s3] sm:$0xff]  ;;  %v1020_v41 = vunpack.c.l.s4 %v9376_v40  ;;  %v1023_v44 = vshrl.u32 %v1022_v42, 7  ;;  %v423_v50 = vld [vmem:[%s15997_s2 + $0x8] sm:$0xff] }
   0xe   : > { %8376 = vmatpush3.msra.mxu1 %v783_v1  ;;  %8321 = vmatprep.subr.mxu0 %v456_v2  ;;  %v780_v7 = vld [vmem:[%s15999_s4] sm:$0xff]  ;;  %s7984_s11 = sshll.u32 %s17914_s14, 8  ;;  %s7653_s17 = sshll.u32 %s17914_s14, 2 }
   0xf   : > { %8377 = vmatprep.subr.mxu1 %v782_v3  ;;  %8322 = vmatpush3.msra.mxu0 %v456_v2  ;;  %s9470_s16 = scalar_lea.vmem %s15995_s0, %s7984_s11  ;;  %s379_s20 = scalar_lea.vmem %s15996_s1, %s7653_s17  ;;  %v1021_v43 = vunpack.c.0.s8 %v1020_v41  ;;  %v9572_v48 = vsub.s32 0, %v1023_v44  ;;  %v422_v55 = vld [vmem:[%s15997_s2] sm:$0xff] }
  0x10   : > { %8378 = vmatpush3.msra.mxu1 %v782_v3  ;;  %8323 = vmatprep.subr.mxu0 %v455_v4  ;;  %v390_v8 = vld [vmem:[%s9470_s16] sm:$0xff]  ;;  %v391_v9 = vld [vmem:[%s9470_s16 + $0x8] sm:$0xff]  ;;  %v392_v10 = vld [vmem:[%s9470_s16 + $0x10] sm:$0xff]  ;;  %s7985_s15 = sshll.u32 %s17914_s14, 10 }
  0x11   : > { %8379 = vmatprep.subr.mxu1 %v781_v5  ;;  %8324 = vmatpush3.msra.mxu0 %v455_v4  ;;  %v393_v11 = vld [vmem:[%s9470_s16 + $0x18] sm:$0xff]  ;;  %v394_v12 = vld [vmem:[%s9470_s16 + $0x20] sm:$0xff]  ;;  %v395_v13 = vld [vmem:[%s9470_s16 + $0x28] sm:$0xff]  ;;  %v1024_v46 = vsub.s32 %v1021_v43, %v1023_v44  ;;  %16458 = vst [vmem:[#allocation2_spill] sm:$0xff] %v9572_v48 }
  0x12   : > { %8380 = vmatpush3.msra.mxu1 %v781_v5  ;;  %8325 = vmatprep.subr.mxu0 %v454_v6  ;;  %v396_v14 = vld [vmem:[%s9470_s16 + $0x30] sm:$0xff]  ;;  %v397_v15 = vld [vmem:[%s9470_s16 + $0x38] sm:$0xff]  ;;  %v398_v16 = vld [vmem:[%s9470_s16 + $0x40] sm:$0xff] }
  0x13   : > { %8381 = vmatprep.subr.mxu1 %v780_v7  ;;  %8326 = vmatpush3.msra.mxu0 %v454_v6  ;;  %v399_v17 = vld [vmem:[%s9470_s16 + $0x48] sm:$0xff]  ;;  %v400_v18 = vld [vmem:[%s9470_s16 + $0x50] sm:$0xff]  ;;  %v401_v19 = vld [vmem:[%s9470_s16 + $0x58] sm:$0xff] }
  0x14   : > { %8327 = vmatprep.mubr.msk.f32.mxu0 %vm458_vm0, %v390_v8  ;;  %8382 = vmatpush3.msra.mxu1 %v780_v7  ;;  %v402_v20 = vld [vmem:[%s9470_s16 + $0x60] sm:$0xff]  ;;  %v403_v21 = vld [vmem:[%s9470_s16 + $0x68] sm:$0xff]  ;;  %v404_v22 = vld [vmem:[%s9470_s16 + $0x70] sm:$0xff] }
  0x15   : > { %8383 = vmatprep.mubr.msk.f32.mxu1 %vm458_vm0, %v390_v8  ;;  %8328 = vmatmul.mubr.msk.f32.vlgmr.msra.gmra.mxu0 %vm458_vm0, %v391_v9  ;;  %v405_v23 = vld [vmem:[%s9470_s16 + $0x78] sm:$0xff]  ;;  %v406_v24 = vld [vmem:[%s9470_s16 + $0x80] sm:$0xff]  ;;  %v407_v25 = vld [vmem:[%s9470_s16 + $0x88] sm:$0xff] }
  0x16   : > { %8384 = vmatmul.mubr.msk.f32.vlgmr.msra.gmra.mxu1 %vm458_vm0, %v391_v9  ;;  %8330 = vmatprep.mubr.msk.f32.mxu0 %vm458_vm0, %v392_v10  ;;  %v408_v26 = vld [vmem:[%s9470_s16 + $0x90] sm:$0xff]  ;;  %v409_v27 = vld [vmem:[%s9470_s16 + $0x98] sm:$0xff]  ;;  %v410_v28 = vld [vmem:[%s9470_s16 + $0xa0] sm:$0xff] }
  0x17   : > { %8386 = vmatprep.mubr.msk.f32.mxu1 %vm458_vm0, %v392_v10  ;;  %v411_v29 = vld [vmem:[%s9470_s16 + $0xa8] sm:$0xff]  ;;  %v412_v30 = vld [vmem:[%s9470_s16 + $0xb0] sm:$0xff]  ;;  %v413_v31 = vld [vmem:[%s9470_s16 + $0xb8] sm:$0xff] }
  0x18   : > { %v414_v32 = vld [vmem:[%s9470_s16 + $0xc0] sm:$0xff]  ;;  %v415_v33 = vld [vmem:[%s9470_s16 + $0xc8] sm:$0xff]  ;;  %v416_v34 = vld [vmem:[%s9470_s16 + $0xd0] sm:$0xff] }
  0x19   : > { %8331 = vmatmul.mubr.msk.f32.gmra.mxu0 %vm458_vm0, %v393_v11  ;;  %v417_v35 = vld [vmem:[%s9470_s16 + $0xd8] sm:$0xff]  ;;  %v418_v36 = vld [vmem:[%s9470_s16 + $0xe0] sm:$0xff]  ;;  %v419_v37 = vld [vmem:[%s9470_s16 + $0xe8] sm:$0xff] }
  0x1a   : > { %8387 = vmatmul.mubr.msk.f32.gmra.mxu1 %vm458_vm0, %v393_v11  ;;  %8333 = vmatprep.mubr.msk.f32.mxu0 %vm458_vm0, %v394_v12  ;;  %v420_v38 = vld [vmem:[%s9470_s16 + $0xf0] sm:$0xff]  ;;  %v421_v39 = vld [vmem:[%s9470_s16 + $0xf8] sm:$0xff]  ;;  %v7722_v45 = vld.sshfl [vmem:[%s379_s20] sm:$0x33 pattern:$0x75316420]  ;;  %s14079_s20 = scalar_lea.vmem %s16004_s9, %s7985_s15  ;;  %s14837_s16 = scalar_lea.vmem %s16005_s10, %s7985_s15 }
  0x1b   : > { %8389 = vmatprep.mubr.msk.f32.mxu1 %vm458_vm0, %v394_v12  ;;  %v1018_v47 = vcombine.high %v7722_v45, %v7722_v45  ;;  %v1025_v49 = vrot.slane %v7722_v45, %v1024_v46  ;;  %v425_v6 = vld [vmem:[%s15997_s2 + $0x18] sm:$0xff]  ;;  %v427_v44 = vld [vmem:[%s15997_s2 + $0x28] sm:$0xff] }
  0x1d   : > { %8334 = vmatmul.mubr.msk.f32.gmra.mxu0 %vm458_vm0, %v395_v13  ;;  %v9578_v51 = vrot.slane %v1025_v49, %v9572_v48  ;;  %v9580_v52 = vrot.slane %v1018_v47, %v1024_v46  ;;  %v1033_v1 = vcombine.high %v1025_v49, %v1025_v49  ;;  %v426_v47 = vld [vmem:[%s15997_s2 + $0x20] sm:$0xff] }
  0x1e   : > { %8390 = vmatmul.mubr.msk.f32.gmra.mxu1 %vm458_vm0, %v395_v13  ;;  %8336 = vmatprep.mubr.msk.f32.mxu0 %vm458_vm0, %v396_v14 }
  0x1f   : > { %8392 = vmatprep.mubr.msk.f32.mxu1 %vm458_vm0, %v396_v14  ;;  %16459 = vst [vmem:[#allocation3_spill] sm:$0xff] %v9580_v52  ;;  %v9591_v58 = vrot.slane %v9580_v52, %v9572_v48  ;;  %v9621_v7 = vrot.slane %v1033_v1, %v9572_v48 }
  0x21   : > { %8337 = vmatmul.mubr.msk.f32.gmra.mxu0 %vm458_vm0, %v397_v15 }
  0x22   : > { %8393 = vmatmul.mubr.msk.f32.gmra.mxu1 %vm458_vm0, %v397_v15  ;;  %8339 = vmatprep.mubr.msk.f32.mxu0 %vm458_vm0, %v398_v16 }
  0x23   : > { %8395 = vmatprep.mubr.msk.f32.mxu1 %vm458_vm0, %v398_v16 }
  0x25   : > { %8340 = vmatmul.mubr.msk.f32.gmra.mxu0 %vm458_vm0, %v399_v17 }
  0x26   : > { %8396 = vmatmul.mubr.msk.f32.gmra.mxu1 %vm458_vm0, %v399_v17  ;;  %8342 = vmatprep.mubr.msk.f32.mxu0 %vm458_vm0, %v400_v18 }
  0x27   : > { %8398 = vmatprep.mubr.msk.f32.mxu1 %vm458_vm0, %v400_v18 }
  0x29   : > { %8343 = vmatmul.mubr.msk.f32.gmra.mxu0 %vm458_vm0, %v401_v19 }
  0x2a   : > { %8399 = vmatmul.mubr.msk.f32.gmra.mxu1 %vm458_vm0, %v401_v19  ;;  %8345 = vmatprep.mubr.msk.f32.mxu0 %vm458_vm0, %v402_v20 }
  0x2b   : > { %8401 = vmatprep.mubr.msk.f32.mxu1 %vm458_vm0, %v402_v20 }
  0x2d   : > { %8346 = vmatmul.mubr.msk.f32.gmra.mxu0 %vm458_vm0, %v403_v21 }
  0x2e   : > { %8402 = vmatmul.mubr.msk.f32.gmra.mxu1 %vm458_vm0, %v403_v21  ;;  %8348 = vmatprep.mubr.msk.f32.mxu0 %vm458_vm0, %v404_v22 }
  0x2f   : > { %8404 = vmatprep.mubr.msk.f32.mxu1 %vm458_vm0, %v404_v22 }
  0x31   : > { %8349 = vmatmul.mubr.msk.f32.gmra.mxu0 %vm458_vm0, %v405_v23 }
  0x32   : > { %8405 = vmatmul.mubr.msk.f32.gmra.mxu1 %vm458_vm0, %v405_v23  ;;  %8351 = vmatprep.mubr.msk.f32.mxu0 %vm458_vm0, %v406_v24 }
  0x33   : > { %8407 = vmatprep.mubr.msk.f32.mxu1 %vm458_vm0, %v406_v24 }
  0x35   : > { %8352 = vmatmul.mubr.msk.f32.gmra.mxu0 %vm458_vm0, %v407_v25 }
  0x36   : > { %8408 = vmatmul.mubr.msk.f32.gmra.mxu1 %vm458_vm0, %v407_v25  ;;  %8354 = vmatprep.mubr.msk.f32.mxu0 %vm458_vm0, %v408_v26 }
  0x37   : > { %8410 = vmatprep.mubr.msk.f32.mxu1 %vm458_vm0, %v408_v26 }
  0x39   : > { %8355 = vmatmul.mubr.msk.f32.gmra.mxu0 %vm458_vm0, %v409_v27 }
  0x3a   : > { %8411 = vmatmul.mubr.msk.f32.gmra.mxu1 %vm458_vm0, %v409_v27  ;;  %8357 = vmatprep.mubr.msk.f32.mxu0 %vm458_vm0, %v410_v28  ;;  %v424_v27 = vld [vmem:[%s15997_s2 + $0x10] sm:$0xff] }
  0x3b   : > { %8413 = vmatprep.mubr.msk.f32.mxu1 %vm458_vm0, %v410_v28 }
  0x3d   : > { %8358 = vmatmul.mubr.msk.f32.gmra.mxu0 %vm458_vm0, %v411_v29 }
  0x3e   : > { %8414 = vmatmul.mubr.msk.f32.gmra.mxu1 %vm458_vm0, %v411_v29  ;;  %8360 = vmatprep.mubr.msk.f32.mxu0 %vm458_vm0, %v412_v30 }
  0x3f   : > { %8416 = vmatprep.mubr.msk.f32.mxu1 %vm458_vm0, %v412_v30 }
  0x41   : > { %8361 = vmatmul.mubr.msk.f32.gmra.mxu0 %vm458_vm0, %v413_v31 }
  0x42   : > { %8417 = vmatmul.mubr.msk.f32.gmra.mxu1 %vm458_vm0, %v413_v31  ;;  %8363 = vmatprep.mubr.msk.f32.mxu0 %vm458_vm0, %v414_v32 }
  0x43   : > { %8419 = vmatprep.mubr.msk.f32.mxu1 %vm458_vm0, %v414_v32 }
  0x45   : > { %8364 = vmatmul.mubr.msk.f32.gmra.mxu0 %vm458_vm0, %v415_v33 }
  0x46   : > { %8420 = vmatmul.mubr.msk.f32.gmra.mxu1 %vm458_vm0, %v415_v33  ;;  %8366 = vmatprep.mubr.msk.f32.mxu0 %vm458_vm0, %v416_v34 }
  0x47   : > { %8422 = vmatprep.mubr.msk.f32.mxu1 %vm458_vm0, %v416_v34 }
  0x49   : > { %8367 = vmatmul.mubr.msk.f32.gmra.mxu0 %vm458_vm0, %v417_v35 }
  0x4a   : > { %8423 = vmatmul.mubr.msk.f32.gmra.mxu1 %vm458_vm0, %v417_v35  ;;  %8369 = vmatprep.mubr.msk.f32.mxu0 %vm458_vm0, %v418_v36 }
  0x4b   : > { %8425 = vmatprep.mubr.msk.f32.mxu1 %vm458_vm0, %v418_v36 }
  0x4d   : > { %8370 = vmatmul.mubr.msk.f32.gmra.mxu0 %vm458_vm0, %v419_v37 }
  0x4e   : > { %8426 = vmatmul.mubr.msk.f32.gmra.mxu1 %vm458_vm0, %v419_v37  ;;  %8372 = vmatprep.mubr.msk.f32.mxu0 %vm458_vm0, %v420_v38 }
  0x4f   : > { %8428 = vmatprep.mubr.msk.f32.mxu1 %vm458_vm0, %v420_v38 }
  0x51   : > { %8373 = vmatmul.mubr.msk.f32.gmra.mxu0 %vm458_vm0, %v421_v39 }
  0x52   : > { %8429 = vmatmul.mubr.msk.f32.gmra.mxu1 %vm458_vm0, %v421_v39 }
  0xd5   : > { %v8329_v53 = vpop.f32.mrf.mxu0 }
  0xd6   : > { %v8385_v54 = vpop.f32.mrf.mxu1  ;;  %v9585_v56 = vadd.f32 %v8329_v53, %v423_v50 }
  0xd7   : > { %v9587_v57 = vadd.f32 %v8385_v54, %v423_v50  ;;  %v621_v59 = vpop.f32.mrf.mxu0 }
  0xd8   : > { %16460 = vst [vmem:[#allocation4_spill] sm:$0xff] %v9585_v56  ;;  %v850_v60 = vpop.f32.mrf.mxu1  ;;  %v9593_v61 = vadd.f32 %v621_v59, %v422_v55  ;;  %v9601_v63 = vsub.f32 %v9585_v56, %v9578_v51  ;;  %v9611_v4 = vsub.f32 %v9585_v56, %v9591_v58  ;;  %v9643_v16 = vsub.f32 %v9585_v56, %v9621_v7 }
  0xd9   : > { %v9597_v62 = vsub.f32 %v9587_v57, %v9578_v51  ;;  %v9603_v0 = vadd.f32 %v850_v60, %v422_v55  ;;  %v9629_v10 = vsub.f32 %v9587_v57, %v9591_v58  ;;  %v8332_v12 = vpop.f32.mrf.mxu0 }
  0xda   : > { %16461 = vst [vmem:[#allocation5_spill] sm:$0xff] %v9593_v61  ;;  %16463 = vst [vmem:[#allocation7_spill] sm:$0xff] %v9601_v63  ;;  %v1314_v3 = vsel %vm458_vm0, %v9601_v63, 0.0  ;;  %v9615_v5 = vsub.f32 %v9593_v61, %v9578_v51  ;;  %v1506_v8 = vsel %vm458_vm0, %v9611_v4, 0.0  ;;  %v9635_v13 = vadd.f32 %v8332_v12, %v425_v6  ;;  %v8388_v18 = vpop.f32.mrf.mxu1 }
  0xdb   : > { %16462 = vst [vmem:[#allocation6_spill] sm:$0xff] %v9597_v62  ;;  %v1410_v2 = vsel %vm458_vm0, %v9597_v62, 0.0  ;;  %16464 = vst [vmem:[#allocation8_spill] sm:$0xff] %v9611_v4  ;;  %1315 = vadd.xlane.f32.xlu0 %v1314_v3  ;;  %v9633_v11 = vsub.f32 %v9603_v0, %v9578_v51  ;;  %v1602_v14 = vsel %vm458_vm0, %v9629_v10, 0.0  ;;  %v9647_v17 = vsub.f32 %v9593_v61, %v9591_v58  ;;  %v631_v31 = vpop.f32.mrf.mxu0 }
  0xdc   : > { %16465 = vst [vmem:[#allocation9_spill] sm:$0xff] %v9615_v5  ;;  %1411 = vadd.xlane.f32.xlu1 %v1410_v2  ;;  %v1311_v9 = vsel %vm458_vm0, %v9615_v5, 0.0  ;;  %16466 = vst [vmem:[#allocation10_spill] sm:$0xff] %v9629_v10  ;;  %v9649_v19 = vadd.f32 %v8388_v18, %v425_v6  ;;  %v9653_v20 = vsub.f32 %v9635_v13, %v9578_v51  ;;  %v1698_v21 = vsel %vm458_vm0, %v9643_v16, 0.0  ;;  %v860_v24 = vpop.f32.mrf.mxu1 }
  0xdd   : > { %16467 = vst [vmem:[#allocation11_spill] sm:$0xff] %v9633_v11  ;;  %16468 = vst [vmem:[#allocation12_spill] sm:$0xff] %v9635_v13  ;;  %v1407_v15 = vsel %vm458_vm0, %v9633_v11, 0.0  ;;  %v1503_v22 = vsel %vm458_vm0, %v9647_v17, 0.0  ;;  %v9661_v23 = vsub.f32 %v9603_v0, %v9591_v58  ;;  %v9672_v28 = vadd.f32 %v860_v24, %v424_v27  ;;  %v8335_v41 = vpop.f32.mrf.mxu0 }
  0xde   : > { %16469 = vst [vmem:[#allocation13_spill] sm:$0xff] %v9643_v16  ;;  %16470 = vst [vmem:[#allocation14_spill] sm:$0xff] %v9647_v17  ;;  %v1320_v25 = vsel %vm458_vm0, %v9653_v20, 0.0  ;;  %v9667_v26 = vsub.f32 %v9649_v19, %v9578_v51  ;;  %v9678_v30 = vsub.f32 %v9593_v61, %v9621_v7  ;;  %v9682_v33 = vadd.f32 %v631_v31, %v424_v27  ;;  %v8391_v50 = vpop.f32.mrf.mxu1 }
  0xdf   : > { %1312 = vadd.xlane.f32.xlu0 %v1311_v9  ;;  %16471 = vst [vmem:[#allocation15_spill] sm:$0xff] %v9653_v20  ;;  %16472 = vst [vmem:[#allocation16_spill] sm:$0xff] %v9661_v23  ;;  %v1599_v29 = vsel %vm458_vm0, %v9661_v23, 0.0  ;;  %v9688_v35 = vsub.f32 %v9635_v13, %v9591_v58  ;;  %v9692_v36 = vsub.f32 %v9672_v28, %v9578_v51  ;;  %v641_v46 = vpop.f32.mrf.mxu0 }
  0xe0   : > { %1507 = vadd.xlane.f32.xlu1 %v1506_v8  ;;  %16473 = vst [vmem:[#allocation17_spill] sm:$0xff] %v9667_v26  ;;  %16474 = vst [vmem:[#allocation18_spill] sm:$0xff] %v9678_v30  ;;  %v1416_v32 = vsel %vm458_vm0, %v9667_v26, 0.0  ;;  %v1695_v34 = vsel %vm458_vm0, %v9678_v30, 0.0  ;;  %v9700_v39 = vsub.f32 %v9649_v19, %v9591_v58  ;;  %v9704_v40 = vsub.f32 %v9682_v33, %v9591_v58  ;;  %v870_v60 = vpop.f32.mrf.mxu1 }
  0xe1   : > { %16475 = vst [vmem:[#allocation19_spill] sm:$0xff] %v9682_v33  ;;  %16476 = vst [vmem:[#allocation20_spill] sm:$0xff] %v9688_v35  ;;  %v1512_v37 = vsel %vm458_vm0, %v9688_v35, 0.0  ;;  %v1413_v38 = vsel %vm458_vm0, %v9692_v36, 0.0  ;;  %v9715_v45 = vsub.f32 %v9635_v13, %v9621_v7  ;;  %v9722_v49 = vsub.f32 %v9672_v28, %v9591_v58  ;;  %v8338_v31 = vpop.f32.mrf.mxu0 }
  0xe2   : > { %16477 = vst [vmem:[#allocation21_spill] sm:$0xff] %v9692_v36  ;;  %16478 = vst [vmem:[#allocation22_spill] sm:$0xff] %v9700_v39  ;;  %v1608_v42 = vsel %vm458_vm0, %v9700_v39, 0.0  ;;  %v1509_v43 = vsel %vm458_vm0, %v9704_v40, 0.0  ;;  %v9724_v53 = vadd.f32 %v8335_v41, %v427_v44  ;;  %v9726_v54 = vadd.f32 %v641_v46, %v426_v47  ;;  %v428_v41 = vld [vmem:[%s15997_s2 + $0x30] sm:$0xff] }
  0xe3   : > { %1408 = vadd.xlane.f32.xlu0 %v1407_v15  ;;  %16479 = vst [vmem:[#allocation23_spill] sm:$0xff] %v9704_v40  ;;  %16480 = vst [vmem:[#allocation24_spill] sm:$0xff] %v9715_v45  ;;  %v1704_v55 = vsel %vm458_vm0, %v9715_v45, 0.0  ;;  %v1605_v59 = vsel %vm458_vm0, %v9722_v49, 0.0  ;;  %v9734_v1 = vsub.f32 %v9682_v33, %v9578_v51  ;;  %v9738_v2 = vsub.f32 %v9682_v33, %v9621_v7 }
  0xe4   : > { %1603 = vadd.xlane.f32.xlu1 %v1602_v14  ;;  %16481 = vst [vmem:[#allocation25_spill] sm:$0xff] %v9722_v49  ;;  %16482 = vst [vmem:[#allocation26_spill] sm:$0xff] %v9724_v53  ;;  %v9740_v3 = vadd.f32 %v8391_v50, %v427_v44  ;;  %v9742_v6 = vadd.f32 %v870_v60, %v426_v47  ;;  %v9750_v12 = vsub.f32 %v9724_v53, %v9578_v51  ;;  %v8394_v44 = vpop.f32.mrf.mxu1 }
  0xe5   : > { %16483 = vst [vmem:[#allocation27_spill] sm:$0xff] %v9726_v54  ;;  %16484 = vst [vmem:[#allocation28_spill] sm:$0xff] %v9734_v1  ;;  %v1317_v8 = vsel %vm458_vm0, %v9734_v1, 0.0  ;;  %v1701_v9 = vsel %vm458_vm0, %v9738_v2, 0.0  ;;  %v9754_v14 = vsub.f32 %v9726_v54, %v9578_v51  ;;  %v9774_v27 = vsub.f32 %v9724_v53, %v9591_v58 }
  0xe6   : > { %16485 = vst [vmem:[#allocation29_spill] sm:$0xff] %v9738_v2  ;;  %16486 = vst [vmem:[#allocation30_spill] sm:$0xff] %v9750_v12  ;;  %v1326_v15 = vsel %vm458_vm0, %v9750_v12, 0.0  ;;  %v9808_v60 = vsub.f32 %v9724_v53, %v9621_v7 }
  0xe7   : > { %1504 = vadd.xlane.f32.xlu0 %v1503_v22  ;;  %16487 = vst [vmem:[#allocation31_spill] sm:$0xff] %v9754_v14  ;;  %v1323_v18 = vsel %vm458_vm0, %v9754_v14, 0.0  ;;  %v9766_v22 = vsub.f32 %v9742_v6, %v9578_v51  ;;  %16490 = vst [vmem:[#allocation34_spill] sm:$0xff] %v9774_v27 }
  0xe8   : > { %1699 = vadd.xlane.f32.xlu1 %v1698_v21  ;;  %v9762_v21 = vsub.f32 %v9740_v3, %v9578_v51  ;;  %16495 = vst [vmem:[#allocation39_spill] sm:$0xff] %v9808_v60 }
  0xe9   : > { %16489 = vst [vmem:[#allocation33_spill] sm:$0xff] %v9766_v22 }
  0xea   : > { %16488 = vst [vmem:[#allocation32_spill] sm:$0xff] %v9762_v21  ;;  %v1422_v24 = vsel %vm458_vm0, %v9762_v21, 0.0 }
  0xeb   : > { %1600 = vadd.xlane.f32.xlu0 %v1599_v29  ;;  %v9778_v29 = vsub.f32 %v9726_v54, %v9591_v58 }
  0xec   : > { %1321 = vadd.xlane.f32.xlu1 %v1320_v25  ;;  %v1419_v25 = vsel %vm458_vm0, %v9766_v22, 0.0 }
  0xed   : > { %16491 = vst [vmem:[#allocation35_spill] sm:$0xff] %v9778_v29 }
  0xef   : > { %1696 = vadd.xlane.f32.xlu0 %v1695_v34  ;;  %v1515_v34 = vsel %vm458_vm0, %v9778_v29, 0.0 }
  0xf0   : > { %1417 = vadd.xlane.f32.xlu1 %v1416_v32  ;;  %v1518_v32 = vsel %vm458_vm0, %v9774_v27, 0.0 }
  0xf3   : > { %1414 = vadd.xlane.f32.xlu0 %v1413_v38  ;;  %v651_v38 = vpop.f32.mrf.mxu0 }
  0xf4   : > { %1513 = vadd.xlane.f32.xlu1 %v1512_v37  ;;  %v429_v37 = vld [vmem:[%s15997_s2 + $0x38] sm:$0xff]  ;;  %v9800_v47 = vadd.f32 %v651_v38, %v428_v41 }
  0xf5   : > { %v9798_v46 = vadd.f32 %v8338_v31, %v429_v37 }
  0xf6   : > { %16494 = vst [vmem:[#allocation38_spill] sm:$0xff] %v9800_v47  ;;  %v9828_v31 = vsub.f32 %v9800_v47, %v9578_v51 }
  0xf7   : > { %1510 = vadd.xlane.f32.xlu0 %v1509_v43  ;;  %v9796_v43 = vsub.f32 %v9742_v6, %v9591_v58 }
  0xf8   : > { %1609 = vadd.xlane.f32.xlu1 %v1608_v42  ;;  %v9792_v42 = vsub.f32 %v9740_v3, %v9591_v58  ;;  %16498 = vst [vmem:[#allocation42_spill] sm:$0xff] %v9828_v31 }
  0xf9   : > { %16493 = vst [vmem:[#allocation37_spill] sm:$0xff] %v9796_v43 }
  0xfa   : > { %16492 = vst [vmem:[#allocation36_spill] sm:$0xff] %v9792_v42  ;;  %v1614_v50 = vsel %vm458_vm0, %v9792_v42, 0.0 }
  0xfb   : > { %1606 = vadd.xlane.f32.xlu0 %v1605_v59  ;;  %v880_v59 = vpop.f32.mrf.mxu1 }
  0xfc   : > { %1705 = vadd.xlane.f32.xlu1 %v1704_v55  ;;  %v1611_v55 = vsel %vm458_vm0, %v9796_v43, 0.0 }
  0xff   : > { %1702 = vadd.xlane.f32.xlu0 %v1701_v9  ;;  %v9814_v9 = vadd.f32 %v8394_v44, %v429_v37 }
 0x100   : > { %1318 = vadd.xlane.f32.xlu1 %v1317_v8  ;;  %v9812_v8 = vsub.f32 %v9726_v54, %v9621_v7 }
 0x101   : > { %v9836_v37 = vsub.f32 %v9814_v9, %v9578_v51 }
 0x102   : > { %16496 = vst [vmem:[#allocation40_spill] sm:$0xff] %v9812_v8 }
 0x103   : > { %1324 = vadd.xlane.f32.xlu0 %v1323_v18  ;;  %v1710_v18 = vsel %vm458_vm0, %v9808_v60, 0.0  ;;  %16499 = vst [vmem:[#allocation43_spill] sm:$0xff] %v9836_v37  ;;  %v1428_v44 = vsel %vm458_vm0, %v9836_v37, 0.0  ;;  %v9865_v37 = vsub.f32 %v9814_v9, %v9591_v58 }
 0x104   : > { %1327 = vadd.xlane.f32.xlu1 %v1326_v15  ;;  %v9816_v15 = vadd.f32 %v880_v59, %v428_v41  ;;  %v431_v41 = vld [vmem:[%s15997_s2 + $0x48] sm:$0xff]  ;;  %v9855_v59 = vsub.f32 %v9800_v47, %v9591_v58 }
 0x105   : > { %16503 = vst [vmem:[#allocation47_spill] sm:$0xff] %v9865_v37  ;;  %v1620_v43 = vsel %vm458_vm0, %v9865_v37, 0.0 }
 0x106   : > { %v9840_v38 = vsub.f32 %v9816_v15, %v9578_v51  ;;  %16502 = vst [vmem:[#allocation46_spill] sm:$0xff] %v9855_v59 }
 0x107   : > { %1420 = vadd.xlane.f32.xlu0 %v1419_v25  ;;  %v9824_v25 = vsub.f32 %v9798_v46, %v9578_v51 }
 0x108   : > { %1423 = vadd.xlane.f32.xlu1 %v1422_v24  ;;  %v1707_v24 = vsel %vm458_vm0, %v9812_v8, 0.0  ;;  %16500 = vst [vmem:[#allocation44_spill] sm:$0xff] %v9840_v38 }
 0x109   : > { %16497 = vst [vmem:[#allocation41_spill] sm:$0xff] %v9824_v25 }
 0x10b   : > { %1516 = vadd.xlane.f32.xlu0 %v1515_v34  ;;  %v1329_v34 = vsel %vm458_vm0, %v9828_v31, 0.0 }
 0x10c   : > { %1519 = vadd.xlane.f32.xlu1 %v1518_v32  ;;  %v1332_v32 = vsel %vm458_vm0, %v9824_v25, 0.0 }
 0x10f   : > { %1612 = vadd.xlane.f32.xlu0 %v1611_v55  ;;  %v9851_v55 = vsub.f32 %v9798_v46, %v9591_v58 }
 0x110   : > { %1615 = vadd.xlane.f32.xlu1 %v1614_v50  ;;  %v1425_v50 = vsel %vm458_vm0, %v9840_v38, 0.0  ;;  %v9869_v38 = vsub.f32 %v9816_v15, %v9591_v58 }
 0x111   : > { %16501 = vst [vmem:[#allocation45_spill] sm:$0xff] %v9851_v55 }
 0x112   : > { %16504 = vst [vmem:[#allocation48_spill] sm:$0xff] %v9869_v38 }
 0x113   : > { %1708 = vadd.xlane.f32.xlu0 %v1707_v24 }
 0x114   : > { %1711 = vadd.xlane.f32.xlu1 %v1710_v18  ;;  %v8341_v18 = vpop.f32.mrf.mxu0 }
 0x115   : > { %v9857_v24 = vadd.f32 %v8341_v18, %v431_v41  ;;  %v8397_v18 = vpop.f32.mrf.mxu1 }
 0x117   : > { %1330 = vadd.xlane.f32.xlu0 %v1329_v34  ;;  %v1521_v34 = vsel %vm458_vm0, %v9855_v59, 0.0  ;;  %v9878_v59 = vsub.f32 %v9857_v24, %v9578_v51 }
 0x118   : > { %1333 = vadd.xlane.f32.xlu1 %v1332_v32  ;;  %v1524_v32 = vsel %vm458_vm0, %v9851_v55, 0.0  ;;  %v9874_v55 = vadd.f32 %v8397_v18, %v431_v41  ;;  %v890_v41 = vpop.f32.mrf.mxu1 }
 0x119   : > { %16505 = vst [vmem:[#allocation49_spill] sm:$0xff] %v9878_v59  ;;  %v1338_v18 = vsel %vm458_vm0, %v9878_v59, 0.0 }
 0x11b   : > { %1426 = vadd.xlane.f32.xlu0 %v1425_v50  ;;  %v430_v50 = vld [vmem:[%s15997_s2 + $0x40] sm:$0xff] }
 0x11c   : > { %1429 = vadd.xlane.f32.xlu1 %v1428_v44  ;;  %v661_v44 = vpop.f32.mrf.mxu0  ;;  %v9896_v42 = vadd.f32 %v890_v41, %v430_v50  ;;  %v9913_v41 = vsub.f32 %v9857_v24, %v9591_v58 }
 0x11d   : > { %v9880_v25 = vadd.f32 %v661_v44, %v430_v50  ;;  %v9894_v44 = vsub.f32 %v9874_v55, %v9578_v51 }
 0x11e   : > { %16509 = vst [vmem:[#allocation53_spill] sm:$0xff] %v9913_v41  ;;  %v9917_v59 = vsub.f32 %v9896_v42, %v9578_v51 }
 0x11f   : > { %1522 = vadd.xlane.f32.xlu0 %v1521_v34  ;;  %v9888_v34 = vsub.f32 %v9800_v47, %v9621_v7  ;;  %16507 = vst [vmem:[#allocation51_spill] sm:$0xff] %v9894_v44  ;;  %v9931_v31 = vsub.f32 %v9880_v25, %v9591_v58 }
 0x120   : > { %1525 = vadd.xlane.f32.xlu1 %v1524_v32  ;;  %v1617_v32 = vsel %vm458_vm0, %v9869_v38, 0.0  ;;  %v9902_v38 = vsub.f32 %v9880_v25, %v9578_v51  ;;  %16510 = vst [vmem:[#allocation54_spill] sm:$0xff] %v9917_v59 }
 0x121   : > { %16506 = vst [vmem:[#allocation50_spill] sm:$0xff] %v9888_v34  ;;  %v1713_v37 = vsel %vm458_vm0, %v9888_v34, 0.0  ;;  %v1431_v34 = vsel %vm458_vm0, %v9917_v59, 0.0  ;;  %16512 = vst [vmem:[#allocation56_spill] sm:$0xff] %v9931_v31 }
 0x122   : > { %16508 = vst [vmem:[#allocation52_spill] sm:$0xff] %v9902_v38  ;;  %v1335_v50 = vsel %vm458_vm0, %v9902_v38, 0.0  ;;  %v9927_v38 = vsub.f32 %v9874_v55, %v9591_v58 }
 0x123   : > { %1618 = vadd.xlane.f32.xlu0 %v1617_v32  ;;  %v433_v32 = vld [vmem:[%s15997_s2 + $0x58] sm:$0xff] }
 0x124   : > { %1621 = vadd.xlane.f32.xlu1 %v1620_v43  ;;  %v1434_v43 = vsel %vm458_vm0, %v9894_v44, 0.0  ;;  %v1530_v44 = vsel %vm458_vm0, %v9913_v41, 0.0  ;;  %16511 = vst [vmem:[#allocation55_spill] sm:$0xff] %v9927_v38  ;;  %v1626_v27 = vsel %vm458_vm0, %v9927_v38, 0.0 }
 0x127   : > { %1714 = vadd.xlane.f32.xlu0 %v1713_v37  ;;  %v8344_v37 = vpop.f32.mrf.mxu0 }
 0x128   : > { %1339 = vadd.xlane.f32.xlu1 %v1338_v18  ;;  %v9919_v18 = vadd.f32 %v8344_v37, %v433_v32  ;;  %v8400_v37 = vpop.f32.mrf.mxu1 }
 0x129   : > { %v9936_v41 = vadd.f32 %v8400_v37, %v433_v32 }
 0x12a   : > { %v9940_v59 = vsub.f32 %v9919_v18, %v9578_v51  ;;  %v900_v32 = vpop.f32.mrf.mxu1 }
 0x12b   : > { %1336 = vadd.xlane.f32.xlu0 %v1335_v50  ;;  %v432_v50 = vld [vmem:[%s15997_s2 + $0x50] sm:$0xff] }
 0x12c   : > { %1435 = vadd.xlane.f32.xlu1 %v1434_v43  ;;  %v671_v43 = vpop.f32.mrf.mxu0  ;;  %16513 = vst [vmem:[#allocation57_spill] sm:$0xff] %v9940_v59  ;;  %v1344_v37 = vsel %vm458_vm0, %v9940_v59, 0.0  ;;  %v9958_v29 = vadd.f32 %v900_v32, %v432_v50  ;;  %v9975_v32 = vsub.f32 %v9919_v18, %v9591_v58 }
 0x12d   : > { %v9942_v60 = vadd.f32 %v671_v43, %v432_v50  ;;  %v9956_v43 = vsub.f32 %v9936_v41, %v9578_v51 }
 0x12e   : > { %16517 = vst [vmem:[#allocation61_spill] sm:$0xff] %v9975_v32 }
 0x12f   : > { %1432 = vadd.xlane.f32.xlu0 %v1431_v34  ;;  %v1527_v34 = vsel %vm458_vm0, %v9931_v31, 0.0  ;;  %16515 = vst [vmem:[#allocation59_spill] sm:$0xff] %v9956_v43  ;;  %v9964_v31 = vsub.f32 %v9942_v60, %v9578_v51  ;;  %v9993_v21 = vsub.f32 %v9942_v60, %v9591_v58 }
 0x130   : > { %1531 = vadd.xlane.f32.xlu1 %v1530_v44  ;;  %v9950_v44 = vsub.f32 %v9896_v42, %v9591_v58 }
 0x131   : > { %16516 = vst [vmem:[#allocation60_spill] sm:$0xff] %v9964_v31  ;;  %v1341_v50 = vsel %vm458_vm0, %v9964_v31, 0.0  ;;  %v9989_v31 = vsub.f32 %v9936_v41, %v9591_v58  ;;  %16520 = vst [vmem:[#allocation64_spill] sm:$0xff] %v9993_v21 }
 0x132   : > { %16514 = vst [vmem:[#allocation58_spill] sm:$0xff] %v9950_v44  ;;  %v1623_v38 = vsel %vm458_vm0, %v9950_v44, 0.0  ;;  %v9979_v44 = vsub.f32 %v9958_v29, %v9578_v51 }
 0x133   : > { %1528 = vadd.xlane.f32.xlu0 %v1527_v34  ;;  %v435_v34 = vld [vmem:[%s15997_s2 + $0x68] sm:$0xff]  ;;  %16519 = vst [vmem:[#allocation63_spill] sm:$0xff] %v9989_v31  ;;  %v1632_v8 = vsel %vm458_vm0, %v9989_v31, 0.0 }
 0x134   : > { %1627 = vadd.xlane.f32.xlu1 %v1626_v27  ;;  %v1440_v27 = vsel %vm458_vm0, %v9956_v43, 0.0  ;;  %16518 = vst [vmem:[#allocation62_spill] sm:$0xff] %v9979_v44  ;;  %v1536_v43 = vsel %vm458_vm0, %v9975_v32, 0.0  ;;  %v1437_v59 = vsel %vm458_vm0, %v9979_v44, 0.0 }
 0x137   : > { %1624 = vadd.xlane.f32.xlu0 %v1623_v38  ;;  %v8347_v38 = vpop.f32.mrf.mxu0 }
 0x138   : > { %1345 = vadd.xlane.f32.xlu1 %v1344_v37  ;;  %v9981_v37 = vadd.f32 %v8347_v38, %v435_v34  ;;  %v8403_v38 = vpop.f32.mrf.mxu1 }
 0x139   : > { %v9998_v32 = vadd.f32 %v8403_v38, %v435_v34 }
 0x13a   : > { %v10002_v44 = vsub.f32 %v9981_v37, %v9578_v51  ;;  %v910_v34 = vpop.f32.mrf.mxu1 }
 0x13b   : > { %1342 = vadd.xlane.f32.xlu0 %v1341_v50  ;;  %v434_v50 = vld [vmem:[%s15997_s2 + $0x60] sm:$0xff] }
 0x13c   : > { %1441 = vadd.xlane.f32.xlu1 %v1440_v27  ;;  %v681_v27 = vpop.f32.mrf.mxu0  ;;  %16521 = vst [vmem:[#allocation65_spill] sm:$0xff] %v10002_v44  ;;  %v1350_v38 = vsel %vm458_vm0, %v10002_v44, 0.0  ;;  %v10020_v12 = vadd.f32 %v910_v34, %v434_v50  ;;  %v10037_v34 = vsub.f32 %v9981_v37, %v9591_v58 }
 0x13d   : > { %v10004_v22 = vadd.f32 %v681_v27, %v434_v50  ;;  %v10018_v27 = vsub.f32 %v9998_v32, %v9578_v51 }
 0x13e   : > { %16525 = vst [vmem:[#allocation69_spill] sm:$0xff] %v10037_v34 }
 0x13f   : > { %1438 = vadd.xlane.f32.xlu0 %v1437_v59  ;;  %v1533_v59 = vsel %vm458_vm0, %v9993_v21, 0.0  ;;  %16523 = vst [vmem:[#allocation67_spill] sm:$0xff] %v10018_v27  ;;  %v10026_v21 = vsub.f32 %v10004_v22, %v9578_v51  ;;  %v10055_v14 = vsub.f32 %v10004_v22, %v9591_v58 }
 0x140   : > { %1537 = vadd.xlane.f32.xlu1 %v1536_v43  ;;  %v10012_v43 = vsub.f32 %v9958_v29, %v9591_v58 }
 0x141   : > { %16524 = vst [vmem:[#allocation68_spill] sm:$0xff] %v10026_v21  ;;  %v1347_v50 = vsel %vm458_vm0, %v10026_v21, 0.0  ;;  %v10051_v21 = vsub.f32 %v9998_v32, %v9591_v58  ;;  %16528 = vst [vmem:[#allocation72_spill] sm:$0xff] %v10055_v14 }
 0x142   : > { %16522 = vst [vmem:[#allocation66_spill] sm:$0xff] %v10012_v43  ;;  %v1629_v31 = vsel %vm458_vm0, %v10012_v43, 0.0  ;;  %v10041_v43 = vsub.f32 %v10020_v12, %v9578_v51 }
 0x143   : > { %1534 = vadd.xlane.f32.xlu0 %v1533_v59  ;;  %v437_v59 = vld [vmem:[%s15997_s2 + $0x78] sm:$0xff]  ;;  %16527 = vst [vmem:[#allocation71_spill] sm:$0xff] %v10051_v21  ;;  %v1638_v45 = vsel %vm458_vm0, %v10051_v21, 0.0 }
 0x144   : > { %1633 = vadd.xlane.f32.xlu1 %v1632_v8  ;;  %v1446_v8 = vsel %vm458_vm0, %v10018_v27, 0.0  ;;  %16526 = vst [vmem:[#allocation70_spill] sm:$0xff] %v10041_v43  ;;  %v1542_v27 = vsel %vm458_vm0, %v10037_v34, 0.0  ;;  %v1443_v44 = vsel %vm458_vm0, %v10041_v43, 0.0 }
 0x147   : > { %1630 = vadd.xlane.f32.xlu0 %v1629_v31  ;;  %v8350_v31 = vpop.f32.mrf.mxu0 }
 0x148   : > { %1351 = vadd.xlane.f32.xlu1 %v1350_v38  ;;  %v10043_v38 = vadd.f32 %v8350_v31, %v437_v59  ;;  %v8406_v31 = vpop.f32.mrf.mxu1 }
 0x149   : > { %v10060_v34 = vadd.f32 %v8406_v31, %v437_v59 }
 0x14a   : > { %v10064_v43 = vsub.f32 %v10043_v38, %v9578_v51  ;;  %v920_v59 = vpop.f32.mrf.mxu1 }
 0x14b   : > { %1348 = vadd.xlane.f32.xlu0 %v1347_v50  ;;  %v436_v50 = vld [vmem:[%s15997_s2 + $0x70] sm:$0xff] }
 0x14c   : > { %1447 = vadd.xlane.f32.xlu1 %v1446_v8  ;;  %v691_v8 = vpop.f32.mrf.mxu0  ;;  %16529 = vst [vmem:[#allocation73_spill] sm:$0xff] %v10064_v43  ;;  %v1356_v31 = vsel %vm458_vm0, %v10064_v43, 0.0  ;;  %v10082_v40 = vadd.f32 %v920_v59, %v436_v50  ;;  %v10099_v59 = vsub.f32 %v10043_v38, %v9591_v58 }
 0x14d   : > { %v10066_v49 = vadd.f32 %v691_v8, %v436_v50  ;;  %v10080_v8 = vsub.f32 %v10060_v34, %v9578_v51 }
 0x14e   : > { %16533 = vst [vmem:[#allocation77_spill] sm:$0xff] %v10099_v59 }
 0x14f   : > { %1444 = vadd.xlane.f32.xlu0 %v1443_v44  ;;  %v1539_v44 = vsel %vm458_vm0, %v10055_v14, 0.0  ;;  %16531 = vst [vmem:[#allocation75_spill] sm:$0xff] %v10080_v8  ;;  %v10088_v14 = vsub.f32 %v10066_v49, %v9578_v51  ;;  %v10117_v39 = vsub.f32 %v10066_v49, %v9591_v58 }
 0x150   : > { %1543 = vadd.xlane.f32.xlu1 %v1542_v27  ;;  %v10074_v27 = vsub.f32 %v10020_v12, %v9591_v58 }
 0x151   : > { %16532 = vst [vmem:[#allocation76_spill] sm:$0xff] %v10088_v14  ;;  %v1353_v50 = vsel %vm458_vm0, %v10088_v14, 0.0  ;;  %v10113_v14 = vsub.f32 %v10060_v34, %v9591_v58  ;;  %16536 = vst [vmem:[#allocation80_spill] sm:$0xff] %v10117_v39 }
 0x152   : > { %16530 = vst [vmem:[#allocation74_spill] sm:$0xff] %v10074_v27  ;;  %v1635_v21 = vsel %vm458_vm0, %v10074_v27, 0.0  ;;  %v10103_v27 = vsub.f32 %v10082_v40, %v9578_v51 }
 0x153   : > { %1540 = vadd.xlane.f32.xlu0 %v1539_v44  ;;  %v439_v44 = vld [vmem:[%s15997_s2 + $0x88] sm:$0xff]  ;;  %16535 = vst [vmem:[#allocation79_spill] sm:$0xff] %v10113_v14  ;;  %v1644_v1 = vsel %vm458_vm0, %v10113_v14, 0.0 }
 0x154   : > { %1639 = vadd.xlane.f32.xlu1 %v1638_v45  ;;  %v1452_v45 = vsel %vm458_vm0, %v10080_v8, 0.0  ;;  %16534 = vst [vmem:[#allocation78_spill] sm:$0xff] %v10103_v27  ;;  %v1548_v8 = vsel %vm458_vm0, %v10099_v59, 0.0  ;;  %v1449_v43 = vsel %vm458_vm0, %v10103_v27, 0.0 }
 0x157   : > { %1636 = vadd.xlane.f32.xlu0 %v1635_v21  ;;  %v8353_v21 = vpop.f32.mrf.mxu0 }
 0x158   : > { %1357 = vadd.xlane.f32.xlu1 %v1356_v31  ;;  %v10105_v31 = vadd.f32 %v8353_v21, %v439_v44  ;;  %v8409_v21 = vpop.f32.mrf.mxu1 }
 0x159   : > { %v10122_v59 = vadd.f32 %v8409_v21, %v439_v44 }
 0x15a   : > { %v10126_v27 = vsub.f32 %v10105_v31, %v9578_v51  ;;  %v930_v44 = vpop.f32.mrf.mxu1 }
 0x15b   : > { %1354 = vadd.xlane.f32.xlu0 %v1353_v50  ;;  %v438_v50 = vld [vmem:[%s15997_s2 + $0x80] sm:$0xff]  ;;  %v10146_v14 = vsub.f32 %v10122_v59, %v9578_v51  ;;  %v10187_v17 = vsub.f32 %v10122_v59, %v9591_v58 }
 0x15c   : > { %1453 = vadd.xlane.f32.xlu1 %v1452_v45  ;;  %v701_v45 = vpop.f32.mrf.mxu0  ;;  %16537 = vst [vmem:[#allocation81_spill] sm:$0xff] %v10126_v27  ;;  %v10148_v36 = vadd.f32 %v930_v44, %v438_v50  ;;  %v8412_v16 = vpop.f32.mrf.mxu1 }
 0x15d   : > { %v10128_v2 = vadd.f32 %v701_v45, %v438_v50  ;;  %v1362_v45 = vsel %vm458_vm0, %v10126_v27, 0.0  ;;  %16541 = vst [vmem:[#allocation85_spill] sm:$0xff] %v10146_v14  ;;  %v1458_v27 = vsel %vm458_vm0, %v10146_v14, 0.0  ;;  %v441_v50 = vld [vmem:[%s15997_s2 + $0x98] sm:$0xff]  ;;  %16549 = vst [vmem:[#allocation93_spill] sm:$0xff] %v10187_v17 }
 0x15e   : > { %v10214_v4 = vsub.f32 %v10148_v36, %v9591_v58 }
 0x15f   : > { %1450 = vadd.xlane.f32.xlu0 %v1449_v43  ;;  %v1545_v43 = vsel %vm458_vm0, %v10117_v39, 0.0 }
 0x160   : > { %1549 = vadd.xlane.f32.xlu1 %v1548_v8  ;;  %v10136_v8 = vsub.f32 %v10082_v40, %v9591_v58  ;;  %16554 = vst [vmem:[#allocation98_spill] sm:$0xff] %v10214_v4 }
 0x162   : > { %16538 = vst [vmem:[#allocation82_spill] sm:$0xff] %v10136_v8  ;;  %v1641_v39 = vsel %vm458_vm0, %v10136_v8, 0.0  ;;  %v10169_v8 = vsub.f32 %v10105_v31, %v9591_v58 }
 0x163   : > { %1546 = vadd.xlane.f32.xlu0 %v1545_v43 }
 0x164   : > { %1645 = vadd.xlane.f32.xlu1 %v1644_v1  ;;  %v10140_v35 = vpop.xlane.xlu0 %1315  ;;  %v10154_v1 = vsub.f32 %v10128_v2, %v9578_v51  ;;  %16545 = vst [vmem:[#allocation89_spill] sm:$0xff] %v10169_v8 }
 0x165   : > { %v10138_v21 = vpop.xlane.xlu1 %1411  ;;  %16540 = vst [vmem:[#allocation84_spill] sm:$0xff] %v10140_v35 }
 0x166   : > { %16539 = vst [vmem:[#allocation83_spill] sm:$0xff] %v10138_v21  ;;  %16542 = vst [vmem:[#allocation86_spill] sm:$0xff] %v10154_v1  ;;  %v1359_v44 = vsel %vm458_vm0, %v10154_v1, 0.0  ;;  %v1554_v1 = vsel %vm458_vm0, %v10169_v8, 0.0 }
 0x167   : > { %1642 = vadd.xlane.f32.xlu0 %v1641_v39  ;;  %v10173_v39 = vsub.f32 %v10148_v36, %v9578_v51 }
 0x168   : > { %1363 = vadd.xlane.f32.xlu1 %v1362_v45  ;;  %v10158_v26 = vpop.xlane.xlu0 %1312  ;;  %v8356_v45 = vpop.f32.mrf.mxu0 }
 0x169   : > { %v10156_v43 = vpop.xlane.xlu1 %1507  ;;  %16544 = vst [vmem:[#allocation88_spill] sm:$0xff] %v10158_v26  ;;  %16546 = vst [vmem:[#allocation90_spill] sm:$0xff] %v10173_v39  ;;  %v10179_v20 = vadd.f32 %v8356_v45, %v441_v50  ;;  %v1455_v30 = vsel %vm458_vm0, %v10173_v39, 0.0  ;;  %v440_v45 = vld [vmem:[%s15997_s2 + $0x90] sm:$0xff]  ;;  %v10200_v39 = vadd.f32 %v8412_v16, %v441_v50  ;;  %v940_v16 = vpop.f32.mrf.mxu1 }
 0x16a   : > { %16543 = vst [vmem:[#allocation87_spill] sm:$0xff] %v10156_v43 }
 0x16b   : > { %1360 = vadd.xlane.f32.xlu0 %v1359_v44  ;;  %v711_v44 = vpop.f32.mrf.mxu0  ;;  %v10204_v10 = vsub.f32 %v10179_v20, %v9578_v51  ;;  %v10265_v63 = vsub.f32 %v10200_v39, %v9591_v58 }
 0x16c   : > { %1459 = vadd.xlane.f32.xlu1 %v1458_v27  ;;  %v10177_v14 = vpop.xlane.xlu0 %1408  ;;  %v10191_v27 = vsub.f32 %v10128_v2, %v9591_v58  ;;  %v10206_v5 = vadd.f32 %v711_v44, %v440_v45 }
 0x16d   : > { %v10175_v23 = vpop.xlane.xlu1 %1603  ;;  %16548 = vst [vmem:[#allocation92_spill] sm:$0xff] %v10177_v14  ;;  %16553 = vst [vmem:[#allocation97_spill] sm:$0xff] %v10204_v10  ;;  %v1368_v44 = vsel %vm458_vm0, %v10204_v10, 0.0 }
 0x16e   : > { %16547 = vst [vmem:[#allocation91_spill] sm:$0xff] %v10175_v23  ;;  %16550 = vst [vmem:[#allocation94_spill] sm:$0xff] %v10191_v27 }
 0x16f   : > { %1456 = vadd.xlane.f32.xlu0 %v1455_v30  ;;  %v1650_v30 = vsel %vm458_vm0, %v10187_v17, 0.0  ;;  %v10224_v17 = vsub.f32 %v10200_v39, %v9578_v51  ;;  %16565 = vst [vmem:[#allocation109_spill] sm:$0xff] %v10265_v63 }
 0x170   : > { %1555 = vadd.xlane.f32.xlu1 %v1554_v1  ;;  %v10198_v11 = vpop.xlane.xlu0 %1504  ;;  %v1551_v1 = vsel %vm458_vm0, %v10191_v27, 0.0  ;;  %v1647_v27 = vsel %vm458_vm0, %v10214_v4, 0.0  ;;  %v10247_v4 = vsub.f32 %v10179_v20, %v9591_v58 }
 0x171   : > { %v10196_v8 = vpop.xlane.xlu1 %1699  ;;  %16552 = vst [vmem:[#allocation96_spill] sm:$0xff] %v10198_v11  ;;  %16557 = vst [vmem:[#allocation101_spill] sm:$0xff] %v10224_v17  ;;  %v1464_v10 = vsel %vm458_vm0, %v10224_v17, 0.0 }
 0x172   : > { %16551 = vst [vmem:[#allocation95_spill] sm:$0xff] %v10196_v8  ;;  %v10226_v8 = vadd.f32 %v940_v16, %v440_v45  ;;  %v443_v45 = vld [vmem:[%s15997_s2 + $0xa8] sm:$0xff]  ;;  %16561 = vst [vmem:[#allocation105_spill] sm:$0xff] %v10247_v4 }
 0x173   : > { %1552 = vadd.xlane.f32.xlu0 %v1551_v1 }
 0x174   : > { %1651 = vadd.xlane.f32.xlu1 %v1650_v30  ;;  %v10218_v11 = vpop.xlane.xlu0 %1600  ;;  %v10232_v30 = vsub.f32 %v10206_v5, %v9578_v51  ;;  %v10292_v23 = vsub.f32 %v10226_v8, %v9591_v58 }
 0x175   : > { %v10216_v50 = vpop.xlane.xlu1 %1321  ;;  %16556 = vst [vmem:[#allocation100_spill] sm:$0xff] %v10218_v11 }
 0x176   : > { %16555 = vst [vmem:[#allocation99_spill] sm:$0xff] %v10216_v50  ;;  %16558 = vst [vmem:[#allocation102_spill] sm:$0xff] %v10232_v30  ;;  %v1365_v16 = vsel %vm458_vm0, %v10232_v30, 0.0  ;;  %v1560_v30 = vsel %vm458_vm0, %v10247_v4, 0.0 }
 0x177   : > { %1648 = vadd.xlane.f32.xlu0 %v1647_v27  ;;  %v10251_v27 = vsub.f32 %v10226_v8, %v9578_v51  ;;  %16570 = vst [vmem:[#allocation114_spill] sm:$0xff] %v10292_v23 }
 0x178   : > { %1369 = vadd.xlane.f32.xlu1 %v1368_v44  ;;  %v10236_v11 = vpop.xlane.xlu0 %1696  ;;  %v8359_v44 = vpop.f32.mrf.mxu0 }
 0x179   : > { %v10234_v1 = vpop.xlane.xlu1 %1417  ;;  %16560 = vst [vmem:[#allocation104_spill] sm:$0xff] %v10236_v11  ;;  %16562 = vst [vmem:[#allocation106_spill] sm:$0xff] %v10251_v27  ;;  %v10257_v50 = vadd.f32 %v8359_v44, %v443_v45  ;;  %v1461_v11 = vsel %vm458_vm0, %v10251_v27, 0.0  ;;  %v442_v44 = vld [vmem:[%s15997_s2 + $0xa0] sm:$0xff] }
 0x17a   : > { %16559 = vst [vmem:[#allocation103_spill] sm:$0xff] %v10234_v1 }
 0x17b   : > { %1366 = vadd.xlane.f32.xlu0 %v1365_v16  ;;  %v721_v16 = vpop.f32.mrf.mxu0  ;;  %v10282_v62 = vsub.f32 %v10257_v50, %v9578_v51 }
 0x17c   : > { %1465 = vadd.xlane.f32.xlu1 %v1464_v10  ;;  %v10255_v17 = vpop.xlane.xlu0 %1414  ;;  %v10269_v10 = vsub.f32 %v10206_v5, %v9591_v58  ;;  %v10284_v14 = vadd.f32 %v721_v16, %v442_v44 }
 0x17d   : > { %v10253_v1 = vpop.xlane.xlu1 %1513  ;;  %16564 = vst [vmem:[#allocation108_spill] sm:$0xff] %v10255_v17  ;;  %16569 = vst [vmem:[#allocation113_spill] sm:$0xff] %v10282_v62  ;;  %v1374_v16 = vsel %vm458_vm0, %v10282_v62, 0.0 }
 0x17e   : > { %16563 = vst [vmem:[#allocation107_spill] sm:$0xff] %v10253_v1  ;;  %16566 = vst [vmem:[#allocation110_spill] sm:$0xff] %v10269_v10  ;;  %v8415_v1 = vpop.f32.mrf.mxu1 }
 0x17f   : > { %1462 = vadd.xlane.f32.xlu0 %v1461_v11  ;;  %v10278_v27 = vadd.f32 %v8415_v1, %v443_v45  ;;  %v1656_v11 = vsel %vm458_vm0, %v10265_v63, 0.0 }
 0x180   : > { %1561 = vadd.xlane.f32.xlu1 %v1560_v30  ;;  %v10276_v17 = vpop.xlane.xlu0 %1510  ;;  %v1557_v30 = vsel %vm458_vm0, %v10269_v10, 0.0  ;;  %v950_v1 = vpop.f32.mrf.mxu1  ;;  %v1653_v10 = vsel %vm458_vm0, %v10292_v23, 0.0  ;;  %v10325_v23 = vsub.f32 %v10257_v50, %v9591_v58 }
 0x181   : > { %v10274_v4 = vpop.xlane.xlu1 %1609  ;;  %16568 = vst [vmem:[#allocation112_spill] sm:$0xff] %v10276_v17  ;;  %v10302_v63 = vsub.f32 %v10278_v27, %v9578_v51  ;;  %v10343_v26 = vsub.f32 %v10278_v27, %v9591_v58 }
 0x182   : > { %16567 = vst [vmem:[#allocation111_spill] sm:$0xff] %v10274_v4  ;;  %v10304_v4 = vadd.f32 %v950_v1, %v442_v44  ;;  %v445_v44 = vld [vmem:[%s15997_s2 + $0xb8] sm:$0xff]  ;;  %16577 = vst [vmem:[#allocation121_spill] sm:$0xff] %v10325_v23 }
 0x183   : > { %1558 = vadd.xlane.f32.xlu0 %v1557_v30  ;;  %16573 = vst [vmem:[#allocation117_spill] sm:$0xff] %v10302_v63  ;;  %v1470_v62 = vsel %vm458_vm0, %v10302_v63, 0.0  ;;  %16581 = vst [vmem:[#allocation125_spill] sm:$0xff] %v10343_v26 }
 0x184   : > { %1657 = vadd.xlane.f32.xlu1 %v1656_v11  ;;  %v10296_v17 = vpop.xlane.xlu0 %1606  ;;  %v10310_v11 = vsub.f32 %v10284_v14, %v9578_v51  ;;  %v10370_v21 = vsub.f32 %v10304_v4, %v9591_v58 }
 0x185   : > { %v10294_v45 = vpop.xlane.xlu1 %1705  ;;  %16572 = vst [vmem:[#allocation116_spill] sm:$0xff] %v10296_v17 }
 0x186   : > { %16571 = vst [vmem:[#allocation115_spill] sm:$0xff] %v10294_v45  ;;  %16574 = vst [vmem:[#allocation118_spill] sm:$0xff] %v10310_v11  ;;  %v1371_v1 = vsel %vm458_vm0, %v10310_v11, 0.0  ;;  %v1566_v11 = vsel %vm458_vm0, %v10325_v23, 0.0 }
 0x187   : > { %1654 = vadd.xlane.f32.xlu0 %v1653_v10  ;;  %v10329_v10 = vsub.f32 %v10304_v4, %v9578_v51  ;;  %16587 = vst [vmem:[#allocation131_spill] sm:$0xff] %v10370_v21 }
 0x188   : > { %1375 = vadd.xlane.f32.xlu1 %v1374_v16  ;;  %v10314_v17 = vpop.xlane.xlu0 %1702  ;;  %v8362_v16 = vpop.f32.mrf.mxu0 }
 0x189   : > { %v10312_v30 = vpop.xlane.xlu1 %1318  ;;  %16576 = vst [vmem:[#allocation120_spill] sm:$0xff] %v10314_v17  ;;  %16578 = vst [vmem:[#allocation122_spill] sm:$0xff] %v10329_v10  ;;  %v10335_v17 = vadd.f32 %v8362_v16, %v445_v44  ;;  %v444_v16 = vld [vmem:[%s15997_s2 + $0xb0] sm:$0xff] }
 0x18a   : > { %16575 = vst [vmem:[#allocation119_spill] sm:$0xff] %v10312_v30  ;;  %v1467_v30 = vsel %vm458_vm0, %v10329_v10, 0.0 }
 0x18b   : > { %1372 = vadd.xlane.f32.xlu0 %v1371_v1  ;;  %v731_v1 = vpop.f32.mrf.mxu0  ;;  %v10360_v43 = vsub.f32 %v10335_v17, %v9578_v51 }
 0x18c   : > { %1471 = vadd.xlane.f32.xlu1 %v1470_v62  ;;  %v10333_v63 = vpop.xlane.xlu0 %1324  ;;  %v10347_v62 = vsub.f32 %v10284_v14, %v9591_v58  ;;  %v10362_v35 = vadd.f32 %v731_v1, %v444_v16 }
 0x18d   : > { %v10331_v45 = vpop.xlane.xlu1 %1327  ;;  %16580 = vst [vmem:[#allocation124_spill] sm:$0xff] %v10333_v63  ;;  %16586 = vst [vmem:[#allocation130_spill] sm:$0xff] %v10360_v43  ;;  %v1380_v1 = vsel %vm458_vm0, %v10360_v43, 0.0 }
 0x18e   : > { %16579 = vst [vmem:[#allocation123_spill] sm:$0xff] %v10331_v45  ;;  %16582 = vst [vmem:[#allocation126_spill] sm:$0xff] %v10347_v62  ;;  %v8418_v45 = vpop.f32.mrf.mxu1 }
 0x18f   : > { %1468 = vadd.xlane.f32.xlu0 %v1467_v30  ;;  %v10356_v10 = vadd.f32 %v8418_v45, %v445_v44  ;;  %v1563_v30 = vsel %vm458_vm0, %v10347_v62, 0.0  ;;  %v1659_v62 = vsel %vm458_vm0, %v10370_v21, 0.0  ;;  %v10403_v21 = vsub.f32 %v10335_v17, %v9591_v58 }
 0x190   : > { %1567 = vadd.xlane.f32.xlu1 %v1566_v11  ;;  %v10354_v63 = vpop.xlane.xlu0 %1420  ;;  %v1662_v11 = vsel %vm458_vm0, %v10343_v26, 0.0  ;;  %v960_v45 = vpop.f32.mrf.mxu1 }
 0x191   : > { %v10352_v23 = vpop.xlane.xlu1 %1423  ;;  %16584 = vst [vmem:[#allocation128_spill] sm:$0xff] %v10354_v63  ;;  %16585 = vst [vmem:[#allocation129_spill] sm:$0xff] %v10356_v10  ;;  %v10380_v26 = vsub.f32 %v10356_v10, %v9578_v51  ;;  %v10382_v63 = vadd.f32 %v960_v45, %v444_v16  ;;  %v447_v16 = vld [vmem:[%s15997_s2 + $0xc8] sm:$0xff]  ;;  %v10421_v47 = vsub.f32 %v10356_v10, %v9591_v58 }
 0x192   : > { %16583 = vst [vmem:[#allocation127_spill] sm:$0xff] %v10352_v23  ;;  %16595 = vst [vmem:[#allocation139_spill] sm:$0xff] %v10403_v21 }
 0x193   : > { %1564 = vadd.xlane.f32.xlu0 %v1563_v30  ;;  %16590 = vst [vmem:[#allocation134_spill] sm:$0xff] %v10380_v26  ;;  %16591 = vst [vmem:[#allocation135_spill] sm:$0xff] %v10382_v63  ;;  %v1476_v43 = vsel %vm458_vm0, %v10380_v26, 0.0  ;;  %v10448_v33 = vsub.f32 %v10382_v63, %v9591_v58 }
 0x194   : > { %1663 = vadd.xlane.f32.xlu1 %v1662_v11  ;;  %v10374_v23 = vpop.xlane.xlu0 %1516  ;;  %v10388_v11 = vsub.f32 %v10362_v35, %v9578_v51  ;;  %16599 = vst [vmem:[#allocation143_spill] sm:$0xff] %v10421_v47 }
 0x195   : > { %v10372_v44 = vpop.xlane.xlu1 %1519  ;;  %16589 = vst [vmem:[#allocation133_spill] sm:$0xff] %v10374_v23  ;;  %16605 = vst [vmem:[#allocation149_spill] sm:$0xff] %v10448_v33 }
 0x196   : > { %16588 = vst [vmem:[#allocation132_spill] sm:$0xff] %v10372_v44  ;;  %16592 = vst [vmem:[#allocation136_spill] sm:$0xff] %v10388_v11  ;;  %v1377_v45 = vsel %vm458_vm0, %v10388_v11, 0.0  ;;  %v1572_v11 = vsel %vm458_vm0, %v10403_v21, 0.0 }
 0x197   : > { %1660 = vadd.xlane.f32.xlu0 %v1659_v62  ;;  %v10407_v62 = vsub.f32 %v10382_v63, %v9578_v51 }
 0x198   : > { %1381 = vadd.xlane.f32.xlu1 %v1380_v1  ;;  %v10392_v44 = vpop.xlane.xlu0 %1612  ;;  %v8365_v1 = vpop.f32.mrf.mxu0 }
 0x199   : > { %v10390_v30 = vpop.xlane.xlu1 %1615  ;;  %16594 = vst [vmem:[#allocation138_spill] sm:$0xff] %v10392_v44  ;;  %16596 = vst [vmem:[#allocation140_spill] sm:$0xff] %v10407_v62  ;;  %v1473_v23 = vsel %vm458_vm0, %v10407_v62, 0.0 }
 0x19a   : > { %16593 = vst [vmem:[#allocation137_spill] sm:$0xff] %v10390_v30  ;;  %v10413_v30 = vadd.f32 %v8365_v1, %v447_v16  ;;  %v446_v1 = vld [vmem:[%s15997_s2 + $0xc0] sm:$0xff] }
 0x19b   : > { %1378 = vadd.xlane.f32.xlu0 %v1377_v45  ;;  %v741_v45 = vpop.f32.mrf.mxu0 }
 0x19c   : > { %1477 = vadd.xlane.f32.xlu1 %v1476_v43  ;;  %v10411_v26 = vpop.xlane.xlu0 %1708  ;;  %v10425_v43 = vsub.f32 %v10362_v35, %v9591_v58  ;;  %v10438_v54 = vsub.f32 %v10413_v30, %v9578_v51  ;;  %v10440_v53 = vadd.f32 %v741_v45, %v446_v1 }
 0x19d   : > { %v10409_v44 = vpop.xlane.xlu1 %1711  ;;  %16598 = vst [vmem:[#allocation142_spill] sm:$0xff] %v10411_v26 }
 0x19e   : > { %16597 = vst [vmem:[#allocation141_spill] sm:$0xff] %v10409_v44  ;;  %16600 = vst [vmem:[#allocation144_spill] sm:$0xff] %v10425_v43  ;;  %v8421_v44 = vpop.f32.mrf.mxu1  ;;  %v1386_v45 = vsel %vm458_vm0, %v10438_v54, 0.0 }
 0x19f   : > { %1474 = vadd.xlane.f32.xlu0 %v1473_v23  ;;  %v10434_v62 = vadd.f32 %v8421_v44, %v447_v16  ;;  %16604 = vst [vmem:[#allocation148_spill] sm:$0xff] %v10438_v54  ;;  %v1668_v23 = vsel %vm458_vm0, %v10421_v47, 0.0 }
 0x1a0   : > { %1573 = vadd.xlane.f32.xlu1 %v1572_v11  ;;  %v10432_v26 = vpop.xlane.xlu0 %1330  ;;  %v1569_v11 = vsel %vm458_vm0, %v10425_v43, 0.0  ;;  %v970_v44 = vpop.f32.mrf.mxu1  ;;  %v1665_v43 = vsel %vm458_vm0, %v10448_v33, 0.0  ;;  %v10481_v33 = vsub.f32 %v10413_v30, %v9591_v58 }
 0x1a1   : > { %v10430_v21 = vpop.xlane.xlu1 %1333  ;;  %16602 = vst [vmem:[#allocation146_spill] sm:$0xff] %v10432_v26  ;;  %16603 = vst [vmem:[#allocation147_spill] sm:$0xff] %v10434_v62  ;;  %v10458_v47 = vsub.f32 %v10434_v62, %v9578_v51  ;;  %v10460_v26 = vadd.f32 %v970_v44, %v446_v1  ;;  %v449_v1 = vld [vmem:[%s15997_s2 + $0xd8] sm:$0xff]  ;;  %v10499_v13 = vsub.f32 %v10434_v62, %v9591_v58 }
 0x1a2   : > { %16601 = vst [vmem:[#allocation145_spill] sm:$0xff] %v10430_v21  ;;  %16613 = vst [vmem:[#allocation157_spill] sm:$0xff] %v10481_v33 }
 0x1a3   : > { %1570 = vadd.xlane.f32.xlu0 %v1569_v11  ;;  %16608 = vst [vmem:[#allocation152_spill] sm:$0xff] %v10458_v47  ;;  %16609 = vst [vmem:[#allocation153_spill] sm:$0xff] %v10460_v26  ;;  %v1482_v54 = vsel %vm458_vm0, %v10458_v47, 0.0  ;;  %v10526_v48 = vsub.f32 %v10460_v26, %v9591_v58 }
 0x1a4   : > { %1669 = vadd.xlane.f32.xlu1 %v1668_v23  ;;  %v10452_v21 = vpop.xlane.xlu0 %1426  ;;  %v10466_v23 = vsub.f32 %v10440_v53, %v9578_v51  ;;  %16617 = vst [vmem:[#allocation161_spill] sm:$0xff] %v10499_v13 }
 0x1a5   : > { %v10450_v16 = vpop.xlane.xlu1 %1429  ;;  %16607 = vst [vmem:[#allocation151_spill] sm:$0xff] %v10452_v21  ;;  %16623 = vst [vmem:[#allocation167_spill] sm:$0xff] %v10526_v48 }
 0x1a6   : > { %16606 = vst [vmem:[#allocation150_spill] sm:$0xff] %v10450_v16  ;;  %16610 = vst [vmem:[#allocation154_spill] sm:$0xff] %v10466_v23  ;;  %v1383_v44 = vsel %vm458_vm0, %v10466_v23, 0.0  ;;  %v1578_v23 = vsel %vm458_vm0, %v10481_v33, 0.0 }
 0x1a7   : > { %1666 = vadd.xlane.f32.xlu0 %v1665_v43  ;;  %v10485_v43 = vsub.f32 %v10460_v26, %v9578_v51 }
 0x1a8   : > { %1387 = vadd.xlane.f32.xlu1 %v1386_v45  ;;  %v10470_v16 = vpop.xlane.xlu0 %1522  ;;  %v8368_v45 = vpop.f32.mrf.mxu0 }
 0x1a9   : > { %v10468_v11 = vpop.xlane.xlu1 %1525  ;;  %16612 = vst [vmem:[#allocation156_spill] sm:$0xff] %v10470_v16  ;;  %16614 = vst [vmem:[#allocation158_spill] sm:$0xff] %v10485_v43  ;;  %v1479_v21 = vsel %vm458_vm0, %v10485_v43, 0.0 }
 0x1aa   : > { %16611 = vst [vmem:[#allocation155_spill] sm:$0xff] %v10468_v11  ;;  %v10491_v11 = vadd.f32 %v8368_v45, %v449_v1  ;;  %v448_v45 = vld [vmem:[%s15997_s2 + $0xd0] sm:$0xff] }
 0x1ab   : > { %1384 = vadd.xlane.f32.xlu0 %v1383_v44  ;;  %v751_v44 = vpop.f32.mrf.mxu0 }
 0x1ac   : > { %1483 = vadd.xlane.f32.xlu1 %v1482_v54  ;;  %v10489_v47 = vpop.xlane.xlu0 %1618  ;;  %v10503_v54 = vsub.f32 %v10440_v53, %v9591_v58  ;;  %v10516_v61 = vsub.f32 %v10491_v11, %v9578_v51  ;;  %v10518_v56 = vadd.f32 %v751_v44, %v448_v45 }
 0x1ad   : > { %v10487_v16 = vpop.xlane.xlu1 %1621  ;;  %16616 = vst [vmem:[#allocation160_spill] sm:$0xff] %v10489_v47 }
 0x1ae   : > { %16615 = vst [vmem:[#allocation159_spill] sm:$0xff] %v10487_v16  ;;  %16618 = vst [vmem:[#allocation162_spill] sm:$0xff] %v10503_v54  ;;  %v8424_v16 = vpop.f32.mrf.mxu1  ;;  %v1392_v44 = vsel %vm458_vm0, %v10516_v61, 0.0 }
 0x1af   : > { %1480 = vadd.xlane.f32.xlu0 %v1479_v21  ;;  %v10512_v43 = vadd.f32 %v8424_v16, %v449_v1  ;;  %16622 = vst [vmem:[#allocation166_spill] sm:$0xff] %v10516_v61  ;;  %v1674_v21 = vsel %vm458_vm0, %v10499_v13, 0.0 }
 0x1b0   : > { %1579 = vadd.xlane.f32.xlu1 %v1578_v23  ;;  %v10510_v47 = vpop.xlane.xlu0 %1714  ;;  %v1575_v23 = vsel %vm458_vm0, %v10503_v54, 0.0  ;;  %v980_v16 = vpop.f32.mrf.mxu1  ;;  %v1671_v54 = vsel %vm458_vm0, %v10526_v48, 0.0  ;;  %v10559_v48 = vsub.f32 %v10491_v11, %v9591_v58 }
 0x1b1   : > { %v10508_v33 = vpop.xlane.xlu1 %1339  ;;  %16620 = vst [vmem:[#allocation164_spill] sm:$0xff] %v10510_v47  ;;  %16621 = vst [vmem:[#allocation165_spill] sm:$0xff] %v10512_v43  ;;  %v10536_v13 = vsub.f32 %v10512_v43, %v9578_v51  ;;  %v10538_v47 = vadd.f32 %v980_v16, %v448_v45  ;;  %v451_v45 = vld [vmem:[%s15997_s2 + $0xe8] sm:$0xff]  ;;  %v10577_v52 = vsub.f32 %v10512_v43, %v9591_v58 }
 0x1b2   : > { %16619 = vst [vmem:[#allocation163_spill] sm:$0xff] %v10508_v33  ;;  %16631 = vst [vmem:[#allocation175_spill] sm:$0xff] %v10559_v48 }
 0x1b3   : > { %1576 = vadd.xlane.f32.xlu0 %v1575_v23  ;;  %16626 = vst [vmem:[#allocation170_spill] sm:$0xff] %v10536_v13  ;;  %16627 = vst [vmem:[#allocation171_spill] sm:$0xff] %v10538_v47  ;;  %v1488_v61 = vsel %vm458_vm0, %v10536_v13, 0.0  ;;  %v10604_v62 = vsub.f32 %v10538_v47, %v9591_v58 }
 0x1b4   : > { %1675 = vadd.xlane.f32.xlu1 %v1674_v21  ;;  %v10530_v33 = vpop.xlane.xlu0 %1336  ;;  %v10544_v21 = vsub.f32 %v10518_v56, %v9578_v51  ;;  %16635 = vst [vmem:[#allocation179_spill] sm:$0xff] %v10577_v52 }
 0x1b5   : > { %v10528_v1 = vpop.xlane.xlu1 %1435  ;;  %16625 = vst [vmem:[#allocation169_spill] sm:$0xff] %v10530_v33  ;;  %16641 = vst [vmem:[#allocation185_spill] sm:$0xff] %v10604_v62 }
 0x1b6   : > { %16624 = vst [vmem:[#allocation168_spill] sm:$0xff] %v10528_v1  ;;  %16628 = vst [vmem:[#allocation172_spill] sm:$0xff] %v10544_v21  ;;  %v1389_v16 = vsel %vm458_vm0, %v10544_v21, 0.0  ;;  %v1584_v21 = vsel %vm458_vm0, %v10559_v48, 0.0 }
 0x1b7   : > { %1672 = vadd.xlane.f32.xlu0 %v1671_v54  ;;  %v10563_v54 = vsub.f32 %v10538_v47, %v9578_v51 }
 0x1b8   : > { %1393 = vadd.xlane.f32.xlu1 %v1392_v44  ;;  %v10548_v1 = vpop.xlane.xlu0 %1432  ;;  %v8371_v44 = vpop.f32.mrf.mxu0 }
 0x1b9   : > { %v10546_v23 = vpop.xlane.xlu1 %1531  ;;  %16630 = vst [vmem:[#allocation174_spill] sm:$0xff] %v10548_v1  ;;  %16632 = vst [vmem:[#allocation176_spill] sm:$0xff] %v10563_v54  ;;  %v1485_v33 = vsel %vm458_vm0, %v10563_v54, 0.0 }
 0x1ba   : > { %16629 = vst [vmem:[#allocation173_spill] sm:$0xff] %v10546_v23  ;;  %v10569_v23 = vadd.f32 %v8371_v44, %v451_v45  ;;  %v450_v44 = vld [vmem:[%s15997_s2 + $0xe0] sm:$0xff] }
 0x1bb   : > { %1390 = vadd.xlane.f32.xlu0 %v1389_v16  ;;  %v761_v16 = vpop.f32.mrf.mxu0 }
 0x1bc   : > { %1489 = vadd.xlane.f32.xlu1 %v1488_v61  ;;  %v10567_v13 = vpop.xlane.xlu0 %1528  ;;  %v10581_v61 = vsub.f32 %v10518_v56, %v9591_v58  ;;  %v10594_v43 = vsub.f32 %v10569_v23, %v9578_v51  ;;  %v10596_v26 = vadd.f32 %v761_v16, %v450_v44 }
 0x1bd   : > { %v10565_v1 = vpop.xlane.xlu1 %1627  ;;  %16634 = vst [vmem:[#allocation178_spill] sm:$0xff] %v10567_v13 }
 0x1be   : > { %16633 = vst [vmem:[#allocation177_spill] sm:$0xff] %v10565_v1  ;;  %16636 = vst [vmem:[#allocation180_spill] sm:$0xff] %v10581_v61  ;;  %v8427_v1 = vpop.f32.mrf.mxu1  ;;  %v1398_v16 = vsel %vm458_vm0, %v10594_v43, 0.0 }
 0x1bf   : > { %1486 = vadd.xlane.f32.xlu0 %v1485_v33  ;;  %v10590_v54 = vadd.f32 %v8427_v1, %v451_v45  ;;  %16640 = vst [vmem:[#allocation184_spill] sm:$0xff] %v10594_v43  ;;  %v1680_v33 = vsel %vm458_vm0, %v10577_v52, 0.0 }
 0x1c0   : > { %1585 = vadd.xlane.f32.xlu1 %v1584_v21  ;;  %v10588_v13 = vpop.xlane.xlu0 %1624  ;;  %v1581_v21 = vsel %vm458_vm0, %v10581_v61, 0.0  ;;  %v990_v1 = vpop.f32.mrf.mxu1  ;;  %v1677_v61 = vsel %vm458_vm0, %v10604_v62, 0.0  ;;  %v10637_v62 = vsub.f32 %v10569_v23, %v9591_v58 }
 0x1c1   : > { %v10586_v48 = vpop.xlane.xlu1 %1345  ;;  %16638 = vst [vmem:[#allocation182_spill] sm:$0xff] %v10588_v13  ;;  %16639 = vst [vmem:[#allocation183_spill] sm:$0xff] %v10590_v54  ;;  %v10614_v52 = vsub.f32 %v10590_v54, %v9578_v51  ;;  %v10655_v47 = vsub.f32 %v10590_v54, %v9591_v58 }
 0x1c2   : > { %16637 = vst [vmem:[#allocation181_spill] sm:$0xff] %v10586_v48  ;;  %v10616_v48 = vadd.f32 %v990_v1, %v450_v44  ;;  %v453_v44 = vld [vmem:[%s15997_s2 + $0xf8] sm:$0xff]  ;;  %16648 = vst [vmem:[#allocation192_spill] sm:$0xff] %v10637_v62 }
 0x1c3   : > { %1582 = vadd.xlane.f32.xlu0 %v1581_v21  ;;  %16644 = vst [vmem:[#allocation188_spill] sm:$0xff] %v10614_v52  ;;  %v1494_v43 = vsel %vm458_vm0, %v10614_v52, 0.0  ;;  %16652 = vst [vmem:[#allocation196_spill] sm:$0xff] %v10655_v47 }
 0x1c4   : > { %1681 = vadd.xlane.f32.xlu1 %v1680_v33  ;;  %v10608_v13 = vpop.xlane.xlu0 %1342  ;;  %v10622_v33 = vsub.f32 %v10596_v26, %v9578_v51  ;;  %v10682_v10 = vsub.f32 %v10616_v48, %v9591_v58 }
 0x1c5   : > { %v10606_v45 = vpop.xlane.xlu1 %1441  ;;  %16643 = vst [vmem:[#allocation187_spill] sm:$0xff] %v10608_v13 }
 0x1c6   : > { %16642 = vst [vmem:[#allocation186_spill] sm:$0xff] %v10606_v45  ;;  %16645 = vst [vmem:[#allocation189_spill] sm:$0xff] %v10622_v33  ;;  %v1395_v1 = vsel %vm458_vm0, %v10622_v33, 0.0  ;;  %v1590_v33 = vsel %vm458_vm0, %v10637_v62, 0.0 }
 0x1c7   : > { %1678 = vadd.xlane.f32.xlu0 %v1677_v61  ;;  %v10641_v61 = vsub.f32 %v10616_v48, %v9578_v51  ;;  %16657 = vst [vmem:[#allocation201_spill] sm:$0xff] %v10682_v10 }
 0x1c8   : > { %1399 = vadd.xlane.f32.xlu1 %v1398_v16  ;;  %v10626_v45 = vpop.xlane.xlu0 %1438  ;;  %v8374_v16 = vpop.f32.mrf.mxu0 }
 0x1c9   : > { %v10624_v21 = vpop.xlane.xlu1 %1537  ;;  %16647 = vst [vmem:[#allocation191_spill] sm:$0xff] %v10626_v45  ;;  %16649 = vst [vmem:[#allocation193_spill] sm:$0xff] %v10641_v61  ;;  %v1491_v13 = vsel %vm458_vm0, %v10641_v61, 0.0 }
 0x1ca   : > { %16646 = vst [vmem:[#allocation190_spill] sm:$0xff] %v10624_v21  ;;  %v10647_v21 = vadd.f32 %v8374_v16, %v453_v44  ;;  %v452_v16 = vld [vmem:[%s15997_s2 + $0xf0] sm:$0xff] }
 0x1cb   : > { %1396 = vadd.xlane.f32.xlu0 %v1395_v1  ;;  %v771_v1 = vpop.f32.mrf.mxu0 }
 0x1cc   : > { %1495 = vadd.xlane.f32.xlu1 %v1494_v43  ;;  %v10645_v52 = vpop.xlane.xlu0 %1534  ;;  %v10659_v43 = vsub.f32 %v10596_v26, %v9591_v58  ;;  %v10672_v54 = vsub.f32 %v10647_v21, %v9578_v51  ;;  %v10674_v63 = vadd.f32 %v771_v1, %v452_v16 }
 0x1cd   : > { %v10643_v45 = vpop.xlane.xlu1 %1633  ;;  %16651 = vst [vmem:[#allocation195_spill] sm:$0xff] %v10645_v52 }
 0x1ce   : > { %16650 = vst [vmem:[#allocation194_spill] sm:$0xff] %v10643_v45  ;;  %16653 = vst [vmem:[#allocation197_spill] sm:$0xff] %v10659_v43  ;;  %v8430_v45 = vpop.f32.mrf.mxu1  ;;  %v1404_v1 = vsel %vm458_vm0, %v10672_v54, 0.0 }
 0x1cf   : > { %1492 = vadd.xlane.f32.xlu0 %v1491_v13  ;;  %v10668_v61 = vadd.f32 %v8430_v45, %v453_v44  ;;  %16656 = vst [vmem:[#allocation200_spill] sm:$0xff] %v10672_v54  ;;  %v1686_v13 = vsel %vm458_vm0, %v10655_v47, 0.0 }
 0x1d0   : > { %1591 = vadd.xlane.f32.xlu1 %v1590_v33  ;;  %v10666_v52 = vpop.xlane.xlu0 %1630  ;;  %v1587_v33 = vsel %vm458_vm0, %v10659_v43, 0.0  ;;  %v1000_v45 = vpop.f32.mrf.mxu1  ;;  %v1683_v43 = vsel %vm458_vm0, %v10682_v10, 0.0 }
 0x1d1   : > { %v10664_v62 = vpop.xlane.xlu1 %1351  ;;  %16655 = vst [vmem:[#allocation199_spill] sm:$0xff] %v10666_v52  ;;  %v10692_v47 = vsub.f32 %v10668_v61, %v9578_v51 }
 0x1d2   : > { %16654 = vst [vmem:[#allocation198_spill] sm:$0xff] %v10664_v62  ;;  %v10694_v62 = vadd.f32 %v1000_v45, %v452_v16  ;;  %v10712_v45 = vsub.f32 %v10647_v21, %v9591_v58 }
 0x1d3   : > { %1588 = vadd.xlane.f32.xlu0 %v1587_v33  ;;  %16660 = vst [vmem:[#allocation204_spill] sm:$0xff] %v10692_v47  ;;  %v1500_v54 = vsel %vm458_vm0, %v10692_v47, 0.0 }
 0x1d4   : > { %1687 = vadd.xlane.f32.xlu1 %v1686_v13  ;;  %v10686_v52 = vpop.xlane.xlu0 %1348  ;;  %v10700_v13 = vsub.f32 %v10674_v63, %v9578_v51  ;;  %16664 = vst [vmem:[#allocation208_spill] sm:$0xff] %v10712_v45  ;;  %v10716_v10 = vsub.f32 %v10694_v62, %v9578_v51  ;;  %v1596_v47 = vsel %vm458_vm0, %v10712_v45, 0.0  ;;  %v10732_v51 = vsub.f32 %v10674_v63, %v9591_v58 }
 0x1d5   : > { %v10684_v44 = vpop.xlane.xlu1 %1447  ;;  %16659 = vst [vmem:[#allocation203_spill] sm:$0xff] %v10686_v52  ;;  %v10796_v52 = vsub.f32 %v10004_v22, %v9621_v7 }
 0x1d6   : > { %16658 = vst [vmem:[#allocation202_spill] sm:$0xff] %v10684_v44  ;;  %16661 = vst [vmem:[#allocation205_spill] sm:$0xff] %v10700_v13  ;;  %v1401_v16 = vsel %vm458_vm0, %v10700_v13, 0.0  ;;  %v1497_v13 = vsel %vm458_vm0, %v10716_v10, 0.0 }
 0x1d7   : > { %1684 = vadd.xlane.f32.xlu0 %v1683_v43  ;;  %16665 = vst [vmem:[#allocation209_spill] sm:$0xff] %v10716_v10  ;;  %16669 = vst [vmem:[#allocation213_spill] sm:$0xff] %v10732_v51  ;;  %v1593_v10 = vsel %vm458_vm0, %v10732_v51, 0.0 }
 0x1d8   : > { %1405 = vadd.xlane.f32.xlu1 %v1404_v1  ;;  %v10704_v44 = vpop.xlane.xlu0 %1444  ;;  %16685 = vst [vmem:[#allocation229_spill] sm:$0xff] %v10796_v52 }
 0x1d9   : > { %v10702_v33 = vpop.xlane.xlu1 %1543  ;;  %16663 = vst [vmem:[#allocation207_spill] sm:$0xff] %v10704_v44  ;;  %v10728_v44 = vsub.f32 %v10668_v61, %v9591_v58 }
 0x1da   : > { %16662 = vst [vmem:[#allocation206_spill] sm:$0xff] %v10702_v33  ;;  %v10776_v33 = vsub.f32 %v9919_v18, %v9621_v7 }
 0x1db   : > { %1402 = vadd.xlane.f32.xlu0 %v1401_v16  ;;  %16668 = vst [vmem:[#allocation212_spill] sm:$0xff] %v10728_v44  ;;  %v1692_v45 = vsel %vm458_vm0, %v10728_v44, 0.0 }
 0x1dc   : > { %1501 = vadd.xlane.f32.xlu1 %v1500_v54  ;;  %v10720_v1 = vpop.xlane.xlu0 %1540  ;;  %16680 = vst [vmem:[#allocation224_spill] sm:$0xff] %v10776_v33 }
 0x1dd   : > { %v10718_v43 = vpop.xlane.xlu1 %1639  ;;  %16667 = vst [vmem:[#allocation211_spill] sm:$0xff] %v10720_v1  ;;  %v10744_v1 = vsub.f32 %v9798_v46, %v9621_v7 }
 0x1de   : > { %16666 = vst [vmem:[#allocation210_spill] sm:$0xff] %v10718_v43  ;;  %v10748_v43 = vsub.f32 %v10694_v62, %v9591_v58  ;;  %v10764_v58 = vsub.f32 %v9880_v25, %v9621_v7 }
 0x1df   : > { %1498 = vadd.xlane.f32.xlu0 %v1497_v13  ;;  %16672 = vst [vmem:[#allocation216_spill] sm:$0xff] %v10744_v1  ;;  %v1716_v44 = vsel %vm458_vm0, %v10744_v1, 0.0  ;;  %v16776_v1 = vld [vmem:[#allocation153_spill] sm:$0xff] }
 0x1e0   : > { %1597 = vadd.xlane.f32.xlu1 %v1596_v47  ;;  %v10736_v16 = vpop.xlane.xlu0 %1636  ;;  %16673 = vst [vmem:[#allocation217_spill] sm:$0xff] %v10748_v43  ;;  %v1689_v51 = vsel %vm458_vm0, %v10748_v43, 0.0  ;;  %16677 = vst [vmem:[#allocation221_spill] sm:$0xff] %v10764_v58  ;;  %v1719_v43 = vsel %vm458_vm0, %v10764_v58, 0.0 }
 0x1e1   : > { %v10734_v54 = vpop.xlane.xlu1 %1357  ;;  %16671 = vst [vmem:[#allocation215_spill] sm:$0xff] %v10736_v16  ;;  %v10760_v16 = vsub.f32 %v9857_v24, %v9621_v7 }
 0x1e2   : > { %16670 = vst [vmem:[#allocation214_spill] sm:$0xff] %v10734_v54  ;;  %v10780_v54 = vsub.f32 %v9942_v60, %v9621_v7 }
 0x1e3   : > { %1594 = vadd.xlane.f32.xlu0 %v1593_v10  ;;  %16676 = vst [vmem:[#allocation220_spill] sm:$0xff] %v10760_v16 }
 0x1e4   : > { %1693 = vadd.xlane.f32.xlu1 %v1692_v45  ;;  %v10752_v13 = vpop.xlane.xlu0 %1354  ;;  %16681 = vst [vmem:[#allocation225_spill] sm:$0xff] %v10780_v54 }
 0x1e5   : > { %v10750_v47 = vpop.xlane.xlu1 %1453  ;;  %16675 = vst [vmem:[#allocation219_spill] sm:$0xff] %v10752_v13  ;;  %v10792_v13 = vsub.f32 %v9981_v37, %v9621_v7 }
 0x1e6   : > { %16674 = vst [vmem:[#allocation218_spill] sm:$0xff] %v10750_v47  ;;  %v1722_v47 = vsel %vm458_vm0, %v10760_v16, 0.0  ;;  %v16770_v16 = vld [vmem:[#allocation135_spill] sm:$0xff] }
 0x1e7   : > { %1690 = vadd.xlane.f32.xlu0 %v1689_v51  ;;  %16684 = vst [vmem:[#allocation228_spill] sm:$0xff] %v10792_v13  ;;  %v11132_v58 = vsub.f32 %v16770_v16, %v9621_v7  ;;  %v11148_v16 = vsub.f32 %v16776_v1, %v9621_v7 }
 0x1e8   : > { %1717 = vadd.xlane.f32.xlu1 %v1716_v44  ;;  %v10768_v45 = vpop.xlane.xlu0 %1450 }
 0x1e9   : > { %v10766_v10 = vpop.xlane.xlu1 %1549  ;;  %16679 = vst [vmem:[#allocation223_spill] sm:$0xff] %v10768_v45  ;;  %v1725_v45 = vsel %vm458_vm0, %v10780_v54, 0.0  ;;  %v10812_v54 = vsub.f32 %v10066_v49, %v9621_v7  ;;  %16771 = vst [vmem:[#allocation313_spill] sm:$0xff] %v11132_v58 }
 0x1ea   : > { %16678 = vst [vmem:[#allocation222_spill] sm:$0xff] %v10766_v10  ;;  %v1728_v10 = vsel %vm458_vm0, %v10776_v33, 0.0  ;;  %v10808_v33 = vsub.f32 %v10043_v38, %v9621_v7  ;;  %16777 = vst [vmem:[#allocation317_spill] sm:$0xff] %v11148_v16 }
 0x1eb   : > { %1720 = vadd.xlane.f32.xlu0 %v1719_v43  ;;  %16689 = vst [vmem:[#allocation233_spill] sm:$0xff] %v10812_v54 }
 0x1ec   : > { %1723 = vadd.xlane.f32.xlu1 %v1722_v47  ;;  %v10784_v51 = vpop.xlane.xlu0 %1546  ;;  %16688 = vst [vmem:[#allocation232_spill] sm:$0xff] %v10808_v33 }
 0x1ed   : > { %v10782_v44 = vpop.xlane.xlu1 %1645  ;;  %16683 = vst [vmem:[#allocation227_spill] sm:$0xff] %v10784_v51  ;;  %v1734_v51 = vsel %vm458_vm0, %v10792_v13, 0.0  ;;  %v10824_v13 = vsub.f32 %v10105_v31, %v9621_v7 }
 0x1ee   : > { %16682 = vst [vmem:[#allocation226_spill] sm:$0xff] %v10782_v44  ;;  %v1731_v44 = vsel %vm458_vm0, %v10796_v52, 0.0  ;;  %v10828_v52 = vsub.f32 %v10128_v2, %v9621_v7 }
 0x1ef   : > { %1726 = vadd.xlane.f32.xlu0 %v1725_v45  ;;  %16692 = vst [vmem:[#allocation236_spill] sm:$0xff] %v10824_v13 }
 0x1f0   : > { %1729 = vadd.xlane.f32.xlu1 %v1728_v10  ;;  %v10800_v47 = vpop.xlane.xlu0 %1642  ;;  %16693 = vst [vmem:[#allocation237_spill] sm:$0xff] %v10828_v52 }
 0x1f1   : > { %v10798_v43 = vpop.xlane.xlu1 %1363  ;;  %16687 = vst [vmem:[#allocation231_spill] sm:$0xff] %v10800_v47  ;;  %v1740_v47 = vsel %vm458_vm0, %v10808_v33, 0.0  ;;  %v1743_v33 = vsel %vm458_vm0, %v10828_v52, 0.0  ;;  %v10860_v52 = vsub.f32 %v10284_v14, %v9621_v7 }
 0x1f2   : > { %16686 = vst [vmem:[#allocation230_spill] sm:$0xff] %v10798_v43  ;;  %v1737_v43 = vsel %vm458_vm0, %v10812_v54, 0.0  ;;  %v10844_v54 = vsub.f32 %v10206_v5, %v9621_v7 }
 0x1f3   : > { %1732 = vadd.xlane.f32.xlu0 %v1731_v44  ;;  %16701 = vst [vmem:[#allocation245_spill] sm:$0xff] %v10860_v52 }
 0x1f4   : > { %1735 = vadd.xlane.f32.xlu1 %v1734_v51  ;;  %v10816_v45 = vpop.xlane.xlu0 %1360  ;;  %16697 = vst [vmem:[#allocation241_spill] sm:$0xff] %v10844_v54 }
 0x1f5   : > { %v10814_v10 = vpop.xlane.xlu1 %1459  ;;  %16691 = vst [vmem:[#allocation235_spill] sm:$0xff] %v10816_v45  ;;  %v10840_v45 = vsub.f32 %v10179_v20, %v9621_v7 }
 0x1f6   : > { %16690 = vst [vmem:[#allocation234_spill] sm:$0xff] %v10814_v10  ;;  %v1746_v10 = vsel %vm458_vm0, %v10824_v13, 0.0  ;;  %v10856_v13 = vsub.f32 %v10257_v50, %v9621_v7 }
 0x1f7   : > { %1738 = vadd.xlane.f32.xlu0 %v1737_v43  ;;  %16696 = vst [vmem:[#allocation240_spill] sm:$0xff] %v10840_v45 }
 0x1f8   : > { %1741 = vadd.xlane.f32.xlu1 %v1740_v47  ;;  %v10832_v51 = vpop.xlane.xlu0 %1456  ;;  %16700 = vst [vmem:[#allocation244_spill] sm:$0xff] %v10856_v13 }
 0x1f9   : > { %v10830_v44 = vpop.xlane.xlu1 %1555  ;;  %16695 = vst [vmem:[#allocation239_spill] sm:$0xff] %v10832_v51  ;;  %v1752_v51 = vsel %vm458_vm0, %v10840_v45, 0.0  ;;  %v10872_v45 = vsub.f32 %v10335_v17, %v9621_v7 }
 0x1fa   : > { %16694 = vst [vmem:[#allocation238_spill] sm:$0xff] %v10830_v44  ;;  %v1749_v44 = vsel %vm458_vm0, %v10844_v54, 0.0  ;;  %v10876_v54 = vsub.f32 %v10362_v35, %v9621_v7 }
 0x1fb   : > { %1744 = vadd.xlane.f32.xlu0 %v1743_v33  ;;  %16704 = vst [vmem:[#allocation248_spill] sm:$0xff] %v10872_v45 }
 0x1fc   : > { %1747 = vadd.xlane.f32.xlu1 %v1746_v10  ;;  %v10848_v47 = vpop.xlane.xlu0 %1552  ;;  %16705 = vst [vmem:[#allocation249_spill] sm:$0xff] %v10876_v54 }
 0x1fd   : > { %v10846_v43 = vpop.xlane.xlu1 %1651  ;;  %16699 = vst [vmem:[#allocation243_spill] sm:$0xff] %v10848_v47  ;;  %v1758_v47 = vsel %vm458_vm0, %v10856_v13, 0.0  ;;  %v1761_v13 = vsel %vm458_vm0, %v10876_v54, 0.0  ;;  %v10904_v54 = vsub.f32 %v10491_v11, %v9621_v7 }
 0x1fe   : > { %16698 = vst [vmem:[#allocation242_spill] sm:$0xff] %v10846_v43  ;;  %v1755_v43 = vsel %vm458_vm0, %v10860_v52, 0.0  ;;  %v10888_v52 = vsub.f32 %v10413_v30, %v9621_v7 }
 0x1ff   : > { %1750 = vadd.xlane.f32.xlu0 %v1749_v44  ;;  %16712 = vst [vmem:[#allocation256_spill] sm:$0xff] %v10904_v54 }
 0x200   : > { %1753 = vadd.xlane.f32.xlu1 %v1752_v51  ;;  %v10864_v10 = vpop.xlane.xlu0 %1648  ;;  %16708 = vst [vmem:[#allocation252_spill] sm:$0xff] %v10888_v52 }
 0x201   : > { %v10862_v33 = vpop.xlane.xlu1 %1369  ;;  %16703 = vst [vmem:[#allocation247_spill] sm:$0xff] %v10864_v10  ;;  %v1764_v10 = vsel %vm458_vm0, %v10872_v45, 0.0 }
 0x202   : > { %16702 = vst [vmem:[#allocation246_spill] sm:$0xff] %v10862_v33  ;;  %v10892_v33 = vsub.f32 %v10440_v53, %v9621_v7 }
 0x203   : > { %1756 = vadd.xlane.f32.xlu0 %v1755_v43 }
 0x204   : > { %1759 = vadd.xlane.f32.xlu1 %v1758_v47  ;;  %v10880_v51 = vpop.xlane.xlu0 %1366  ;;  %16709 = vst [vmem:[#allocation253_spill] sm:$0xff] %v10892_v33  ;;  %v1767_v45 = vsel %vm458_vm0, %v10892_v33, 0.0  ;;  %v10924_v33 = vsub.f32 %v10596_v26, %v9621_v7 }
 0x205   : > { %v10878_v44 = vpop.xlane.xlu1 %1465  ;;  %16707 = vst [vmem:[#allocation251_spill] sm:$0xff] %v10880_v51  ;;  %v10908_v51 = vsub.f32 %v10518_v56, %v9621_v7 }
 0x206   : > { %16706 = vst [vmem:[#allocation250_spill] sm:$0xff] %v10878_v44  ;;  %v1770_v44 = vsel %vm458_vm0, %v10888_v52, 0.0  ;;  %v10920_v52 = vsub.f32 %v10569_v23, %v9621_v7  ;;  %16717 = vst [vmem:[#allocation261_spill] sm:$0xff] %v10924_v33 }
 0x207   : > { %1762 = vadd.xlane.f32.xlu0 %v1761_v13  ;;  %16713 = vst [vmem:[#allocation257_spill] sm:$0xff] %v10908_v51 }
 0x208   : > { %1765 = vadd.xlane.f32.xlu1 %v1764_v10  ;;  %v10896_v47 = vpop.xlane.xlu0 %1462  ;;  %16716 = vst [vmem:[#allocation260_spill] sm:$0xff] %v10920_v52 }
 0x209   : > { %v10894_v43 = vpop.xlane.xlu1 %1561  ;;  %16711 = vst [vmem:[#allocation255_spill] sm:$0xff] %v10896_v47  ;;  %v1776_v47 = vsel %vm458_vm0, %v10904_v54, 0.0  ;;  %v1782_v54 = vsel %vm458_vm0, %v10920_v52, 0.0 }
 0x20a   : > { %16710 = vst [vmem:[#allocation254_spill] sm:$0xff] %v10894_v43  ;;  %v1773_v43 = vsel %vm458_vm0, %v10908_v51, 0.0  ;;  %v10940_v51 = vsub.f32 %v10674_v63, %v9621_v7 }
 0x20b   : > { %1768 = vadd.xlane.f32.xlu0 %v1767_v45 }
 0x20c   : > { %1771 = vadd.xlane.f32.xlu1 %v1770_v44  ;;  %v10912_v10 = vpop.xlane.xlu0 %1558  ;;  %16721 = vst [vmem:[#allocation265_spill] sm:$0xff] %v10940_v51 }
 0x20d   : > { %v10910_v13 = vpop.xlane.xlu1 %1657  ;;  %16715 = vst [vmem:[#allocation259_spill] sm:$0xff] %v10912_v10  ;;  %v10936_v10 = vsub.f32 %v10647_v21, %v9621_v7 }
 0x20e   : > { %16714 = vst [vmem:[#allocation258_spill] sm:$0xff] %v10910_v13  ;;  %v1779_v13 = vsel %vm458_vm0, %v10924_v33, 0.0  ;;  %v10952_v33 = vsub.f32 %v9587_v57, %v9621_v7 }
 0x20f   : > { %1774 = vadd.xlane.f32.xlu0 %v1773_v43  ;;  %16720 = vst [vmem:[#allocation264_spill] sm:$0xff] %v10936_v10  ;;  %v1788_v52 = vsel %vm458_vm0, %v10936_v10, 0.0 }
 0x210   : > { %1777 = vadd.xlane.f32.xlu1 %v1776_v47  ;;  %v10928_v44 = vpop.xlane.xlu0 %1654  ;;  %16724 = vst [vmem:[#allocation268_spill] sm:$0xff] %v10952_v33  ;;  %v1794_v10 = vsel %vm458_vm0, %v10952_v33, 0.0 }
 0x211   : > { %v10926_v45 = vpop.xlane.xlu1 %1375  ;;  %16719 = vst [vmem:[#allocation263_spill] sm:$0xff] %v10928_v44  ;;  %v1785_v44 = vsel %vm458_vm0, %v10940_v51, 0.0 }
 0x212   : > { %16718 = vst [vmem:[#allocation262_spill] sm:$0xff] %v10926_v45  ;;  %v10956_v45 = vsub.f32 %v9603_v0, %v9621_v7 }
 0x213   : > { %1780 = vadd.xlane.f32.xlu0 %v1779_v13 }
 0x214   : > { %1783 = vadd.xlane.f32.xlu1 %v1782_v54  ;;  %v10944_v47 = vpop.xlane.xlu0 %1372  ;;  %16725 = vst [vmem:[#allocation269_spill] sm:$0xff] %v10956_v45  ;;  %v1791_v51 = vsel %vm458_vm0, %v10956_v45, 0.0 }
 0x215   : > { %v10942_v43 = vpop.xlane.xlu1 %1471  ;;  %16723 = vst [vmem:[#allocation267_spill] sm:$0xff] %v10944_v47  ;;  %v10972_v47 = vsub.f32 %v9672_v28, %v9621_v7 }
 0x216   : > { %16722 = vst [vmem:[#allocation266_spill] sm:$0xff] %v10942_v43  ;;  %v10968_v43 = vsub.f32 %v9649_v19, %v9621_v7 }
 0x217   : > { %1786 = vadd.xlane.f32.xlu0 %v1785_v44  ;;  %16729 = vst [vmem:[#allocation273_spill] sm:$0xff] %v10972_v47  ;;  %v1797_v45 = vsel %vm458_vm0, %v10972_v47, 0.0 }
 0x218   : > { %1789 = vadd.xlane.f32.xlu1 %v1788_v52  ;;  %v10960_v13 = vpop.xlane.xlu0 %1468  ;;  %16728 = vst [vmem:[#allocation272_spill] sm:$0xff] %v10968_v43  ;;  %v1800_v33 = vsel %vm458_vm0, %v10968_v43, 0.0 }
 0x219   : > { %v10958_v54 = vpop.xlane.xlu1 %1567  ;;  %16727 = vst [vmem:[#allocation271_spill] sm:$0xff] %v10960_v13  ;;  %v10984_v13 = vsub.f32 %v9740_v3, %v9621_v7 }
 0x21a   : > { %16726 = vst [vmem:[#allocation270_spill] sm:$0xff] %v10958_v54  ;;  %v10988_v54 = vsub.f32 %v9742_v6, %v9621_v7 }
 0x21b   : > { %1792 = vadd.xlane.f32.xlu0 %v1791_v51  ;;  %16732 = vst [vmem:[#allocation276_spill] sm:$0xff] %v10984_v13  ;;  %v1806_v43 = vsel %vm458_vm0, %v10984_v13, 0.0 }
 0x21c   : > { %1795 = vadd.xlane.f32.xlu1 %v1794_v10  ;;  %v10976_v44 = vpop.xlane.xlu0 %1564  ;;  %16733 = vst [vmem:[#allocation277_spill] sm:$0xff] %v10988_v54  ;;  %v1803_v47 = vsel %vm458_vm0, %v10988_v54, 0.0  ;;  %v11016_v54 = vsub.f32 %v9874_v55, %v9621_v7 }
 0x21d   : > { %v10974_v52 = vpop.xlane.xlu1 %1663  ;;  %16731 = vst [vmem:[#allocation275_spill] sm:$0xff] %v10976_v44  ;;  %v11004_v44 = vsub.f32 %v9816_v15, %v9621_v7 }
 0x21e   : > { %16730 = vst [vmem:[#allocation274_spill] sm:$0xff] %v10974_v52  ;;  %v11000_v52 = vsub.f32 %v9814_v9, %v9621_v7  ;;  %16740 = vst [vmem:[#allocation284_spill] sm:$0xff] %v11016_v54 }
 0x21f   : > { %1798 = vadd.xlane.f32.xlu0 %v1797_v45  ;;  %16737 = vst [vmem:[#allocation281_spill] sm:$0xff] %v11004_v44  ;;  %v1809_v13 = vsel %vm458_vm0, %v11004_v44, 0.0 }
 0x220   : > { %1801 = vadd.xlane.f32.xlu1 %v1800_v33  ;;  %v10992_v10 = vpop.xlane.xlu0 %1660  ;;  %16736 = vst [vmem:[#allocation280_spill] sm:$0xff] %v11000_v52 }
 0x221   : > { %v10990_v51 = vpop.xlane.xlu1 %1381  ;;  %16735 = vst [vmem:[#allocation279_spill] sm:$0xff] %v10992_v10  ;;  %v1812_v10 = vsel %vm458_vm0, %v11000_v52, 0.0  ;;  %v1818_v52 = vsel %vm458_vm0, %v11016_v54, 0.0 }
 0x222   : > { %16734 = vst [vmem:[#allocation278_spill] sm:$0xff] %v10990_v51  ;;  %v11020_v51 = vsub.f32 %v9896_v42, %v9621_v7 }
 0x223   : > { %1804 = vadd.xlane.f32.xlu0 %v1803_v47 }
 0x224   : > { %1807 = vadd.xlane.f32.xlu1 %v1806_v43  ;;  %v11008_v45 = vpop.xlane.xlu0 %1378  ;;  %16741 = vst [vmem:[#allocation285_spill] sm:$0xff] %v11020_v51  ;;  %v1815_v44 = vsel %vm458_vm0, %v11020_v51, 0.0 }
 0x225   : > { %v11006_v33 = vpop.xlane.xlu1 %1477  ;;  %16739 = vst [vmem:[#allocation283_spill] sm:$0xff] %v11008_v45  ;;  %v11036_v45 = vsub.f32 %v9958_v29, %v9621_v7 }
 0x226   : > { %16738 = vst [vmem:[#allocation282_spill] sm:$0xff] %v11006_v33  ;;  %v11032_v33 = vsub.f32 %v9936_v41, %v9621_v7 }
 0x227   : > { %1810 = vadd.xlane.f32.xlu0 %v1809_v13  ;;  %16745 = vst [vmem:[#allocation289_spill] sm:$0xff] %v11036_v45  ;;  %v1821_v51 = vsel %vm458_vm0, %v11036_v45, 0.0  ;;  %v11064_v45 = vsub.f32 %v10060_v34, %v9621_v7 }
 0x228   : > { %1813 = vadd.xlane.f32.xlu1 %v1812_v10  ;;  %v11024_v47 = vpop.xlane.xlu0 %1474  ;;  %16744 = vst [vmem:[#allocation288_spill] sm:$0xff] %v11032_v33  ;;  %v1824_v54 = vsel %vm458_vm0, %v11032_v33, 0.0 }
 0x229   : > { %v11022_v43 = vpop.xlane.xlu1 %1573  ;;  %16743 = vst [vmem:[#allocation287_spill] sm:$0xff] %v11024_v47  ;;  %v11052_v47 = vsub.f32 %v10020_v12, %v9621_v7  ;;  %16752 = vst [vmem:[#allocation296_spill] sm:$0xff] %v11064_v45 }
 0x22a   : > { %16742 = vst [vmem:[#allocation286_spill] sm:$0xff] %v11022_v43  ;;  %v11048_v43 = vsub.f32 %v9998_v32, %v9621_v7 }
 0x22b   : > { %1816 = vadd.xlane.f32.xlu0 %v1815_v44  ;;  %16749 = vst [vmem:[#allocation293_spill] sm:$0xff] %v11052_v47  ;;  %v1827_v33 = vsel %vm458_vm0, %v11052_v47, 0.0 }
 0x22c   : > { %1819 = vadd.xlane.f32.xlu1 %v1818_v52  ;;  %v11040_v10 = vpop.xlane.xlu0 %1570  ;;  %16748 = vst [vmem:[#allocation292_spill] sm:$0xff] %v11048_v43 }
 0x22d   : > { %v11038_v13 = vpop.xlane.xlu1 %1669  ;;  %16747 = vst [vmem:[#allocation291_spill] sm:$0xff] %v11040_v10  ;;  %v11068_v10 = vsub.f32 %v10082_v40, %v9621_v7 }
 0x22e   : > { %16746 = vst [vmem:[#allocation290_spill] sm:$0xff] %v11038_v13  ;;  %v1830_v13 = vsel %vm458_vm0, %v11048_v43, 0.0  ;;  %v11080_v43 = vsub.f32 %v10122_v59, %v9621_v7 }
 0x22f   : > { %1822 = vadd.xlane.f32.xlu0 %v1821_v51  ;;  %16753 = vst [vmem:[#allocation297_spill] sm:$0xff] %v11068_v10  ;;  %v1833_v47 = vsel %vm458_vm0, %v11068_v10, 0.0 }
 0x230   : > { %1825 = vadd.xlane.f32.xlu1 %v1824_v54  ;;  %v11056_v44 = vpop.xlane.xlu0 %1666  ;;  %16756 = vst [vmem:[#allocation300_spill] sm:$0xff] %v11080_v43 }
 0x231   : > { %v11054_v52 = vpop.xlane.xlu1 %1387  ;;  %16751 = vst [vmem:[#allocation295_spill] sm:$0xff] %v11056_v44  ;;  %v1836_v44 = vsel %vm458_vm0, %v11064_v45, 0.0  ;;  %v1842_v45 = vsel %vm458_vm0, %v11080_v43, 0.0 }
 0x232   : > { %16750 = vst [vmem:[#allocation294_spill] sm:$0xff] %v11054_v52  ;;  %v11084_v52 = vsub.f32 %v10148_v36, %v9621_v7 }
 0x233   : > { %1828 = vadd.xlane.f32.xlu0 %v1827_v33 }
 0x234   : > { %1831 = vadd.xlane.f32.xlu1 %v1830_v13  ;;  %v11072_v51 = vpop.xlane.xlu0 %1384  ;;  %16757 = vst [vmem:[#allocation301_spill] sm:$0xff] %v11084_v52  ;;  %v1839_v10 = vsel %vm458_vm0, %v11084_v52, 0.0 }
 0x235   : > { %v11070_v54 = vpop.xlane.xlu1 %1483  ;;  %16755 = vst [vmem:[#allocation299_spill] sm:$0xff] %v11072_v51  ;;  %v11100_v51 = vsub.f32 %v10226_v8, %v9621_v7 }
 0x236   : > { %16754 = vst [vmem:[#allocation298_spill] sm:$0xff] %v11070_v54  ;;  %v11096_v54 = vsub.f32 %v10200_v39, %v9621_v7 }
 0x237   : > { %1834 = vadd.xlane.f32.xlu0 %v1833_v47  ;;  %16761 = vst [vmem:[#allocation305_spill] sm:$0xff] %v11100_v51  ;;  %v1845_v52 = vsel %vm458_vm0, %v11100_v51, 0.0 }
 0x238   : > { %1837 = vadd.xlane.f32.xlu1 %v1836_v44  ;;  %v11088_v13 = vpop.xlane.xlu0 %1480  ;;  %16760 = vst [vmem:[#allocation304_spill] sm:$0xff] %v11096_v54  ;;  %v1848_v43 = vsel %vm458_vm0, %v11096_v54, 0.0  ;;  %v16768_v54 = vld [vmem:[#allocation129_spill] sm:$0xff] }
 0x239   : > { %v11086_v33 = vpop.xlane.xlu1 %1579  ;;  %16759 = vst [vmem:[#allocation303_spill] sm:$0xff] %v11088_v13  ;;  %v11116_v13 = vsub.f32 %v10304_v4, %v9621_v7 }
 0x23a   : > { %16758 = vst [vmem:[#allocation302_spill] sm:$0xff] %v11086_v33  ;;  %v11112_v33 = vsub.f32 %v10278_v27, %v9621_v7 }
 0x23b   : > { %1840 = vadd.xlane.f32.xlu0 %v1839_v10  ;;  %16765 = vst [vmem:[#allocation309_spill] sm:$0xff] %v11116_v13  ;;  %v1851_v51 = vsel %vm458_vm0, %v11116_v13, 0.0  ;;  %v1857_v13 = vsel %vm458_vm0, %v11132_v58, 0.0  ;;  %v1863_v58 = vsel %vm458_vm0, %v11148_v16, 0.0 }
 0x23c   : > { %1843 = vadd.xlane.f32.xlu1 %v1842_v45  ;;  %v11104_v44 = vpop.xlane.xlu0 %1576  ;;  %16764 = vst [vmem:[#allocation308_spill] sm:$0xff] %v11112_v33 }
 0x23d   : > { %v11102_v47 = vpop.xlane.xlu1 %1675  ;;  %16763 = vst [vmem:[#allocation307_spill] sm:$0xff] %v11104_v44  ;;  %v11128_v44 = vsub.f32 %v16768_v54, %v9621_v7 }
 0x23e   : > { %16762 = vst [vmem:[#allocation306_spill] sm:$0xff] %v11102_v47  ;;  %v1854_v47 = vsel %vm458_vm0, %v11112_v33, 0.0  ;;  %v16774_v33 = vld [vmem:[#allocation147_spill] sm:$0xff] }
 0x23f   : > { %1846 = vadd.xlane.f32.xlu0 %v1845_v52  ;;  %16769 = vst [vmem:[#allocation312_spill] sm:$0xff] %v11128_v44 }
 0x240   : > { %1849 = vadd.xlane.f32.xlu1 %v1848_v43  ;;  %v11120_v10 = vpop.xlane.xlu0 %1672 }
 0x241   : > { %v11118_v45 = vpop.xlane.xlu1 %1393  ;;  %16767 = vst [vmem:[#allocation311_spill] sm:$0xff] %v11120_v10  ;;  %v1860_v10 = vsel %vm458_vm0, %v11128_v44, 0.0 }
 0x242   : > { %16766 = vst [vmem:[#allocation310_spill] sm:$0xff] %v11118_v45  ;;  %v11144_v45 = vsub.f32 %v16774_v33, %v9621_v7  ;;  %v16782_v33 = vld [vmem:[#allocation171_spill] sm:$0xff] }
 0x243   : > { %1852 = vadd.xlane.f32.xlu0 %v1851_v51  ;;  %v11164_v1 = vsub.f32 %v16782_v33, %v9621_v7 }
 0x244   : > { %1855 = vadd.xlane.f32.xlu1 %v1854_v47  ;;  %v11136_v52 = vpop.xlane.xlu0 %1390  ;;  %16775 = vst [vmem:[#allocation316_spill] sm:$0xff] %v11144_v45  ;;  %v1866_v44 = vsel %vm458_vm0, %v11144_v45, 0.0 }
 0x245   : > { %v11134_v43 = vpop.xlane.xlu1 %1489  ;;  %16773 = vst [vmem:[#allocation315_spill] sm:$0xff] %v11136_v52  ;;  %16783 = vst [vmem:[#allocation171_spill] sm:$0xff] %v11164_v1 }
 0x246   : > { %16772 = vst [vmem:[#allocation314_spill] sm:$0xff] %v11134_v43  ;;  %v16780_v43 = vld [vmem:[#allocation165_spill] sm:$0xff] }
 0x247   : > { %1858 = vadd.xlane.f32.xlu0 %v1857_v13  ;;  %v11160_v52 = vsub.f32 %v16780_v43, %v9621_v7  ;;  %v16787_v43 = vld [vmem:[#allocation183_spill] sm:$0xff] }
 0x248   : > { %1861 = vadd.xlane.f32.xlu1 %v1860_v10  ;;  %v11152_v47 = vpop.xlane.xlu0 %1486  ;;  %v11178_v54 = vsub.f32 %v16787_v43, %v9621_v7  ;;  %v11197_v43 = vsub.f32 %v10668_v61, %v9621_v7 }
 0x249   : > { %v11150_v51 = vpop.xlane.xlu1 %1585  ;;  %16779 = vst [vmem:[#allocation319_spill] sm:$0xff] %v11152_v47  ;;  %16781 = vst [vmem:[#allocation320_spill] sm:$0xff] %v11160_v52  ;;  %v1872_v16 = vsel %vm458_vm0, %v11160_v52, 0.0  ;;  %v1869_v47 = vsel %vm458_vm0, %v11164_v1, 0.0 }
 0x24a   : > { %16778 = vst [vmem:[#allocation318_spill] sm:$0xff] %v11150_v51  ;;  %v16786_v51 = vld [vmem:[#allocation3_spill] sm:$0xff]  ;;  %v1878_v1 = vsel %vm458_vm0, %v11178_v54, 0.0 }
 0x24b   : > { %1864 = vadd.xlane.f32.xlu0 %v1863_v58  ;;  %v1034_v45 = vcombine.high %v16786_v51, %v16786_v51  ;;  %16788 = vst [vmem:[#allocation3_spill] sm:$0xff] %v11178_v54  ;;  %v11182_v58 = vsub.f32 %v10616_v48, %v9621_v7  ;;  %v16792_v51 = vld [vmem:[#allocation2_spill] sm:$0xff] }
 0x24c   : > { %1867 = vadd.xlane.f32.xlu1 %v1866_v44  ;;  %v11168_v10 = vpop.xlane.xlu0 %1582  ;;  %16793 = vst [vmem:[#allocation2_spill] sm:$0xff] %v11197_v43 }
 0x24d   : > { %v11166_v13 = vpop.xlane.xlu1 %1681  ;;  %16785 = vst [vmem:[#allocation322_spill] sm:$0xff] %v11168_v10  ;;  %16789 = vst [vmem:[#allocation323_spill] sm:$0xff] %v11182_v58  ;;  %v11189_v10 = vrot.slane %v1034_v45, %v16792_v51  ;;  %v1875_v52 = vsel %vm458_vm0, %v11182_v58, 0.0  ;;  %v1884_v51 = vsel %vm458_vm0, %v11197_v43, 0.0  ;;  %v16797_v58 = vld [vmem:[#allocation4_spill] sm:$0xff] }
 0x24e   : > { %16784 = vst [vmem:[#allocation321_spill] sm:$0xff] %v11166_v13 }
 0x24f   : > { %1870 = vadd.xlane.f32.xlu0 %v1869_v47  ;;  %v11213_v54 = vsub.f32 %v16797_v58, %v11189_v10 }
 0x250   : > { %1873 = vadd.xlane.f32.xlu1 %v1872_v16  ;;  %v11186_v13 = vpop.xlane.xlu0 %1678  ;;  %v11201_v16 = vsub.f32 %v10694_v62, %v9621_v7 }
 0x251   : > { %v11184_v44 = vpop.xlane.xlu1 %1399  ;;  %16791 = vst [vmem:[#allocation325_spill] sm:$0xff] %v11186_v13  ;;  %16798 = vst [vmem:[#allocation4_spill] sm:$0xff] %v11213_v54  ;;  %v1890_v43 = vsel %vm458_vm0, %v11213_v54, 0.0 }
 0x252   : > { %16790 = vst [vmem:[#allocation324_spill] sm:$0xff] %v11184_v44  ;;  %16794 = vst [vmem:[#allocation326_spill] sm:$0xff] %v11201_v16  ;;  %v1881_v13 = vsel %vm458_vm0, %v11201_v16, 0.0  ;;  %v16799_v44 = vld [vmem:[#allocation5_spill] sm:$0xff] }
 0x253   : > { %1876 = vadd.xlane.f32.xlu0 %v1875_v52  ;;  %v11217_v7 = vsub.f32 %v16799_v44, %v11189_v10 }
 0x254   : > { %1879 = vadd.xlane.f32.xlu1 %v1878_v1  ;;  %v11205_v45 = vpop.xlane.xlu0 %1396 }
 0x255   : > { %v11203_v47 = vpop.xlane.xlu1 %1495  ;;  %16796 = vst [vmem:[#allocation328_spill] sm:$0xff] %v11205_v45  ;;  %16800 = vst [vmem:[#allocation5_spill] sm:$0xff] %v11217_v7  ;;  %v1887_v16 = vsel %vm458_vm0, %v11217_v7, 0.0  ;;  %v16805_v45 = vld [vmem:[#allocation19_spill] sm:$0xff] }
 0x256   : > { %16795 = vst [vmem:[#allocation327_spill] sm:$0xff] %v11203_v47  ;;  %v16803_v47 = vld [vmem:[#allocation12_spill] sm:$0xff]  ;;  %v11233_v44 = vsub.f32 %v16805_v45, %v11189_v10 }
 0x257   : > { %1882 = vadd.xlane.f32.xlu0 %v1881_v13  ;;  %v11229_v58 = vsub.f32 %v16803_v47, %v11189_v10 }
 0x258   : > { %1885 = vadd.xlane.f32.xlu1 %v1884_v51  ;;  %v11221_v52 = vpop.xlane.xlu0 %1492  ;;  %16806 = vst [vmem:[#allocation19_spill] sm:$0xff] %v11233_v44  ;;  %v1893_v7 = vsel %vm458_vm0, %v11233_v44, 0.0 }
 0x259   : > { %v11219_v1 = vpop.xlane.xlu1 %1591  ;;  %16802 = vst [vmem:[#allocation330_spill] sm:$0xff] %v11221_v52  ;;  %16804 = vst [vmem:[#allocation12_spill] sm:$0xff] %v11229_v58  ;;  %v1896_v54 = vsel %vm458_vm0, %v11229_v58, 0.0  ;;  %v16811_v52 = vld [vmem:[#allocation27_spill] sm:$0xff]  ;;  %v16815_v58 = vld [vmem:[#allocation38_spill] sm:$0xff] }
 0x25a   : > { %16801 = vst [vmem:[#allocation329_spill] sm:$0xff] %v11219_v1  ;;  %v16809_v1 = vld [vmem:[#allocation26_spill] sm:$0xff]  ;;  %v11249_v45 = vsub.f32 %v16811_v52, %v11189_v10  ;;  %v11265_v52 = vsub.f32 %v16815_v58, %v11189_v10  ;;  %v11281_v58 = vsub.f32 %v9880_v25, %v11189_v10  ;;  %v11297_v25 = vsub.f32 %v9942_v60, %v11189_v10 }
 0x25b   : > { %1888 = vadd.xlane.f32.xlu0 %v1887_v16  ;;  %v11245_v47 = vsub.f32 %v16809_v1, %v11189_v10  ;;  %v11261_v1 = vsub.f32 %v9798_v46, %v11189_v10  ;;  %v11277_v46 = vsub.f32 %v9857_v24, %v11189_v10  ;;  %v11293_v24 = vsub.f32 %v9919_v18, %v11189_v10 }
 0x25c   : > { %1891 = vadd.xlane.f32.xlu1 %v1890_v43  ;;  %v11237_v51 = vpop.xlane.xlu0 %1588  ;;  %16812 = vst [vmem:[#allocation27_spill] sm:$0xff] %v11249_v45  ;;  %v1899_v44 = vsel %vm458_vm0, %v11249_v45, 0.0  ;;  %16816 = vst [vmem:[#allocation38_spill] sm:$0xff] %v11265_v52  ;;  %v1905_v45 = vsel %vm458_vm0, %v11265_v52, 0.0  ;;  %v1911_v52 = vsel %vm458_vm0, %v11281_v58, 0.0  ;;  %v11309_v18 = vsub.f32 %v9981_v37, %v11189_v10 }
 0x25d   : > { %v11235_v13 = vpop.xlane.xlu1 %1687  ;;  %16808 = vst [vmem:[#allocation332_spill] sm:$0xff] %v11237_v51  ;;  %16810 = vst [vmem:[#allocation26_spill] sm:$0xff] %v11245_v47  ;;  %v11313_v60 = vsub.f32 %v10004_v22, %v11189_v10  ;;  %v11325_v37 = vsub.f32 %v10043_v38, %v11189_v10  ;;  %v11329_v22 = vsub.f32 %v10066_v49, %v11189_v10 }
 0x25e   : > { %16807 = vst [vmem:[#allocation331_spill] sm:$0xff] %v11235_v13  ;;  %v1902_v13 = vsel %vm458_vm0, %v11245_v47, 0.0  ;;  %16814 = vst [vmem:[#allocation334_spill] sm:$0xff] %v11261_v1  ;;  %v11341_v38 = vsub.f32 %v10105_v31, %v11189_v10  ;;  %v11345_v49 = vsub.f32 %v10128_v2, %v11189_v10  ;;  %v11357_v31 = vsub.f32 %v10179_v20, %v11189_v10 }
 0x25f   : > { %1894 = vadd.xlane.f32.xlu0 %v1893_v7  ;;  %16818 = vst [vmem:[#allocation336_spill] sm:$0xff] %v11277_v46  ;;  %16819 = vst [vmem:[#allocation337_spill] sm:$0xff] %v11281_v58  ;;  %v1917_v58 = vsel %vm458_vm0, %v11297_v25, 0.0  ;;  %v11361_v2 = vsub.f32 %v10206_v5, %v11189_v10  ;;  %v11373_v20 = vsub.f32 %v10257_v50, %v11189_v10 }
 0x260   : > { %1897 = vadd.xlane.f32.xlu1 %v1896_v54  ;;  %v11253_v16 = vpop.xlane.xlu0 %1684  ;;  %16822 = vst [vmem:[#allocation340_spill] sm:$0xff] %v11293_v24  ;;  %16823 = vst [vmem:[#allocation341_spill] sm:$0xff] %v11297_v25  ;;  %v1923_v25 = vsel %vm458_vm0, %v11313_v60, 0.0  ;;  %v11377_v5 = vsub.f32 %v10284_v14, %v11189_v10  ;;  %v11389_v50 = vsub.f32 %v10335_v17, %v11189_v10 }
 0x261   : > { %v11251_v43 = vpop.xlane.xlu1 %1405  ;;  %16813 = vst [vmem:[#allocation333_spill] sm:$0xff] %v11253_v16  ;;  %v1908_v16 = vsel %vm458_vm0, %v11261_v1, 0.0  ;;  %v1914_v1 = vsel %vm458_vm0, %v11277_v46, 0.0  ;;  %v1920_v46 = vsel %vm458_vm0, %v11293_v24, 0.0  ;;  %16826 = vst [vmem:[#allocation344_spill] sm:$0xff] %v11309_v18  ;;  %v11393_v14 = vsub.f32 %v10362_v35, %v11189_v10 }
 0x262   : > { %16827 = vst [vmem:[#allocation345_spill] sm:$0xff] %v11313_v60  ;;  %16829 = vst [vmem:[#allocation347_spill] sm:$0xff] %v11325_v37  ;;  %v1929_v60 = vsel %vm458_vm0, %v11329_v22, 0.0  ;;  %v11405_v17 = vsub.f32 %v10413_v30, %v11189_v10  ;;  %v11409_v35 = vsub.f32 %v10440_v53, %v11189_v10  ;;  %v11421_v30 = vsub.f32 %v10491_v11, %v11189_v10 }
 0x263   : > { %1900 = vadd.xlane.f32.xlu0 %v1899_v44  ;;  %16830 = vst [vmem:[#allocation348_spill] sm:$0xff] %v11329_v22  ;;  %16831 = vst [vmem:[#allocation349_spill] sm:$0xff] %v11341_v38  ;;  %v1935_v22 = vsel %vm458_vm0, %v11345_v49, 0.0  ;;  %v11425_v53 = vsub.f32 %v10518_v56, %v11189_v10  ;;  %v11437_v11 = vsub.f32 %v10569_v23, %v11189_v10 }
 0x264   : > { %1903 = vadd.xlane.f32.xlu1 %v1902_v13  ;;  %v11269_v7 = vpop.xlane.xlu0 %1402  ;;  %16832 = vst [vmem:[#allocation350_spill] sm:$0xff] %v11345_v49  ;;  %16833 = vst [vmem:[#allocation351_spill] sm:$0xff] %v11357_v31  ;;  %v1941_v49 = vsel %vm458_vm0, %v11361_v2, 0.0  ;;  %v11441_v56 = vsub.f32 %v10596_v26, %v11189_v10  ;;  %v11453_v23 = vsub.f32 %v10647_v21, %v11189_v10 }
 0x265   : > { %v11267_v54 = vpop.xlane.xlu1 %1501  ;;  %16834 = vst [vmem:[#allocation352_spill] sm:$0xff] %v11361_v2  ;;  %16835 = vst [vmem:[#allocation353_spill] sm:$0xff] %v11373_v20  ;;  %v1947_v2 = vsel %vm458_vm0, %v11377_v5, 0.0  ;;  %v11457_v26 = vsub.f32 %v10674_v63, %v11189_v10  ;;  %v11469_v21 = vsub.f32 %v9587_v57, %v11189_v10  ;;  %v11473_v63 = vsub.f32 %v9603_v0, %v11189_v10 }
 0x266   : > { %16817 = vst [vmem:[#allocation335_spill] sm:$0xff] %v11267_v54  ;;  %16836 = vst [vmem:[#allocation354_spill] sm:$0xff] %v11377_v5  ;;  %v1953_v5 = vsel %vm458_vm0, %v11393_v14, 0.0  ;;  %v11485_v57 = vsub.f32 %v9649_v19, %v11189_v10  ;;  %v11489_v0 = vsub.f32 %v9672_v28, %v11189_v10  ;;  %v11501_v19 = vsub.f32 %v9740_v3, %v11189_v10  ;;  %v16874_v54 = vld [vmem:[#allocation6_spill] sm:$0xff] }
 0x267   : > { %1906 = vadd.xlane.f32.xlu0 %v1905_v45  ;;  %16837 = vst [vmem:[#allocation355_spill] sm:$0xff] %v11389_v50  ;;  %16838 = vst [vmem:[#allocation356_spill] sm:$0xff] %v11393_v14  ;;  %v1959_v14 = vsel %vm458_vm0, %v11409_v35, 0.0  ;;  %v11505_v28 = vsub.f32 %v9742_v6, %v11189_v10 }
 0x268   : > { %1909 = vadd.xlane.f32.xlu1 %v1908_v16  ;;  %v11285_v13 = vpop.xlane.xlu0 %1498  ;;  %16839 = vst [vmem:[#allocation357_spill] sm:$0xff] %v11405_v17  ;;  %16840 = vst [vmem:[#allocation358_spill] sm:$0xff] %v11409_v35  ;;  %v1965_v35 = vsel %vm458_vm0, %v11425_v53, 0.0  ;;  %v1998_v3 = vsel %vm458_vm0, %v11501_v19, 0.0 }
 0x269   : > { %v11283_v44 = vpop.xlane.xlu1 %1597  ;;  %16821 = vst [vmem:[#allocation339_spill] sm:$0xff] %v11285_v13  ;;  %16841 = vst [vmem:[#allocation359_spill] sm:$0xff] %v11421_v30  ;;  %v1995_v6 = vsel %vm458_vm0, %v11505_v28, 0.0  ;;  %v16872_v13 = vld [vmem:[#allocation92_spill] sm:$0xff] }
 0x26a   : > { %16820 = vst [vmem:[#allocation338_spill] sm:$0xff] %v11283_v44  ;;  %16842 = vst [vmem:[#allocation360_spill] sm:$0xff] %v11425_v53  ;;  %v1971_v53 = vsel %vm458_vm0, %v11441_v56, 0.0 }
 0x26b   : > { %1912 = vadd.xlane.f32.xlu0 %v1911_v52  ;;  %16843 = vst [vmem:[#allocation361_spill] sm:$0xff] %v11437_v11  ;;  %16844 = vst [vmem:[#allocation362_spill] sm:$0xff] %v11441_v56  ;;  %v1977_v56 = vsel %vm458_vm0, %v11457_v26, 0.0 }
 0x26c   : > { %1915 = vadd.xlane.f32.xlu1 %v1914_v1  ;;  %v11301_v16 = vpop.xlane.xlu0 %1594  ;;  %16845 = vst [vmem:[#allocation363_spill] sm:$0xff] %v11453_v23  ;;  %16846 = vst [vmem:[#allocation364_spill] sm:$0xff] %v11457_v26  ;;  %v1983_v26 = vsel %vm458_vm0, %v11473_v63, 0.0 }
 0x26d   : > { %v11299_v45 = vpop.xlane.xlu1 %1693  ;;  %16825 = vst [vmem:[#allocation343_spill] sm:$0xff] %v11301_v16  ;;  %16847 = vst [vmem:[#allocation365_spill] sm:$0xff] %v11469_v21 }
 0x26e   : > { %16824 = vst [vmem:[#allocation342_spill] sm:$0xff] %v11299_v45  ;;  %v1926_v45 = vsel %vm458_vm0, %v11309_v18, 0.0  ;;  %16848 = vst [vmem:[#allocation366_spill] sm:$0xff] %v11473_v63  ;;  %v1989_v63 = vsel %vm458_vm0, %v11489_v0, 0.0  ;;  %v16861_v18 = vld [vmem:[#allocation84_spill] sm:$0xff] }
 0x26f   : > { %1918 = vadd.xlane.f32.xlu0 %v1917_v58  ;;  %16849 = vst [vmem:[#allocation367_spill] sm:$0xff] %v11485_v57  ;;  %16850 = vst [vmem:[#allocation368_spill] sm:$0xff] %v11489_v0  ;;  %v11517_v0 = vsub.f32 %v9816_v15, %v11189_v10  ;;  %v2081_v24 = vmul.f32 0.03125, %v16861_v18  ;;  %v11567_v18 = vsub.f32 %v10082_v40, %v11189_v10  ;;  %v2112_v40 = vmul.f32 0.03125, %v16872_v13 }
 0x270   : > { %1921 = vadd.xlane.f32.xlu1 %v1920_v46  ;;  %v11317_v52 = vpop.xlane.xlu0 %1690  ;;  %16851 = vst [vmem:[#allocation369_spill] sm:$0xff] %v11501_v19  ;;  %16852 = vst [vmem:[#allocation370_spill] sm:$0xff] %v11505_v28  ;;  %v11537_v19 = vsub.f32 %v9936_v41, %v11189_v10  ;;  %v11553_v41 = vsub.f32 %v9998_v32, %v11189_v10 }
 0x271   : > { %v11315_v1 = vpop.xlane.xlu1 %1717  ;;  %16828 = vst [vmem:[#allocation346_spill] sm:$0xff] %v11317_v52  ;;  %v1932_v52 = vsel %vm458_vm0, %v11325_v37, 0.0  ;;  %v1938_v37 = vsel %vm458_vm0, %v11341_v38, 0.0  ;;  %v1944_v38 = vsel %vm458_vm0, %v11357_v31, 0.0  ;;  %v1950_v31 = vsel %vm458_vm0, %v11373_v20, 0.0  ;;  %16854 = vst [vmem:[#allocation372_spill] sm:$0xff] %v11517_v0 }
 0x272   : > { %v1956_v20 = vsel %vm458_vm0, %v11389_v50, 0.0  ;;  %v1962_v50 = vsel %vm458_vm0, %v11405_v17, 0.0  ;;  %v1968_v17 = vsel %vm458_vm0, %v11421_v30, 0.0  ;;  %v1974_v30 = vsel %vm458_vm0, %v11437_v11, 0.0  ;;  %16858 = vst [vmem:[#allocation376_spill] sm:$0xff] %v11537_v19  ;;  %16865 = vst [vmem:[#allocation379_spill] sm:$0xff] %v11567_v18 }
 0x273   : > { %1924 = vadd.xlane.f32.xlu0 %v1923_v25  ;;  %v1980_v11 = vsel %vm458_vm0, %v11453_v23, 0.0  ;;  %v1986_v23 = vsel %vm458_vm0, %v11469_v21, 0.0  ;;  %v1992_v21 = vsel %vm458_vm0, %v11485_v57, 0.0  ;;  %v11513_v57 = vsub.f32 %v9814_v9, %v11189_v10 }
 0x274   : > { %1927 = vadd.xlane.f32.xlu1 %v1926_v45  ;;  %v11333_v58 = vpop.xlane.xlu0 %1720  ;;  %v11529_v9 = vsub.f32 %v9896_v42, %v11189_v10  ;;  %v16860_v42 = vld [vmem:[#allocation83_spill] sm:$0xff] }
 0x275   : > { %v11331_v46 = vpop.xlane.xlu1 %1723  ;;  %16853 = vst [vmem:[#allocation371_spill] sm:$0xff] %v11513_v57  ;;  %v2004_v28 = vsel %vm458_vm0, %v11513_v57, 0.0  ;;  %16862 = vst [vmem:[#allocation83_spill] sm:$0xff] %v11553_v41  ;;  %v16867_v57 = vld [vmem:[#allocation88_spill] sm:$0xff] }
 0x276   : > { %16856 = vst [vmem:[#allocation374_spill] sm:$0xff] %v11529_v9 }
 0x277   : > { %1930 = vadd.xlane.f32.xlu0 %v1929_v60 }
 0x278   : > { %1933 = vadd.xlane.f32.xlu1 %v1932_v52  ;;  %v11349_v45 = vpop.xlane.xlu0 %1726 }
 0x279   : > { %v11347_v25 = vpop.xlane.xlu1 %1729 }
 0x27b   : > { %1936 = vadd.xlane.f32.xlu0 %v1935_v22 }
 0x27c   : > { %1939 = vadd.xlane.f32.xlu1 %v1938_v37  ;;  %v11365_v52 = vpop.xlane.xlu0 %1732 }
 0x27d   : > { %v11363_v60 = vpop.xlane.xlu1 %1735 }
 0x27f   : > { %1942 = vadd.xlane.f32.xlu0 %v1941_v49 }
 0x280   : > { %1945 = vadd.xlane.f32.xlu1 %v1944_v38  ;;  %v11381_v22 = vpop.xlane.xlu0 %1738 }
 0x281   : > { %v11379_v37 = vpop.xlane.xlu1 %1741 }
 0x283   : > { %1948 = vadd.xlane.f32.xlu0 %v1947_v2 }
 0x284   : > { %1951 = vadd.xlane.f32.xlu1 %v1950_v31  ;;  %v11397_v49 = vpop.xlane.xlu0 %1744 }
 0x285   : > { %v11395_v38 = vpop.xlane.xlu1 %1747 }
 0x287   : > { %1954 = vadd.xlane.f32.xlu0 %v1953_v5 }
 0x288   : > { %1957 = vadd.xlane.f32.xlu1 %v1956_v20  ;;  %v11413_v2 = vpop.xlane.xlu0 %1750 }
 0x289   : > { %v11411_v31 = vpop.xlane.xlu1 %1753 }
 0x28b   : > { %1960 = vadd.xlane.f32.xlu0 %v1959_v14 }
 0x28c   : > { %1963 = vadd.xlane.f32.xlu1 %v1962_v50  ;;  %v11429_v5 = vpop.xlane.xlu0 %1756 }
 0x28d   : > { %v11427_v20 = vpop.xlane.xlu1 %1759 }
 0x28f   : > { %1966 = vadd.xlane.f32.xlu0 %v1965_v35 }
 0x290   : > { %1969 = vadd.xlane.f32.xlu1 %v1968_v17  ;;  %v11445_v14 = vpop.xlane.xlu0 %1762 }
 0x291   : > { %v11443_v50 = vpop.xlane.xlu1 %1765 }
 0x293   : > { %1972 = vadd.xlane.f32.xlu0 %v1971_v53 }
 0x294   : > { %1975 = vadd.xlane.f32.xlu1 %v1974_v30  ;;  %v11461_v35 = vpop.xlane.xlu0 %1768 }
 0x295   : > { %v11459_v17 = vpop.xlane.xlu1 %1771 }
 0x297   : > { %1978 = vadd.xlane.f32.xlu0 %v1977_v56 }
 0x298   : > { %1981 = vadd.xlane.f32.xlu1 %v1980_v11  ;;  %v11477_v53 = vpop.xlane.xlu0 %1774 }
 0x299   : > { %v11475_v30 = vpop.xlane.xlu1 %1777 }
 0x29b   : > { %1984 = vadd.xlane.f32.xlu0 %v1983_v26 }
 0x29c   : > { %1987 = vadd.xlane.f32.xlu1 %v1986_v23  ;;  %v11493_v56 = vpop.xlane.xlu0 %1780 }
 0x29d   : > { %v11491_v11 = vpop.xlane.xlu1 %1783 }
 0x29f   : > { %1990 = vadd.xlane.f32.xlu0 %v1989_v63 }
 0x2a0   : > { %1993 = vadd.xlane.f32.xlu1 %v1992_v21  ;;  %v11509_v26 = vpop.xlane.xlu0 %1786  ;;  %v11525_v21 = vsub.f32 %v9874_v55, %v11189_v10  ;;  %v2001_v55 = vsel %vm458_vm0, %v11517_v0, 0.0  ;;  %v2007_v0 = vsel %vm458_vm0, %v11529_v9, 0.0  ;;  %v11579_v9 = vsub.f32 %v10122_v59, %v11189_v10 }
 0x2a1   : > { %v11507_v23 = vpop.xlane.xlu1 %1789  ;;  %v2022_v59 = vsel %vm458_vm0, %v11553_v41, 0.0 }
 0x2a2   : > { %16855 = vst [vmem:[#allocation373_spill] sm:$0xff] %v11525_v21  ;;  %v2010_v47 = vsel %vm458_vm0, %v11525_v21, 0.0  ;;  %v16866_v21 = vld [vmem:[#allocation87_spill] sm:$0xff]  ;;  %16870 = vst [vmem:[#allocation380_spill] sm:$0xff] %v11579_v9 }
 0x2a3   : > { %1996 = vadd.xlane.f32.xlu0 %v1995_v6  ;;  %v2113_v6 = vmul.f32 0.03125, %v16860_v42  ;;  %v11563_v42 = vsub.f32 %v10060_v34, %v11189_v10  ;;  %v2145_v32 = vmul.f32 0.03125, %v16866_v21  ;;  %v16871_v34 = vld [vmem:[#allocation91_spill] sm:$0xff] }
 0x2a4   : > { %1999 = vadd.xlane.f32.xlu1 %v1998_v3  ;;  %v11533_v15 = vpop.xlane.xlu0 %1792  ;;  %v11545_v3 = vsub.f32 %v9958_v29, %v11189_v10  ;;  %v11559_v29 = vsub.f32 %v10020_v12, %v11189_v10  ;;  %v2016_v12 = vsel %vm458_vm0, %v11537_v19, 0.0  ;;  %v2177_v44 = vmul.f32 0.03125, %v16871_v34 }
 0x2a5   : > { %v11531_v63 = vpop.xlane.xlu1 %1795  ;;  %16864 = vst [vmem:[#allocation378_spill] sm:$0xff] %v11563_v42  ;;  %v11590_v51 = vsub.f32 %v16874_v54, %v2113_v6  ;;  %v11599_v34 = vsub.f32 %v10200_v39, %v11189_v10  ;;  %v2025_v54 = vsel %vm458_vm0, %v11567_v18, 0.0  ;;  %v16880_v6 = vld [vmem:[#allocation8_spill] sm:$0xff]  ;;  %v16882_v39 = vld [vmem:[#allocation9_spill] sm:$0xff]  ;;  %v16887_v18 = vld [vmem:[#allocation10_spill] sm:$0xff] }
 0x2a6   : > { %16857 = vst [vmem:[#allocation375_spill] sm:$0xff] %v11531_v63  ;;  %16859 = vst [vmem:[#allocation377_spill] sm:$0xff] %v11545_v3  ;;  %v2013_v21 = vsel %vm458_vm0, %v11545_v3, 0.0  ;;  %v2019_v13 = vsel %vm458_vm0, %v11559_v29, 0.0 }
 0x2a7   : > { %2002 = vadd.xlane.f32.xlu0 %v2001_v55  ;;  %16863 = vst [vmem:[#allocation84_spill] sm:$0xff] %v11559_v29  ;;  %16875 = vst [vmem:[#allocation92_spill] sm:$0xff] %v11590_v51 }
 0x2a8   : > { %2005 = vadd.xlane.f32.xlu1 %v2004_v28  ;;  %v2080_v28 = vmul.f32 0.03125, %v16867_v57  ;;  %v11573_v16 = vpop.xlane.xlu0 %1798  ;;  %v11587_v57 = vsub.f32 %v10148_v36, %v11189_v10  ;;  %v2028_v36 = vsel %vm458_vm0, %v11563_v42, 0.0  ;;  %v11624_v42 = vsel %vm458_vm0, %v11579_v9, 0.0 }
 0x2a9   : > { %v11571_v55 = vpop.xlane.xlu1 %1801  ;;  %16869 = vst [vmem:[#allocation88_spill] sm:$0xff] %v11573_v16  ;;  %16886 = vst [vmem:[#allocation382_spill] sm:$0xff] %v11624_v42  ;;  %v11627_v16 = vsub.f32 %v16887_v18, %v2177_v44  ;;  %v2625_v9 = vmul.f32 %v11590_v51, %v11590_v51  ;;  %v11644_v44 = vsel %vm458_vm0, %v11599_v34, 0.0  ;;  %v16895_v18 = vld [vmem:[#allocation99_spill] sm:$0xff] }
 0x2aa   : > { %16868 = vst [vmem:[#allocation87_spill] sm:$0xff] %v11571_v55  ;;  %16873 = vst [vmem:[#allocation91_spill] sm:$0xff] %v11587_v57  ;;  %v16876_v55 = vld [vmem:[#allocation7_spill] sm:$0xff]  ;;  %v11615_v41 = vsub.f32 %v16882_v39, %v2080_v28  ;;  %v11635_v28 = vsel %vm458_vm0, %v11587_v57, 0.0  ;;  %v16893_v39 = vld [vmem:[#allocation104_spill] sm:$0xff] }
 0x2ab   : > { %v11593_v19 = vsub.f32 %v16876_v55, %v2081_v24  ;;  %16878 = vst [vmem:[#allocation7_spill] sm:$0xff] %v11599_v34  ;;  %2008 = vadd.xlane.f32.xlu0 %v2007_v0  ;;  %v11609_v24 = vsub.f32 %v10226_v8, %v11189_v10  ;;  %v11612_v55 = vsub.f32 %v16880_v6, %v2145_v32  ;;  %16888 = vst [vmem:[#allocation10_spill] sm:$0xff] %v11627_v16  ;;  %v16889_v8 = vld [vmem:[#allocation11_spill] sm:$0xff]  ;;  %v16891_v32 = vld [vmem:[#allocation96_spill] sm:$0xff] }
 0x2ac   : > { %2011 = vadd.xlane.f32.xlu1 %v2010_v47  ;;  %16883 = vst [vmem:[#allocation9_spill] sm:$0xff] %v11615_v41  ;;  %v16884_v47 = vld [vmem:[#allocation95_spill] sm:$0xff]  ;;  %v11620_v29 = vpop.xlane.xlu0 %1804  ;;  %v11630_v63 = vsub.f32 %v16889_v8, %v2112_v40  ;;  %v2144_v6 = vmul.f32 0.03125, %v16891_v32  ;;  %16892 = vst [vmem:[#allocation96_spill] sm:$0xff] %v11635_v28  ;;  %v2083_v40 = vmul.f32 0.03125, %v16895_v18  ;;  %v11653_v32 = vsub.f32 %v10278_v27, %v11189_v10  ;;  %v16899_v57 = vld [vmem:[#allocation13_spill] sm:$0xff] }
 0x2ad   : > { %16877 = vst [vmem:[#allocation6_spill] sm:$0xff] %v11593_v19  ;;  %16879 = vst [vmem:[#allocation381_spill] sm:$0xff] %v11609_v24  ;;  %v2209_v0 = vmul.f32 0.03125, %v16884_v47  ;;  %v11618_v3 = vpop.xlane.xlu1 %1807  ;;  %v2208_v47 = vmul.f32 0.03125, %v16893_v39  ;;  %v11649_v8 = vsel %vm458_vm0, %v11609_v24, 0.0  ;;  %v11657_v39 = vsub.f32 %v10304_v4, %v11189_v10  ;;  %v16901_v34 = vld [vmem:[#allocation100_spill] sm:$0xff] }
 0x2ae   : > { %16881 = vst [vmem:[#allocation8_spill] sm:$0xff] %v11612_v55  ;;  %16885 = vst [vmem:[#allocation95_spill] sm:$0xff] %v11618_v3  ;;  %v2593_v3 = vmul.f32 %v11593_v19, %v11593_v19  ;;  %v2657_v27 = vmul.f32 %v11612_v55, %v11612_v55  ;;  %v16904_v24 = vld [vmem:[#allocation14_spill] sm:$0xff]  ;;  %v16906_v4 = vld [vmem:[#allocation103_spill] sm:$0xff]  ;;  %v11687_v55 = vsel %vm458_vm0, %v2625_v9, 0.0 }
 0x2af   : > { %16890 = vst [vmem:[#allocation11_spill] sm:$0xff] %v11630_v63  ;;  %16894 = vst [vmem:[#allocation104_spill] sm:$0xff] %v11644_v44  ;;  %2014 = vadd.xlane.f32.xlu0 %v2013_v21  ;;  %v11660_v28 = vsub.f32 %v16899_v57, %v2209_v0  ;;  %v2176_v44 = vmul.f32 0.03125, %v16901_v34  ;;  %v2592_v21 = vmul.f32 %v11615_v41, %v11615_v41  ;;  %v2115_v42 = vmul.f32 0.03125, %v16906_v4  ;;  %v16907_v0 = vld [vmem:[#allocation18_spill] sm:$0xff]  ;;  %v16909_v19 = vld [vmem:[#allocation108_spill] sm:$0xff] }
 0x2b0   : > { %2017 = vadd.xlane.f32.xlu1 %v2016_v12  ;;  %16896 = vst [vmem:[#allocation99_spill] sm:$0xff] %v11649_v8  ;;  %16897 = vst [vmem:[#allocation383_spill] sm:$0xff] %v11653_v32  ;;  %v11665_v12 = vpop.xlane.xlu0 %1810  ;;  %v11672_v8 = vsub.f32 %v16904_v24, %v2144_v6  ;;  %v2624_v57 = vmul.f32 %v11630_v63, %v11630_v63  ;;  %v2689_v34 = vmul.f32 %v11627_v16, %v11627_v16  ;;  %v16911_v24 = vld [vmem:[#allocation15_spill] sm:$0xff]  ;;  %v16927_v63 = vld [vmem:[#allocation120_spill] sm:$0xff] }
 0x2b1   : > { %16898 = vst [vmem:[#allocation384_spill] sm:$0xff] %v11657_v39  ;;  %16900 = vst [vmem:[#allocation13_spill] sm:$0xff] %v11660_v28  ;;  %v11663_v18 = vpop.xlane.xlu1 %1813  ;;  %v11680_v51 = vsub.f32 %v16907_v0, %v2208_v47  ;;  %v11684_v41 = vsel %vm458_vm0, %v2593_v3, 0.0  ;;  %v11690_v6 = vsub.f32 %v16911_v24, %v2083_v40  ;;  %v16913_v4 = vld [vmem:[#allocation107_spill] sm:$0xff]  ;;  %v11695_v16 = vsel %vm458_vm0, %v11653_v32, 0.0  ;;  %v16916_v3 = vld [vmem:[#allocation16_spill] sm:$0xff] }
 0x2b2   : > { %16902 = vst [vmem:[#allocation100_spill] sm:$0xff] %v11663_v18  ;;  %16903 = vst [vmem:[#allocation385_spill] sm:$0xff] %v11665_v12  ;;  %v2114_v18 = vmul.f32 0.03125, %v16909_v19  ;;  %v2147_v12 = vmul.f32 0.03125, %v16913_v4  ;;  %v11699_v19 = vsel %vm458_vm0, %v11657_v39, 0.0  ;;  %v11702_v47 = vsub.f32 %v16916_v3, %v2176_v44  ;;  %v16921_v24 = vld [vmem:[#allocation17_spill] sm:$0xff] }
 0x2b3   : > { %16905 = vst [vmem:[#allocation14_spill] sm:$0xff] %v11672_v8  ;;  %16908 = vst [vmem:[#allocation103_spill] sm:$0xff] %v11680_v51  ;;  %2020 = vadd.xlane.f32.xlu0 %v2019_v13  ;;  %v2848_v40 = vsel %vm458_vm0, %v2592_v21, 0.0  ;;  %v11712_v13 = vsel %vm458_vm0, %v2657_v27, 0.0  ;;  %v11715_v4 = vsub.f32 %v16921_v24, %v2115_v42  ;;  %v11718_v32 = vsel %vm458_vm0, %v2624_v57, 0.0  ;;  %v16924_v39 = vld [vmem:[#allocation21_spill] sm:$0xff] }
 0x2b4   : > { %16910 = vst [vmem:[#allocation18_spill] sm:$0xff] %v11687_v55  ;;  %16912 = vst [vmem:[#allocation108_spill] sm:$0xff] %v11690_v6  ;;  %2023 = vadd.xlane.f32.xlu1 %v2022_v59  ;;  %v11706_v0 = vpop.xlane.xlu0 %1816  ;;  %v2721_v59 = vmul.f32 %v11660_v28, %v11660_v28  ;;  %v2656_v44 = vmul.f32 %v11672_v8, %v11672_v8  ;;  %v11723_v3 = vsel %vm458_vm0, %v2689_v34, 0.0  ;;  %v2210_v27 = vmul.f32 0.03125, %v16927_v63  ;;  %v16928_v24 = vld [vmem:[#allocation20_spill] sm:$0xff]  ;;  %v16930_v57 = vld [vmem:[#allocation111_spill] sm:$0xff] }
 0x2b5   : > { %16914 = vst [vmem:[#allocation15_spill] sm:$0xff] %v11695_v16  ;;  %16915 = vst [vmem:[#allocation107_spill] sm:$0xff] %v11699_v19  ;;  %v11704_v9 = vpop.xlane.xlu1 %1819  ;;  %v11726_v21 = vsub.f32 %v16924_v39, %v2114_v18  ;;  %v16926_v19 = vld [vmem:[#allocation119_spill] sm:$0xff]  ;;  %v2720_v42 = vmul.f32 %v11680_v51, %v11680_v51  ;;  %v2179_v28 = vmul.f32 0.03125, %v16930_v57  ;;  %v2595_v39 = vmul.f32 %v11690_v6, %v11690_v6 }
 0x2b6   : > { %16917 = vst [vmem:[#allocation16_spill] sm:$0xff] %v11702_v47  ;;  %16918 = vst [vmem:[#allocation386_spill] sm:$0xff] %v11704_v9  ;;  %v2082_v16 = vmul.f32 0.03125, %v16926_v19  ;;  %v16931_v9 = vld [vmem:[#allocation112_spill] sm:$0xff]  ;;  %v16932_v18 = vld [vmem:[#allocation115_spill] sm:$0xff]  ;;  %v2627_v57 = vmul.f32 %v11715_v4, %v11715_v4 }
 0x2b7   : > { %16919 = vst [vmem:[#allocation387_spill] sm:$0xff] %v11706_v0  ;;  %16920 = vst [vmem:[#allocation388_spill] sm:$0xff] %v11712_v13  ;;  %v11733_v13 = vsub.f32 %v16928_v24, %v2147_v12  ;;  %v2146_v8 = vmul.f32 0.03125, %v16931_v9  ;;  %2026 = vadd.xlane.f32.xlu0 %v2025_v54  ;;  %v2211_v34 = vmul.f32 0.03125, %v16932_v18  ;;  %v16935_v12 = vld [vmem:[#allocation129_spill] sm:$0xff]  ;;  %v2688_v9 = vmul.f32 %v11702_v47, %v11702_v47  ;;  %v16939_v6 = vld [vmem:[#allocation135_spill] sm:$0xff] }
 0x2b8   : > { %16922 = vst [vmem:[#allocation17_spill] sm:$0xff] %v11715_v4  ;;  %16923 = vst [vmem:[#allocation389_spill] sm:$0xff] %v11723_v3  ;;  %2029 = vadd.xlane.f32.xlu1 %v2028_v36  ;;  %v11742_v63 = vpop.xlane.xlu0 %1822  ;;  %v3235_v3 = vsel %vm458_vm0, %v2721_v59, 0.0  ;;  %v11747_v24 = vsub.f32 %v16935_v12, %v11189_v10  ;;  %v16937_v36 = vld [vmem:[#allocation116_spill] sm:$0xff]  ;;  %v11755_v18 = vsel %vm458_vm0, %v2656_v44, 0.0  ;;  %v11759_v51 = vsub.f32 %v16939_v6, %v11189_v10  ;;  %v16943_v12 = vld [vmem:[#allocation29_spill] sm:$0xff] }
 0x2b9   : > { %16925 = vst [vmem:[#allocation21_spill] sm:$0xff] %v11726_v21  ;;  %16929 = vst [vmem:[#allocation119_spill] sm:$0xff] %v11733_v13  ;;  %v11740_v19 = vpop.xlane.xlu1 %1825  ;;  %v2178_v54 = vmul.f32 0.03125, %v16937_v36  ;;  %v16941_v59 = vld [vmem:[#allocation28_spill] sm:$0xff]  ;;  %v3232_v47 = vsel %vm458_vm0, %v2720_v42, 0.0  ;;  %v2626_v36 = vmul.f32 %v11726_v21, %v11726_v21  ;;  %v16945_v0 = vld [vmem:[#allocation22_spill] sm:$0xff] }
 0x2ba   : > { %16933 = vst [vmem:[#allocation120_spill] sm:$0xff] %v11740_v19  ;;  %16934 = vst [vmem:[#allocation20_spill] sm:$0xff] %v11742_v63  ;;  %v11762_v19 = vsub.f32 %v16941_v59, %v2082_v16  ;;  %v11765_v63 = vsub.f32 %v16943_v12, %v2210_v27  ;;  %v11771_v4 = vsub.f32 %v16945_v0, %v2179_v28  ;;  %v16947_v44 = vld [vmem:[#allocation23_spill] sm:$0xff]  ;;  %v2857_v6 = vsel %vm458_vm0, %v2595_v39, 0.0  ;;  %v16949_v27 = vld [vmem:[#allocation24_spill] sm:$0xff] }
 0x2bb   : > { %16936 = vst [vmem:[#allocation111_spill] sm:$0xff] %v11747_v24  ;;  %16938 = vst [vmem:[#allocation112_spill] sm:$0xff] %v11755_v18  ;;  %v11774_v18 = vsub.f32 %v16947_v44, %v2146_v8  ;;  %2849 = vadd.xlane.f32.xlu0 %v2848_v40  ;;  %v2659_v16 = vmul.f32 %v11733_v13, %v11733_v13  ;;  %v11780_v59 = vsub.f32 %v16949_v27, %v2211_v34  ;;  %v16951_v42 = vld [vmem:[#allocation124_spill] sm:$0xff]  ;;  %v16957_v40 = vld [vmem:[#allocation123_spill] sm:$0xff] }
 0x2bc   : > { %16940 = vst [vmem:[#allocation115_spill] sm:$0xff] %v11759_v51  ;;  %16942 = vst [vmem:[#allocation129_spill] sm:$0xff] %v11762_v19  ;;  %3233 = vadd.xlane.f32.xlu1 %v3232_v47  ;;  %v2084_v12 = vmul.f32 0.03125, %v16951_v42  ;;  %v11785_v21 = vpop.xlane.xlu0 %1828  ;;  %v11789_v28 = vsel %vm458_vm0, %v11747_v24, 0.0  ;;  %v11792_v8 = vsel %vm458_vm0, %v2688_v9, 0.0  ;;  %v16955_v47 = vld [vmem:[#allocation25_spill] sm:$0xff]  ;;  %v2722_v24 = vmul.f32 %v11765_v63, %v11765_v63 }
 0x2bd   : > { %16944 = vst [vmem:[#allocation116_spill] sm:$0xff] %v11765_v63  ;;  %16946 = vst [vmem:[#allocation135_spill] sm:$0xff] %v11771_v4  ;;  %v11783_v55 = vpop.xlane.xlu1 %1831  ;;  %v11795_v0 = vsub.f32 %v16955_v47, %v2178_v54  ;;  %v2085_v39 = vmul.f32 0.03125, %v16957_v40  ;;  %v11799_v34 = vsel %vm458_vm0, %v2627_v57, 0.0  ;;  %v11803_v44 = vsel %vm458_vm0, %v11759_v51, 0.0  ;;  %v16959_v27 = vld [vmem:[#allocation142_spill] sm:$0xff] }
 0x2be   : > { %16948 = vst [vmem:[#allocation28_spill] sm:$0xff] %v11774_v18  ;;  %16950 = vst [vmem:[#allocation29_spill] sm:$0xff] %v11780_v59  ;;  %v2212_v42 = vmul.f32 0.03125, %v16959_v27  ;;  %v2594_v9 = vmul.f32 %v11762_v19, %v11762_v19  ;;  %v11811_v54 = vsel %vm458_vm0, %v2626_v36, 0.0  ;;  %v16960_v47 = vld [vmem:[#allocation128_spill] sm:$0xff]  ;;  %v2658_v57 = vmul.f32 %v11774_v18, %v11774_v18  ;;  %v16962_v13 = vld [vmem:[#allocation31_spill] sm:$0xff] }
 0x2bf   : > { %16952 = vst [vmem:[#allocation22_spill] sm:$0xff] %v11785_v21  ;;  %16953 = vst [vmem:[#allocation23_spill] sm:$0xff] %v11789_v28  ;;  %v2116_v40 = vmul.f32 0.03125, %v16960_v47  ;;  %2852 = vadd.xlane.f32.xlu0 %v11684_v41  ;;  %v11818_v51 = vsel %vm458_vm0, %v2659_v16, 0.0  ;;  %v2691_v27 = vmul.f32 %v11771_v4, %v11771_v4  ;;  %v16965_v28 = vld [vmem:[#allocation133_spill] sm:$0xff]  ;;  %v2723_v41 = vmul.f32 %v11780_v59, %v11780_v59  ;;  %v16968_v18 = vld [vmem:[#allocation30_spill] sm:$0xff] }
 0x2c0   : > { %16954 = vst [vmem:[#allocation24_spill] sm:$0xff] %v11792_v8  ;;  %16956 = vst [vmem:[#allocation124_spill] sm:$0xff] %v11795_v0  ;;  %3236 = vadd.xlane.f32.xlu1 %v3235_v3  ;;  %v11823_v8 = vsub.f32 %v16962_v13, %v2084_v12  ;;  %v2148_v19 = vmul.f32 0.03125, %v16965_v28  ;;  %v11829_v3 = vpop.xlane.xlu0 %1834  ;;  %v11834_v16 = vsub.f32 %v16968_v18, %v2085_v39  ;;  %v16971_v4 = vld [vmem:[#allocation147_spill] sm:$0xff]  ;;  %v16973_v28 = vld [vmem:[#allocation141_spill] sm:$0xff]  ;;  %v2854_v59 = vsel %vm458_vm0, %v2594_v9, 0.0 }
 0x2c1   : > { %16958 = vst [vmem:[#allocation25_spill] sm:$0xff] %v11803_v44  ;;  %16961 = vst [vmem:[#allocation123_spill] sm:$0xff] %v11818_v51  ;;  %v16964_v44 = vld [vmem:[#allocation127_spill] sm:$0xff]  ;;  %v11827_v47 = vpop.xlane.xlu1 %1837  ;;  %v16970_v51 = vld [vmem:[#allocation132_spill] sm:$0xff]  ;;  %v11839_v13 = vsub.f32 %v16971_v4, %v11189_v10  ;;  %v2690_v12 = vmul.f32 %v11795_v0, %v11795_v0 }
 0x2c2   : > { %16963 = vst [vmem:[#allocation142_spill] sm:$0xff] %v11823_v8  ;;  %v2117_v36 = vmul.f32 0.03125, %v16964_v44  ;;  %16966 = vst [vmem:[#allocation128_spill] sm:$0xff] %v11827_v47  ;;  %v2149_v63 = vmul.f32 0.03125, %v16970_v51  ;;  %v2213_v44 = vmul.f32 0.03125, %v16973_v28  ;;  %v16974_v47 = vld [vmem:[#allocation40_spill] sm:$0xff] }
 0x2c3   : > { %16967 = vst [vmem:[#allocation31_spill] sm:$0xff] %v11829_v3  ;;  %16969 = vst [vmem:[#allocation127_spill] sm:$0xff] %v11834_v16  ;;  %v11845_v21 = vsub.f32 %v16974_v47, %v2212_v42  ;;  %v3238_v3 = vsel %vm458_vm0, %v2722_v24, 0.0  ;;  %v16976_v18 = vld [vmem:[#allocation33_spill] sm:$0xff]  ;;  %2855 = vadd.xlane.f32.xlu0 %v2854_v59  ;;  %v11853_v51 = vsel %vm458_vm0, %v2658_v57, 0.0  ;;  %v11860_v28 = vsel %vm458_vm0, %v2691_v27, 0.0 }
 0x2c4   : > { %16972 = vst [vmem:[#allocation133_spill] sm:$0xff] %v11839_v13  ;;  %v11850_v39 = vsub.f32 %v16976_v18, %v2116_v40  ;;  %3239 = vadd.xlane.f32.xlu1 %v3238_v3  ;;  %16978 = vst [vmem:[#allocation147_spill] sm:$0xff] %v11853_v51  ;;  %v16979_v4 = vld [vmem:[#allocation153_spill] sm:$0xff]  ;;  %v16982_v42 = vld [vmem:[#allocation32_spill] sm:$0xff]  ;;  %v11870_v3 = vpop.xlane.xlu0 %1840  ;;  %v3241_v59 = vsel %vm458_vm0, %v2723_v41, 0.0  ;;  %v2596_v57 = vmul.f32 %v11823_v8, %v11823_v8 }
 0x2c5   : > { %16975 = vst [vmem:[#allocation30_spill] sm:$0xff] %v11845_v21  ;;  %v11857_v0 = vsub.f32 %v16979_v4, %v11189_v10  ;;  %16981 = vst [vmem:[#allocation40_spill] sm:$0xff] %v11860_v28  ;;  %v11863_v47 = vsub.f32 %v16982_v42, %v2117_v36  ;;  %v16984_v24 = vld [vmem:[#allocation35_spill] sm:$0xff]  ;;  %v11868_v40 = vpop.xlane.xlu1 %1843  ;;  %v16988_v18 = vld [vmem:[#allocation34_spill] sm:$0xff]  ;;  %v2597_v36 = vmul.f32 %v11834_v16, %v11834_v16 }
 0x2c6   : > { %16977 = vst [vmem:[#allocation132_spill] sm:$0xff] %v11850_v39  ;;  %v11866_v9 = vsub.f32 %v16984_v24, %v2148_v19  ;;  %16986 = vst [vmem:[#allocation32_spill] sm:$0xff] %v11868_v40  ;;  %v11876_v4 = vsub.f32 %v16988_v18, %v2149_v63  ;;  %v16990_v27 = vld [vmem:[#allocation146_spill] sm:$0xff]  ;;  %v11882_v19 = vsel %vm458_vm0, %v2690_v12, 0.0  ;;  %v16992_v42 = vld [vmem:[#allocation39_spill] sm:$0xff]  ;;  %v2724_v41 = vmul.f32 %v11845_v21, %v11845_v21 }
 0x2c7   : > { %16980 = vst [vmem:[#allocation141_spill] sm:$0xff] %v11857_v0  ;;  %16983 = vst [vmem:[#allocation33_spill] sm:$0xff] %v11863_v47  ;;  %v2086_v28 = vmul.f32 0.03125, %v16990_v27  ;;  %v11885_v24 = vsub.f32 %v16992_v42, %v2213_v44  ;;  %v16994_v51 = vld [vmem:[#allocation164_spill] sm:$0xff]  ;;  %v11892_v63 = vsel %vm458_vm0, %v11839_v13, 0.0  ;;  %v16996_v18 = vld [vmem:[#allocation137_spill] sm:$0xff]  ;;  %2858 = vadd.xlane.f32.xlu0 %v2857_v6  ;;  %v2628_v12 = vmul.f32 %v11850_v39, %v11850_v39 }
 0x2c8   : > { %16985 = vst [vmem:[#allocation153_spill] sm:$0xff] %v11866_v9  ;;  %16987 = vst [vmem:[#allocation35_spill] sm:$0xff] %v11870_v3  ;;  %v2214_v3 = vmul.f32 0.03125, %v16994_v51  ;;  %v2181_v27 = vmul.f32 0.03125, %v16996_v18  ;;  %v16997_v8 = vld [vmem:[#allocation138_spill] sm:$0xff]  ;;  %3242 = vadd.xlane.f32.xlu1 %v3241_v59  ;;  %v11900_v44 = vsel %vm458_vm0, %v11857_v0, 0.0  ;;  %v11905_v16 = vpop.xlane.xlu0 %1846  ;;  %v2660_v6 = vmul.f32 %v11866_v9, %v11866_v9 }
 0x2c9   : > { %16989 = vst [vmem:[#allocation34_spill] sm:$0xff] %v11876_v4  ;;  %16991 = vst [vmem:[#allocation146_spill] sm:$0xff] %v11882_v19  ;;  %v2180_v40 = vmul.f32 0.03125, %v16997_v8  ;;  %v16999_v51 = vld [vmem:[#allocation145_spill] sm:$0xff]  ;;  %v11903_v19 = vpop.xlane.xlu1 %1849  ;;  %v2860_v13 = vsel %vm458_vm0, %v2596_v57, 0.0  ;;  %v2629_v8 = vmul.f32 %v11863_v47, %v11863_v47  ;;  %v17002_v59 = vld [vmem:[#allocation42_spill] sm:$0xff]  ;;  %v2725_v9 = vmul.f32 %v11885_v24, %v11885_v24 }
 0x2ca   : > { %16993 = vst [vmem:[#allocation39_spill] sm:$0xff] %v11885_v24  ;;  %16995 = vst [vmem:[#allocation164_spill] sm:$0xff] %v11892_v63  ;;  %v2087_v42 = vmul.f32 0.03125, %v16999_v51  ;;  %v11913_v18 = vsub.f32 %v17002_v59, %v2086_v28  ;;  %v17003_v63 = vld [vmem:[#allocation151_spill] sm:$0xff]  ;;  %v2661_v51 = vmul.f32 %v11876_v4, %v11876_v4  ;;  %v17004_v39 = vld [vmem:[#allocation50_spill] sm:$0xff]  ;;  %v2215_v57 = vmul.f32 0.03125, %v11315_v1 }
 0x2cb   : > { %16998 = vst [vmem:[#allocation137_spill] sm:$0xff] %v11900_v44  ;;  %17000 = vst [vmem:[#allocation138_spill] sm:$0xff] %v11903_v19  ;;  %v2118_v0 = vmul.f32 0.03125, %v17003_v63  ;;  %v2863_v44 = vsel %vm458_vm0, %v2597_v36, 0.0  ;;  %v3244_v47 = vsel %vm458_vm0, %v2724_v41, 0.0  ;;  %v17005_v19 = vld [vmem:[#allocation36_spill] sm:$0xff]  ;;  %2861 = vadd.xlane.f32.xlu0 %v2860_v13 }
 0x2cc   : > { %17001 = vst [vmem:[#allocation145_spill] sm:$0xff] %v11905_v16  ;;  %v11920_v16 = vsub.f32 %v17004_v39, %v2214_v3  ;;  %v11927_v28 = vsub.f32 %v17005_v19, %v2181_v27  ;;  %v17007_v59 = vld [vmem:[#allocation37_spill] sm:$0xff]  ;;  %3245 = vadd.xlane.f32.xlu1 %v3244_v47  ;;  %v11933_v36 = vsel %vm458_vm0, %v2628_v12, 0.0  ;;  %v17013_v4 = vld [vmem:[#allocation150_spill] sm:$0xff]  ;;  %v11945_v19 = vpop.xlane.xlu0 %1852  ;;  %v11951_v13 = vsel %vm458_vm0, %v2660_v6, 0.0  ;;  %v17017_v47 = vld [vmem:[#allocation44_spill] sm:$0xff] }
 0x2cd   : > { %v11930_v63 = vsub.f32 %v17007_v59, %v2180_v40  ;;  %v17009_v39 = vld [vmem:[#allocation165_spill] sm:$0xff]  ;;  %v2119_v24 = vmul.f32 0.03125, %v17013_v4  ;;  %v11943_v21 = vpop.xlane.xlu1 %1855  ;;  %v11948_v40 = vsel %vm458_vm0, %v2629_v8, 0.0  ;;  %v11954_v27 = vsub.f32 %v17017_v47, %v2118_v0 }
 0x2ce   : > { %17006 = vst [vmem:[#allocation42_spill] sm:$0xff] %v11927_v28  ;;  %v11937_v3 = vsub.f32 %v17009_v39, %v11189_v10  ;;  %v17011_v1 = vld [vmem:[#allocation41_spill] sm:$0xff]  ;;  %17014 = vst [vmem:[#allocation37_spill] sm:$0xff] %v11943_v21  ;;  %v11960_v4 = vsel %vm458_vm0, %v2661_v51, 0.0  ;;  %v17021_v39 = vld [vmem:[#allocation216_spill] sm:$0xff]  ;;  %v2216_v8 = vmul.f32 0.03125, %v11333_v58  ;;  %v2726_v6 = vmul.f32 %v11920_v16, %v11920_v16 }
 0x2cf   : > { %17008 = vst [vmem:[#allocation151_spill] sm:$0xff] %v11930_v63  ;;  %v11940_v41 = vsub.f32 %v17011_v1, %v2087_v42  ;;  %17015 = vst [vmem:[#allocation165_spill] sm:$0xff] %v11945_v19  ;;  %v17019_v12 = vld [vmem:[#allocation169_spill] sm:$0xff]  ;;  %v2598_v42 = vmul.f32 %v11913_v18, %v11913_v18  ;;  %v11963_v1 = vsub.f32 %v17021_v39, %v2215_v57  ;;  %v3247_v19 = vsel %vm458_vm0, %v2725_v9, 0.0  ;;  %v17024_v9 = vld [vmem:[#allocation43_spill] sm:$0xff] }
 0x2d0   : > { %17010 = vst [vmem:[#allocation50_spill] sm:$0xff] %v11937_v3  ;;  %17016 = vst [vmem:[#allocation41_spill] sm:$0xff] %v11951_v13  ;;  %v2088_v59 = vmul.f32 0.03125, %v17019_v12  ;;  %3248 = vadd.xlane.f32.xlu1 %v3247_v19  ;;  %2864 = vadd.xlane.f32.xlu0 %v2863_v44  ;;  %v11971_v0 = vsel %vm458_vm0, %v11937_v3, 0.0  ;;  %v11975_v51 = vsub.f32 %v16782_v33, %v11189_v10  ;;  %v17026_v12 = vld [vmem:[#allocation155_spill] sm:$0xff]  ;;  %v17027_v44 = vld [vmem:[#allocation156_spill] sm:$0xff]  ;;  %v11988_v3 = vpop.xlane.xlu0 %1858 }
 0x2d1   : > { %17012 = vst [vmem:[#allocation36_spill] sm:$0xff] %v11940_v41  ;;  %17018 = vst [vmem:[#allocation150_spill] sm:$0xff] %v11954_v27  ;;  %v2692_v57 = vmul.f32 %v11930_v63, %v11930_v63  ;;  %v2693_v58 = vmul.f32 %v11927_v28, %v11927_v28  ;;  %v11982_v47 = vsub.f32 %v17024_v9, %v2119_v24  ;;  %v2151_v19 = vmul.f32 0.03125, %v17026_v12  ;;  %v17031_v63 = vld [vmem:[#allocation52_spill] sm:$0xff]  ;;  %v17033_v12 = vld [vmem:[#allocation221_spill] sm:$0xff] }
 0x2d2   : > { %17020 = vst [vmem:[#allocation44_spill] sm:$0xff] %v11960_v4  ;;  %17022 = vst [vmem:[#allocation169_spill] sm:$0xff] %v11971_v0  ;;  %v2150_v39 = vmul.f32 0.03125, %v17027_v44  ;;  %v11986_v4 = vpop.xlane.xlu1 %1861  ;;  %v2599_v33 = vmul.f32 %v11940_v41, %v11940_v41  ;;  %v17030_v0 = vld [vmem:[#allocation163_spill] sm:$0xff]  ;;  %v11994_v21 = vsub.f32 %v17031_v63, %v2088_v59  ;;  %v2866_v28 = vsel %vm458_vm0, %v2598_v42, 0.0  ;;  %v17035_v41 = vld [vmem:[#allocation160_spill] sm:$0xff] }
 0x2d3   : > { %17023 = vst [vmem:[#allocation216_spill] sm:$0xff] %v11975_v51  ;;  %17025 = vst [vmem:[#allocation43_spill] sm:$0xff] %v11982_v47  ;;  %v2089_v13 = vmul.f32 0.03125, %v17030_v0  ;;  %v2630_v24 = vmul.f32 %v11954_v27, %v11954_v27  ;;  %v2217_v9 = vmul.f32 0.03125, %v11331_v46  ;;  %v12001_v44 = vsub.f32 %v17033_v12, %v2216_v8  ;;  %v17039_v42 = vld [vmem:[#allocation45_spill] sm:$0xff] }
 0x2d4   : > { %17028 = vst [vmem:[#allocation155_spill] sm:$0xff] %v11986_v4  ;;  %17029 = vst [vmem:[#allocation156_spill] sm:$0xff] %v11988_v3  ;;  %v3250_v3 = vsel %vm458_vm0, %v2726_v6, 0.0  ;;  %v2727_v4 = vmul.f32 %v11963_v1, %v11963_v1  ;;  %v2182_v0 = vmul.f32 0.03125, %v17035_v41  ;;  %2867 = vadd.xlane.f32.xlu0 %v2866_v28  ;;  %v12009_v63 = vsel %vm458_vm0, %v11975_v51, 0.0  ;;  %v17041_v6 = vld [vmem:[#allocation46_spill] sm:$0xff] }
 0x2d5   : > { %17032 = vst [vmem:[#allocation163_spill] sm:$0xff] %v11994_v21  ;;  %17034 = vst [vmem:[#allocation52_spill] sm:$0xff] %v12001_v44  ;;  %3251 = vadd.xlane.f32.xlu1 %v3250_v3  ;;  %v12012_v59 = vsel %vm458_vm0, %v2692_v57, 0.0  ;;  %v12015_v46 = vsel %vm458_vm0, %v2693_v58, 0.0  ;;  %v12018_v8 = vsub.f32 %v17039_v42, %v2151_v19  ;;  %v12021_v12 = vsub.f32 %v17041_v6, %v2150_v39  ;;  %v12025_v3 = vpop.xlane.xlu0 %1864  ;;  %v17045_v57 = vld [vmem:[#allocation49_spill] sm:$0xff]  ;;  %v17047_v58 = vld [vmem:[#allocation187_spill] sm:$0xff] }
 0x2d6   : > { %17036 = vst [vmem:[#allocation221_spill] sm:$0xff] %v12009_v63  ;;  %17037 = vst [vmem:[#allocation160_spill] sm:$0xff] %v12012_v59  ;;  %v12023_v27 = vpop.xlane.xlu1 %1867  ;;  %v2869_v28 = vsel %vm458_vm0, %v2599_v33, 0.0  ;;  %v2631_v41 = vmul.f32 %v11982_v47, %v11982_v47  ;;  %v12031_v51 = vsub.f32 %v17045_v57, %v2089_v13  ;;  %v2600_v19 = vmul.f32 %v11994_v21, %v11994_v21  ;;  %v17048_v42 = vld [vmem:[#allocation220_spill] sm:$0xff]  ;;  %v17050_v13 = vld [vmem:[#allocation159_spill] sm:$0xff] }
 0x2d7   : > { %17038 = vst [vmem:[#allocation390_spill] sm:$0xff] %v12015_v46  ;;  %17040 = vst [vmem:[#allocation45_spill] sm:$0xff] %v12018_v8  ;;  %v2090_v46 = vmul.f32 0.03125, %v17047_v58  ;;  %v12037_v39 = vsel %vm458_vm0, %v2630_v24, 0.0  ;;  %v12040_v6 = vsub.f32 %v17048_v42, %v2217_v9  ;;  %v2218_v59 = vmul.f32 0.03125, %v11349_v45  ;;  %v17051_v47 = vld [vmem:[#allocation48_spill] sm:$0xff] }
 0x2d8   : > { %17042 = vst [vmem:[#allocation46_spill] sm:$0xff] %v12021_v12  ;;  %17043 = vst [vmem:[#allocation391_spill] sm:$0xff] %v12023_v27  ;;  %v3253_v33 = vsel %vm458_vm0, %v2727_v4, 0.0  ;;  %v2728_v63 = vmul.f32 %v12001_v44, %v12001_v44  ;;  %v2183_v57 = vmul.f32 0.03125, %v17050_v13  ;;  %v12048_v58 = vsub.f32 %v17051_v47, %v2182_v0  ;;  %2870 = vadd.xlane.f32.xlu0 %v2869_v28  ;;  %v17054_v24 = vld [vmem:[#allocation183_spill] sm:$0xff] }
 0x2d9   : > { %17044 = vst [vmem:[#allocation392_spill] sm:$0xff] %v12025_v3  ;;  %17046 = vst [vmem:[#allocation49_spill] sm:$0xff] %v12031_v51  ;;  %v17053_v3 = vld [vmem:[#allocation168_spill] sm:$0xff]  ;;  %3254 = vadd.xlane.f32.xlu1 %v3253_v33  ;;  %v12053_v9 = vsub.f32 %v17054_v24, %v11189_v10  ;;  %v12057_v45 = vpop.xlane.xlu0 %1870  ;;  %v12060_v4 = vsel %vm458_vm0, %v2631_v41, 0.0  ;;  %v2662_v13 = vmul.f32 %v12021_v12, %v12021_v12  ;;  %v17061_v12 = vld [vmem:[#allocation225_spill] sm:$0xff] }
 0x2da   : > { %17049 = vst [vmem:[#allocation187_spill] sm:$0xff] %v12040_v6  ;;  %17052 = vst [vmem:[#allocation220_spill] sm:$0xff] %v12048_v58  ;;  %v2121_v27 = vmul.f32 0.03125, %v17053_v3  ;;  %v12055_v42 = vpop.xlane.xlu1 %1873  ;;  %v2663_v47 = vmul.f32 %v12018_v8, %v12018_v8  ;;  %v12068_v0 = vsub.f32 %v10616_v48, %v11189_v10  ;;  %v17059_v3 = vld [vmem:[#allocation181_spill] sm:$0xff]  ;;  %v17060_v33 = vld [vmem:[#allocation60_spill] sm:$0xff]  ;;  %v2601_v41 = vmul.f32 %v12031_v51, %v12031_v51 }
 0x2db   : > { %17055 = vst [vmem:[#allocation159_spill] sm:$0xff] %v12053_v9  ;;  %17056 = vst [vmem:[#allocation48_spill] sm:$0xff] %v12055_v42  ;;  %v2091_v28 = vmul.f32 0.03125, %v17059_v3  ;;  %v12072_v24 = vsub.f32 %v17060_v33, %v2090_v46  ;;  %v2219_v42 = vmul.f32 0.03125, %v11347_v25  ;;  %v12079_v21 = vsub.f32 %v17061_v12, %v2218_v59  ;;  %v17062_v44 = vld [vmem:[#allocation47_spill] sm:$0xff]  ;;  %v17067_v59 = vld [vmem:[#allocation173_spill] sm:$0xff] }
 0x2dc   : > { %17057 = vst [vmem:[#allocation168_spill] sm:$0xff] %v12057_v45  ;;  %17058 = vst [vmem:[#allocation183_spill] sm:$0xff] %v12068_v0  ;;  %v2872_v45 = vsel %vm458_vm0, %v2600_v19, 0.0  ;;  %v3256_v8 = vsel %vm458_vm0, %v2728_v63, 0.0  ;;  %v2729_v48 = vmul.f32 %v12040_v6, %v12040_v6  ;;  %v12085_v3 = vsub.f32 %v17062_v44, %v2183_v57  ;;  %v17064_v46 = vld [vmem:[#allocation51_spill] sm:$0xff]  ;;  %v17068_v12 = vld [vmem:[#allocation174_spill] sm:$0xff] }
 0x2dd   : > { %v12088_v33 = vsub.f32 %v17064_v46, %v2121_v27  ;;  %3257 = vadd.xlane.f32.xlu1 %v3256_v8  ;;  %2873 = vadd.xlane.f32.xlu0 %v2872_v45  ;;  %v12092_v19 = vsel %vm458_vm0, %v12053_v9, 0.0  ;;  %v2694_v25 = vmul.f32 %v12048_v58, %v12048_v58  ;;  %v2153_v63 = vmul.f32 0.03125, %v17067_v59  ;;  %v12100_v44 = vpop.xlane.xlu0 %1876  ;;  %v17073_v57 = vld [vmem:[#allocation57_spill] sm:$0xff]  ;;  %v17074_v46 = vld [vmem:[#allocation203_spill] sm:$0xff]  ;;  %v17075_v9 = vld [vmem:[#allocation224_spill] sm:$0xff] }
 0x2de   : > { %17063 = vst [vmem:[#allocation181_spill] sm:$0xff] %v12085_v3  ;;  %17066 = vst [vmem:[#allocation225_spill] sm:$0xff] %v12092_v19  ;;  %v2120_v51 = vmul.f32 0.03125, %v17068_v12  ;;  %v12098_v6 = vpop.xlane.xlu1 %1879  ;;  %v12103_v27 = vsel %vm458_vm0, %v2662_v13, 0.0  ;;  %v12107_v8 = vsel %vm458_vm0, %v12068_v0, 0.0  ;;  %v12110_v45 = vsub.f32 %v17073_v57, %v2091_v28  ;;  %v5169_v28 = vld [vmem:[%s16002_s7 + $0x18] sm:$0xff] }
 0x2df   : > { %17065 = vst [vmem:[#allocation60_spill] sm:$0xff] %v12088_v33  ;;  %17069 = vst [vmem:[#allocation47_spill] sm:$0xff] %v12098_v6  ;;  %v2092_v58 = vmul.f32 0.03125, %v17074_v46  ;;  %v2875_v59 = vsel %vm458_vm0, %v2601_v41, 0.0  ;;  %v2602_v12 = vmul.f32 %v12072_v24, %v12072_v24  ;;  %v12117_v19 = vsub.f32 %v17075_v9, %v2219_v42  ;;  %v5168_v41 = vld [vmem:[%s16002_s7 + $0x10] sm:$0xff]  ;;  %v17078_v57 = vld [vmem:[#allocation53_spill] sm:$0xff]  ;;  %8431 = vmatprep.subr.mxu0 %v5169_v28 }
 0x2e0   : > { %17070 = vst [vmem:[#allocation51_spill] sm:$0xff] %v12100_v44  ;;  %17071 = vst [vmem:[#allocation173_spill] sm:$0xff] %v12103_v27  ;;  %v2220_v13 = vmul.f32 0.03125, %v11365_v52  ;;  %v3259_v27 = vsel %vm458_vm0, %v2729_v48, 0.0  ;;  %v2730_v0 = vmul.f32 %v12079_v21, %v12079_v21  ;;  %v2633_v9 = vmul.f32 %v12088_v33, %v12088_v33  ;;  %8823 = vmatprep.subr.mxu1 %v5169_v28 }
 0x2e1   : > { %17072 = vst [vmem:[#allocation174_spill] sm:$0xff] %v12107_v8  ;;  %3260 = vadd.xlane.f32.xlu1 %v3259_v27  ;;  %2876 = vadd.xlane.f32.xlu0 %v2875_v59  ;;  %v12132_v52 = vsel %vm458_vm0, %v2663_v47, 0.0  ;;  %v12135_v42 = vsel %vm458_vm0, %v2694_v25, 0.0  ;;  %v2695_v48 = vmul.f32 %v12085_v3, %v12085_v3  ;;  %v12140_v46 = vsub.f32 %v17078_v57, %v2153_v63  ;;  %v17080_v27 = vld [vmem:[#allocation54_spill] sm:$0xff]  ;;  %v12148_v33 = vpop.xlane.xlu0 %1882 }
 0x2e2   : > { %17076 = vst [vmem:[#allocation57_spill] sm:$0xff] %v12132_v52  ;;  %17077 = vst [vmem:[#allocation203_spill] sm:$0xff] %v12135_v42  ;;  %v12143_v59 = vsub.f32 %v17080_v27, %v2120_v51  ;;  %v17082_v8 = vld [vmem:[#allocation178_spill] sm:$0xff]  ;;  %v12146_v6 = vpop.xlane.xlu1 %1885  ;;  %v12152_v47 = vsub.f32 %v10668_v61, %v11189_v10  ;;  %v17087_v42 = vld [vmem:[#allocation68_spill] sm:$0xff]  ;;  %v2878_v51 = vsel %vm458_vm0, %v2602_v12, 0.0  ;;  %8432 = vmatpush3.msra.mxu0 %v5169_v28  ;;  %8827 = vmatpush3.msra.mxu1 %v5169_v28 }
 0x2e3   : > { %17079 = vst [vmem:[#allocation224_spill] sm:$0xff] %v12140_v46  ;;  %v2152_v44 = vmul.f32 0.03125, %v17082_v8  ;;  %17083 = vst [vmem:[#allocation54_spill] sm:$0xff] %v12146_v6  ;;  %v17086_v25 = vld [vmem:[#allocation198_spill] sm:$0xff]  ;;  %v12156_v63 = vsub.f32 %v17087_v42, %v2092_v58  ;;  %v2603_v8 = vmul.f32 %v12110_v45, %v12110_v45  ;;  %v2221_v57 = vmul.f32 0.03125, %v11363_v60  ;;  %v17089_v27 = vld [vmem:[#allocation229_spill] sm:$0xff]  ;;  %8433 = vmatprep.subr.mxu0 %v5168_v41 }
 0x2e4   : > { %17081 = vst [vmem:[#allocation53_spill] sm:$0xff] %v12143_v59  ;;  %17084 = vst [vmem:[#allocation178_spill] sm:$0xff] %v12148_v33  ;;  %v2093_v3 = vmul.f32 0.03125, %v17086_v25  ;;  %v12163_v52 = vsub.f32 %v17089_v27, %v2220_v13  ;;  %v3262_v61 = vsel %vm458_vm0, %v2730_v0, 0.0  ;;  %v2731_v25 = vmul.f32 %v12117_v19, %v12117_v19  ;;  %8824 = vmatprep.subr.mxu1 %v5168_v41  ;;  %v5167_v58 = vld [vmem:[%s16002_s7 + $0x8] sm:$0xff]  ;;  %v17091_v12 = vld [vmem:[#allocation177_spill] sm:$0xff] }
 0x2e5   : > { %17085 = vst [vmem:[#allocation393_spill] sm:$0xff] %v12152_v47  ;;  %17088 = vst [vmem:[#allocation198_spill] sm:$0xff] %v12156_v63  ;;  %v2185_v42 = vmul.f32 0.03125, %v17091_v12  ;;  %3263 = vadd.xlane.f32.xlu1 %v3262_v61  ;;  %2879 = vadd.xlane.f32.xlu0 %v2878_v51  ;;  %v12173_v60 = vsel %vm458_vm0, %v2633_v9, 0.0  ;;  %v12177_v13 = vsub.f32 %v10694_v62, %v11189_v10  ;;  %v12180_v0 = vsel %vm458_vm0, %v2695_v48, 0.0  ;;  %v17094_v28 = vld [vmem:[#allocation56_spill] sm:$0xff]  ;;  %v12187_v6 = vpop.xlane.xlu0 %1888 }
 0x2e6   : > { %17090 = vst [vmem:[#allocation68_spill] sm:$0xff] %v12163_v52  ;;  %17093 = vst [vmem:[#allocation177_spill] sm:$0xff] %v12180_v0  ;;  %v12183_v27 = vsub.f32 %v17094_v28, %v2152_v44  ;;  %v12185_v33 = vpop.xlane.xlu1 %1891  ;;  %v2632_v51 = vmul.f32 %v12143_v59, %v12143_v59  ;;  %8434 = vmatpush3.msra.mxu0 %v5168_v41  ;;  %8828 = vmatpush3.msra.mxu1 %v5168_v41  ;;  %v12195_v62 = vsel %vm458_vm0, %v12152_v47, 0.0  ;;  %v17099_v10 = vld [vmem:[#allocation65_spill] sm:$0xff]  ;;  %v17101_v44 = vld [vmem:[#allocation219_spill] sm:$0xff] }
 0x2e7   : > { %17092 = vst [vmem:[#allocation229_spill] sm:$0xff] %v12177_v13  ;;  %17096 = vst [vmem:[#allocation394_spill] sm:$0xff] %v12185_v33  ;;  %v2665_v9 = vmul.f32 %v12140_v46, %v12140_v46  ;;  %v12198_v48 = vsub.f32 %v17099_v10, %v2093_v3  ;;  %v2094_v61 = vmul.f32 0.03125, %v17101_v44  ;;  %v2881_v12 = vsel %vm458_vm0, %v2603_v8, 0.0  ;;  %8435 = vmatprep.subr.mxu0 %v5167_v58  ;;  %v5166_v41 = vld [vmem:[%s16002_s7] sm:$0xff]  ;;  %v17102_v46 = vld [vmem:[#allocation228_spill] sm:$0xff] }
 0x2e8   : > { %17095 = vst [vmem:[#allocation56_spill] sm:$0xff] %v12183_v27  ;;  %17097 = vst [vmem:[#allocation395_spill] sm:$0xff] %v12187_v6  ;;  %v2604_v28 = vmul.f32 %v12156_v63, %v12156_v63  ;;  %8825 = vmatprep.subr.mxu1 %v5167_v58  ;;  %v12208_v0 = vsub.f32 %v17102_v46, %v2221_v57  ;;  %v2222_v47 = vmul.f32 0.03125, %v11381_v22  ;;  %v3265_v3 = vsel %vm458_vm0, %v2731_v25, 0.0  ;;  %v17103_v8 = vld [vmem:[#allocation55_spill] sm:$0xff]  ;;  %v17106_v6 = vld [vmem:[#allocation186_spill] sm:$0xff] }
 0x2e9   : > { %17098 = vst [vmem:[#allocation396_spill] sm:$0xff] %v12195_v62  ;;  %17100 = vst [vmem:[#allocation65_spill] sm:$0xff] %v12198_v48  ;;  %v2732_v10 = vmul.f32 %v12163_v52, %v12163_v52  ;;  %8436 = vmatpush3.msra.mxu0 %v5167_v58  ;;  %8829 = vmatpush3.msra.mxu1 %v5167_v58  ;;  %v12215_v44 = vsub.f32 %v17103_v8, %v2185_v42  ;;  %v17105_v62 = vld [vmem:[#allocation182_spill] sm:$0xff]  ;;  %v2123_v33 = vmul.f32 0.03125, %v17106_v6  ;;  %v17109_v25 = vld [vmem:[#allocation191_spill] sm:$0xff]  ;;  %v12227_v58 = vpop.xlane.xlu0 %1894 }
 0x2ea   : > { %v2184_v59 = vmul.f32 0.03125, %v17105_v62  ;;  %3266 = vadd.xlane.f32.xlu1 %v3265_v3  ;;  %2882 = vadd.xlane.f32.xlu0 %v2881_v12  ;;  %v12221_v46 = vsel %vm458_vm0, %v12177_v13, 0.0  ;;  %v17108_v22 = vld [vmem:[#allocation190_spill] sm:$0xff]  ;;  %v2122_v63 = vmul.f32 0.03125, %v17109_v25  ;;  %v12225_v52 = vpop.xlane.xlu1 %1897  ;;  %17111 = vst [vmem:[#allocation182_spill] sm:$0xff] %v12227_v58  ;;  %v12230_v42 = vsel %vm458_vm0, %v2632_v51, 0.0 }
 0x2eb   : > { %17104 = vst [vmem:[#allocation219_spill] sm:$0xff] %v12215_v44  ;;  %17107 = vst [vmem:[#allocation228_spill] sm:$0xff] %v12221_v46  ;;  %v2155_v57 = vmul.f32 0.03125, %v17108_v22  ;;  %8437 = vmatprep.subr.mxu0 %v5166_v41  ;;  %8826 = vmatprep.subr.mxu1 %v5166_v41  ;;  %v2664_v6 = vmul.f32 %v12183_v27, %v12183_v27  ;;  %v17112_v62 = vld [vmem:[#allocation214_spill] sm:$0xff]  ;;  %v17113_v3 = vld [vmem:[#allocation76_spill] sm:$0xff]  ;;  %v2884_v22 = vsel %vm458_vm0, %v2604_v28, 0.0 }
 0x2ec   : > { %17110 = vst [vmem:[#allocation55_spill] sm:$0xff] %v12225_v52  ;;  %v2095_v12 = vmul.f32 0.03125, %v17112_v62  ;;  %v12236_v8 = vsub.f32 %v17113_v3, %v2094_v61  ;;  %v2605_v25 = vmul.f32 %v12198_v48, %v12198_v48  ;;  %8438 = vmatpush3.msra.mxu0 %v5166_v41  ;;  %8830 = vmatpush3.msra.mxu1 %v5166_v41  ;;  %v2223_v51 = vmul.f32 0.03125, %v11379_v37  ;;  %v17115_v13 = vld [vmem:[#allocation233_spill] sm:$0xff]  ;;  %v17116_v27 = vld [vmem:[#allocation58_spill] sm:$0xff]  ;;  %v17118_v3 = vld [vmem:[#allocation59_spill] sm:$0xff] }
 0x2ed   : > { %v12243_v46 = vsub.f32 %v17115_v13, %v2222_v47  ;;  %v3268_v58 = vsel %vm458_vm0, %v2732_v10, 0.0  ;;  %v2733_v62 = vmul.f32 %v12208_v0, %v12208_v0  ;;  %v12249_v61 = vsub.f32 %v17116_v27, %v2184_v59  ;;  %v17121_v47 = vld [vmem:[#allocation61_spill] sm:$0xff]  ;;  %v17123_v10 = vld [vmem:[#allocation62_spill] sm:$0xff]  ;;  %v17125_v48 = vld [vmem:[#allocation195_spill] sm:$0xff] }
 0x2ee   : > { %17114 = vst [vmem:[#allocation186_spill] sm:$0xff] %v12236_v8  ;;  %v12252_v28 = vsub.f32 %v17118_v3, %v2123_v33  ;;  %3269 = vadd.xlane.f32.xlu1 %v3268_v58  ;;  %2885 = vadd.xlane.f32.xlu0 %v2884_v22  ;;  %v12255_v41 = vsel %vm458_vm0, %v2665_v9, 0.0  ;;  %v2697_v37 = vmul.f32 %v12215_v44, %v12215_v44  ;;  %v2154_v59 = vmul.f32 0.03125, %v17125_v48  ;;  %v12266_v27 = vpop.xlane.xlu1 %1903  ;;  %v12268_v33 = vpop.xlane.xlu0 %1900  ;;  %v17129_v9 = vld [vmem:[#allocation73_spill] sm:$0xff]  ;;  %v17131_v3 = vld [vmem:[#allocation235_spill] sm:$0xff] }
 0x2ef   : > { %17117 = vst [vmem:[#allocation190_spill] sm:$0xff] %v12249_v61  ;;  %17120 = vst [vmem:[#allocation214_spill] sm:$0xff] %v12255_v41  ;;  %v12260_v13 = vsub.f32 %v17121_v47, %v2155_v57  ;;  %v12263_v52 = vsub.f32 %v17123_v10, %v2122_v63  ;;  %v12271_v58 = vsel %vm458_vm0, %v2664_v6, 0.0  ;;  %v12274_v22 = vsub.f32 %v17129_v9, %v2095_v12  ;;  %v17132_v47 = vld [vmem:[#allocation232_spill] sm:$0xff] }
 0x2f0   : > { %17119 = vst [vmem:[#allocation191_spill] sm:$0xff] %v12252_v28  ;;  %17126 = vst [vmem:[#allocation58_spill] sm:$0xff] %v12266_v27  ;;  %v2096_v44 = vmul.f32 0.03125, %v17131_v3  ;;  %v2887_v57 = vsel %vm458_vm0, %v2605_v25, 0.0  ;;  %v2606_v63 = vmul.f32 %v12236_v8, %v12236_v8  ;;  %v12281_v10 = vsub.f32 %v17132_v47, %v2223_v51  ;;  %v17136_v3 = vld [vmem:[#allocation64_spill] sm:$0xff] }
 0x2f1   : > { %17122 = vst [vmem:[#allocation76_spill] sm:$0xff] %v12260_v13  ;;  %17124 = vst [vmem:[#allocation233_spill] sm:$0xff] %v12263_v52  ;;  %v2224_v48 = vmul.f32 0.03125, %v11397_v49  ;;  %v3271_v41 = vsel %vm458_vm0, %v2733_v62, 0.0  ;;  %v2734_v6 = vmul.f32 %v12243_v46, %v12243_v46  ;;  %v2635_v25 = vmul.f32 %v12252_v28, %v12252_v28  ;;  %v17138_v62 = vld [vmem:[#allocation199_spill] sm:$0xff]  ;;  %v17142_v28 = vld [vmem:[#allocation86_spill] sm:$0xff] }
 0x2f2   : > { %17127 = vst [vmem:[#allocation59_spill] sm:$0xff] %v12268_v33  ;;  %17128 = vst [vmem:[#allocation61_spill] sm:$0xff] %v12271_v58  ;;  %v17134_v58 = vld [vmem:[#allocation194_spill] sm:$0xff]  ;;  %3272 = vadd.xlane.f32.xlu1 %v3271_v41  ;;  %2888 = vadd.xlane.f32.xlu0 %v2887_v57  ;;  %v2696_v9 = vmul.f32 %v12249_v61, %v12249_v61  ;;  %v12293_v51 = vsel %vm458_vm0, %v2697_v37, 0.0  ;;  %v12296_v49 = vsub.f32 %v17136_v3, %v2154_v59  ;;  %v12299_v33 = vpop.xlane.xlu1 %1909  ;;  %v12301_v27 = vpop.xlane.xlu0 %1906 }
 0x2f3   : > { %17130 = vst [vmem:[#allocation62_spill] sm:$0xff] %v12274_v22  ;;  %17133 = vst [vmem:[#allocation195_spill] sm:$0xff] %v12281_v10  ;;  %v2187_v12 = vmul.f32 0.03125, %v17134_v58  ;;  %v2186_v47 = vmul.f32 0.03125, %v17138_v62  ;;  %v2634_v41 = vmul.f32 %v12263_v52, %v12263_v52  ;;  %v2667_v58 = vmul.f32 %v12260_v13, %v12260_v13  ;;  %v17141_v57 = vld [vmem:[#allocation230_spill] sm:$0xff] }
 0x2f4   : > { %17135 = vst [vmem:[#allocation73_spill] sm:$0xff] %v12293_v51  ;;  %17137 = vst [vmem:[#allocation235_spill] sm:$0xff] %v12296_v49  ;;  %v2097_v61 = vmul.f32 0.03125, %v17141_v57  ;;  %v12309_v37 = vsub.f32 %v17142_v28, %v2096_v44  ;;  %v2890_v59 = vsel %vm458_vm0, %v2606_v63, 0.0  ;;  %v2607_v3 = vmul.f32 %v12274_v22, %v12274_v22  ;;  %v17144_v51 = vld [vmem:[#allocation237_spill] sm:$0xff]  ;;  %v17147_v44 = vld [vmem:[#allocation202_spill] sm:$0xff] }
 0x2f5   : > { %17139 = vst [vmem:[#allocation232_spill] sm:$0xff] %v12299_v33  ;;  %17140 = vst [vmem:[#allocation194_spill] sm:$0xff] %v12301_v27  ;;  %v2225_v62 = vmul.f32 0.03125, %v11395_v38  ;;  %v12316_v27 = vsub.f32 %v17144_v51, %v2224_v48  ;;  %v3274_v52 = vsel %vm458_vm0, %v2734_v6, 0.0  ;;  %v2735_v13 = vmul.f32 %v12281_v10, %v12281_v10  ;;  %v17145_v33 = vld [vmem:[#allocation63_spill] sm:$0xff]  ;;  %v17149_v48 = vld [vmem:[#allocation66_spill] sm:$0xff] }
 0x2f6   : > { %17143 = vst [vmem:[#allocation64_spill] sm:$0xff] %v12309_v37  ;;  %v12322_v57 = vsub.f32 %v17145_v33, %v2187_v12  ;;  %v2125_v28 = vmul.f32 0.03125, %v17147_v44  ;;  %3275 = vadd.xlane.f32.xlu1 %v3274_v52  ;;  %2891 = vadd.xlane.f32.xlu0 %v2890_v59  ;;  %v12326_v63 = vsel %vm458_vm0, %v2635_v25, 0.0  ;;  %v12329_v38 = vsel %vm458_vm0, %v2696_v9, 0.0  ;;  %v12334_v6 = vpop.xlane.xlu1 %1915  ;;  %v12336_v22 = vpop.xlane.xlu0 %1912  ;;  %v17154_v25 = vld [vmem:[#allocation81_spill] sm:$0xff]  ;;  %v17156_v9 = vld [vmem:[#allocation251_spill] sm:$0xff] }
 0x2f7   : > { %17148 = vst [vmem:[#allocation230_spill] sm:$0xff] %v12329_v38  ;;  %v12332_v51 = vsub.f32 %v17149_v48, %v2186_v47  ;;  %17151 = vst [vmem:[#allocation237_spill] sm:$0xff] %v12334_v6  ;;  %v12339_v33 = vsel %vm458_vm0, %v2634_v41, 0.0  ;;  %v2666_v52 = vmul.f32 %v12296_v49, %v12296_v49  ;;  %v12344_v12 = vsel %vm458_vm0, %v2667_v58, 0.0  ;;  %v17157_v38 = vld [vmem:[#allocation236_spill] sm:$0xff]  ;;  %v17162_v6 = vld [vmem:[#allocation207_spill] sm:$0xff] }
 0x2f8   : > { %17146 = vst [vmem:[#allocation199_spill] sm:$0xff] %v12322_v57  ;;  %17152 = vst [vmem:[#allocation63_spill] sm:$0xff] %v12336_v22  ;;  %v12347_v59 = vsub.f32 %v17154_v25, %v2097_v61  ;;  %v2098_v44 = vmul.f32 0.03125, %v17156_v9  ;;  %v2893_v47 = vsel %vm458_vm0, %v2607_v3, 0.0  ;;  %v2608_v48 = vmul.f32 %v12309_v37, %v12309_v37  ;;  %v17161_v25 = vld [vmem:[#allocation206_spill] sm:$0xff] }
 0x2f9   : > { %17150 = vst [vmem:[#allocation86_spill] sm:$0xff] %v12332_v51  ;;  %17153 = vst [vmem:[#allocation202_spill] sm:$0xff] %v12344_v12  ;;  %v12354_v22 = vsub.f32 %v17157_v38, %v2225_v62  ;;  %v2226_v41 = vmul.f32 0.03125, %v11413_v2  ;;  %v3277_v49 = vsel %vm458_vm0, %v2735_v13, 0.0  ;;  %v2736_v58 = vmul.f32 %v12316_v27, %v12316_v27  ;;  %v17159_v12 = vld [vmem:[#allocation67_spill] sm:$0xff]  ;;  %v17163_v38 = vld [vmem:[#allocation210_spill] sm:$0xff] }
 0x2fa   : > { %17155 = vst [vmem:[#allocation66_spill] sm:$0xff] %v12347_v59  ;;  %v12361_v61 = vsub.f32 %v17159_v12, %v2125_v28  ;;  %v2157_v9 = vmul.f32 0.03125, %v17161_v25  ;;  %v2124_v3 = vmul.f32 0.03125, %v17162_v6  ;;  %3278 = vadd.xlane.f32.xlu1 %v3277_v49  ;;  %2894 = vadd.xlane.f32.xlu0 %v2893_v47  ;;  %v2699_v62 = vmul.f32 %v12322_v57, %v12322_v57  ;;  %v17164_v2 = vld [vmem:[#allocation211_spill] sm:$0xff]  ;;  %v12369_v13 = vpop.xlane.xlu1 %1921  ;;  %v12371_v8 = vpop.xlane.xlu0 %1918  ;;  %v17168_v6 = vld [vmem:[#allocation246_spill] sm:$0xff] }
 0x2fb   : > { %17158 = vst [vmem:[#allocation81_spill] sm:$0xff] %v12354_v22  ;;  %v2189_v37 = vmul.f32 0.03125, %v17163_v38  ;;  %v2156_v10 = vmul.f32 0.03125, %v17164_v2  ;;  %17165 = vst [vmem:[#allocation236_spill] sm:$0xff] %v12369_v13  ;;  %v12374_v28 = vsel %vm458_vm0, %v2666_v52, 0.0  ;;  %v2698_v12 = vmul.f32 %v12332_v51, %v12332_v51  ;;  %v17169_v47 = vld [vmem:[#allocation102_spill] sm:$0xff] }
 0x2fc   : > { %17160 = vst [vmem:[#allocation251_spill] sm:$0xff] %v12361_v61  ;;  %17166 = vst [vmem:[#allocation67_spill] sm:$0xff] %v12371_v8  ;;  %v2099_v49 = vmul.f32 0.03125, %v17168_v6  ;;  %v12380_v25 = vsub.f32 %v17169_v47, %v2098_v44  ;;  %v2896_v57 = vsel %vm458_vm0, %v2608_v48, 0.0  ;;  %v2609_v38 = vmul.f32 %v12347_v59, %v12347_v59  ;;  %v17171_v13 = vld [vmem:[#allocation241_spill] sm:$0xff]  ;;  %v17175_v44 = vld [vmem:[#allocation70_spill] sm:$0xff] }
 0x2fd   : > { %17167 = vst [vmem:[#allocation206_spill] sm:$0xff] %v12374_v28  ;;  %v2227_v2 = vmul.f32 0.03125, %v11411_v31  ;;  %v12387_v8 = vsub.f32 %v17171_v13, %v2226_v41  ;;  %v3280_v52 = vsel %vm458_vm0, %v2736_v58, 0.0  ;;  %v2737_v51 = vmul.f32 %v12354_v22, %v12354_v22  ;;  %v17173_v28 = vld [vmem:[#allocation69_spill] sm:$0xff]  ;;  %v17178_v41 = vld [vmem:[#allocation71_spill] sm:$0xff]  ;;  %v17180_v58 = vld [vmem:[#allocation72_spill] sm:$0xff] }
 0x2fe   : > { %17170 = vst [vmem:[#allocation207_spill] sm:$0xff] %v12380_v25  ;;  %v12393_v6 = vsub.f32 %v17173_v28, %v2157_v9  ;;  %v12396_v47 = vsub.f32 %v17175_v44, %v2124_v3  ;;  %3281 = vadd.xlane.f32.xlu1 %v3280_v52  ;;  %2897 = vadd.xlane.f32.xlu0 %v2896_v57  ;;  %v12401_v31 = vsel %vm458_vm0, %v2699_v62, 0.0  ;;  %v17182_v22 = vld [vmem:[#allocation215_spill] sm:$0xff]  ;;  %v12410_v28 = vpop.xlane.xlu1 %1927  ;;  %v12412_v3 = vpop.xlane.xlu0 %1924  ;;  %v12415_v57 = vsel %vm458_vm0, %v2698_v12, 0.0  ;;  %v17186_v52 = vld [vmem:[#allocation97_spill] sm:$0xff] }
 0x2ff   : > { %17172 = vst [vmem:[#allocation210_spill] sm:$0xff] %v12387_v8  ;;  %v2637_v48 = vmul.f32 %v12361_v61, %v12361_v61  ;;  %17177 = vst [vmem:[#allocation102_spill] sm:$0xff] %v12401_v31  ;;  %v12404_v13 = vsub.f32 %v17178_v41, %v2189_v37  ;;  %v12407_v59 = vsub.f32 %v17180_v58, %v2156_v10  ;;  %v2188_v9 = vmul.f32 0.03125, %v17182_v22  ;;  %v17188_v62 = vld [vmem:[#allocation267_spill] sm:$0xff]  ;;  %v17189_v41 = vld [vmem:[#allocation240_spill] sm:$0xff] }
 0x300   : > { %17174 = vst [vmem:[#allocation211_spill] sm:$0xff] %v12393_v6  ;;  %17176 = vst [vmem:[#allocation246_spill] sm:$0xff] %v12396_v47  ;;  %v12418_v44 = vsub.f32 %v17186_v52, %v2099_v49  ;;  %v2100_v31 = vmul.f32 0.03125, %v17188_v62  ;;  %v2899_v37 = vsel %vm458_vm0, %v2609_v38, 0.0  ;;  %v2610_v10 = vmul.f32 %v12380_v25, %v12380_v25  ;;  %v17192_v62 = vld [vmem:[#allocation74_spill] sm:$0xff] }
 0x301   : > { %17179 = vst [vmem:[#allocation241_spill] sm:$0xff] %v12404_v13  ;;  %17181 = vst [vmem:[#allocation69_spill] sm:$0xff] %v12407_v59  ;;  %v12425_v58 = vsub.f32 %v17189_v41, %v2227_v2  ;;  %v2228_v22 = vmul.f32 0.03125, %v11429_v5  ;;  %v3283_v61 = vsel %vm458_vm0, %v2737_v51, 0.0  ;;  %v2738_v12 = vmul.f32 %v12387_v8, %v12387_v8  ;;  %v17194_v51 = vld [vmem:[#allocation223_spill] sm:$0xff] }
 0x302   : > { %17183 = vst [vmem:[#allocation70_spill] sm:$0xff] %v12410_v28  ;;  %17184 = vst [vmem:[#allocation71_spill] sm:$0xff] %v12412_v3  ;;  %3284 = vadd.xlane.f32.xlu1 %v3283_v61  ;;  %2900 = vadd.xlane.f32.xlu0 %v2899_v37  ;;  %v2636_v38 = vmul.f32 %v12396_v47, %v12396_v47  ;;  %v12435_v52 = vsel %vm458_vm0, %v2637_v48, 0.0  ;;  %v2669_v2 = vmul.f32 %v12393_v6, %v12393_v6  ;;  %v12443_v3 = vpop.xlane.xlu1 %1933  ;;  %v12445_v28 = vpop.xlane.xlu0 %1930  ;;  %v17197_v48 = vld [vmem:[#allocation262_spill] sm:$0xff]  ;;  %v17200_v6 = vld [vmem:[#allocation245_spill] sm:$0xff] }
 0x303   : > { %17185 = vst [vmem:[#allocation72_spill] sm:$0xff] %v12415_v57  ;;  %17187 = vst [vmem:[#allocation215_spill] sm:$0xff] %v12418_v44  ;;  %v17191_v57 = vld [vmem:[#allocation218_spill] sm:$0xff]  ;;  %v12440_v5 = vsub.f32 %v17192_v62, %v2188_v9  ;;  %v2126_v41 = vmul.f32 0.03125, %v17194_v51  ;;  %v2668_v61 = vmul.f32 %v12407_v59, %v12407_v59  ;;  %v2101_v37 = vmul.f32 0.03125, %v17197_v48 }
 0x304   : > { %17190 = vst [vmem:[#allocation97_spill] sm:$0xff] %v12425_v58  ;;  %v2127_v49 = vmul.f32 0.03125, %v17191_v57  ;;  %17195 = vst [vmem:[#allocation240_spill] sm:$0xff] %v12443_v3  ;;  %v2701_v57 = vmul.f32 %v12404_v13, %v12404_v13  ;;  %v17198_v47 = vld [vmem:[#allocation118_spill] sm:$0xff]  ;;  %v2902_v9 = vsel %vm458_vm0, %v2610_v10, 0.0  ;;  %v2611_v62 = vmul.f32 %v12418_v44, %v12418_v44  ;;  %v17202_v3 = vld [vmem:[#allocation75_spill] sm:$0xff] }
 0x305   : > { %17193 = vst [vmem:[#allocation267_spill] sm:$0xff] %v12440_v5  ;;  %17196 = vst [vmem:[#allocation218_spill] sm:$0xff] %v12445_v28  ;;  %v12453_v25 = vsub.f32 %v17198_v47, %v2100_v31  ;;  %v2229_v51 = vmul.f32 0.03125, %v11427_v20  ;;  %v12460_v28 = vsub.f32 %v17200_v6, %v2228_v22  ;;  %v3286_v59 = vsel %vm458_vm0, %v2738_v12, 0.0  ;;  %v17204_v47 = vld [vmem:[#allocation222_spill] sm:$0xff] }
 0x306   : > { %v2739_v13 = vmul.f32 %v12425_v58, %v12425_v58  ;;  %v12466_v48 = vsub.f32 %v17202_v3, %v2127_v49  ;;  %v2159_v31 = vmul.f32 0.03125, %v17204_v47  ;;  %3287 = vadd.xlane.f32.xlu1 %v3286_v59  ;;  %2903 = vadd.xlane.f32.xlu0 %v2902_v9  ;;  %v12470_v10 = vsel %vm458_vm0, %v2636_v38, 0.0  ;;  %v17206_v6 = vld [vmem:[#allocation78_spill] sm:$0xff]  ;;  %v12478_v12 = vpop.xlane.xlu1 %1939  ;;  %v12480_v44 = vpop.xlane.xlu0 %1936  ;;  %v17212_v38 = vld [vmem:[#allocation113_spill] sm:$0xff] }
 0x307   : > { %17199 = vst [vmem:[#allocation74_spill] sm:$0xff] %v12453_v25  ;;  %17201 = vst [vmem:[#allocation223_spill] sm:$0xff] %v12460_v28  ;;  %v12473_v20 = vsel %vm458_vm0, %v2669_v2, 0.0  ;;  %v12476_v22 = vsub.f32 %v17206_v6, %v2126_v41  ;;  %v12483_v3 = vsel %vm458_vm0, %v2668_v61, 0.0  ;;  %v2700_v59 = vmul.f32 %v12440_v5, %v12440_v5  ;;  %v17214_v2 = vld [vmem:[#allocation283_spill] sm:$0xff] }
 0x308   : > { %17203 = vst [vmem:[#allocation262_spill] sm:$0xff] %v12466_v48  ;;  %17205 = vst [vmem:[#allocation118_spill] sm:$0xff] %v12473_v20  ;;  %v12488_v49 = vsel %vm458_vm0, %v2701_v57, 0.0  ;;  %v12491_v9 = vsub.f32 %v17212_v38, %v2101_v37  ;;  %v2102_v47 = vmul.f32 0.03125, %v17214_v2  ;;  %v2905_v41 = vsel %vm458_vm0, %v2611_v62, 0.0  ;;  %v17215_v20 = vld [vmem:[#allocation244_spill] sm:$0xff] }
 0x309   : > { %17207 = vst [vmem:[#allocation245_spill] sm:$0xff] %v12476_v22  ;;  %17208 = vst [vmem:[#allocation75_spill] sm:$0xff] %v12478_v12  ;;  %v2612_v6 = vmul.f32 %v12453_v25, %v12453_v25  ;;  %v2230_v61 = vmul.f32 0.03125, %v11445_v14  ;;  %v3289_v5 = vsel %vm458_vm0, %v2739_v13, 0.0  ;;  %v2740_v57 = vmul.f32 %v12460_v28, %v12460_v28  ;;  %v17219_v38 = vld [vmem:[#allocation226_spill] sm:$0xff] }
 0x30a   : > { %17209 = vst [vmem:[#allocation222_spill] sm:$0xff] %v12480_v44  ;;  %17210 = vst [vmem:[#allocation78_spill] sm:$0xff] %v12483_v3  ;;  %v12498_v44 = vsub.f32 %v17215_v20, %v2229_v51  ;;  %v2191_v2 = vmul.f32 0.03125, %v17219_v38  ;;  %v17220_v3 = vld [vmem:[#allocation227_spill] sm:$0xff]  ;;  %3290 = vadd.xlane.f32.xlu1 %v3289_v5  ;;  %2906 = vadd.xlane.f32.xlu0 %v2905_v41  ;;  %v2639_v51 = vmul.f32 %v12466_v48, %v12466_v48  ;;  %v17222_v14 = vld [vmem:[#allocation234_spill] sm:$0xff]  ;;  %v12513_v13 = vpop.xlane.xlu1 %1945  ;;  %v12515_v58 = vpop.xlane.xlu0 %1942 }
 0x30b   : > { %17211 = vst [vmem:[#allocation397_spill] sm:$0xff] %v12488_v49  ;;  %17213 = vst [vmem:[#allocation113_spill] sm:$0xff] %v12491_v9  ;;  %v17217_v49 = vld [vmem:[#allocation77_spill] sm:$0xff]  ;;  %v2158_v62 = vmul.f32 0.03125, %v17220_v3  ;;  %v17221_v20 = vld [vmem:[#allocation231_spill] sm:$0xff]  ;;  %v2129_v25 = vmul.f32 0.03125, %v17222_v14 }
 0x30c   : > { %17216 = vst [vmem:[#allocation283_spill] sm:$0xff] %v12498_v44  ;;  %v12505_v37 = vsub.f32 %v17217_v49, %v2159_v31  ;;  %v2190_v12 = vmul.f32 0.03125, %v17221_v20  ;;  %17223 = vst [vmem:[#allocation77_spill] sm:$0xff] %v12513_v13  ;;  %v2638_v31 = vmul.f32 %v12476_v22, %v12476_v22  ;;  %v12520_v49 = vsel %vm458_vm0, %v2700_v59, 0.0  ;;  %v17226_v3 = vld [vmem:[#allocation278_spill] sm:$0xff]  ;;  %v17227_v41 = vld [vmem:[#allocation136_spill] sm:$0xff] }
 0x30d   : > { %17224 = vst [vmem:[#allocation226_spill] sm:$0xff] %v12515_v58  ;;  %17225 = vst [vmem:[#allocation227_spill] sm:$0xff] %v12520_v49  ;;  %v2103_v5 = vmul.f32 0.03125, %v17226_v3  ;;  %v12524_v38 = vsub.f32 %v17227_v41, %v2102_v47  ;;  %v2908_v48 = vsel %vm458_vm0, %v2612_v6, 0.0  ;;  %v2613_v20 = vmul.f32 %v12491_v9, %v12491_v9  ;;  %v17229_v13 = vld [vmem:[#allocation249_spill] sm:$0xff]  ;;  %v17230_v49 = vld [vmem:[#allocation79_spill] sm:$0xff] }
 0x30e   : > { %17218 = vst [vmem:[#allocation244_spill] sm:$0xff] %v12505_v37  ;;  %v2231_v14 = vmul.f32 0.03125, %v11443_v50  ;;  %v12531_v58 = vsub.f32 %v17229_v13, %v2230_v61  ;;  %v3292_v22 = vsel %vm458_vm0, %v2740_v57, 0.0  ;;  %v2741_v59 = vmul.f32 %v12498_v44, %v12498_v44  ;;  %v17232_v47 = vld [vmem:[#allocation80_spill] sm:$0xff]  ;;  %2909 = vadd.xlane.f32.xlu0 %v2908_v48  ;;  %v17234_v61 = vld [vmem:[#allocation82_spill] sm:$0xff]  ;;  %v17236_v57 = vld [vmem:[#allocation85_spill] sm:$0xff] }
 0x30f   : > { %17228 = vst [vmem:[#allocation231_spill] sm:$0xff] %v12524_v38  ;;  %v12537_v3 = vsub.f32 %v17230_v49, %v2191_v2  ;;  %v12540_v41 = vsub.f32 %v17232_v47, %v2158_v62  ;;  %3293 = vadd.xlane.f32.xlu1 %v3292_v22  ;;  %v12543_v6 = vsel %vm458_vm0, %v2639_v51, 0.0  ;;  %v2671_v50 = vmul.f32 %v12505_v37, %v12505_v37  ;;  %v17238_v44 = vld [vmem:[#allocation238_spill] sm:$0xff]  ;;  %v17239_v49 = vld [vmem:[#allocation239_spill] sm:$0xff]  ;;  %v12555_v62 = vpop.xlane.xlu1 %1951  ;;  %v12557_v22 = vpop.xlane.xlu0 %1948 }
 0x310   : > { %v12548_v13 = vsub.f32 %v17234_v61, %v2190_v12  ;;  %v12551_v9 = vsub.f32 %v17236_v57, %v2129_v25  ;;  %v2161_v2 = vmul.f32 0.03125, %v17238_v44  ;;  %v2128_v28 = vmul.f32 0.03125, %v17239_v49  ;;  %17240 = vst [vmem:[#allocation79_spill] sm:$0xff] %v12555_v62  ;;  %17241 = vst [vmem:[#allocation80_spill] sm:$0xff] %v12557_v22  ;;  %v17242_v48 = vld [vmem:[#allocation130_spill] sm:$0xff]  ;;  %v17244_v47 = vld [vmem:[#allocation299_spill] sm:$0xff] }
 0x311   : > { %17231 = vst [vmem:[#allocation234_spill] sm:$0xff] %v12537_v3  ;;  %17233 = vst [vmem:[#allocation278_spill] sm:$0xff] %v12540_v41  ;;  %v12560_v51 = vsub.f32 %v17242_v48, %v2103_v5  ;;  %v2104_v8 = vmul.f32 0.03125, %v17244_v47  ;;  %v2911_v37 = vsel %vm458_vm0, %v2613_v20, 0.0  ;;  %v2614_v12 = vmul.f32 %v12524_v38, %v12524_v38  ;;  %v17245_v25 = vld [vmem:[#allocation248_spill] sm:$0xff]  ;;  %v17255_v22 = vld [vmem:[#allocation154_spill] sm:$0xff] }
 0x312   : > { %17235 = vst [vmem:[#allocation136_spill] sm:$0xff] %v12548_v13  ;;  %17237 = vst [vmem:[#allocation249_spill] sm:$0xff] %v12551_v9  ;;  %v12567_v61 = vsub.f32 %v17245_v25, %v2231_v14  ;;  %v2232_v44 = vmul.f32 0.03125, %v11461_v35  ;;  %v3295_v57 = vsel %vm458_vm0, %v2741_v59, 0.0  ;;  %v2742_v49 = vmul.f32 %v12531_v58, %v12531_v58  ;;  %2912 = vadd.xlane.f32.xlu0 %v2911_v37  ;;  %v17248_v35 = vld [vmem:[#allocation89_spill] sm:$0xff]  ;;  %v17250_v59 = vld [vmem:[#allocation90_spill] sm:$0xff] }
 0x313   : > { %17243 = vst [vmem:[#allocation82_spill] sm:$0xff] %v12560_v51  ;;  %3296 = vadd.xlane.f32.xlu1 %v3295_v57  ;;  %v12574_v5 = vsel %vm458_vm0, %v2638_v31, 0.0  ;;  %v2670_v20 = vmul.f32 %v12540_v41, %v12540_v41  ;;  %v12579_v48 = vsel %vm458_vm0, %v2671_v50, 0.0  ;;  %v2703_v14 = vmul.f32 %v12537_v3, %v12537_v3  ;;  %v12589_v57 = vpop.xlane.xlu1 %1957  ;;  %v12591_v37 = vpop.xlane.xlu0 %1954  ;;  %v17254_v41 = vld [vmem:[#allocation294_spill] sm:$0xff]  ;;  %v17260_v62 = vld [vmem:[#allocation243_spill] sm:$0xff] }
 0x314   : > { %17246 = vst [vmem:[#allocation85_spill] sm:$0xff] %v12567_v61  ;;  %17247 = vst [vmem:[#allocation238_spill] sm:$0xff] %v12579_v48  ;;  %v12584_v47 = vsub.f32 %v17248_v35, %v2161_v2  ;;  %v12587_v25 = vsub.f32 %v17250_v59, %v2128_v28  ;;  %v2641_v31 = vmul.f32 %v12551_v9, %v12551_v9  ;;  %v2105_v48 = vmul.f32 0.03125, %v17254_v41  ;;  %v17257_v59 = vld [vmem:[#allocation253_spill] sm:$0xff] }
 0x315   : > { %17252 = vst [vmem:[#allocation299_spill] sm:$0xff] %v12589_v57  ;;  %17253 = vst [vmem:[#allocation248_spill] sm:$0xff] %v12591_v37  ;;  %v2702_v50 = vmul.f32 %v12548_v13, %v12548_v13  ;;  %v12599_v3 = vsub.f32 %v17255_v22, %v2104_v8  ;;  %v2914_v2 = vsel %vm458_vm0, %v2614_v12, 0.0  ;;  %v2615_v28 = vmul.f32 %v12560_v51, %v12560_v51  ;;  %v17259_v57 = vld [vmem:[#allocation242_spill] sm:$0xff] }
 0x316   : > { %17249 = vst [vmem:[#allocation239_spill] sm:$0xff] %v12584_v47  ;;  %17251 = vst [vmem:[#allocation130_spill] sm:$0xff] %v12587_v25  ;;  %v2233_v35 = vmul.f32 0.03125, %v11459_v17  ;;  %v12606_v37 = vsub.f32 %v17257_v59, %v2232_v44  ;;  %v3298_v9 = vsel %vm458_vm0, %v2742_v49, 0.0  ;;  %v2743_v13 = vmul.f32 %v12567_v61, %v12567_v61  ;;  %2915 = vadd.xlane.f32.xlu0 %v2914_v2  ;;  %v17276_v51 = vld [vmem:[#allocation250_spill] sm:$0xff] }
 0x317   : > { %17256 = vst [vmem:[#allocation89_spill] sm:$0xff] %v12599_v3  ;;  %v2193_v41 = vmul.f32 0.03125, %v17259_v57  ;;  %v2160_v8 = vmul.f32 0.03125, %v17260_v62  ;;  %3299 = vadd.xlane.f32.xlu1 %v3298_v9  ;;  %v12614_v22 = vsel %vm458_vm0, %v2670_v20, 0.0  ;;  %v12617_v12 = vsel %vm458_vm0, %v2703_v14, 0.0  ;;  %v12619_v17 = vpop.xlane.xlu1 %1963  ;;  %v12621_v44 = vpop.xlane.xlu0 %1960  ;;  %v17266_v20 = vld [vmem:[#allocation148_spill] sm:$0xff] }
 0x318   : > { %17258 = vst [vmem:[#allocation90_spill] sm:$0xff] %v12606_v37  ;;  %17261 = vst [vmem:[#allocation294_spill] sm:$0xff] %v12614_v22  ;;  %v2640_v49 = vmul.f32 %v12587_v25, %v12587_v25  ;;  %v12626_v59 = vsel %vm458_vm0, %v2641_v31, 0.0  ;;  %v2673_v9 = vmul.f32 %v12584_v47, %v12584_v47  ;;  %v12631_v62 = vsel %vm458_vm0, %v2702_v50, 0.0  ;;  %v17268_v14 = vld [vmem:[#allocation315_spill] sm:$0xff]  ;;  %v17269_v25 = vld [vmem:[#allocation252_spill] sm:$0xff] }
 0x319   : > { %17262 = vst [vmem:[#allocation154_spill] sm:$0xff] %v12617_v12  ;;  %17263 = vst [vmem:[#allocation253_spill] sm:$0xff] %v12619_v17  ;;  %v12634_v57 = vsub.f32 %v17266_v20, %v2105_v48  ;;  %v2106_v2 = vmul.f32 0.03125, %v17268_v14  ;;  %v2917_v12 = vsel %vm458_vm0, %v2615_v28, 0.0  ;;  %v12641_v17 = vsub.f32 %v17269_v25, %v2233_v35  ;;  %v17273_v20 = vld [vmem:[#allocation94_spill] sm:$0xff]  ;;  %v17275_v28 = vld [vmem:[#allocation247_spill] sm:$0xff] }
 0x31a   : > { %17264 = vst [vmem:[#allocation242_spill] sm:$0xff] %v12621_v44  ;;  %17265 = vst [vmem:[#allocation243_spill] sm:$0xff] %v12631_v62  ;;  %v2616_v44 = vmul.f32 %v12599_v3, %v12599_v3  ;;  %v2234_v31 = vmul.f32 0.03125, %v11477_v53  ;;  %v3301_v47 = vsel %vm458_vm0, %v2743_v13, 0.0  ;;  %v2744_v50 = vmul.f32 %v12606_v37, %v12606_v37  ;;  %v17271_v62 = vld [vmem:[#allocation93_spill] sm:$0xff]  ;;  %2918 = vadd.xlane.f32.xlu0 %v2917_v12  ;;  %v17277_v25 = vld [vmem:[#allocation254_spill] sm:$0xff] }
 0x31b   : > { %17267 = vst [vmem:[#allocation148_spill] sm:$0xff] %v12634_v57  ;;  %17270 = vst [vmem:[#allocation315_spill] sm:$0xff] %v12641_v17  ;;  %v12648_v48 = vsub.f32 %v17271_v62, %v2193_v41  ;;  %v12651_v14 = vsub.f32 %v17273_v20, %v2160_v8  ;;  %v2192_v22 = vmul.f32 0.03125, %v17275_v28  ;;  %v2131_v3 = vmul.f32 0.03125, %v17276_v51  ;;  %3302 = vadd.xlane.f32.xlu1 %v3301_v47  ;;  %v17278_v53 = vld [vmem:[#allocation255_spill] sm:$0xff]  ;;  %v12657_v13 = vpop.xlane.xlu1 %1969  ;;  %v12659_v38 = vpop.xlane.xlu0 %1966  ;;  %v17282_v62 = vld [vmem:[#allocation310_spill] sm:$0xff] }
 0x31c   : > { %v2163_v35 = vmul.f32 0.03125, %v17277_v25  ;;  %v2130_v61 = vmul.f32 0.03125, %v17278_v53  ;;  %17279 = vst [vmem:[#allocation94_spill] sm:$0xff] %v12657_v13  ;;  %17280 = vst [vmem:[#allocation247_spill] sm:$0xff] %v12659_v38  ;;  %v12662_v41 = vsel %vm458_vm0, %v2640_v49, 0.0  ;;  %v12665_v8 = vsel %vm458_vm0, %v2673_v9, 0.0 }
 0x31d   : > { %17272 = vst [vmem:[#allocation252_spill] sm:$0xff] %v12648_v48  ;;  %17274 = vst [vmem:[#allocation93_spill] sm:$0xff] %v12651_v14  ;;  %v2107_v20 = vmul.f32 0.03125, %v17282_v62  ;;  %v17283_v28 = vld [vmem:[#allocation172_spill] sm:$0xff]  ;;  %v2920_v47 = vsel %vm458_vm0, %v2616_v44, 0.0  ;;  %v2617_v12 = vmul.f32 %v12634_v57, %v12634_v57  ;;  %v2235_v25 = vmul.f32 0.03125, %v11475_v30 }
 0x31e   : > { %17281 = vst [vmem:[#allocation250_spill] sm:$0xff] %v12665_v8  ;;  %v12669_v51 = vsub.f32 %v17283_v28, %v2106_v2  ;;  %v17285_v53 = vld [vmem:[#allocation257_spill] sm:$0xff]  ;;  %v3304_v49 = vsel %vm458_vm0, %v2744_v50, 0.0  ;;  %v2745_v9 = vmul.f32 %v12641_v17, %v12641_v17  ;;  %v17286_v8 = vld [vmem:[#allocation98_spill] sm:$0xff]  ;;  %v17290_v44 = vld [vmem:[#allocation259_spill] sm:$0xff]  ;;  %2921 = vadd.xlane.f32.xlu0 %v2920_v47  ;;  %v2672_v30 = vmul.f32 %v12651_v14, %v12651_v14 }
 0x31f   : > { %v12676_v38 = vsub.f32 %v17285_v53, %v2234_v31  ;;  %v12682_v62 = vsub.f32 %v17286_v8, %v2192_v22  ;;  %v17288_v2 = vld [vmem:[#allocation101_spill] sm:$0xff]  ;;  %v2162_v13 = vmul.f32 0.03125, %v17290_v44  ;;  %3305 = vadd.xlane.f32.xlu1 %v3304_v49  ;;  %v17293_v50 = vld [vmem:[#allocation106_spill] sm:$0xff]  ;;  %v12697_v22 = vpop.xlane.xlu1 %1975  ;;  %v12699_v8 = vpop.xlane.xlu0 %1972 }
 0x320   : > { %17284 = vst [vmem:[#allocation254_spill] sm:$0xff] %v12669_v51  ;;  %v12685_v28 = vsub.f32 %v17288_v2, %v2131_v3  ;;  %v17291_v31 = vld [vmem:[#allocation105_spill] sm:$0xff]  ;;  %v12694_v57 = vsub.f32 %v17293_v50, %v2130_v61  ;;  %v17295_v17 = vld [vmem:[#allocation258_spill] sm:$0xff]  ;;  %17296 = vst [vmem:[#allocation98_spill] sm:$0xff] %v12697_v22  ;;  %v2705_v3 = vmul.f32 %v12648_v48, %v12648_v48  ;;  %v3307_v14 = vsel %vm458_vm0, %v2745_v9, 0.0 }
 0x321   : > { %17287 = vst [vmem:[#allocation255_spill] sm:$0xff] %v12682_v62  ;;  %v12691_v53 = vsub.f32 %v17291_v31, %v2163_v35  ;;  %v2195_v37 = vmul.f32 0.03125, %v17295_v17  ;;  %17297 = vst [vmem:[#allocation101_spill] sm:$0xff] %v12699_v8  ;;  %v17298_v49 = vld [vmem:[#allocation166_spill] sm:$0xff]  ;;  %v17300_v2 = vld [vmem:[#allocation328_spill] sm:$0xff]  ;;  %v2923_v35 = vsel %vm458_vm0, %v2617_v12, 0.0  ;;  %v2618_v61 = vmul.f32 %v12669_v51, %v12669_v51 }
 0x322   : > { %17289 = vst [vmem:[#allocation310_spill] sm:$0xff] %v12685_v28  ;;  %17294 = vst [vmem:[#allocation257_spill] sm:$0xff] %v12694_v57  ;;  %v12704_v47 = vsub.f32 %v17298_v49, %v2107_v20  ;;  %v2108_v44 = vmul.f32 0.03125, %v17300_v2  ;;  %v17301_v31 = vld [vmem:[#allocation256_spill] sm:$0xff]  ;;  %v2236_v17 = vmul.f32 0.03125, %v11493_v56  ;;  %v2746_v48 = vmul.f32 %v12676_v38, %v12676_v38  ;;  %v17303_v8 = vld [vmem:[#allocation110_spill] sm:$0xff]  ;;  %2924 = vadd.xlane.f32.xlu0 %v2923_v35 }
 0x323   : > { %17292 = vst [vmem:[#allocation172_spill] sm:$0xff] %v12691_v53  ;;  %v12711_v50 = vsub.f32 %v17301_v31, %v2235_v25  ;;  %v12718_v20 = vsub.f32 %v17303_v8, %v2162_v13  ;;  %3308 = vadd.xlane.f32.xlu1 %v3307_v14  ;;  %v2643_v12 = vmul.f32 %v12685_v28, %v12685_v28  ;;  %v12723_v49 = vsel %vm458_vm0, %v2672_v30, 0.0  ;;  %v17306_v56 = vld [vmem:[#allocation109_spill] sm:$0xff]  ;;  %v12730_v9 = vpop.xlane.xlu1 %1981  ;;  %v12732_v31 = vpop.xlane.xlu0 %1978  ;;  %v17311_v30 = vld [vmem:[#allocation324_spill] sm:$0xff] }
 0x324   : > { %17299 = vst [vmem:[#allocation259_spill] sm:$0xff] %v12704_v47  ;;  %17305 = vst [vmem:[#allocation258_spill] sm:$0xff] %v12723_v49  ;;  %v2704_v25 = vmul.f32 %v12682_v62, %v12682_v62  ;;  %v12728_v2 = vsub.f32 %v17306_v56, %v2195_v37  ;;  %v2642_v14 = vmul.f32 %v12694_v57, %v12694_v57  ;;  %v12739_v8 = vsel %vm458_vm0, %v2705_v3, 0.0  ;;  %v17312_v28 = vld [vmem:[#allocation189_spill] sm:$0xff] }
 0x325   : > { %17302 = vst [vmem:[#allocation105_spill] sm:$0xff] %v12711_v50  ;;  %17304 = vst [vmem:[#allocation106_spill] sm:$0xff] %v12718_v20  ;;  %v2675_v13 = vmul.f32 %v12691_v53, %v12691_v53  ;;  %v2109_v35 = vmul.f32 0.03125, %v17311_v30  ;;  %v12743_v62 = vsub.f32 %v17312_v28, %v2108_v44  ;;  %v2926_v37 = vsel %vm458_vm0, %v2618_v61, 0.0  ;;  %v17318_v61 = vld [vmem:[#allocation266_spill] sm:$0xff] }
 0x326   : > { %17307 = vst [vmem:[#allocation166_spill] sm:$0xff] %v12728_v2  ;;  %17308 = vst [vmem:[#allocation328_spill] sm:$0xff] %v12730_v9  ;;  %v2619_v56 = vmul.f32 %v12704_v47, %v12704_v47  ;;  %v17314_v9 = vld [vmem:[#allocation261_spill] sm:$0xff]  ;;  %v3310_v53 = vsel %vm458_vm0, %v2746_v48, 0.0  ;;  %v2747_v3 = vmul.f32 %v12711_v50, %v12711_v50  ;;  %2927 = vadd.xlane.f32.xlu0 %v2926_v37  ;;  %v12757_v28 = vsel %vm458_vm0, %v2643_v12, 0.0 }
 0x327   : > { %17309 = vst [vmem:[#allocation256_spill] sm:$0xff] %v12732_v31  ;;  %17310 = vst [vmem:[#allocation110_spill] sm:$0xff] %v12739_v8  ;;  %v2237_v31 = vmul.f32 0.03125, %v11491_v11  ;;  %v12750_v57 = vsub.f32 %v17314_v9, %v2236_v17  ;;  %v17316_v8 = vld [vmem:[#allocation263_spill] sm:$0xff]  ;;  %3311 = vadd.xlane.f32.xlu1 %v3310_v53  ;;  %v2674_v44 = vmul.f32 %v12718_v20, %v12718_v20  ;;  %v12762_v11 = vsel %vm458_vm0, %v2704_v25, 0.0  ;;  %v12765_v9 = vpop.xlane.xlu1 %1987  ;;  %v12767_v48 = vpop.xlane.xlu0 %1984 }
 0x328   : > { %17313 = vst [vmem:[#allocation109_spill] sm:$0xff] %v12743_v62  ;;  %v2194_v30 = vmul.f32 0.03125, %v17316_v8  ;;  %17317 = vst [vmem:[#allocation189_spill] sm:$0xff] %v12762_v11  ;;  %v2133_v17 = vmul.f32 0.03125, %v17318_v61  ;;  %v12770_v22 = vsel %vm458_vm0, %v2642_v14, 0.0  ;;  %v12773_v53 = vsel %vm458_vm0, %v2675_v13, 0.0 }
 0x329   : > { %17315 = vst [vmem:[#allocation324_spill] sm:$0xff] %v12750_v57  ;;  %17319 = vst [vmem:[#allocation261_spill] sm:$0xff] %v12765_v9  ;;  %v2707_v12 = vmul.f32 %v12728_v2, %v12728_v2  ;;  %v17322_v8 = vld [vmem:[#allocation184_spill] sm:$0xff]  ;;  %v2110_v25 = vmul.f32 0.03125, %v11269_v7  ;;  %v2929_v61 = vsel %vm458_vm0, %v2619_v56, 0.0  ;;  %v2620_v20 = vmul.f32 %v12743_v62, %v12743_v62  ;;  %v17326_v9 = vld [vmem:[#allocation114_spill] sm:$0xff] }
 0x32a   : > { %17320 = vst [vmem:[#allocation263_spill] sm:$0xff] %v12767_v48  ;;  %17321 = vst [vmem:[#allocation266_spill] sm:$0xff] %v12773_v53  ;;  %v12778_v37 = vsub.f32 %v17322_v8, %v2109_v35  ;;  %v17324_v11 = vld [vmem:[#allocation260_spill] sm:$0xff]  ;;  %v2238_v14 = vmul.f32 0.03125, %v11509_v26  ;;  %v3313_v13 = vsel %vm458_vm0, %v2747_v3, 0.0  ;;  %v2748_v2 = vmul.f32 %v12750_v57, %v12750_v57  ;;  %v17328_v8 = vld [vmem:[#allocation270_spill] sm:$0xff]  ;;  %2930 = vadd.xlane.f32.xlu0 %v2929_v61 }
 0x32b   : > { %v12785_v48 = vsub.f32 %v17324_v11, %v2237_v31  ;;  %v12792_v35 = vsub.f32 %v17326_v9, %v2194_v30  ;;  %v2165_v7 = vmul.f32 0.03125, %v17328_v8  ;;  %v17329_v53 = vld [vmem:[#allocation271_spill] sm:$0xff]  ;;  %3314 = vadd.xlane.f32.xlu1 %v3313_v13  ;;  %v12797_v49 = vsel %vm458_vm0, %v2674_v44, 0.0  ;;  %v17331_v31 = vld [vmem:[#allocation117_spill] sm:$0xff]  ;;  %v17334_v62 = vld [vmem:[#allocation282_spill] sm:$0xff]  ;;  %v12805_v30 = vpop.xlane.xlu1 %1993  ;;  %v12807_v9 = vpop.xlane.xlu0 %1990 }
 0x32c   : > { %17323 = vst [vmem:[#allocation184_spill] sm:$0xff] %v12778_v37  ;;  %v2132_v56 = vmul.f32 0.03125, %v17329_v53  ;;  %17330 = vst [vmem:[#allocation270_spill] sm:$0xff] %v12797_v49  ;;  %v12800_v11 = vsub.f32 %v17331_v31, %v2133_v17  ;;  %v17333_v26 = vld [vmem:[#allocation275_spill] sm:$0xff]  ;;  %v2135_v47 = vmul.f32 0.03125, %v17334_v62  ;;  %v2111_v53 = vmul.f32 0.03125, %v11251_v43 }
 0x32d   : > { %17325 = vst [vmem:[#allocation260_spill] sm:$0xff] %v12785_v48  ;;  %17327 = vst [vmem:[#allocation114_spill] sm:$0xff] %v12792_v35  ;;  %v2164_v3 = vmul.f32 0.03125, %v17333_v26  ;;  %v17335_v57 = vld [vmem:[#allocation287_spill] sm:$0xff]  ;;  %v17338_v13 = vld [vmem:[#allocation205_spill] sm:$0xff]  ;;  %v2932_v44 = vsel %vm458_vm0, %v2620_v20, 0.0  ;;  %v2621_v17 = vmul.f32 %v12778_v37, %v12778_v37  ;;  %v2749_v26 = vmul.f32 %v12785_v48, %v12785_v48 }
 0x32e   : > { %17332 = vst [vmem:[#allocation271_spill] sm:$0xff] %v12800_v11  ;;  %v2134_v50 = vmul.f32 0.03125, %v17335_v57  ;;  %17336 = vst [vmem:[#allocation117_spill] sm:$0xff] %v12805_v30  ;;  %v12811_v61 = vsub.f32 %v17338_v13, %v2110_v25  ;;  %v2239_v8 = vmul.f32 0.03125, %v11507_v23  ;;  %v17340_v31 = vld [vmem:[#allocation265_spill] sm:$0xff]  ;;  %v3316_v57 = vsel %vm458_vm0, %v2748_v2, 0.0  ;;  %2933 = vadd.xlane.f32.xlu0 %v2932_v44 }
 0x32f   : > { %17337 = vst [vmem:[#allocation275_spill] sm:$0xff] %v12807_v9  ;;  %v12818_v62 = vsub.f32 %v17340_v31, %v2238_v14  ;;  %v17342_v9 = vld [vmem:[#allocation121_spill] sm:$0xff]  ;;  %v17344_v25 = vld [vmem:[#allocation122_spill] sm:$0xff]  ;;  %3317 = vadd.xlane.f32.xlu1 %v3316_v57  ;;  %v12832_v23 = vmul.f32 %v12792_v35, %v12792_v35  ;;  %v17355_v44 = vld [vmem:[#allocation140_spill] sm:$0xff]  ;;  %v3319_v35 = vsel %vm458_vm0, %v2749_v26, 0.0 }
 0x330   : > { %17339 = vst [vmem:[#allocation282_spill] sm:$0xff] %v12811_v61  ;;  %v12824_v43 = vsub.f32 %v17342_v9, %v2165_v7  ;;  %v12827_v13 = vsub.f32 %v17344_v25, %v2132_v56  ;;  %v17346_v20 = vld [vmem:[#allocation286_spill] sm:$0xff]  ;;  %v12841_v7 = vpop.xlane.xlu1 %1999  ;;  %v12843_v56 = vpop.xlane.xlu0 %1996  ;;  %v2645_v9 = vmul.f32 %v12800_v11, %v12800_v11  ;;  %v12848_v57 = vsub.f32 %v17355_v44, %v2134_v50  ;;  %v17357_v25 = vld [vmem:[#allocation200_spill] sm:$0xff]  ;;  %v17361_v50 = vld [vmem:[#allocation139_spill] sm:$0xff] }
 0x331   : > { %17341 = vst [vmem:[#allocation287_spill] sm:$0xff] %v12818_v62  ;;  %v2167_v30 = vmul.f32 0.03125, %v17346_v20  ;;  %17347 = vst [vmem:[#allocation121_spill] sm:$0xff] %v12832_v23  ;;  %v17348_v14 = vld [vmem:[#allocation274_spill] sm:$0xff]  ;;  %v12851_v20 = vsub.f32 %v17357_v25, %v2111_v53  ;;  %v2750_v23 = vmul.f32 %v12818_v62, %v12818_v62 }
 0x332   : > { %17343 = vst [vmem:[#allocation205_spill] sm:$0xff] %v12824_v43  ;;  %17345 = vst [vmem:[#allocation265_spill] sm:$0xff] %v12827_v13  ;;  %v2197_v31 = vmul.f32 0.03125, %v17348_v14  ;;  %v17349_v2 = vld [vmem:[#allocation126_spill] sm:$0xff]  ;;  %v2935_v14 = vsel %vm458_vm0, %v2621_v17, 0.0  ;;  %v2644_v53 = vmul.f32 %v12827_v13, %v12827_v13  ;;  %v2677_v17 = vmul.f32 %v12824_v43, %v12824_v43 }
 0x333   : > { %v12836_v49 = vsub.f32 %v17349_v2, %v2164_v3  ;;  %v17351_v37 = vld [vmem:[#allocation134_spill] sm:$0xff]  ;;  %17353 = vst [vmem:[#allocation274_spill] sm:$0xff] %v12841_v7  ;;  %17354 = vst [vmem:[#allocation126_spill] sm:$0xff] %v12843_v56  ;;  %v2622_v3 = vmul.f32 %v12811_v61, %v12811_v61  ;;  %v2240_v2 = vmul.f32 0.03125, %v11533_v15  ;;  %v12864_v44 = vsub.f32 %v17361_v50, %v2167_v30  ;;  %v17364_v15 = vld [vmem:[#allocation291_spill] sm:$0xff] }
 0x334   : > { %v12839_v48 = vsub.f32 %v17351_v37, %v2135_v47  ;;  %17356 = vst [vmem:[#allocation134_spill] sm:$0xff] %v12848_v57  ;;  %17358 = vst [vmem:[#allocation140_spill] sm:$0xff] %v12851_v20  ;;  %v17359_v47 = vld [vmem:[#allocation264_spill] sm:$0xff]  ;;  %3320 = vadd.xlane.f32.xlu1 %v3319_v35  ;;  %2936 = vadd.xlane.f32.xlu0 %v2935_v14  ;;  %v2166_v25 = vmul.f32 0.03125, %v17364_v15  ;;  %v12874_v26 = vpop.xlane.xlu1 %2005  ;;  %v12879_v30 = vsel %vm458_vm0, %v2645_v9, 0.0  ;;  %v17367_v50 = vld [vmem:[#allocation125_spill] sm:$0xff] }
 0x335   : > { %17350 = vst [vmem:[#allocation122_spill] sm:$0xff] %v12836_v49  ;;  %v12857_v37 = vsub.f32 %v17359_v47, %v2239_v8  ;;  %17362 = vst [vmem:[#allocation264_spill] sm:$0xff] %v12864_v44  ;;  %v12871_v8 = vsel %vm458_vm0, %v2707_v12, 0.0  ;;  %v12876_v47 = vpop.xlane.xlu0 %2002  ;;  %v2676_v14 = vmul.f32 %v12836_v49, %v12836_v49  ;;  %v12886_v43 = vsub.f32 %v17367_v50, %v2197_v31  ;;  %v17372_v31 = vld [vmem:[#allocation298_spill] sm:$0xff] }
 0x336   : > { %17352 = vst [vmem:[#allocation286_spill] sm:$0xff] %v12839_v48  ;;  %17363 = vst [vmem:[#allocation139_spill] sm:$0xff] %v12871_v8  ;;  %v2647_v35 = vmul.f32 %v12839_v48, %v12839_v48  ;;  %v2938_v12 = vsel %vm458_vm0, %v2622_v3, 0.0  ;;  %v2623_v15 = vmul.f32 %v12851_v20, %v12851_v20  ;;  %v2646_v8 = vmul.f32 %v12848_v57, %v12848_v57  ;;  %v17388_v20 = vld [vmem:[#allocation319_spill] sm:$0xff] }
 0x337   : > { %17360 = vst [vmem:[#allocation200_spill] sm:$0xff] %v12857_v37  ;;  %17365 = vst [vmem:[#allocation291_spill] sm:$0xff] %v12874_v26  ;;  %v17370_v26 = vld [vmem:[#allocation269_spill] sm:$0xff]  ;;  %v3322_v7 = vsel %vm458_vm0, %v2750_v23, 0.0  ;;  %v2751_v49 = vmul.f32 %v12857_v37, %v12857_v37  ;;  %v2137_v50 = vmul.f32 0.03125, %v17372_v31  ;;  %v12902_v3 = vsel %vm458_vm0, %v2644_v53, 0.0 }
 0x338   : > { %17366 = vst [vmem:[#allocation398_spill] sm:$0xff] %v12876_v47  ;;  %17368 = vst [vmem:[#allocation125_spill] sm:$0xff] %v12886_v43  ;;  %v17369_v47 = vld [vmem:[#allocation375_spill] sm:$0xff]  ;;  %v12895_v56 = vsub.f32 %v17370_v26, %v2240_v2  ;;  %3323 = vadd.xlane.f32.xlu1 %v3322_v7  ;;  %2939 = vadd.xlane.f32.xlu0 %v2938_v12  ;;  %v12905_v43 = vsel %vm458_vm0, %v2677_v17, 0.0  ;;  %v17374_v2 = vld [vmem:[#allocation144_spill] sm:$0xff]  ;;  %v12913_v57 = vpop.xlane.xlu1 %2011  ;;  %v12918_v7 = vsel %vm458_vm0, %v2647_v35, 0.0 }
 0x339   : > { %v2241_v9 = vmul.f32 0.03125, %v17369_v47  ;;  %17373 = vst [vmem:[#allocation269_spill] sm:$0xff] %v12905_v43  ;;  %v2679_v47 = vmul.f32 %v12864_v44, %v12864_v44  ;;  %v12910_v26 = vsub.f32 %v17374_v2, %v2166_v25  ;;  %v17376_v23 = vld [vmem:[#allocation303_spill] sm:$0xff]  ;;  %17377 = vst [vmem:[#allocation144_spill] sm:$0xff] %v12913_v57  ;;  %v12915_v11 = vpop.xlane.xlu0 %2008  ;;  %v12921_v53 = vsel %vm458_vm0, %v2676_v14, 0.0  ;;  %v17380_v17 = vld [vmem:[#allocation302_spill] sm:$0xff] }
 0x33a   : > { %17371 = vst [vmem:[#allocation375_spill] sm:$0xff] %v12895_v56  ;;  %v2136_v48 = vmul.f32 0.03125, %v17376_v23  ;;  %17378 = vst [vmem:[#allocation303_spill] sm:$0xff] %v12915_v11  ;;  %v2169_v12 = vmul.f32 0.03125, %v17380_v17  ;;  %v17381_v31 = vld [vmem:[#allocation307_spill] sm:$0xff]  ;;  %v2941_v44 = vsel %vm458_vm0, %v2623_v15, 0.0  ;;  %v2752_v14 = vmul.f32 %v12895_v56, %v12895_v56 }
 0x33b   : > { %17375 = vst [vmem:[#allocation298_spill] sm:$0xff] %v12910_v26  ;;  %17379 = vst [vmem:[#allocation399_spill] sm:$0xff] %v12921_v53  ;;  %v2168_v13 = vmul.f32 0.03125, %v17381_v31  ;;  %v12927_v25 = vsel %vm458_vm0, %v2646_v8, 0.0  ;;  %v17382_v2 = vld [vmem:[#allocation268_spill] sm:$0xff]  ;;  %v3325_v35 = vsel %vm458_vm0, %v2751_v49, 0.0 }
 0x33c   : > { %v12930_v23 = vsub.f32 %v17382_v2, %v2241_v9  ;;  %v17384_v57 = vld [vmem:[#allocation88_spill] sm:$0xff]  ;;  %v17387_v17 = vld [vmem:[#allocation314_spill] sm:$0xff]  ;;  %v2138_v15 = vmul.f32 0.03125, %v17388_v20  ;;  %3326 = vadd.xlane.f32.xlu1 %v3325_v35  ;;  %2942 = vadd.xlane.f32.xlu0 %v2941_v44  ;;  %v12942_v8 = vsel %vm458_vm0, %v2679_v47, 0.0  ;;  %v12949_v56 = vpop.xlane.xlu1 %2017  ;;  %v17396_v20 = vld [vmem:[#allocation157_spill] sm:$0xff] }
 0x33d   : > { %v2242_v11 = vmul.f32 0.03125, %v17384_v57  ;;  %v17385_v43 = vld [vmem:[#allocation152_spill] sm:$0xff]  ;;  %v2139_v31 = vmul.f32 0.03125, %v17387_v17  ;;  %17389 = vst [vmem:[#allocation268_spill] sm:$0xff] %v12942_v8  ;;  %v17390_v9 = vld [vmem:[#allocation158_spill] sm:$0xff]  ;;  %v12956_v35 = vsub.f32 %v17396_v20, %v2169_v12  ;;  %v17400_v17 = vld [vmem:[#allocation327_spill] sm:$0xff] }
 0x33e   : > { %17383 = vst [vmem:[#allocation302_spill] sm:$0xff] %v12930_v23  ;;  %v12937_v53 = vsub.f32 %v17385_v43, %v2137_v50  ;;  %v12945_v2 = vsub.f32 %v17390_v9, %v2136_v48  ;;  %v17392_v57 = vld [vmem:[#allocation318_spill] sm:$0xff]  ;;  %17394 = vst [vmem:[#allocation152_spill] sm:$0xff] %v12949_v56  ;;  %v12951_v43 = vpop.xlane.xlu0 %2014  ;;  %v2678_v50 = vmul.f32 %v12910_v26, %v12910_v26  ;;  %v2141_v48 = vmul.f32 0.03125, %v17400_v17  ;;  %v17407_v20 = vld [vmem:[#allocation176_spill] sm:$0xff] }
 0x33f   : > { %v2171_v49 = vmul.f32 0.03125, %v17392_v57  ;;  %v17393_v37 = vld [vmem:[#allocation322_spill] sm:$0xff]  ;;  %17395 = vst [vmem:[#allocation314_spill] sm:$0xff] %v12951_v43  ;;  %17397 = vst [vmem:[#allocation319_spill] sm:$0xff] %v12956_v35  ;;  %v17402_v57 = vld [vmem:[#allocation87_spill] sm:$0xff]  ;;  %v3328_v56 = vsel %vm458_vm0, %v2752_v14, 0.0  ;;  %v2753_v26 = vmul.f32 %v12930_v23, %v12930_v23 }
 0x340   : > { %17386 = vst [vmem:[#allocation307_spill] sm:$0xff] %v12937_v53  ;;  %17391 = vst [vmem:[#allocation88_spill] sm:$0xff] %v12945_v2  ;;  %v2170_v61 = vmul.f32 0.03125, %v17393_v37  ;;  %v17398_v44 = vld [vmem:[#allocation162_spill] sm:$0xff]  ;;  %v2243_v62 = vmul.f32 0.03125, %v17402_v57  ;;  %v17403_v37 = vld [vmem:[#allocation273_spill] sm:$0xff]  ;;  %3329 = vadd.xlane.f32.xlu1 %v3328_v56  ;;  %2945 = vadd.xlane.f32.xlu0 %v11718_v32  ;;  %v2648_v56 = vmul.f32 %v12945_v2, %v12945_v2 }
 0x341   : > { %v12959_v47 = vsub.f32 %v17398_v44, %v2168_v13  ;;  %v17401_v9 = vld [vmem:[#allocation330_spill] sm:$0xff]  ;;  %v12965_v51 = vsub.f32 %v17403_v37, %v2242_v11  ;;  %v12974_v13 = vsub.f32 %v17407_v20, %v2138_v15  ;;  %v17409_v44 = vld [vmem:[#allocation329_spill] sm:$0xff]  ;;  %v2649_v11 = vmul.f32 %v12937_v53, %v12937_v53  ;;  %v17412_v14 = vld [vmem:[#allocation180_spill] sm:$0xff] }
 0x342   : > { %v2140_v8 = vmul.f32 0.03125, %v17401_v9  ;;  %v17405_v43 = vld [vmem:[#allocation170_spill] sm:$0xff]  ;;  %v2173_v17 = vmul.f32 0.03125, %v17409_v44  ;;  %v17410_v9 = vld [vmem:[#allocation175_spill] sm:$0xff]  ;;  %v12984_v37 = vsub.f32 %v17412_v14, %v2170_v61  ;;  %v17414_v23 = vld [vmem:[#allocation332_spill] sm:$0xff]  ;;  %v12989_v15 = vpop.xlane.xlu0 %2020  ;;  %v2681_v61 = vmul.f32 %v12956_v35, %v12956_v35 }
 0x343   : > { %17399 = vst [vmem:[#allocation158_spill] sm:$0xff] %v12959_v47  ;;  %17404 = vst [vmem:[#allocation318_spill] sm:$0xff] %v12965_v51  ;;  %v12971_v12 = vsub.f32 %v17405_v43, %v2139_v31  ;;  %v12981_v57 = vsub.f32 %v17410_v9, %v2171_v49  ;;  %v2172_v31 = vmul.f32 0.03125, %v17414_v23  ;;  %v12987_v43 = vpop.xlane.xlu1 %2023  ;;  %v17417_v20 = vld [vmem:[#allocation188_spill] sm:$0xff]  ;;  %v17419_v44 = vld [vmem:[#allocation193_spill] sm:$0xff]  ;;  %v2680_v49 = vmul.f32 %v12959_v47, %v12959_v47 }
 0x344   : > { %17408 = vst [vmem:[#allocation157_spill] sm:$0xff] %v12974_v13  ;;  %17413 = vst [vmem:[#allocation327_spill] sm:$0xff] %v12984_v37  ;;  %v12994_v32 = vsub.f32 %v17417_v20, %v2141_v48  ;;  %v12997_v53 = vsub.f32 %v17419_v44, %v2140_v8  ;;  %v17421_v23 = vld [vmem:[#allocation272_spill] sm:$0xff]  ;;  %v2244_v14 = vmul.f32 0.03125, %v11620_v29  ;;  %v2754_v48 = vmul.f32 %v12965_v51, %v12965_v51  ;;  %v17425_v8 = vld [vmem:[#allocation18_spill] sm:$0xff] }
 0x345   : > { %17406 = vst [vmem:[#allocation322_spill] sm:$0xff] %v12971_v12  ;;  %17411 = vst [vmem:[#allocation162_spill] sm:$0xff] %v12981_v57  ;;  %v13004_v9 = vsub.f32 %v17421_v23, %v2243_v62  ;;  %v17423_v20 = vld [vmem:[#allocation192_spill] sm:$0xff]  ;;  %2948 = vadd.xlane.f32.xlu0 %v17425_v8  ;;  %v2650_v44 = vmul.f32 %v12974_v13, %v12974_v13  ;;  %v2651_v62 = vmul.f32 %v12971_v12, %v12971_v12  ;;  %v17427_v29 = vld [vmem:[#allocation197_spill] sm:$0xff] }
 0x346   : > { %17415 = vst [vmem:[#allocation330_spill] sm:$0xff] %v12987_v43  ;;  %17416 = vst [vmem:[#allocation87_spill] sm:$0xff] %v12989_v15  ;;  %v3331_v43 = vsel %vm458_vm0, %v2753_v26, 0.0  ;;  %v13011_v15 = vsub.f32 %v17423_v20, %v2173_v17  ;;  %v13019_v23 = vsel %vm458_vm0, %v2678_v50, 0.0  ;;  %v13022_v26 = vsub.f32 %v17427_v29, %v2172_v31  ;;  %v13026_v47 = vpop.xlane.xlu0 %2026  ;;  %v17447_v2 = vld [vmem:[#allocation343_spill] sm:$0xff] }
 0x347   : > { %17418 = vst [vmem:[#allocation273_spill] sm:$0xff] %v12994_v32  ;;  %17420 = vst [vmem:[#allocation170_spill] sm:$0xff] %v12997_v53  ;;  %3332 = vadd.xlane.f32.xlu1 %v3331_v43  ;;  %v13024_v35 = vpop.xlane.xlu1 %2029  ;;  %v13029_v17 = vsel %vm458_vm0, %v2649_v11, 0.0  ;;  %v2682_v43 = vmul.f32 %v12984_v37, %v12984_v37  ;;  %v2683_v20 = vmul.f32 %v12981_v57, %v12981_v57  ;;  %v13036_v8 = vsel %vm458_vm0, %v2648_v56, 0.0  ;;  %v17432_v11 = vld [vmem:[#allocation95_spill] sm:$0xff] }
 0x348   : > { %17422 = vst [vmem:[#allocation176_spill] sm:$0xff] %v13004_v9  ;;  %17424 = vst [vmem:[#allocation329_spill] sm:$0xff] %v13011_v15  ;;  %v2652_v50 = vmul.f32 %v12997_v53, %v12997_v53  ;;  %v2653_v31 = vmul.f32 %v12994_v32, %v12994_v32  ;;  %v13043_v29 = vsel %vm458_vm0, %v2681_v61, 0.0  ;;  %v3334_v37 = vsel %vm458_vm0, %v2754_v48, 0.0 }
 0x349   : > { %17426 = vst [vmem:[#allocation175_spill] sm:$0xff] %v13019_v23  ;;  %17428 = vst [vmem:[#allocation180_spill] sm:$0xff] %v13022_v26  ;;  %v2755_v56 = vmul.f32 %v13004_v9, %v13004_v9  ;;  %2951 = vadd.xlane.f32.xlu0 %v11811_v54  ;;  %v13054_v57 = vsel %vm458_vm0, %v2650_v44, 0.0  ;;  %v13057_v32 = vsel %vm458_vm0, %v2651_v62, 0.0  ;;  %v13060_v61 = vsel %vm458_vm0, %v2680_v49, 0.0 }
 0x34a   : > { %17429 = vst [vmem:[#allocation332_spill] sm:$0xff] %v13024_v35  ;;  %17430 = vst [vmem:[#allocation188_spill] sm:$0xff] %v13026_v47  ;;  %v2245_v35 = vmul.f32 0.03125, %v17432_v11  ;;  %v17433_v47 = vld [vmem:[#allocation277_spill] sm:$0xff]  ;;  %v2850_v53 = vpop.xlane.xlu0 %2849  ;;  %v13069_v54 = vsel %vm458_vm0, %v2683_v20, 0.0  ;;  %v2684_v44 = vmul.f32 %v13022_v26, %v13022_v26  ;;  %v13074_v49 = vsel %vm458_vm0, %v2652_v50, 0.0 }
 0x34b   : > { %17431 = vst [vmem:[#allocation193_spill] sm:$0xff] %v13043_v29  ;;  %v13047_v12 = vsub.f32 %v17433_v47, %v2244_v14  ;;  %3335 = vadd.xlane.f32.xlu1 %v3334_v37  ;;  %17435 = vst [vmem:[#allocation192_spill] sm:$0xff] %v13060_v61  ;;  %v2685_v47 = vmul.f32 %v13011_v15, %v13011_v15  ;;  %v17436_v14 = vld [vmem:[#allocation335_spill] sm:$0xff]  ;;  %v3234_v11 = vpop.xlane.xlu1 %3233  ;;  %v13066_v37 = vsel %vm458_vm0, %v2682_v43, 0.0  ;;  %v3616_v13 = vmul.f32 0.03125, %v2850_v53  ;;  %v17441_v61 = vld [vmem:[#allocation385_spill] sm:$0xff] }
 0x34c   : > { %v2143_v48 = vmul.f32 0.03125, %v17436_v14  ;;  %17437 = vst [vmem:[#allocation18_spill] sm:$0xff] %v13066_v37  ;;  %17438 = vst [vmem:[#allocation197_spill] sm:$0xff] %v13069_v54  ;;  %v3744_v62 = vmul.f32 0.03125, %v3234_v11  ;;  %v13077_v15 = vsel %vm458_vm0, %v2653_v31, 0.0  ;;  %v17439_v14 = vld [vmem:[#allocation276_spill] sm:$0xff] }
 0x34d   : > { %17434 = vst [vmem:[#allocation272_spill] sm:$0xff] %v13047_v12  ;;  %v13080_v29 = vsub.f32 %v17439_v14, %v2245_v35  ;;  %v2246_v43 = vmul.f32 0.03125, %v17441_v61  ;;  %v3337_v37 = vsel %vm458_vm0, %v2755_v56, 0.0  ;;  %v2756_v20 = vmul.f32 %v13047_v12, %v13047_v12  ;;  %v17442_v54 = vld [vmem:[#allocation339_spill] sm:$0xff]  ;;  %2954 = vadd.xlane.f32.xlu0 %v11799_v34  ;;  %v17444_v31 = vld [vmem:[#allocation204_spill] sm:$0xff]  ;;  %v17446_v14 = vld [vmem:[#allocation338_spill] sm:$0xff] }
 0x34e   : > { %v2142_v26 = vmul.f32 0.03125, %v17442_v54  ;;  %v4000_v11 = vadd.f32 1e-05, %v3744_v62  ;;  %v3872_v53 = vadd.f32 1e-05, %v3616_v13  ;;  %v13089_v50 = vsel %vm458_vm0, %v2685_v47, 0.0  ;;  %v2853_v9 = vpop.xlane.xlu0 %2852 }
 0x34f   : > { %17440 = vst [vmem:[#allocation95_spill] sm:$0xff] %v13080_v29  ;;  %3338 = vadd.xlane.f32.xlu1 %v3337_v37  ;;  %17443 = vst [vmem:[#allocation277_spill] sm:$0xff] %v13089_v50  ;;  %v13092_v35 = vsub.f32 %v17444_v31, %v2143_v48  ;;  %v2175_v61 = vmul.f32 0.03125, %v17446_v14  ;;  %v2174_v56 = vmul.f32 0.03125, %v17447_v2  ;;  %v3237_v23 = vpop.xlane.xlu1 %3236  ;;  %v13097_v12 = vsel %vm458_vm0, %v2684_v44, 0.0  ;;  %v17449_v54 = vld [vmem:[#allocation100_spill] sm:$0xff] }
 0x350   : > { %17448 = vst [vmem:[#allocation276_spill] sm:$0xff] %v13097_v12  ;;  %v2247_v13 = vmul.f32 0.03125, %v17449_v54  ;;  %8840 = vrsqrt.f32 %v4000_v11  ;;  %v3745_v37 = vmul.f32 0.03125, %v3237_v23  ;;  %v3617_v34 = vmul.f32 0.03125, %v2853_v9  ;;  %v17450_v62 = vld [vmem:[#allocation281_spill] sm:$0xff]  ;;  %v17454_v50 = vld [vmem:[#allocation387_spill] sm:$0xff] }
 0x351   : > { %17445 = vst [vmem:[#allocation335_spill] sm:$0xff] %v13092_v35  ;;  %v13101_v47 = vsub.f32 %v17450_v62, %v2246_v43  ;;  %8842 = vrsqrt.f32 %v3872_v53  ;;  %v3340_v48 = vsel %vm458_vm0, %v2756_v20, 0.0  ;;  %v2757_v31 = vmul.f32 %v13080_v29, %v13080_v29  ;;  %v17452_v2 = vld [vmem:[#allocation209_spill] sm:$0xff]  ;;  %2957 = vadd.xlane.f32.xlu0 %v11933_v36  ;;  %v17455_v9 = vld [vmem:[#allocation208_spill] sm:$0xff]  ;;  %v17459_v20 = vld [vmem:[#allocation386_spill] sm:$0xff] }
 0x352   : > { %v13107_v14 = vsub.f32 %v17452_v2, %v2142_v26  ;;  %v2248_v44 = vmul.f32 0.03125, %v17454_v50  ;;  %v4001_v12 = vadd.f32 1e-05, %v3745_v37  ;;  %v3873_v51 = vadd.f32 1e-05, %v3617_v34  ;;  %v17457_v43 = vld [vmem:[#allocation213_spill] sm:$0xff]  ;;  %v2856_v62 = vpop.xlane.xlu0 %2855 }
 0x353   : > { %17451 = vst [vmem:[#allocation385_spill] sm:$0xff] %v13101_v47  ;;  %3341 = vadd.xlane.f32.xlu1 %v3340_v48  ;;  %v13112_v23 = vsub.f32 %v17455_v9, %v2175_v61  ;;  %v13115_v11 = vsub.f32 %v17457_v43, %v2174_v56  ;;  %v2249_v53 = vmul.f32 0.03125, %v17459_v20  ;;  %v3240_v54 = vpop.xlane.xlu1 %3239  ;;  %v2655_v26 = vmul.f32 %v13092_v35, %v13092_v35  ;;  %v17460_v2 = vld [vmem:[#allocation280_spill] sm:$0xff]  ;;  %v17463_v9 = vld [vmem:[#allocation285_spill] sm:$0xff] }
 0x354   : > { %17453 = vst [vmem:[#allocation339_spill] sm:$0xff] %v13107_v14  ;;  %v13121_v50 = vsub.f32 %v17460_v2, %v2247_v13  ;;  %8844 = vrsqrt.f32 %v4001_v12  ;;  %v3746_v37 = vmul.f32 0.03125, %v3240_v54  ;;  %v3618_v34 = vmul.f32 0.03125, %v2856_v62  ;;  %v17462_v36 = vld [vmem:[#allocation20_spill] sm:$0xff] }
 0x355   : > { %17456 = vst [vmem:[#allocation204_spill] sm:$0xff] %v13112_v23  ;;  %17458 = vst [vmem:[#allocation338_spill] sm:$0xff] %v13115_v11  ;;  %v2250_v48 = vmul.f32 0.03125, %v17462_v36  ;;  %8846 = vrsqrt.f32 %v3873_v51  ;;  %v3343_v61 = vsel %vm458_vm0, %v2757_v31, 0.0  ;;  %v2758_v56 = vmul.f32 %v13101_v47, %v13101_v47  ;;  %2960 = vadd.xlane.f32.xlu0 %v11948_v40  ;;  %v17465_v13 = vld [vmem:[#allocation284_spill] sm:$0xff] }
 0x356   : > { %17461 = vst [vmem:[#allocation343_spill] sm:$0xff] %v13121_v50  ;;  %v13128_v43 = vsub.f32 %v17463_v9, %v2248_v44  ;;  %v4002_v20 = vadd.f32 1e-05, %v3746_v37  ;;  %v3874_v29 = vadd.f32 1e-05, %v3618_v34  ;;  %v2654_v12 = vmul.f32 %v13107_v14, %v13107_v14  ;;  %v17467_v51 = vld [vmem:[#allocation120_spill] sm:$0xff]  ;;  %v2859_v2 = vpop.xlane.xlu0 %2858 }
 0x357   : > { %3344 = vadd.xlane.f32.xlu1 %v3343_v61  ;;  %v13134_v54 = vsub.f32 %v17465_v13, %v2249_v53  ;;  %v2251_v62 = vmul.f32 0.03125, %v17467_v51  ;;  %v3243_v31 = vpop.xlane.xlu1 %3242  ;;  %v13138_v36 = vsel %vm458_vm0, %v2655_v26, 0.0  ;;  %v2687_v44 = vmul.f32 %v13112_v23, %v13112_v23  ;;  %v17468_v61 = vld [vmem:[#allocation289_spill] sm:$0xff]  ;;  %v17476_v35 = vld [vmem:[#allocation292_spill] sm:$0xff] }
 0x358   : > { %17464 = vst [vmem:[#allocation100_spill] sm:$0xff] %v13128_v43  ;;  %8848 = vrsqrt.f32 %v4002_v20  ;;  %v3747_v37 = vmul.f32 0.03125, %v3243_v31  ;;  %v3619_v34 = vmul.f32 0.03125, %v2859_v2  ;;  %v2686_v40 = vmul.f32 %v13115_v11, %v13115_v11  ;;  %v17470_v2 = vld [vmem:[#allocation288_spill] sm:$0xff]  ;;  %v17474_v11 = vld [vmem:[#allocation22_spill] sm:$0xff] }
 0x359   : > { %17466 = vst [vmem:[#allocation281_spill] sm:$0xff] %v13134_v54  ;;  %v13145_v9 = vsub.f32 %v17468_v61, %v2250_v48  ;;  %8850 = vrsqrt.f32 %v3874_v29  ;;  %v3346_v53 = vsel %vm458_vm0, %v2758_v56, 0.0  ;;  %v2759_v13 = vmul.f32 %v13121_v50, %v13121_v50  ;;  %2963 = vadd.xlane.f32.xlu0 %v12037_v39 }
 0x35a   : > { %v4003_v26 = vadd.f32 1e-05, %v3747_v37  ;;  %v3875_v51 = vadd.f32 1e-05, %v3619_v34  ;;  %v2760_v20 = vmul.f32 %v13128_v43, %v13128_v43  ;;  %v13154_v31 = vsel %vm458_vm0, %v2654_v12, 0.0  ;;  %v2862_v61 = vpop.xlane.xlu0 %2861  ;;  %v17479_v43 = vld [vmem:[#allocation13_spill] sm:$0xff] }
 0x35b   : > { %17469 = vst [vmem:[#allocation209_spill] sm:$0xff] %v13145_v9  ;;  %3347 = vadd.xlane.f32.xlu1 %v3346_v53  ;;  %v13157_v48 = vsub.f32 %v17470_v2, %v2251_v62  ;;  %v2253_v29 = vmul.f32 0.03125, %v11783_v55  ;;  %v3246_v56 = vpop.xlane.xlu1 %3245  ;;  %v2761_v37 = vmul.f32 %v13134_v54, %v13134_v54  ;;  %v13163_v34 = vsel %vm458_vm0, %v2687_v44, 0.0  ;;  %v13172_v55 = vld [vmem:[%s16000_s5] ss:$0 sm:$0xff]  ;;  %v17477_v54 = vld [vmem:[#allocation9_spill] sm:$0xff] }
 0x35c   : > { %17472 = vst [vmem:[#allocation208_spill] sm:$0xff] %v13163_v34  ;;  %8852 = vrsqrt.f32 %v4003_v26  ;;  %v3748_v39 = vmul.f32 0.03125, %v3246_v56  ;;  %v3620_v53 = vmul.f32 0.03125, %v2862_v61  ;;  %v13166_v23 = vsel %vm458_vm0, %v2686_v40, 0.0 }
 0x35d   : > { %17471 = vst [vmem:[#allocation387_spill] sm:$0xff] %v13157_v48  ;;  %17473 = vst [vmem:[#allocation213_spill] sm:$0xff] %v13166_v23  ;;  %v8841_v12 = vpop.eup %8840  ;;  %v2252_v62 = vmul.f32 0.03125, %v17474_v11  ;;  %8854 = vrsqrt.f32 %v3875_v51  ;;  %v3349_v2 = vsel %vm458_vm0, %v2759_v13, 0.0  ;;  %v2762_v44 = vmul.f32 %v13145_v9, %v13145_v9  ;;  %2966 = vadd.xlane.f32.xlu0 %v12060_v4  ;;  %v17475_v11 = vld [vmem:[#allocation103_spill] sm:$0xff] }
 0x35e   : > { %v8843_v26 = vpop.eup %8842  ;;  %v4004_v56 = vadd.f32 1e-05, %v3748_v39  ;;  %v3876_v61 = vadd.f32 1e-05, %v3620_v53  ;;  %v3352_v40 = vsel %vm458_vm0, %v2760_v20, 0.0  ;;  %v4512_v34 = vmul.f32 %v8841_v12, %v17475_v11  ;;  %v2865_v51 = vpop.xlane.xlu0 %2864  ;;  %v17478_v12 = vld [vmem:[#allocation293_spill] sm:$0xff] }
 0x35f   : > { %3350 = vadd.xlane.f32.xlu1 %v3349_v2  ;;  %v13181_v23 = vsub.f32 %v17476_v35, %v2253_v29  ;;  %v3249_v14 = vpop.xlane.xlu1 %3248  ;;  %v4384_v13 = vmul.f32 %v8843_v26, %v17477_v54  ;;  %v13187_v9 = vld [vmem:[%s16001_s6] ss:$0 sm:$0xff]  ;;  %v3355_v39 = vsel %vm458_vm0, %v2761_v37, 0.0  ;;  %v2763_v4 = vmul.f32 %v13157_v48, %v13157_v48 }
 0x360   : > { %8856 = vrsqrt.f32 %v4004_v56  ;;  %v3749_v20 = vmul.f32 0.03125, %v3249_v14  ;;  %v3621_v53 = vmul.f32 0.03125, %v2865_v51  ;;  %v4775_v35 = vmul.f32 %v13172_v55, %v4512_v34  ;;  %v17480_v34 = vld [vmem:[#allocation128_spill] sm:$0xff]  ;;  %v17481_v51 = vld [vmem:[#allocation6_spill] sm:$0xff] }
 0x361   : > { %v8845_v29 = vpop.eup %8844  ;;  %v13194_v2 = vsub.f32 %v17478_v12, %v2252_v62  ;;  %8858 = vrsqrt.f32 %v3876_v61  ;;  %v4647_v54 = vmul.f32 %v13172_v55, %v4384_v13  ;;  %v3358_v26 = vsel %vm458_vm0, %v2762_v44, 0.0  ;;  %2969 = vadd.xlane.f32.xlu0 %v12230_v42 }
 0x362   : > { %v8847_v11 = vpop.eup %8846  ;;  %v4513_v37 = vmul.f32 %v8845_v29, %v17479_v43  ;;  %v4005_v50 = vadd.f32 1e-05, %v3749_v20  ;;  %v3877_v47 = vadd.f32 1e-05, %v3621_v53  ;;  %v5038_v14 = vadd.f32 %v13187_v9, %v4775_v35  ;;  %v2868_v61 = vpop.xlane.xlu0 %2867 }
 0x363   : > { %3353 = vadd.xlane.f32.xlu1 %v3352_v40  ;;  %v2255_v56 = vmul.f32 0.03125, %v17480_v34  ;;  %v4385_v62 = vmul.f32 %v8847_v11, %v17481_v51  ;;  %v3252_v12 = vpop.xlane.xlu1 %3251  ;;  %v4910_v13 = vadd.f32 %v13187_v9, %v4647_v54  ;;  %v3361_v44 = vsel %vm458_vm0, %v2763_v4, 0.0  ;;  %v17482_v40 = vld [vmem:[#allocation31_spill] sm:$0xff]  ;;  %v17484_v34 = vld [vmem:[#allocation296_spill] sm:$0xff] }
 0x364   : > { %v4776_v48 = vmul.f32 %v13172_v55, %v4513_v37  ;;  %8860 = vrsqrt.f32 %v4005_v50  ;;  %v3750_v43 = vmul.f32 0.03125, %v3252_v12  ;;  %v3622_v20 = vmul.f32 0.03125, %v2868_v61  ;;  %8631 = vmatprep.mubr.msk.f32.mxu1 %vm458_vm0, %v5038_v14  ;;  %v17483_v37 = vld [vmem:[#allocation116_spill] sm:$0xff]  ;;  %v17485_v61 = vld [vmem:[#allocation129_spill] sm:$0xff] }
 0x365   : > { %v8849_v42 = vpop.eup %8848  ;;  %v2254_v53 = vmul.f32 0.03125, %v17482_v40  ;;  %v4648_v35 = vmul.f32 %v13172_v55, %v4385_v62  ;;  %8862 = vrsqrt.f32 %v3877_v47  ;;  %8439 = vmatprep.mubr.msk.f32.mxu0 %vm458_vm0, %v4910_v13  ;;  %v2764_v29 = vmul.f32 %v13194_v2, %v13194_v2  ;;  %2972 = vadd.xlane.f32.xlu0 %v12173_v60 }
 0x366   : > { %v8851_v54 = vpop.eup %8850  ;;  %v4006_v4 = vadd.f32 1e-05, %v3750_v43  ;;  %v3878_v11 = vadd.f32 1e-05, %v3622_v20  ;;  %v5039_v50 = vadd.f32 %v13187_v9, %v4776_v48  ;;  %v4514_v14 = vmul.f32 %v8849_v42, %v17483_v37  ;;  %v2871_v47 = vpop.xlane.xlu0 %2870  ;;  %v17486_v42 = vld [vmem:[#allocation297_spill] sm:$0xff] }
 0x367   : > { %3356 = vadd.xlane.f32.xlu1 %v3355_v39  ;;  %v13216_v51 = vsub.f32 %v17484_v34, %v2255_v56  ;;  %v3255_v62 = vpop.xlane.xlu1 %3254  ;;  %v4911_v12 = vadd.f32 %v13187_v9, %v4648_v35  ;;  %v4386_v13 = vmul.f32 %v8851_v54, %v17485_v61  ;;  %v2765_v43 = vmul.f32 %v13181_v23, %v13181_v23  ;;  %v17489_v61 = vld [vmem:[#allocation108_spill] sm:$0xff] }
 0x368   : > { %8864 = vrsqrt.f32 %v4006_v4  ;;  %v3751_v39 = vmul.f32 0.03125, %v3255_v62  ;;  %v3623_v20 = vmul.f32 0.03125, %v2871_v47  ;;  %8632 = vmatmul.mubr.msk.f32.vlgmr.msra.gmra.mxu1 %vm458_vm0, %v5039_v50  ;;  %v4777_v60 = vmul.f32 %v13172_v55, %v4514_v14  ;;  %v17487_v14 = vld [vmem:[#allocation29_spill] sm:$0xff]  ;;  %v17488_v62 = vld [vmem:[#allocation32_spill] sm:$0xff] }
 0x369   : > { %v8853_v48 = vpop.eup %8852  ;;  %v13225_v56 = vsub.f32 %v17486_v42, %v2254_v53  ;;  %8866 = vrsqrt.f32 %v3878_v11  ;;  %8440 = vmatmul.mubr.msk.f32.vlgmr.msra.gmra.mxu0 %vm458_vm0, %v4911_v12  ;;  %v4649_v40 = vmul.f32 %v13172_v55, %v4386_v13  ;;  %v3364_v35 = vsel %vm458_vm0, %v2764_v29, 0.0  ;;  %2975 = vadd.xlane.f32.xlu0 %v12339_v33 }
 0x36a   : > { %v8855_v54 = vpop.eup %8854  ;;  %v4007_v37 = vadd.f32 1e-05, %v3751_v39  ;;  %v3879_v4 = vadd.f32 1e-05, %v3623_v20  ;;  %v5040_v50 = vadd.f32 %v13187_v9, %v4777_v60  ;;  %v4515_v34 = vmul.f32 %v8853_v48, %v17487_v14  ;;  %v2874_v11 = vpop.xlane.xlu0 %2873  ;;  %v17490_v60 = vld [vmem:[#allocation35_spill] sm:$0xff]  ;;  %v17491_v14 = vld [vmem:[#allocation30_spill] sm:$0xff] }
 0x36b   : > { %3359 = vadd.xlane.f32.xlu1 %v3358_v26  ;;  %v2257_v53 = vmul.f32 0.03125, %v17488_v62  ;;  %v3258_v47 = vpop.xlane.xlu1 %3257  ;;  %v4912_v12 = vadd.f32 %v13187_v9, %v4649_v40  ;;  %v4387_v13 = vmul.f32 %v8855_v54, %v17489_v61  ;;  %v3367_v29 = vsel %vm458_vm0, %v2765_v43, 0.0  ;;  %v17492_v62 = vld [vmem:[#allocation300_spill] sm:$0xff]  ;;  %v17493_v61 = vld [vmem:[#allocation142_spill] sm:$0xff] }
 0x36c   : > { %8868 = vrsqrt.f32 %v4007_v37  ;;  %v3752_v39 = vmul.f32 0.03125, %v3258_v47  ;;  %v3624_v20 = vmul.f32 0.03125, %v2874_v11  ;;  %8634 = vmatprep.mubr.msk.f32.mxu1 %vm458_vm0, %v5040_v50  ;;  %v4778_v33 = vmul.f32 %v13172_v55, %v4515_v34 }
 0x36d   : > { %v8857_v26 = vpop.eup %8856  ;;  %v2256_v48 = vmul.f32 0.03125, %v17490_v60  ;;  %8870 = vrsqrt.f32 %v3879_v4  ;;  %8442 = vmatprep.mubr.msk.f32.mxu0 %vm458_vm0, %v4912_v12  ;;  %v4650_v42 = vmul.f32 %v13172_v55, %v4387_v13  ;;  %v2766_v40 = vmul.f32 %v13225_v56, %v13225_v56  ;;  %2978 = vadd.xlane.f32.xlu0 %v12326_v63 }
 0x36e   : > { %v8859_v54 = vpop.eup %8858  ;;  %v4008_v43 = vadd.f32 1e-05, %v3752_v39  ;;  %v3880_v37 = vadd.f32 1e-05, %v3624_v20  ;;  %v5041_v50 = vadd.f32 %v13187_v9, %v4778_v33  ;;  %v4516_v34 = vmul.f32 %v8857_v26, %v17491_v14  ;;  %v2877_v11 = vpop.xlane.xlu0 %2876  ;;  %v17494_v26 = vld [vmem:[#allocation301_spill] sm:$0xff] }
 0x36f   : > { %3362 = vadd.xlane.f32.xlu1 %v3361_v44  ;;  %v13248_v47 = vsub.f32 %v17492_v62, %v2257_v53  ;;  %v3261_v4 = vpop.xlane.xlu1 %3260  ;;  %v4913_v12 = vadd.f32 %v13187_v9, %v4650_v42  ;;  %v4388_v13 = vmul.f32 %v8859_v54, %v17493_v61  ;;  %v2767_v39 = vmul.f32 %v13216_v51, %v13216_v51  ;;  %v17497_v61 = vld [vmem:[#allocation127_spill] sm:$0xff] }
 0x370   : > { %8872 = vrsqrt.f32 %v4008_v43  ;;  %v3753_v44 = vmul.f32 0.03125, %v3261_v4  ;;  %v3625_v20 = vmul.f32 0.03125, %v2877_v11  ;;  %8635 = vmatmul.mubr.msk.f32.gmra.mxu1 %vm458_vm0, %v5041_v50  ;;  %v4779_v63 = vmul.f32 %v13172_v55, %v4516_v34  ;;  %v17495_v34 = vld [vmem:[#allocation39_spill] sm:$0xff]  ;;  %v17496_v4 = vld [vmem:[#allocation138_spill] sm:$0xff] }
 0x371   : > { %v8861_v33 = vpop.eup %8860  ;;  %v13257_v53 = vsub.f32 %v17494_v26, %v2256_v48  ;;  %8874 = vrsqrt.f32 %v3880_v37  ;;  %8443 = vmatmul.mubr.msk.f32.gmra.mxu0 %vm458_vm0, %v4913_v12  ;;  %v4651_v60 = vmul.f32 %v13172_v55, %v4388_v13  ;;  %v3370_v42 = vsel %vm458_vm0, %v2766_v40, 0.0  ;;  %2981 = vadd.xlane.f32.xlu0 %v12470_v10 }
 0x372   : > { %v8863_v54 = vpop.eup %8862  ;;  %v4009_v14 = vadd.f32 1e-05, %v3753_v44  ;;  %v3881_v43 = vadd.f32 1e-05, %v3625_v20  ;;  %v5042_v50 = vadd.f32 %v13187_v9, %v4779_v63  ;;  %v4517_v62 = vmul.f32 %v8861_v33, %v17495_v34  ;;  %v2880_v37 = vpop.xlane.xlu0 %2879  ;;  %v17498_v63 = vld [vmem:[#allocation145_spill] sm:$0xff] }
 0x373   : > { %3365 = vadd.xlane.f32.xlu1 %v3364_v35  ;;  %v2259_v48 = vmul.f32 0.03125, %v17496_v4  ;;  %v3264_v11 = vpop.xlane.xlu1 %3263  ;;  %v4914_v12 = vadd.f32 %v13187_v9, %v4651_v60  ;;  %v4389_v13 = vmul.f32 %v8863_v54, %v17497_v61  ;;  %v3373_v40 = vsel %vm458_vm0, %v2767_v39, 0.0 }
 0x374   : > { %8876 = vrsqrt.f32 %v4009_v14  ;;  %v3754_v44 = vmul.f32 0.03125, %v3264_v11  ;;  %v3626_v20 = vmul.f32 0.03125, %v2880_v37  ;;  %8637 = vmatprep.mubr.msk.f32.mxu1 %vm458_vm0, %v5042_v50  ;;  %v4780_v10 = vmul.f32 %v13172_v55, %v4517_v62  ;;  %v17499_v62 = vld [vmem:[#allocation304_spill] sm:$0xff] }
 0x375   : > { %v8865_v35 = vpop.eup %8864  ;;  %v2258_v33 = vmul.f32 0.03125, %v17498_v63  ;;  %8878 = vrsqrt.f32 %v3881_v43  ;;  %8445 = vmatprep.mubr.msk.f32.mxu0 %vm458_vm0, %v4914_v12  ;;  %v4652_v26 = vmul.f32 %v13172_v55, %v4389_v13  ;;  %v2768_v60 = vmul.f32 %v13257_v53, %v13257_v53  ;;  %2984 = vadd.xlane.f32.xlu0 %v12435_v52 }
 0x376   : > { %v8867_v54 = vpop.eup %8866  ;;  %v4010_v39 = vadd.f32 1e-05, %v3754_v44  ;;  %v3882_v14 = vadd.f32 1e-05, %v3626_v20  ;;  %v5043_v50 = vadd.f32 %v13187_v9, %v4780_v10  ;;  %v4518_v34 = vmul.f32 %v8865_v35, %v11920_v16  ;;  %v2883_v11 = vpop.xlane.xlu0 %2882  ;;  %v17500_v44 = vld [vmem:[#allocation305_spill] sm:$0xff] }
 0x377   : > { %3368 = vadd.xlane.f32.xlu1 %v3367_v29  ;;  %v13280_v4 = vsub.f32 %v17499_v62, %v2259_v48  ;;  %v3267_v43 = vpop.xlane.xlu1 %3266  ;;  %v4915_v37 = vadd.f32 %v13187_v9, %v4652_v26  ;;  %v4390_v12 = vmul.f32 %v8867_v54, %v11913_v18  ;;  %v2769_v61 = vmul.f32 %v13248_v47, %v13248_v47  ;;  %v17502_v62 = vld [vmem:[#allocation36_spill] sm:$0xff] }
 0x378   : > { %8880 = vrsqrt.f32 %v4010_v39  ;;  %v3755_v29 = vmul.f32 0.03125, %v3267_v43  ;;  %v3627_v13 = vmul.f32 0.03125, %v2883_v11  ;;  %8638 = vmatmul.mubr.msk.f32.gmra.mxu1 %vm458_vm0, %v5043_v50  ;;  %v4781_v52 = vmul.f32 %v13172_v55, %v4518_v34  ;;  %v17501_v39 = vld [vmem:[#allocation37_spill] sm:$0xff] }
 0x379   : > { %v8869_v16 = vpop.eup %8868  ;;  %v13289_v48 = vsub.f32 %v17500_v44, %v2258_v33  ;;  %8882 = vrsqrt.f32 %v3882_v14  ;;  %8446 = vmatmul.mubr.msk.f32.gmra.mxu0 %vm458_vm0, %v4915_v37  ;;  %v4653_v20 = vmul.f32 %v13172_v55, %v4390_v12  ;;  %v3376_v18 = vsel %vm458_vm0, %v2768_v60, 0.0  ;;  %2987 = vadd.xlane.f32.xlu0 %v12574_v5  ;;  %v17503_v12 = vld [vmem:[#allocation165_spill] sm:$0xff] }
 0x37a   : > { %v8871_v10 = vpop.eup %8870  ;;  %v4011_v35 = vadd.f32 1e-05, %v3755_v29  ;;  %v3883_v63 = vadd.f32 1e-05, %v3627_v13  ;;  %v5044_v26 = vadd.f32 %v13187_v9, %v4781_v52  ;;  %v4519_v54 = vmul.f32 %v8869_v16, %v11963_v1  ;;  %v2886_v14 = vpop.xlane.xlu0 %2885 }
 0x37b   : > { %3371 = vadd.xlane.f32.xlu1 %v3370_v42  ;;  %v2261_v33 = vmul.f32 0.03125, %v17501_v39  ;;  %v3270_v50 = vpop.xlane.xlu1 %3269  ;;  %v4916_v34 = vadd.f32 %v13187_v9, %v4653_v20  ;;  %v4391_v43 = vmul.f32 %v8871_v10, %v17502_v62  ;;  %v3379_v60 = vsel %vm458_vm0, %v2769_v61, 0.0  ;;  %v17504_v20 = vld [vmem:[#allocation52_spill] sm:$0xff] }
 0x37c   : > { %8884 = vrsqrt.f32 %v4011_v35  ;;  %v3756_v11 = vmul.f32 0.03125, %v3270_v50  ;;  %v3628_v37 = vmul.f32 0.03125, %v2886_v14  ;;  %8640 = vmatprep.mubr.msk.f32.mxu1 %vm458_vm0, %v5044_v26  ;;  %v4782_v5 = vmul.f32 %v13172_v55, %v4519_v54  ;;  %v17505_v35 = vld [vmem:[#allocation308_spill] sm:$0xff]  ;;  %v17506_v50 = vld [vmem:[#allocation163_spill] sm:$0xff] }
 0x37d   : > { %v8873_v42 = vpop.eup %8872  ;;  %v2260_v1 = vmul.f32 0.03125, %v17503_v12  ;;  %8886 = vrsqrt.f32 %v3883_v63  ;;  %8448 = vmatprep.mubr.msk.f32.mxu0 %vm458_vm0, %v4916_v34  ;;  %v4654_v29 = vmul.f32 %v13172_v55, %v4391_v43  ;;  %v2770_v13 = vmul.f32 %v13289_v48, %v13289_v48  ;;  %2990 = vadd.xlane.f32.xlu0 %v12543_v6 }
 0x37e   : > { %v8875_v52 = vpop.eup %8874  ;;  %v4012_v61 = vadd.f32 1e-05, %v3756_v11  ;;  %v3884_v16 = vadd.f32 1e-05, %v3628_v37  ;;  %v5045_v44 = vadd.f32 %v13187_v9, %v4782_v5  ;;  %v4520_v10 = vmul.f32 %v8873_v42, %v17504_v20  ;;  %v2889_v54 = vpop.xlane.xlu0 %2888  ;;  %v17507_v11 = vld [vmem:[#allocation309_spill] sm:$0xff]  ;;  %v17509_v20 = vld [vmem:[#allocation155_spill] sm:$0xff] }
 0x37f   : > { %3374 = vadd.xlane.f32.xlu1 %v3373_v40  ;;  %v13312_v26 = vsub.f32 %v17505_v35, %v2261_v33  ;;  %v3273_v63 = vpop.xlane.xlu1 %3272  ;;  %v4917_v39 = vadd.f32 %v13187_v9, %v4654_v29  ;;  %v4392_v14 = vmul.f32 %v8875_v52, %v17506_v50  ;;  %v2771_v34 = vmul.f32 %v13280_v4, %v13280_v4 }
 0x380   : > { %8888 = vrsqrt.f32 %v4012_v61  ;;  %v3757_v40 = vmul.f32 0.03125, %v3273_v63  ;;  %v3629_v62 = vmul.f32 0.03125, %v2889_v54  ;;  %8641 = vmatmul.mubr.msk.f32.gmra.mxu1 %vm458_vm0, %v5045_v44  ;;  %v4783_v6 = vmul.f32 %v13172_v55, %v4520_v10  ;;  %v17508_v61 = vld [vmem:[#allocation187_spill] sm:$0xff]  ;;  %v17510_v63 = vld [vmem:[#allocation49_spill] sm:$0xff] }
 0x381   : > { %v8877_v43 = vpop.eup %8876  ;;  %v13321_v33 = vsub.f32 %v17507_v11, %v2260_v1  ;;  %8890 = vrsqrt.f32 %v3884_v16  ;;  %8449 = vmatmul.mubr.msk.f32.gmra.mxu0 %vm458_vm0, %v4917_v39  ;;  %v4655_v37 = vmul.f32 %v13172_v55, %v4392_v14  ;;  %v3382_v5 = vsel %vm458_vm0, %v2770_v13, 0.0  ;;  %2993 = vadd.xlane.f32.xlu0 %v12662_v41  ;;  %v17511_v14 = vld [vmem:[#allocation156_spill] sm:$0xff] }
 0x382   : > { %v8879_v42 = vpop.eup %8878  ;;  %v4013_v12 = vadd.f32 1e-05, %v3757_v40  ;;  %v3885_v29 = vadd.f32 1e-05, %v3629_v62  ;;  %v5046_v52 = vadd.f32 %v13187_v9, %v4783_v6  ;;  %v4521_v44 = vmul.f32 %v8877_v43, %v17508_v61  ;;  %v2892_v16 = vpop.xlane.xlu0 %2891 }
 0x383   : > { %3377 = vadd.xlane.f32.xlu1 %v3376_v18  ;;  %v2263_v1 = vmul.f32 0.03125, %v17509_v20  ;;  %v3276_v10 = vpop.xlane.xlu1 %3275  ;;  %v4918_v35 = vadd.f32 %v13187_v9, %v4655_v37  ;;  %v4393_v54 = vmul.f32 %v8879_v42, %v17510_v63  ;;  %v3385_v13 = vsel %vm458_vm0, %v2771_v34, 0.0 }
 0x384   : > { %8892 = vrsqrt.f32 %v4013_v12  ;;  %v3758_v39 = vmul.f32 0.03125, %v3276_v10  ;;  %v3630_v50 = vmul.f32 0.03125, %v2892_v16  ;;  %8643 = vmatprep.mubr.msk.f32.mxu1 %vm458_vm0, %v5046_v52  ;;  %v4784_v41 = vmul.f32 %v13172_v55, %v4521_v44  ;;  %v17512_v12 = vld [vmem:[#allocation312_spill] sm:$0xff] }
 0x385   : > { %v8881_v18 = vpop.eup %8880  ;;  %v2262_v40 = vmul.f32 0.03125, %v17511_v14  ;;  %8894 = vrsqrt.f32 %v3885_v29  ;;  %8451 = vmatprep.mubr.msk.f32.mxu0 %vm458_vm0, %v4918_v35  ;;  %v4656_v62 = vmul.f32 %v13172_v55, %v4393_v54  ;;  %v2772_v6 = vmul.f32 %v13321_v33, %v13321_v33  ;;  %2996 = vadd.xlane.f32.xlu0 %v12626_v59  ;;  %v17513_v35 = vld [vmem:[#allocation313_spill] sm:$0xff]  ;;  %v17514_v14 = vld [vmem:[#allocation391_spill] sm:$0xff] }
 0x386   : > { %v8883_v43 = vpop.eup %8882  ;;  %v4014_v34 = vadd.f32 1e-05, %v3758_v39  ;;  %v3886_v11 = vadd.f32 1e-05, %v3630_v50  ;;  %v5047_v37 = vadd.f32 %v13187_v9, %v4784_v41  ;;  %v4522_v42 = vmul.f32 %v8881_v18, %v12079_v21  ;;  %v2895_v61 = vpop.xlane.xlu0 %2894 }
 0x387   : > { %3380 = vadd.xlane.f32.xlu1 %v3379_v60  ;;  %v13344_v52 = vsub.f32 %v17512_v12, %v2263_v1  ;;  %v3279_v29 = vpop.xlane.xlu1 %3278  ;;  %v4919_v44 = vadd.f32 %v13187_v9, %v4656_v62  ;;  %v4394_v20 = vmul.f32 %v8883_v43, %v12072_v24  ;;  %v2773_v10 = vmul.f32 %v13312_v26, %v13312_v26  ;;  %v17515_v12 = vld [vmem:[#allocation392_spill] sm:$0xff] }
 0x388   : > { %8896 = vrsqrt.f32 %v4014_v34  ;;  %v3759_v60 = vmul.f32 0.03125, %v3279_v29  ;;  %v3631_v16 = vmul.f32 0.03125, %v2895_v61  ;;  %8644 = vmatmul.mubr.msk.f32.gmra.mxu1 %vm458_vm0, %v5047_v37  ;;  %v4785_v59 = vmul.f32 %v13172_v55, %v4522_v42 }
 0x389   : > { %v8885_v21 = vpop.eup %8884  ;;  %v13353_v1 = vsub.f32 %v17513_v35, %v2262_v40  ;;  %8898 = vrsqrt.f32 %v3886_v11  ;;  %8452 = vmatmul.mubr.msk.f32.gmra.mxu0 %vm458_vm0, %v4919_v44  ;;  %v4657_v63 = vmul.f32 %v13172_v55, %v4394_v20  ;;  %v3388_v24 = vsel %vm458_vm0, %v2772_v6, 0.0  ;;  %2999 = vadd.xlane.f32.xlu0 %v12770_v22 }
 0x38a   : > { %v8887_v54 = vpop.eup %8886  ;;  %v4015_v39 = vadd.f32 1e-05, %v3759_v60  ;;  %v3887_v50 = vadd.f32 1e-05, %v3631_v16  ;;  %v5048_v41 = vadd.f32 %v13187_v9, %v4785_v59  ;;  %v4523_v18 = vmul.f32 %v8885_v21, %v12117_v19  ;;  %v2898_v43 = vpop.xlane.xlu0 %2897  ;;  %v17516_v60 = vld [vmem:[#allocation68_spill] sm:$0xff] }
 0x38b   : > { %3383 = vadd.xlane.f32.xlu1 %v3382_v5  ;;  %v2265_v40 = vmul.f32 0.03125, %v17514_v14  ;;  %v3282_v62 = vpop.xlane.xlu1 %3281  ;;  %v4920_v34 = vadd.f32 %v13187_v9, %v4657_v63  ;;  %v4395_v11 = vmul.f32 %v8887_v54, %v12110_v45  ;;  %v3391_v6 = vsel %vm458_vm0, %v2773_v10, 0.0  ;;  %v17517_v59 = vld [vmem:[#allocation316_spill] sm:$0xff] }
 0x38c   : > { %8900 = vrsqrt.f32 %v4015_v39  ;;  %v3760_v37 = vmul.f32 0.03125, %v3282_v62  ;;  %v3632_v42 = vmul.f32 0.03125, %v2898_v43  ;;  %8646 = vmatprep.mubr.msk.f32.mxu1 %vm458_vm0, %v5048_v41  ;;  %v4786_v22 = vmul.f32 %v13172_v55, %v4523_v18  ;;  %v17518_v39 = vld [vmem:[#allocation198_spill] sm:$0xff]  ;;  %v17519_v62 = vld [vmem:[#allocation317_spill] sm:$0xff] }
 0x38d   : > { %v8889_v5 = vpop.eup %8888  ;;  %v2264_v19 = vmul.f32 0.03125, %v17515_v12  ;;  %8902 = vrsqrt.f32 %v3887_v50  ;;  %8454 = vmatprep.mubr.msk.f32.mxu0 %vm458_vm0, %v4920_v34  ;;  %v4658_v29 = vmul.f32 %v13172_v55, %v4395_v11  ;;  %v2774_v45 = vmul.f32 %v13353_v1, %v13353_v1  ;;  %3002 = vadd.xlane.f32.xlu0 %v12757_v28  ;;  %v17520_v12 = vld [vmem:[#allocation48_spill] sm:$0xff] }
 0x38e   : > { %v8891_v61 = vpop.eup %8890  ;;  %v4016_v44 = vadd.f32 1e-05, %v3760_v37  ;;  %v3888_v20 = vadd.f32 1e-05, %v3632_v42  ;;  %v5049_v10 = vadd.f32 %v13187_v9, %v4786_v22  ;;  %v4524_v16 = vmul.f32 %v8889_v5, %v17516_v60  ;;  %v2901_v63 = vpop.xlane.xlu0 %2900 }
 0x38f   : > { %3386 = vadd.xlane.f32.xlu1 %v3385_v13  ;;  %v13376_v21 = vsub.f32 %v17517_v59, %v2265_v40  ;;  %v3285_v35 = vpop.xlane.xlu1 %3284  ;;  %v4921_v54 = vadd.f32 %v13187_v9, %v4658_v29  ;;  %v4396_v50 = vmul.f32 %v8891_v61, %v17518_v39  ;;  %v2775_v41 = vmul.f32 %v13344_v52, %v13344_v52  ;;  %v17522_v59 = vld [vmem:[#allocation168_spill] sm:$0xff] }
 0x390   : > { %8904 = vrsqrt.f32 %v4016_v44  ;;  %v3761_v13 = vmul.f32 0.03125, %v3285_v35  ;;  %v3633_v18 = vmul.f32 0.03125, %v2901_v63  ;;  %8647 = vmatmul.mubr.msk.f32.gmra.mxu1 %vm458_vm0, %v5049_v10  ;;  %v4787_v28 = vmul.f32 %v13172_v55, %v4524_v16 }
 0x391   : > { %v8893_v14 = vpop.eup %8892  ;;  %v13385_v40 = vsub.f32 %v17519_v62, %v2264_v19  ;;  %8906 = vrsqrt.f32 %v3888_v20  ;;  %8455 = vmatmul.mubr.msk.f32.gmra.mxu0 %vm458_vm0, %v4921_v54  ;;  %v4659_v43 = vmul.f32 %v13172_v55, %v4396_v50  ;;  %v3394_v34 = vsel %vm458_vm0, %v2774_v45, 0.0  ;;  %3005 = vadd.xlane.f32.xlu0 %v12902_v3  ;;  %v17521_v20 = vld [vmem:[#allocation65_spill] sm:$0xff] }
 0x392   : > { %v8895_v11 = vpop.eup %8894  ;;  %v4017_v37 = vadd.f32 1e-05, %v3761_v13  ;;  %v3889_v42 = vadd.f32 1e-05, %v3633_v18  ;;  %v5050_v22 = vadd.f32 %v13187_v9, %v4787_v28  ;;  %v4525_v5 = vmul.f32 %v8893_v14, %v12208_v0  ;;  %v2904_v61 = vpop.xlane.xlu0 %2903  ;;  %v17523_v18 = vld [vmem:[#allocation320_spill] sm:$0xff] }
 0x393   : > { %3389 = vadd.xlane.f32.xlu1 %v3388_v24  ;;  %v2267_v19 = vmul.f32 0.03125, %v17520_v12  ;;  %v3288_v29 = vpop.xlane.xlu1 %3287  ;;  %v4922_v44 = vadd.f32 %v13187_v9, %v4659_v43  ;;  %v4397_v10 = vmul.f32 %v8895_v11, %v17521_v20  ;;  %v3397_v45 = vsel %vm458_vm0, %v2775_v41, 0.0  ;;  %v17524_v11 = vld [vmem:[#allocation186_spill] sm:$0xff] }
 0x394   : > { %8908 = vrsqrt.f32 %v4017_v37  ;;  %v3762_v60 = vmul.f32 0.03125, %v3288_v29  ;;  %v3634_v16 = vmul.f32 0.03125, %v2904_v61  ;;  %8649 = vmatprep.mubr.msk.f32.mxu1 %vm458_vm0, %v5050_v22  ;;  %v4788_v3 = vmul.f32 %v13172_v55, %v4525_v5  ;;  %v17525_v5 = vld [vmem:[#allocation171_spill] sm:$0xff] }
 0x395   : > { %v8897_v24 = vpop.eup %8896  ;;  %v2266_v0 = vmul.f32 0.03125, %v17522_v59  ;;  %8910 = vrsqrt.f32 %v3889_v42  ;;  %8457 = vmatprep.mubr.msk.f32.mxu0 %vm458_vm0, %v4922_v44  ;;  %v4660_v35 = vmul.f32 %v13172_v55, %v4397_v10  ;;  %v2776_v63 = vmul.f32 %v13385_v40, %v13385_v40  ;;  %3008 = vadd.xlane.f32.xlu0 %v12879_v30 }
 0x396   : > { %v8899_v54 = vpop.eup %8898  ;;  %v4018_v39 = vadd.f32 1e-05, %v3762_v60  ;;  %v3890_v50 = vadd.f32 1e-05, %v3634_v16  ;;  %v5051_v41 = vadd.f32 %v13187_v9, %v4788_v3  ;;  %v4526_v13 = vmul.f32 %v8897_v24, %v12243_v46  ;;  %v2907_v62 = vpop.xlane.xlu0 %2906  ;;  %v17526_v60 = vld [vmem:[#allocation195_spill] sm:$0xff] }
 0x397   : > { %3392 = vadd.xlane.f32.xlu1 %v3391_v6  ;;  %v13408_v28 = vsub.f32 %v17523_v18, %v2267_v19  ;;  %v3291_v14 = vpop.xlane.xlu1 %3290  ;;  %v4923_v43 = vadd.f32 %v13187_v9, %v4660_v35  ;;  %v4398_v37 = vmul.f32 %v8899_v54, %v17524_v11  ;;  %v2777_v42 = vmul.f32 %v13376_v21, %v13376_v21  ;;  %v17527_v3 = vld [vmem:[#allocation47_spill] sm:$0xff]  ;;  %v17528_v54 = vld [vmem:[#allocation62_spill] sm:$0xff] }
 0x398   : > { %8912 = vrsqrt.f32 %v4018_v39  ;;  %v3763_v6 = vmul.f32 0.03125, %v3291_v14  ;;  %v3635_v22 = vmul.f32 0.03125, %v2907_v62  ;;  %8650 = vmatmul.mubr.msk.f32.gmra.mxu1 %vm458_vm0, %v5051_v41  ;;  %v4789_v30 = vmul.f32 %v13172_v55, %v4526_v13  ;;  %v17529_v13 = vld [vmem:[#allocation51_spill] sm:$0xff] }
 0x399   : > { %v8901_v46 = vpop.eup %8900  ;;  %v13417_v12 = vsub.f32 %v17525_v5, %v2266_v0  ;;  %8914 = vrsqrt.f32 %v3890_v50  ;;  %8458 = vmatmul.mubr.msk.f32.gmra.mxu0 %vm458_vm0, %v4923_v43  ;;  %v4661_v19 = vmul.f32 %v13172_v55, %v4398_v37  ;;  %v3400_v29 = vsel %vm458_vm0, %v2776_v63, 0.0  ;;  %3011 = vadd.xlane.f32.xlu0 %v12927_v25 }
 0x39a   : > { %v8903_v61 = vpop.eup %8902  ;;  %v4019_v44 = vadd.f32 1e-05, %v3763_v6  ;;  %v3891_v20 = vadd.f32 1e-05, %v3635_v22  ;;  %v5052_v10 = vadd.f32 %v13187_v9, %v4789_v30  ;;  %v4527_v16 = vmul.f32 %v8901_v46, %v17526_v60  ;;  %v2910_v0 = vpop.xlane.xlu0 %2909  ;;  %v17530_v22 = vld [vmem:[#allocation3_spill] sm:$0xff] }
 0x39b   : > { %3395 = vadd.xlane.f32.xlu1 %v3394_v34  ;;  %v2269_v24 = vmul.f32 0.03125, %v17527_v3  ;;  %v3294_v59 = vpop.xlane.xlu1 %3293  ;;  %v4924_v35 = vadd.f32 %v13187_v9, %v4661_v19  ;;  %v4399_v39 = vmul.f32 %v8903_v61, %v17528_v54  ;;  %v3403_v63 = vsel %vm458_vm0, %v2777_v42, 0.0  ;;  %v17531_v61 = vld [vmem:[#allocation64_spill] sm:$0xff]  ;;  %v17532_v60 = vld [vmem:[#allocation323_spill] sm:$0xff] }
 0x39c   : > { %8916 = vrsqrt.f32 %v4019_v44  ;;  %v3764_v50 = vmul.f32 0.03125, %v3294_v59  ;;  %v3636_v41 = vmul.f32 0.03125, %v2910_v0  ;;  %8652 = vmatprep.mubr.msk.f32.mxu1 %vm458_vm0, %v5052_v10  ;;  %v4790_v25 = vmul.f32 %v13172_v55, %v4527_v16 }
 0x39d   : > { %v8905_v34 = vpop.eup %8904  ;;  %v2268_v18 = vmul.f32 0.03125, %v17529_v13  ;;  %8918 = vrsqrt.f32 %v3891_v20  ;;  %8460 = vmatprep.mubr.msk.f32.mxu0 %vm458_vm0, %v4924_v35  ;;  %v4662_v14 = vmul.f32 %v13172_v55, %v4399_v39  ;;  %v2778_v62 = vmul.f32 %v13417_v12, %v13417_v12  ;;  %3014 = vadd.xlane.f32.xlu0 %v12918_v7  ;;  %v17533_v39 = vld [vmem:[#allocation81_spill] sm:$0xff] }
 0x39e   : > { %v8907_v43 = vpop.eup %8906  ;;  %v4020_v11 = vadd.f32 1e-05, %v3764_v50  ;;  %v3892_v37 = vadd.f32 1e-05, %v3636_v41  ;;  %v5053_v42 = vadd.f32 %v13187_v9, %v4790_v25  ;;  %v4528_v6 = vmul.f32 %v8905_v34, %v12316_v27  ;;  %v2913_v5 = vpop.xlane.xlu0 %2912  ;;  %v17534_v41 = vld [vmem:[#allocation54_spill] sm:$0xff] }
 0x39f   : > { %3398 = vadd.xlane.f32.xlu1 %v3397_v45  ;;  %v13440_v30 = vsub.f32 %v17530_v22, %v2269_v24  ;;  %v3297_v46 = vpop.xlane.xlu1 %3296  ;;  %v4925_v19 = vadd.f32 %v13187_v9, %v4662_v14  ;;  %v4400_v44 = vmul.f32 %v8907_v43, %v17531_v61  ;;  %v2779_v20 = vmul.f32 %v13408_v28, %v13408_v28  ;;  %v17535_v14 = vld [vmem:[#allocation66_spill] sm:$0xff] }
 0x3a0   : > { %8920 = vrsqrt.f32 %v4020_v11  ;;  %v3765_v45 = vmul.f32 0.03125, %v3297_v46  ;;  %v3637_v10 = vmul.f32 0.03125, %v2913_v5  ;;  %8653 = vmatmul.mubr.msk.f32.gmra.mxu1 %vm458_vm0, %v5053_v42  ;;  %v4791_v7 = vmul.f32 %v13172_v55, %v4528_v6  ;;  %v17536_v42 = vld [vmem:[#allocation178_spill] sm:$0xff] }
 0x3a1   : > { %v8909_v27 = vpop.eup %8908  ;;  %v13449_v16 = vsub.f32 %v17532_v60, %v2268_v18  ;;  %8922 = vrsqrt.f32 %v3892_v37  ;;  %8461 = vmatmul.mubr.msk.f32.gmra.mxu0 %vm458_vm0, %v4925_v19  ;;  %v4663_v3 = vmul.f32 %v13172_v55, %v4400_v44  ;;  %v3406_v24 = vsel %vm458_vm0, %v2778_v62, 0.0  ;;  %3017 = vadd.xlane.f32.xlu0 %v13036_v8 }
 0x3a2   : > { %v8911_v59 = vpop.eup %8910  ;;  %v4021_v0 = vadd.f32 1e-05, %v3765_v45  ;;  %v3893_v35 = vadd.f32 1e-05, %v3637_v10  ;;  %v5054_v54 = vadd.f32 %v13187_v9, %v4791_v7  ;;  %v4529_v50 = vmul.f32 %v8909_v27, %v17533_v39  ;;  %v2916_v13 = vpop.xlane.xlu0 %2915  ;;  %v17538_v10 = vld [vmem:[#allocation2_spill] sm:$0xff] }
 0x3a3   : > { %3401 = vadd.xlane.f32.xlu1 %v3400_v29  ;;  %v2271_v25 = vmul.f32 0.03125, %v17534_v41  ;;  %v3300_v34 = vpop.xlane.xlu1 %3299  ;;  %v4926_v18 = vadd.f32 %v13187_v9, %v4663_v3  ;;  %v4401_v43 = vmul.f32 %v8911_v59, %v17535_v14  ;;  %v3409_v62 = vsel %vm458_vm0, %v2779_v20, 0.0  ;;  %v17537_v20 = vld [vmem:[#allocation210_spill] sm:$0xff]  ;;  %v17539_v59 = vld [vmem:[#allocation207_spill] sm:$0xff] }
 0x3a4   : > { %8924 = vrsqrt.f32 %v4021_v0  ;;  %v3766_v11 = vmul.f32 0.03125, %v3300_v34  ;;  %v3638_v37 = vmul.f32 0.03125, %v2916_v13  ;;  %8655 = vmatprep.mubr.msk.f32.mxu1 %vm458_vm0, %v5054_v54  ;;  %v4792_v8 = vmul.f32 %v13172_v55, %v4529_v50  ;;  %v17540_v50 = vld [vmem:[#allocation326_spill] sm:$0xff] }
 0x3a5   : > { %v8913_v29 = vpop.eup %8912  ;;  %v2270_v6 = vmul.f32 0.03125, %v17536_v42  ;;  %8926 = vrsqrt.f32 %v3893_v35  ;;  %8463 = vmatprep.mubr.msk.f32.mxu0 %vm458_vm0, %v4926_v18  ;;  %v4664_v22 = vmul.f32 %v13172_v55, %v4401_v43  ;;  %v2780_v46 = vmul.f32 %v13449_v16, %v13449_v16  ;;  %3020 = vadd.xlane.f32.xlu0 %v13029_v17 }
 0x3a6   : > { %v8915_v5 = vpop.eup %8914  ;;  %v4022_v19 = vadd.f32 1e-05, %v3766_v11  ;;  %v3894_v61 = vadd.f32 1e-05, %v3638_v37  ;;  %v5055_v44 = vadd.f32 %v13187_v9, %v4792_v8  ;;  %v4530_v45 = vmul.f32 %v8913_v29, %v17537_v20  ;;  %v2919_v60 = vpop.xlane.xlu0 %2918  ;;  %v17541_v11 = vld [vmem:[#allocation97_spill] sm:$0xff]  ;;  %v17542_v8 = vld [vmem:[#allocation394_spill] sm:$0xff] }
 0x3a7   : > { %3404 = vadd.xlane.f32.xlu1 %v3403_v63  ;;  %v13472_v7 = vsub.f32 %v17538_v10, %v2271_v25  ;;  %v3303_v27 = vpop.xlane.xlu1 %3302  ;;  %v4927_v3 = vadd.f32 %v13187_v9, %v4664_v22  ;;  %v4402_v0 = vmul.f32 %v8915_v5, %v17539_v59  ;;  %v2781_v35 = vmul.f32 %v13440_v30, %v13440_v30  ;;  %v17543_v5 = vld [vmem:[#allocation215_spill] sm:$0xff] }
 0x3a8   : > { %8928 = vrsqrt.f32 %v4022_v19  ;;  %v3767_v63 = vmul.f32 0.03125, %v3303_v27  ;;  %v3639_v54 = vmul.f32 0.03125, %v2919_v60  ;;  %8656 = vmatmul.mubr.msk.f32.gmra.mxu1 %vm458_vm0, %v5055_v44  ;;  %v4793_v17 = vmul.f32 %v13172_v55, %v4530_v45  ;;  %v17544_v20 = vld [vmem:[#allocation395_spill] sm:$0xff] }
 0x3a9   : > { %v8917_v39 = vpop.eup %8916  ;;  %v13481_v41 = vsub.f32 %v17540_v50, %v2270_v6  ;;  %8930 = vrsqrt.f32 %v3894_v61  ;;  %8464 = vmatmul.mubr.msk.f32.gmra.mxu0 %vm458_vm0, %v4927_v3  ;;  %v4665_v25 = vmul.f32 %v13172_v55, %v4402_v0  ;;  %v3412_v34 = vsel %vm458_vm0, %v2780_v46, 0.0  ;;  %3023 = vadd.xlane.f32.xlu0 %v13054_v57 }
 0x3aa   : > { %v8919_v13 = vpop.eup %8918  ;;  %v4023_v18 = vadd.f32 1e-05, %v3767_v63  ;;  %v3895_v14 = vadd.f32 1e-05, %v3639_v54  ;;  %v5056_v43 = vadd.f32 %v13187_v9, %v4793_v17  ;;  %v4531_v37 = vmul.f32 %v8917_v39, %v17541_v11  ;;  %v2922_v6 = vpop.xlane.xlu0 %2921  ;;  %v17546_v54 = vld [vmem:[#allocation4_spill] sm:$0xff] }
 0x3ab   : > { %3407 = vadd.xlane.f32.xlu1 %v3406_v24  ;;  %v2273_v29 = vmul.f32 0.03125, %v17542_v8  ;;  %v3306_v42 = vpop.xlane.xlu1 %3305  ;;  %v4928_v22 = vadd.f32 %v13187_v9, %v4665_v25  ;;  %v4403_v19 = vmul.f32 %v8919_v13, %v17543_v5  ;;  %v13493_v46 = vsel %vm458_vm0, %v2781_v35, 0.0  ;;  %v17545_v35 = vld [vmem:[#allocation223_spill] sm:$0xff]  ;;  %v17547_v13 = vld [vmem:[#allocation74_spill] sm:$0xff] }
 0x3ac   : > { %8932 = vrsqrt.f32 %v4023_v18  ;;  %v3768_v61 = vmul.f32 0.03125, %v3306_v42  ;;  %v3640_v24 = vmul.f32 0.03125, %v2922_v6  ;;  %8658 = vmatprep.mubr.msk.f32.mxu1 %vm458_vm0, %v5056_v43  ;;  %v4794_v57 = vmul.f32 %v13172_v55, %v4531_v37  ;;  %v17548_v37 = vld [vmem:[#allocation5_spill] sm:$0xff] }
 0x3ad   : > { %v8921_v44 = vpop.eup %8920  ;;  %v2272_v45 = vmul.f32 0.03125, %v17544_v20  ;;  %8934 = vrsqrt.f32 %v3895_v14  ;;  %8466 = vmatprep.mubr.msk.f32.mxu0 %vm458_vm0, %v4928_v22  ;;  %v4666_v10 = vmul.f32 %v13172_v55, %v4403_v19  ;;  %v2782_v27 = vmul.f32 %v13481_v41, %v13481_v41  ;;  %3026 = vadd.xlane.f32.xlu0 %v13057_v32 }
 0x3ae   : > { %v8923_v60 = vpop.eup %8922  ;;  %v4024_v3 = vadd.f32 1e-05, %v3768_v61  ;;  %v3896_v59 = vadd.f32 1e-05, %v3640_v24  ;;  %v5057_v0 = vadd.f32 %v13187_v9, %v4794_v57  ;;  %v4532_v63 = vmul.f32 %v8921_v44, %v17545_v35  ;;  %v2925_v50 = vpop.xlane.xlu0 %2924  ;;  %v17549_v61 = vld [vmem:[#allocation283_spill] sm:$0xff]  ;;  %v17552_v35 = vld [vmem:[#allocation182_spill] sm:$0xff] }
 0x3af   : > { %3410 = vadd.xlane.f32.xlu1 %v3409_v62  ;;  %v13506_v17 = vsub.f32 %v17546_v54, %v2273_v29  ;;  %v3309_v39 = vpop.xlane.xlu1 %3308  ;;  %v4929_v25 = vadd.f32 %v13187_v9, %v4666_v10  ;;  %v4404_v18 = vmul.f32 %v8923_v60, %v17547_v13  ;;  %v2783_v14 = vmul.f32 %v13472_v7, %v13472_v7  ;;  %v17550_v57 = vld [vmem:[#allocation55_spill] sm:$0xff]  ;;  %v17551_v60 = vld [vmem:[#allocation113_spill] sm:$0xff]  ;;  %v13546_v13 = vld [vmem:[%s16001_s6] ss:$0 sm:$0xff] }
 0x3b0   : > { %8936 = vrsqrt.f32 %v4024_v3  ;;  %v3769_v62 = vmul.f32 0.03125, %v3309_v39  ;;  %v3641_v43 = vmul.f32 0.03125, %v2925_v50  ;;  %8659 = vmatmul.mubr.msk.f32.gmra.mxu1 %vm458_vm0, %v5057_v0  ;;  %v4795_v32 = vmul.f32 %v13172_v55, %v4532_v63 }
 0x3b1   : > { %v8925_v11 = vpop.eup %8924  ;;  %v13515_v8 = vsub.f32 %v17548_v37, %v2272_v45  ;;  %8938 = vrsqrt.f32 %v3896_v59  ;;  %8467 = vmatmul.mubr.msk.f32.gmra.mxu0 %vm458_vm0, %v4929_v25  ;;  %v4667_v29 = vmul.f32 %v13172_v55, %v4404_v18  ;;  %v3418_v42 = vsel %vm458_vm0, %v2782_v27, 0.0  ;;  %3029 = vadd.xlane.f32.xlu0 %v13074_v49  ;;  %v13533_v49 = vld [vmem:[%s16000_s5] ss:$0 sm:$0xff] }
 0x3b2   : > { %v8927_v6 = vpop.eup %8926  ;;  %v4025_v22 = vadd.f32 1e-05, %v3769_v62  ;;  %v3897_v5 = vadd.f32 1e-05, %v3641_v43  ;;  %v5058_v19 = vadd.f32 %v13187_v9, %v4795_v32  ;;  %v4533_v24 = vmul.f32 %v8925_v11, %v17549_v61  ;;  %v2928_v45 = vpop.xlane.xlu0 %2927  ;;  %v17553_v62 = vld [vmem:[#allocation12_spill] sm:$0xff] }
 0x3b3   : > { %3413 = vadd.xlane.f32.xlu1 %v3412_v34  ;;  %v2275_v44 = vmul.f32 0.03125, %v17550_v57  ;;  %v3312_v20 = vpop.xlane.xlu1 %3311  ;;  %v4930_v10 = vadd.f32 %v13187_v9, %v4667_v29  ;;  %v4405_v55 = vmul.f32 %v8927_v6, %v17551_v60  ;;  %v13527_v27 = vsel %vm458_vm0, %v2783_v14, 0.0  ;;  %v17554_v29 = vld [vmem:[#allocation231_spill] sm:$0xff]  ;;  %v17556_v60 = vld [vmem:[#allocation85_spill] sm:$0xff] }
 0x3b4   : > { %8940 = vrsqrt.f32 %v4025_v22  ;;  %v3770_v3 = vmul.f32 0.03125, %v3312_v20  ;;  %v3642_v34 = vmul.f32 0.03125, %v2928_v45  ;;  %8661 = vmatprep.mubr.msk.f32.mxu1 %vm458_vm0, %v5058_v19  ;;  %v4796_v59 = vmul.f32 %v13533_v49, %v4533_v24  ;;  %v17555_v19 = vld [vmem:[#allocation19_spill] sm:$0xff] }
 0x3b5   : > { %v8929_v0 = vpop.eup %8928  ;;  %v2274_v9 = vmul.f32 0.03125, %v17552_v35  ;;  %8942 = vrsqrt.f32 %v3897_v5  ;;  %8469 = vmatprep.mubr.msk.f32.mxu0 %vm458_vm0, %v4930_v10  ;;  %v4668_v63 = vmul.f32 %v13533_v49, %v4405_v55  ;;  %v2784_v54 = vmul.f32 %v13515_v8, %v13515_v8  ;;  %3032 = vadd.xlane.f32.xlu0 %v13077_v15 }
 0x3b6   : > { %v8931_v39 = vpop.eup %8930  ;;  %v4026_v50 = vadd.f32 1e-05, %v3770_v3  ;;  %v3898_v25 = vadd.f32 1e-05, %v3642_v34  ;;  %v5059_v18 = vadd.f32 %v13546_v13, %v4796_v59  ;;  %v4534_v14 = vmul.f32 %v8929_v0, %v12531_v58  ;;  %v2931_v11 = vpop.xlane.xlu0 %2930  ;;  %v17557_v3 = vld [vmem:[#allocation58_spill] sm:$0xff] }
 0x3b7   : > { %3416 = vadd.xlane.f32.xlu1 %v13493_v46  ;;  %v13551_v43 = vsub.f32 %v17553_v62, %v2275_v44  ;;  %v3315_v32 = vpop.xlane.xlu1 %3314  ;;  %v4931_v37 = vadd.f32 %v13546_v13, %v4668_v63  ;;  %v4406_v46 = vmul.f32 %v8931_v39, %v17554_v29  ;;  %v2785_v15 = vmul.f32 %v13506_v17, %v13506_v17 }
 0x3b8   : > { %8944 = vrsqrt.f32 %v4026_v50  ;;  %v3771_v6 = vmul.f32 0.03125, %v3315_v32  ;;  %v3643_v22 = vmul.f32 0.03125, %v2931_v11  ;;  %8662 = vmatmul.mubr.msk.f32.gmra.mxu1 %vm458_vm0, %v5059_v18  ;;  %v4797_v5 = vmul.f32 %v13533_v49, %v4534_v14 }
 0x3b9   : > { %v8933_v58 = vpop.eup %8932  ;;  %v13560_v61 = vsub.f32 %v17555_v19, %v2274_v9  ;;  %8946 = vrsqrt.f32 %v3898_v25  ;;  %8470 = vmatmul.mubr.msk.f32.gmra.mxu0 %vm458_vm0, %v4931_v37  ;;  %v4669_v24 = vmul.f32 %v13533_v49, %v4406_v46  ;;  %v3424_v57 = vsel %vm458_vm0, %v2784_v54, 0.0  ;;  %3035 = vadd.xlane.f32.xlu0 %v13154_v31  ;;  %v17558_v9 = vld [vmem:[#allocation82_spill] sm:$0xff]  ;;  %v17559_v25 = vld [vmem:[#allocation59_spill] sm:$0xff] }
 0x3ba   : > { %v8935_v44 = vpop.eup %8934  ;;  %v4027_v20 = vadd.f32 1e-05, %v3771_v6  ;;  %v3899_v45 = vadd.f32 1e-05, %v3643_v22  ;;  %v5060_v10 = vadd.f32 %v13546_v13, %v4797_v5  ;;  %v4535_v55 = vmul.f32 %v8933_v58, %v17556_v60  ;;  %v2934_v0 = vpop.xlane.xlu0 %2933  ;;  %v17560_v46 = vld [vmem:[#allocation90_spill] sm:$0xff]  ;;  %v17563_v60 = vld [vmem:[#allocation27_spill] sm:$0xff] }
 0x3bb   : > { %3419 = vadd.xlane.f32.xlu1 %v3418_v42  ;;  %v2277_v34 = vmul.f32 0.03125, %v17557_v3  ;;  %v3318_v59 = vpop.xlane.xlu1 %3317  ;;  %v4932_v35 = vadd.f32 %v13546_v13, %v4669_v24  ;;  %v4407_v63 = vmul.f32 %v8935_v44, %v17558_v9  ;;  %v3427_v54 = vsel %vm458_vm0, %v2785_v15, 0.0  ;;  %v17561_v6 = vld [vmem:[#allocation26_spill] sm:$0xff]  ;;  %v17562_v24 = vld [vmem:[#allocation89_spill] sm:$0xff]  ;;  %v17564_v9 = vld [vmem:[#allocation112_spill] sm:$0xff] }
 0x3bc   : > { %8948 = vrsqrt.f32 %v4027_v20  ;;  %v3772_v39 = vmul.f32 0.03125, %v3318_v59  ;;  %v3644_v50 = vmul.f32 0.03125, %v2934_v0  ;;  %8664 = vmatprep.mubr.msk.f32.mxu1 %vm458_vm0, %v5060_v10  ;;  %v4798_v31 = vmul.f32 %v13533_v49, %v4535_v55 }
 0x3bd   : > { %v8937_v42 = vpop.eup %8936  ;;  %v2276_v18 = vmul.f32 0.03125, %v17559_v25  ;;  %8950 = vrsqrt.f32 %v3899_v45  ;;  %8472 = vmatprep.mubr.msk.f32.mxu0 %vm458_vm0, %v4932_v35  ;;  %v4670_v14 = vmul.f32 %v13533_v49, %v4407_v63  ;;  %v2786_v62 = vmul.f32 %v13560_v61, %v13560_v61  ;;  %3038 = vadd.xlane.f32.xlu0 %v13138_v36 }
 0x3be   : > { %v8939_v32 = vpop.eup %8938  ;;  %v4028_v11 = vadd.f32 1e-05, %v3772_v39  ;;  %v3900_v37 = vadd.f32 1e-05, %v3644_v50  ;;  %v5061_v29 = vadd.f32 %v13546_v13, %v4798_v31  ;;  %v4536_v15 = vmul.f32 %v8937_v42, %v17560_v46  ;;  %v2937_v58 = vpop.xlane.xlu0 %2936  ;;  %v17565_v39 = vld [vmem:[#allocation315_spill] sm:$0xff]  ;;  %v17566_v31 = vld [vmem:[#allocation232_spill] sm:$0xff] }
 0x3bf   : > { %3422 = vadd.xlane.f32.xlu1 %v13527_v27  ;;  %v13584_v22 = vsub.f32 %v17561_v6, %v2277_v34  ;;  %v3321_v5 = vpop.xlane.xlu1 %3320  ;;  %v4933_v19 = vadd.f32 %v13546_v13, %v4670_v14  ;;  %v4408_v44 = vmul.f32 %v8939_v32, %v17562_v24  ;;  %v2787_v20 = vmul.f32 %v13551_v43, %v13551_v43  ;;  %v17567_v32 = vld [vmem:[#allocation148_spill] sm:$0xff] }
 0x3c0   : > { %8952 = vrsqrt.f32 %v4028_v11  ;;  %v3773_v27 = vmul.f32 0.03125, %v3321_v5  ;;  %v3645_v45 = vmul.f32 0.03125, %v2937_v58  ;;  %8665 = vmatmul.mubr.msk.f32.gmra.mxu1 %vm458_vm0, %v5061_v29  ;;  %v4799_v36 = vmul.f32 %v13533_v49, %v4536_v15  ;;  %v17568_v15 = vld [vmem:[#allocation194_spill] sm:$0xff] }
 0x3c1   : > { %v8941_v10 = vpop.eup %8940  ;;  %v13593_v55 = vsub.f32 %v17563_v60, %v2276_v18  ;;  %8954 = vrsqrt.f32 %v3900_v37  ;;  %8473 = vmatmul.mubr.msk.f32.gmra.mxu0 %vm458_vm0, %v4933_v19  ;;  %v4671_v3 = vmul.f32 %v13533_v49, %v4408_v44  ;;  %v3430_v34 = vsel %vm458_vm0, %v2786_v62, 0.0  ;;  %3041 = vadd.xlane.f32.xlu0 %v17564_v9 }
 0x3c2   : > { %v8943_v59 = vpop.eup %8942  ;;  %v4029_v0 = vadd.f32 1e-05, %v3773_v27  ;;  %v3901_v35 = vadd.f32 1e-05, %v3645_v45  ;;  %v5062_v63 = vadd.f32 %v13546_v13, %v4799_v36  ;;  %v4537_v50 = vmul.f32 %v8941_v10, %v17565_v39  ;;  %v2940_v18 = vpop.xlane.xlu0 %2939  ;;  %v17570_v36 = vld [vmem:[#allocation334_spill] sm:$0xff] }
 0x3c3   : > { %3425 = vadd.xlane.f32.xlu1 %v3424_v57  ;;  %v2279_v42 = vmul.f32 0.03125, %v17566_v31  ;;  %v3324_v25 = vpop.xlane.xlu1 %3323  ;;  %v4934_v14 = vadd.f32 %v13546_v13, %v4671_v3  ;;  %v4409_v11 = vmul.f32 %v8943_v59, %v17567_v32  ;;  %v3433_v62 = vsel %vm458_vm0, %v2787_v20, 0.0  ;;  %v17569_v20 = vld [vmem:[#allocation388_spill] sm:$0xff] }
 0x3c4   : > { %8956 = vrsqrt.f32 %v4029_v0  ;;  %v3774_v37 = vmul.f32 0.03125, %v3324_v25  ;;  %v3646_v29 = vmul.f32 0.03125, %v2940_v18  ;;  %8667 = vmatprep.mubr.msk.f32.mxu1 %vm458_vm0, %v5062_v63  ;;  %v4800_v57 = vmul.f32 %v13533_v49, %v4537_v50  ;;  %v17571_v0 = vld [vmem:[#allocation254_spill] sm:$0xff] }
 0x3c5   : > { %v8945_v46 = vpop.eup %8944  ;;  %v2278_v6 = vmul.f32 0.03125, %v17568_v15  ;;  %8958 = vrsqrt.f32 %v3901_v35  ;;  %8475 = vmatprep.mubr.msk.f32.mxu0 %vm458_vm0, %v4934_v14  ;;  %v4672_v5 = vmul.f32 %v13533_v49, %v4409_v11  ;;  %v2788_v58 = vmul.f32 %v13593_v55, %v13593_v55  ;;  %3044 = vadd.xlane.f32.xlu0 %v17569_v20  ;;  %v17572_v50 = vld [vmem:[#allocation38_spill] sm:$0xff]  ;;  %v17573_v11 = vld [vmem:[#allocation147_spill] sm:$0xff] }
 0x3c6   : > { %v8947_v19 = vpop.eup %8946  ;;  %v4030_v24 = vadd.f32 1e-05, %v3774_v37  ;;  %v3902_v44 = vadd.f32 1e-05, %v3646_v29  ;;  %v5063_v27 = vadd.f32 %v13546_v13, %v4800_v57  ;;  %v4538_v45 = vmul.f32 %v8945_v46, %v12676_v38  ;;  %v2943_v3 = vpop.xlane.xlu0 %2942  ;;  %v17574_v29 = vld [vmem:[#allocation105_spill] sm:$0xff] }
 0x3c7   : > { %3428 = vadd.xlane.f32.xlu1 %v3427_v54  ;;  %v13616_v10 = vsub.f32 %v17570_v36, %v2279_v42  ;;  %v3327_v60 = vpop.xlane.xlu1 %3326  ;;  %v4935_v59 = vadd.f32 %v13546_v13, %v4672_v5  ;;  %v4410_v35 = vmul.f32 %v8947_v19, %v17571_v0  ;;  %v2789_v9 = vmul.f32 %v13584_v22, %v13584_v22  ;;  %v17575_v46 = vld [vmem:[#allocation237_spill] sm:$0xff]  ;;  %v17577_v36 = vld [vmem:[#allocation63_spill] sm:$0xff] }
 0x3c8   : > { %8960 = vrsqrt.f32 %v4030_v24  ;;  %v3775_v54 = vmul.f32 0.03125, %v3327_v60  ;;  %v3647_v63 = vmul.f32 0.03125, %v2943_v3  ;;  %8668 = vmatmul.mubr.msk.f32.gmra.mxu1 %vm458_vm0, %v5063_v27  ;;  %v4801_v39 = vmul.f32 %v13533_v49, %v4538_v45  ;;  %v17576_v24 = vld [vmem:[#allocation259_spill] sm:$0xff] }
 0x3c9   : > { %v8949_v38 = vpop.eup %8948  ;;  %v13625_v31 = vsub.f32 %v17572_v50, %v2278_v6  ;;  %8962 = vrsqrt.f32 %v3902_v44  ;;  %8476 = vmatmul.mubr.msk.f32.gmra.mxu0 %vm458_vm0, %v4935_v59  ;;  %v4673_v42 = vmul.f32 %v13533_v49, %v4410_v35  ;;  %v3436_v25 = vsel %vm458_vm0, %v2788_v58, 0.0  ;;  %3047 = vadd.xlane.f32.xlu0 %v17573_v11  ;;  %v17580_v50 = vld [vmem:[#allocation336_spill] sm:$0xff]  ;;  %v17581_v11 = vld [vmem:[#allocation109_spill] sm:$0xff] }
 0x3ca   : > { %v8951_v18 = vpop.eup %8950  ;;  %v4031_v14 = vadd.f32 1e-05, %v3775_v54  ;;  %v3903_v32 = vadd.f32 1e-05, %v3647_v63  ;;  %v5064_v37 = vadd.f32 %v13546_v13, %v4801_v39  ;;  %v4539_v57 = vmul.f32 %v8949_v38, %v17574_v29  ;;  %v2946_v5 = vpop.xlane.xlu0 %2945  ;;  %v17578_v54 = vld [vmem:[#allocation123_spill] sm:$0xff]  ;;  %v17579_v39 = vld [vmem:[#allocation324_spill] sm:$0xff] }
 0x3cb   : > { %3431 = vadd.xlane.f32.xlu1 %v3430_v34  ;;  %v2281_v15 = vmul.f32 0.03125, %v17575_v46  ;;  %v3330_v6 = vpop.xlane.xlu1 %3329  ;;  %v4936_v19 = vadd.f32 %v13546_v13, %v4673_v42  ;;  %v4411_v44 = vmul.f32 %v8951_v18, %v17576_v24  ;;  %v3439_v58 = vsel %vm458_vm0, %v2789_v9, 0.0 }
 0x3cc   : > { %8964 = vrsqrt.f32 %v4031_v14  ;;  %v3776_v20 = vmul.f32 0.03125, %v3330_v6  ;;  %v3648_v27 = vmul.f32 0.03125, %v2946_v5  ;;  %8670 = vmatprep.mubr.msk.f32.mxu1 %vm458_vm0, %v5064_v37  ;;  %v4802_v34 = vmul.f32 %v13533_v49, %v4539_v57  ;;  %v17582_v5 = vld [vmem:[#allocation337_spill] sm:$0xff] }
 0x3cd   : > { %v8953_v45 = vpop.eup %8952  ;;  %v2280_v60 = vmul.f32 0.03125, %v17577_v36  ;;  %8966 = vrsqrt.f32 %v3903_v32  ;;  %8478 = vmatprep.mubr.msk.f32.mxu0 %vm458_vm0, %v4936_v19  ;;  %v4674_v3 = vmul.f32 %v13533_v49, %v4411_v44  ;;  %v2790_v59 = vmul.f32 %v13625_v31, %v13625_v31  ;;  %3050 = vadd.xlane.f32.xlu0 %v17578_v54  ;;  %v17584_v36 = vld [vmem:[#allocation260_spill] sm:$0xff] }
 0x3ce   : > { %v8955_v0 = vpop.eup %8954  ;;  %v4032_v35 = vadd.f32 1e-05, %v3776_v20  ;;  %v3904_v9 = vadd.f32 1e-05, %v3648_v27  ;;  %v5065_v63 = vadd.f32 %v13546_v13, %v4802_v34  ;;  %v4540_v38 = vmul.f32 %v8953_v45, %v17579_v39  ;;  %v2949_v14 = vpop.xlane.xlu0 %2948  ;;  %v17583_v34 = vld [vmem:[#allocation41_spill] sm:$0xff] }
 0x3cf   : > { %3434 = vadd.xlane.f32.xlu1 %v3433_v62  ;;  %v13648_v42 = vsub.f32 %v17580_v50, %v2281_v15  ;;  %v4937_v32 = vadd.f32 %v13546_v13, %v4674_v3  ;;  %v4412_v37 = vmul.f32 %v8955_v0, %v17581_v11  ;;  %v2791_v29 = vmul.f32 %v13616_v10, %v13616_v10  ;;  %v17585_v0 = vld [vmem:[#allocation236_spill] sm:$0xff] }
 0x3d0   : > { %v3333_v18 = vpop.xlane.xlu1 %3332  ;;  %8968 = vrsqrt.f32 %v4032_v35  ;;  %v3649_v57 = vmul.f32 0.03125, %v2949_v14  ;;  %8671 = vmatmul.mubr.msk.f32.gmra.mxu1 %vm458_vm0, %v5065_v63  ;;  %v4803_v46 = vmul.f32 %v13533_v49, %v4540_v38  ;;  %v13657_v15 = vsub.f32 %v17582_v5, %v2280_v60  ;;  %v17586_v63 = vld [vmem:[#allocation184_spill] sm:$0xff]  ;;  %v17587_v14 = vld [vmem:[#allocation67_spill] sm:$0xff] }
 0x3d1   : > { %v3777_v62 = vmul.f32 0.03125, %v3333_v18  ;;  %v8957_v6 = vpop.eup %8956  ;;  %8970 = vrsqrt.f32 %v3904_v9  ;;  %8479 = vmatmul.mubr.msk.f32.gmra.mxu0 %vm458_vm0, %v4937_v32  ;;  %v4675_v19 = vmul.f32 %v13533_v49, %v4412_v37  ;;  %v3442_v24 = vsel %vm458_vm0, %v2790_v59, 0.0  ;;  %3053 = vadd.xlane.f32.xlu0 %v17583_v34  ;;  %v17589_v5 = vld [vmem:[#allocation287_spill] sm:$0xff] }
 0x3d2   : > { %v8959_v44 = vpop.eup %8958  ;;  %v3905_v27 = vadd.f32 1e-05, %v3649_v57  ;;  %v5066_v45 = vadd.f32 %v13546_v13, %v4803_v46  ;;  %v4541_v3 = vmul.f32 %v8957_v6, %v17584_v36  ;;  %v2283_v60 = vmul.f32 0.03125, %v17585_v0  ;;  %v2952_v9 = vpop.xlane.xlu0 %2951  ;;  %v17588_v46 = vld [vmem:[#allocation44_spill] sm:$0xff]  ;;  %v17591_v36 = vld [vmem:[#allocation282_spill] sm:$0xff] }
 0x3d3   : > { %v4033_v20 = vadd.f32 1e-05, %v3777_v62  ;;  %3437 = vadd.xlane.f32.xlu1 %v3436_v25  ;;  %v4938_v54 = vadd.f32 %v13546_v13, %v4675_v19  ;;  %v4413_v39 = vmul.f32 %v8959_v44, %v17586_v63  ;;  %v3445_v59 = vsel %vm458_vm0, %v2791_v29, 0.0  ;;  %v17590_v44 = vld [vmem:[#allocation340_spill] sm:$0xff]  ;;  %v17592_v63 = vld [vmem:[#allocation341_spill] sm:$0xff] }
 0x3d4   : > { %v3336_v35 = vpop.xlane.xlu1 %3335  ;;  %v3650_v50 = vmul.f32 0.03125, %v2952_v9  ;;  %8673 = vmatprep.mubr.msk.f32.mxu1 %vm458_vm0, %v5066_v45  ;;  %v4804_v25 = vmul.f32 %v13533_v49, %v4541_v3  ;;  %v2282_v32 = vmul.f32 0.03125, %v17587_v14  ;;  %v2792_v37 = vmul.f32 %v13657_v15, %v13657_v15  ;;  %v17593_v14 = vld [vmem:[#allocation173_spill] sm:$0xff] }
 0x3d5   : > { %8972 = vrsqrt.f32 %v4033_v20  ;;  %v3778_v38 = vmul.f32 0.03125, %v3336_v35  ;;  %v8961_v18 = vpop.eup %8960  ;;  %8481 = vmatprep.mubr.msk.f32.mxu0 %vm458_vm0, %v4938_v54  ;;  %v4676_v11 = vmul.f32 %v13533_v49, %v4413_v39  ;;  %3056 = vadd.xlane.f32.xlu0 %v17588_v46  ;;  %v13680_v20 = vsub.f32 %v17590_v44, %v2283_v60  ;;  %v17595_v46 = vld [vmem:[#allocation70_spill] sm:$0xff] }
 0x3d6   : > { %8974 = vrsqrt.f32 %v3905_v27  ;;  %v8963_v62 = vpop.eup %8962  ;;  %v3906_v57 = vadd.f32 1e-05, %v3650_v50  ;;  %v5067_v6 = vadd.f32 %v13546_v13, %v4804_v25  ;;  %v4542_v19 = vmul.f32 %v8961_v18, %v17589_v5  ;;  %v2955_v34 = vpop.xlane.xlu0 %2954 }
 0x3d7   : > { %v4034_v29 = vadd.f32 1e-05, %v3778_v38  ;;  %3440 = vadd.xlane.f32.xlu1 %v3439_v58  ;;  %v4939_v45 = vadd.f32 %v13546_v13, %v4676_v11  ;;  %v4414_v3 = vmul.f32 %v8963_v62, %v17591_v36  ;;  %v2793_v0 = vmul.f32 %v13648_v42, %v13648_v42  ;;  %v17594_v62 = vld [vmem:[#allocation200_spill] sm:$0xff]  ;;  %v17597_v36 = vld [vmem:[#allocation71_spill] sm:$0xff] }
 0x3d8   : > { %v3339_v27 = vpop.xlane.xlu1 %3338  ;;  %v3651_v35 = vmul.f32 0.03125, %v2955_v34  ;;  %8674 = vmatmul.mubr.msk.f32.gmra.mxu1 %vm458_vm0, %v5067_v6  ;;  %v4805_v9 = vmul.f32 %v13533_v49, %v4542_v19  ;;  %v13689_v60 = vsub.f32 %v17592_v63, %v2282_v32  ;;  %v3448_v38 = vsel %vm458_vm0, %v2792_v37, 0.0  ;;  %v17596_v19 = vld [vmem:[#allocation140_spill] sm:$0xff]  ;;  %v17598_v63 = vld [vmem:[#allocation57_spill] sm:$0xff] }
 0x3d9   : > { %8976 = vrsqrt.f32 %v4034_v29  ;;  %v3779_v58 = vmul.f32 0.03125, %v3339_v27  ;;  %v8965_v54 = vpop.eup %8964  ;;  %8482 = vmatmul.mubr.msk.f32.gmra.mxu0 %vm458_vm0, %v4939_v45  ;;  %v4677_v39 = vmul.f32 %v13533_v49, %v4414_v3  ;;  %3059 = vadd.xlane.f32.xlu0 %v17593_v14  ;;  %v2285_v32 = vmul.f32 0.03125, %v17595_v46  ;;  %v17600_v14 = vld [vmem:[#allocation344_spill] sm:$0xff]  ;;  %v17602_v46 = vld [vmem:[#allocation11_spill] sm:$0xff] }
 0x3da   : > { %8978 = vrsqrt.f32 %v3906_v57  ;;  %v8967_v50 = vpop.eup %8966  ;;  %v3907_v18 = vadd.f32 1e-05, %v3651_v35  ;;  %v5068_v11 = vadd.f32 %v13546_v13, %v4805_v9  ;;  %v4543_v29 = vmul.f32 %v8965_v54, %v17594_v62  ;;  %v2958_v57 = vpop.xlane.xlu0 %2957 }
 0x3db   : > { %v4035_v25 = vadd.f32 1e-05, %v3779_v58  ;;  %3443 = vadd.xlane.f32.xlu1 %v3442_v24  ;;  %v4940_v5 = vadd.f32 %v13546_v13, %v4677_v39  ;;  %v4415_v44 = vmul.f32 %v8967_v50, %v17596_v19  ;;  %v3451_v37 = vsel %vm458_vm0, %v2793_v0, 0.0  ;;  %v17599_v50 = vld [vmem:[#allocation375_spill] sm:$0xff] }
 0x3dc   : > { %v3342_v6 = vpop.xlane.xlu1 %3341  ;;  %v3652_v34 = vmul.f32 0.03125, %v2958_v57  ;;  %8676 = vmatprep.mubr.msk.f32.mxu1 %vm458_vm0, %v5068_v11  ;;  %v4806_v24 = vmul.f32 %v13533_v49, %v4543_v29  ;;  %v2284_v3 = vmul.f32 0.03125, %v17597_v36  ;;  %v2794_v35 = vmul.f32 %v13689_v60, %v13689_v60 }
 0x3dd   : > { %8980 = vrsqrt.f32 %v4035_v25  ;;  %v3780_v27 = vmul.f32 0.03125, %v3342_v6  ;;  %v8969_v45 = vpop.eup %8968  ;;  %8484 = vmatprep.mubr.msk.f32.mxu0 %vm458_vm0, %v4940_v5  ;;  %v4678_v58 = vmul.f32 %v13533_v49, %v4415_v44  ;;  %3062 = vadd.xlane.f32.xlu0 %v17598_v63  ;;  %v13712_v11 = vsub.f32 %v17600_v14, %v2285_v32  ;;  %v17605_v63 = vld [vmem:[#allocation302_spill] sm:$0xff] }
 0x3de   : > { %8982 = vrsqrt.f32 %v3907_v18  ;;  %v8971_v9 = vpop.eup %8970  ;;  %v3908_v54 = vadd.f32 1e-05, %v3652_v34  ;;  %v5069_v39 = vadd.f32 %v13546_v13, %v4806_v24  ;;  %v4544_v25 = vmul.f32 %v8969_v45, %v17599_v50  ;;  %v2961_v62 = vpop.xlane.xlu0 %2960 }
 0x3df   : > { %v4036_v0 = vadd.f32 1e-05, %v3780_v27  ;;  %3446 = vadd.xlane.f32.xlu1 %v3445_v59  ;;  %17601 = vst [vmem:[#allocation386_spill] sm:$0xff] %v13712_v11  ;;  %v4941_v29 = vadd.f32 %v13546_v13, %v4678_v58  ;;  %v4416_v6 = vmul.f32 %v8971_v9, %v17602_v46  ;;  %v2795_v57 = vmul.f32 %v13680_v20, %v13680_v20  ;;  %v17603_v27 = vld [vmem:[#allocation345_spill] sm:$0xff] }
 0x3e0   : > { %v3345_v18 = vpop.xlane.xlu1 %3344  ;;  %v3653_v5 = vmul.f32 0.03125, %v2961_v62  ;;  %8677 = vmatmul.mubr.msk.f32.gmra.mxu1 %vm458_vm0, %v5069_v39  ;;  %v4807_v19 = vmul.f32 %v13533_v49, %v4544_v25  ;;  %v13721_v32 = vsub.f32 %v17603_v27, %v2284_v3  ;;  %v13726_v24 = vsel %vm458_vm0, %v2794_v35, 0.0  ;;  %v17604_v9 = vld [vmem:[#allocation61_spill] sm:$0xff]  ;;  %v17606_v3 = vld [vmem:[#allocation240_spill] sm:$0xff] }
 0x3e1   : > { %8984 = vrsqrt.f32 %v4036_v0  ;;  %v3781_v59 = vmul.f32 0.03125, %v3345_v18  ;;  %8485 = vmatmul.mubr.msk.f32.gmra.mxu0 %vm458_vm0, %v4941_v29  ;;  %v4679_v34 = vmul.f32 %v13533_v49, %v4416_v6  ;;  %3065 = vadd.xlane.f32.xlu0 %v17604_v9  ;;  %v2287_v50 = vmul.f32 0.03125, %v17606_v3  ;;  %v17607_v18 = vld [vmem:[#allocation92_spill] sm:$0xff]  ;;  %v17610_v9 = vld [vmem:[#allocation318_spill] sm:$0xff] }
 0x3e2   : > { %v8973_v44 = vpop.eup %8972  ;;  %8986 = vrsqrt.f32 %v3908_v54  ;;  %v3909_v58 = vadd.f32 1e-05, %v3653_v5  ;;  %v5070_v0 = vadd.f32 %v13546_v13, %v4807_v19  ;;  %v2964_v25 = vpop.xlane.xlu0 %2963  ;;  %v13735_v35 = vsel %vm458_vm0, %v2795_v57, 0.0 }
 0x3e3   : > { %v8975_v45 = vpop.eup %8974  ;;  %v4037_v36 = vadd.f32 1e-05, %v3781_v59  ;;  %3449 = vadd.xlane.f32.xlu1 %v3448_v38  ;;  %v4545_v39 = vmul.f32 %v8973_v44, %v17605_v63  ;;  %v4942_v14 = vadd.f32 %v13546_v13, %v4679_v34  ;;  %v3654_v38 = vmul.f32 0.03125, %v2964_v25  ;;  %v17608_v59 = vld [vmem:[#allocation218_spill] sm:$0xff]  ;;  %v17611_v63 = vld [vmem:[#allocation347_spill] sm:$0xff]  ;;  %v17613_v25 = vld [vmem:[#allocation21_spill] sm:$0xff] }
 0x3e4   : > { %v3348_v54 = vpop.xlane.xlu1 %3347  ;;  %v4417_v62 = vmul.f32 %v8975_v45, %v17607_v18  ;;  %8679 = vmatprep.mubr.msk.f32.mxu1 %vm458_vm0, %v5070_v0  ;;  %v2286_v5 = vmul.f32 0.03125, %v17608_v59  ;;  %v2796_v44 = vmul.f32 %v13721_v32, %v13721_v32  ;;  %v17609_v45 = vld [vmem:[#allocation214_spill] sm:$0xff]  ;;  %v2797_v18 = vmul.f32 %v13712_v11, %v13712_v11 }
 0x3e5   : > { %8988 = vrsqrt.f32 %v4037_v36  ;;  %v3782_v29 = vmul.f32 0.03125, %v3348_v54  ;;  %v4808_v46 = vmul.f32 %v13533_v49, %v4545_v39  ;;  %8487 = vmatprep.mubr.msk.f32.mxu0 %vm458_vm0, %v4942_v14  ;;  %v3910_v34 = vadd.f32 1e-05, %v3654_v38  ;;  %3068 = vadd.xlane.f32.xlu0 %v17609_v45  ;;  %v17616_v45 = vld [vmem:[#allocation382_spill] sm:$0xff] }
 0x3e6   : > { %v8977_v6 = vpop.eup %8976  ;;  %8990 = vrsqrt.f32 %v3909_v58  ;;  %v4680_v19 = vmul.f32 %v13533_v49, %v4417_v62  ;;  %v13748_v39 = vsub.f32 %v17611_v63, %v2287_v50  ;;  %v2967_v3 = vpop.xlane.xlu0 %2966  ;;  %v13762_v59 = vsel %vm458_vm0, %v2796_v44, 0.0  ;;  %v17619_v63 = vld [vmem:[#allocation75_spill] sm:$0xff] }
 0x3e7   : > { %v8979_v57 = vpop.eup %8978  ;;  %v4038_v27 = vadd.f32 1e-05, %v3782_v29  ;;  %3452 = vadd.xlane.f32.xlu1 %v3451_v37  ;;  %v5071_v36 = vadd.f32 %v13546_v13, %v4808_v46  ;;  %v4546_v0 = vmul.f32 %v8977_v6, %v17610_v9  ;;  %v3655_v62 = vmul.f32 0.03125, %v2967_v3  ;;  %v17614_v46 = vld [vmem:[#allocation348_spill] sm:$0xff] }
 0x3e8   : > { %17612 = vst [vmem:[#allocation280_spill] sm:$0xff] %v13748_v39  ;;  %v3351_v58 = vpop.xlane.xlu1 %3350  ;;  %v4943_v54 = vadd.f32 %v13546_v13, %v4680_v19  ;;  %v4418_v14 = vmul.f32 %v8979_v57, %v17613_v25  ;;  %v13757_v50 = vsub.f32 %v17614_v46, %v2286_v5  ;;  %v17620_v25 = vld [vmem:[#allocation17_spill] sm:$0xff] }
 0x3e9   : > { %8992 = vrsqrt.f32 %v4038_v27  ;;  %v3783_v37 = vmul.f32 0.03125, %v3351_v58  ;;  %8680 = vmatmul.mubr.msk.f32.gmra.mxu1 %vm458_vm0, %v5071_v36  ;;  %v4809_v29 = vmul.f32 %v13533_v49, %v4546_v0  ;;  %v3911_v27 = vadd.f32 1e-05, %v3655_v62  ;;  %v17617_v36 = vld [vmem:[#allocation96_spill] sm:$0xff] }
 0x3ea   : > { %v8981_v38 = vpop.eup %8980  ;;  %17615 = vst [vmem:[#allocation20_spill] sm:$0xff] %v13757_v50  ;;  %8994 = vrsqrt.f32 %v3910_v34  ;;  %8488 = vmatmul.mubr.msk.f32.gmra.mxu0 %vm458_vm0, %v4943_v54  ;;  %v4681_v6 = vmul.f32 %v13533_v49, %v4418_v14  ;;  %2032 = vadd.xlane.f32.xlu0 %v17617_v36  ;;  %v17618_v0 = vld [vmem:[#allocation176_spill] sm:$0xff]  ;;  %v2289_v34 = vmul.f32 0.03125, %v17619_v63  ;;  %v2970_v3 = vpop.xlane.xlu0 %2969  ;;  %v13772_v14 = vsel %vm458_vm0, %v2797_v18, 0.0 }
 0x3eb   : > { %v8983_v19 = vpop.eup %8982  ;;  %v4039_v57 = vadd.f32 1e-05, %v3783_v37  ;;  %2035 = vadd.xlane.f32.xlu1 %v17616_v45  ;;  %v5072_v9 = vadd.f32 %v13546_v13, %v4809_v29  ;;  %v4547_v5 = vmul.f32 %v8981_v38, %v17618_v0  ;;  %v3656_v62 = vmul.f32 0.03125, %v2970_v3  ;;  %v17621_v38 = vld [vmem:[#allocation222_spill] sm:$0xff] }
 0x3ec   : > { %v3354_v58 = vpop.xlane.xlu1 %3353  ;;  %v4944_v54 = vadd.f32 %v13546_v13, %v4681_v6  ;;  %v4419_v44 = vmul.f32 %v8983_v19, %v17620_v25  ;;  %v2288_v45 = vmul.f32 0.03125, %v17621_v38  ;;  %v2798_v19 = vmul.f32 %v13757_v50, %v13757_v50  ;;  %v17622_v0 = vld [vmem:[#allocation206_spill] sm:$0xff] }
 0x3ed   : > { %8996 = vrsqrt.f32 %v4039_v57  ;;  %v3784_v37 = vmul.f32 0.03125, %v3354_v58  ;;  %8682 = vmatprep.mubr.msk.f32.mxu1 %vm458_vm0, %v5072_v9  ;;  %v4810_v29 = vmul.f32 %v13533_v49, %v4547_v5  ;;  %v3912_v57 = vadd.f32 1e-05, %v3656_v62  ;;  %v17623_v5 = vld [vmem:[#allocation272_spill] sm:$0xff]  ;;  %v17624_v58 = vld [vmem:[#allocation349_spill] sm:$0xff]  ;;  %v17639_v50 = vld [vmem:[#allocation150_spill] sm:$0xff] }
 0x3ee   : > { %v8985_v46 = vpop.eup %8984  ;;  %8998 = vrsqrt.f32 %v3911_v27  ;;  %8490 = vmatprep.mubr.msk.f32.mxu0 %vm458_vm0, %v4944_v54  ;;  %v4682_v6 = vmul.f32 %v13533_v49, %v4419_v44  ;;  %3071 = vadd.xlane.f32.xlu0 %v17622_v0  ;;  %v13786_v27 = vsub.f32 %v17624_v58, %v2289_v34  ;;  %v2973_v54 = vpop.xlane.xlu0 %2972  ;;  %v17626_v44 = vld [vmem:[#allocation132_spill] sm:$0xff]  ;;  %v17627_v0 = vld [vmem:[#allocation350_spill] sm:$0xff] }
 0x3ef   : > { %v8987_v18 = vpop.eup %8986  ;;  %v4040_v36 = vadd.f32 1e-05, %v3784_v37  ;;  %3455 = vadd.xlane.f32.xlu1 %v13726_v24  ;;  %v5073_v9 = vadd.f32 %v13546_v13, %v4810_v29  ;;  %v4548_v63 = vmul.f32 %v8985_v46, %v17623_v5  ;;  %v2799_v37 = vmul.f32 %v13748_v39, %v13748_v39 }
 0x3f0   : > { %17625 = vst [vmem:[#allocation285_spill] sm:$0xff] %v13786_v27  ;;  %v3357_v3 = vpop.xlane.xlu1 %3356  ;;  %v4945_v25 = vadd.f32 %v13546_v13, %v4682_v6  ;;  %v4420_v38 = vmul.f32 %v8987_v18, %v17626_v44  ;;  %v3657_v62 = vmul.f32 0.03125, %v2973_v54  ;;  %v13795_v34 = vsub.f32 %v17627_v0, %v2288_v45  ;;  %v17631_v54 = vld [vmem:[#allocation77_spill] sm:$0xff] }
 0x3f1   : > { %9000 = vrsqrt.f32 %v4040_v36  ;;  %v3785_v24 = vmul.f32 0.03125, %v3357_v3  ;;  %8683 = vmatmul.mubr.msk.f32.gmra.mxu1 %vm458_vm0, %v5073_v9  ;;  %v4811_v29 = vmul.f32 %v13533_v49, %v4548_v63  ;;  %v13800_v18 = vsel %vm458_vm0, %v2798_v19, 0.0  ;;  %v17629_v9 = vld [vmem:[#allocation202_spill] sm:$0xff]  ;;  %v17630_v3 = vld [vmem:[#allocation95_spill] sm:$0xff]  ;;  %v17632_v0 = vld [vmem:[#allocation33_spill] sm:$0xff] }
 0x3f2   : > { %v8989_v46 = vpop.eup %8988  ;;  %17628 = vst [vmem:[#allocation284_spill] sm:$0xff] %v13795_v34  ;;  %9002 = vrsqrt.f32 %v3912_v57  ;;  %8491 = vmatmul.mubr.msk.f32.gmra.mxu0 %vm458_vm0, %v4945_v25  ;;  %v4683_v6 = vmul.f32 %v13533_v49, %v4420_v38  ;;  %v3913_v58 = vadd.f32 1e-05, %v3657_v62  ;;  %3074 = vadd.xlane.f32.xlu0 %v17629_v9  ;;  %v2291_v57 = vmul.f32 0.03125, %v17631_v54  ;;  %v2976_v25 = vpop.xlane.xlu0 %2975  ;;  %v17634_v54 = vld [vmem:[#allocation104_spill] sm:$0xff] }
 0x3f3   : > { %v8991_v5 = vpop.eup %8990  ;;  %v4041_v36 = vadd.f32 1e-05, %v3785_v24  ;;  %3458 = vadd.xlane.f32.xlu1 %v13735_v35  ;;  %v5074_v63 = vadd.f32 %v13546_v13, %v4811_v29  ;;  %v4549_v45 = vmul.f32 %v8989_v46, %v17630_v3  ;;  %v13810_v39 = vsel %vm458_vm0, %v2799_v37, 0.0  ;;  %v17633_v46 = vld [vmem:[#allocation226_spill] sm:$0xff] }
 0x3f4   : > { %v3360_v44 = vpop.xlane.xlu1 %3359  ;;  %v4946_v38 = vadd.f32 %v13546_v13, %v4683_v6  ;;  %v4421_v19 = vmul.f32 %v8991_v5, %v17632_v0  ;;  %v3658_v35 = vmul.f32 0.03125, %v2976_v25  ;;  %v2290_v9 = vmul.f32 0.03125, %v17633_v46  ;;  %v17637_v0 = vld [vmem:[#allocation351_spill] sm:$0xff] }
 0x3f5   : > { %9004 = vrsqrt.f32 %v4041_v36  ;;  %v3786_v24 = vmul.f32 0.03125, %v3360_v44  ;;  %8685 = vmatprep.mubr.msk.f32.mxu1 %vm458_vm0, %v5074_v63  ;;  %v4812_v62 = vmul.f32 %v13533_v49, %v4549_v45  ;;  %v2800_v5 = vmul.f32 %v13795_v34, %v13795_v34  ;;  %v17635_v44 = vld [vmem:[#allocation99_spill] sm:$0xff]  ;;  %v17636_v45 = vld [vmem:[#allocation385_spill] sm:$0xff] }
 0x3f6   : > { %v8993_v29 = vpop.eup %8992  ;;  %9006 = vrsqrt.f32 %v3913_v58  ;;  %8493 = vmatprep.mubr.msk.f32.mxu0 %vm458_vm0, %v4946_v38  ;;  %v4684_v6 = vmul.f32 %v13533_v49, %v4421_v19  ;;  %v3914_v36 = vadd.f32 1e-05, %v3658_v35  ;;  %2038 = vadd.xlane.f32.xlu0 %v17635_v44  ;;  %v13824_v58 = vsub.f32 %v17637_v0, %v2291_v57  ;;  %v2979_v46 = vpop.xlane.xlu0 %2978  ;;  %v17640_v44 = vld [vmem:[#allocation352_spill] sm:$0xff]  ;;  %v17643_v0 = vld [vmem:[#allocation343_spill] sm:$0xff] }
 0x3f7   : > { %v8995_v37 = vpop.eup %8994  ;;  %v4042_v3 = vadd.f32 1e-05, %v3786_v24  ;;  %2041 = vadd.xlane.f32.xlu1 %v17634_v54  ;;  %v5075_v63 = vadd.f32 %v13546_v13, %v4812_v62  ;;  %v4550_v25 = vmul.f32 %v8993_v29, %v17636_v45  ;;  %v2801_v24 = vmul.f32 %v13786_v27, %v13786_v27 }
 0x3f8   : > { %17638 = vst [vmem:[#allocation120_spill] sm:$0xff] %v13824_v58  ;;  %v3363_v38 = vpop.xlane.xlu1 %3362  ;;  %v4947_v19 = vadd.f32 %v13546_v13, %v4684_v6  ;;  %v4422_v34 = vmul.f32 %v8995_v37, %v17639_v50  ;;  %v3659_v54 = vmul.f32 0.03125, %v2979_v46  ;;  %v13833_v57 = vsub.f32 %v17640_v44, %v2290_v9  ;;  %v17645_v44 = vld [vmem:[#allocation43_spill] sm:$0xff] }
 0x3f9   : > { %9008 = vrsqrt.f32 %v4042_v3  ;;  %v3787_v35 = vmul.f32 0.03125, %v3363_v38  ;;  %8686 = vmatmul.mubr.msk.f32.gmra.mxu1 %vm458_vm0, %v5075_v63  ;;  %v4813_v62 = vmul.f32 %v13533_v49, %v4550_v25  ;;  %v13838_v50 = vsel %vm458_vm0, %v2800_v5, 0.0  ;;  %v17642_v63 = vld [vmem:[#allocation78_spill] sm:$0xff]  ;;  %v17644_v38 = vld [vmem:[#allocation79_spill] sm:$0xff] }
 0x3fa   : > { %v8997_v29 = vpop.eup %8996  ;;  %17641 = vst [vmem:[#allocation289_spill] sm:$0xff] %v13833_v57  ;;  %9010 = vrsqrt.f32 %v3914_v36  ;;  %8494 = vmatmul.mubr.msk.f32.gmra.mxu0 %vm458_vm0, %v4947_v19  ;;  %v4685_v6 = vmul.f32 %v13533_v49, %v4422_v34  ;;  %v3915_v45 = vadd.f32 1e-05, %v3659_v54  ;;  %3077 = vadd.xlane.f32.xlu0 %v17642_v63  ;;  %v2293_v36 = vmul.f32 0.03125, %v17644_v38  ;;  %v2982_v19 = vpop.xlane.xlu0 %2981  ;;  %v17647_v38 = vld [vmem:[#allocation118_spill] sm:$0xff] }
 0x3fb   : > { %v8999_v37 = vpop.eup %8998  ;;  %v4043_v3 = vadd.f32 1e-05, %v3787_v35  ;;  %3461 = vadd.xlane.f32.xlu1 %v13762_v59  ;;  %v5076_v25 = vadd.f32 %v13546_v13, %v4813_v62  ;;  %v4551_v9 = vmul.f32 %v8997_v29, %v17643_v0  ;;  %v13848_v27 = vsel %vm458_vm0, %v2801_v24, 0.0  ;;  %v17646_v29 = vld [vmem:[#allocation80_spill] sm:$0xff] }
 0x3fc   : > { %v3366_v46 = vpop.xlane.xlu1 %3365  ;;  %v4948_v34 = vadd.f32 %v13546_v13, %v4685_v6  ;;  %v4423_v5 = vmul.f32 %v8999_v37, %v17645_v44  ;;  %v3660_v59 = vmul.f32 0.03125, %v2982_v19  ;;  %v2292_v63 = vmul.f32 0.03125, %v17646_v29  ;;  %v17649_v19 = vld [vmem:[#allocation353_spill] sm:$0xff] }
 0x3fd   : > { %9012 = vrsqrt.f32 %v4043_v3  ;;  %v3788_v35 = vmul.f32 0.03125, %v3366_v46  ;;  %8688 = vmatprep.mubr.msk.f32.mxu1 %vm458_vm0, %v5076_v25  ;;  %v4814_v54 = vmul.f32 %v13533_v49, %v4551_v9  ;;  %v2802_v37 = vmul.f32 %v13833_v57, %v13833_v57  ;;  %v17648_v9 = vld [vmem:[#allocation100_spill] sm:$0xff]  ;;  %v17650_v29 = vld [vmem:[#allocation53_spill] sm:$0xff] }
 0x3fe   : > { %v9001_v62 = vpop.eup %9000  ;;  %9014 = vrsqrt.f32 %v3915_v45  ;;  %8496 = vmatprep.mubr.msk.f32.mxu0 %vm458_vm0, %v4948_v34  ;;  %v4686_v6 = vmul.f32 %v13533_v49, %v4423_v5  ;;  %v3916_v3 = vadd.f32 1e-05, %v3660_v59  ;;  %3080 = vadd.xlane.f32.xlu0 %v17647_v38  ;;  %v13862_v45 = vsub.f32 %v17649_v19, %v2293_v36  ;;  %v2985_v44 = vpop.xlane.xlu0 %2984  ;;  %v17651_v38 = vld [vmem:[#allocation354_spill] sm:$0xff] }
 0x3ff   : > { %v9003_v24 = vpop.eup %9002  ;;  %v4044_v0 = vadd.f32 1e-05, %v3788_v35  ;;  %3464 = vadd.xlane.f32.xlu1 %v13772_v14  ;;  %v5077_v25 = vadd.f32 %v13546_v13, %v4814_v54  ;;  %v4552_v46 = vmul.f32 %v9001_v62, %v17648_v9  ;;  %v2803_v35 = vmul.f32 %v13824_v58, %v13824_v58  ;;  %v17657_v58 = vld [vmem:[#allocation60_spill] sm:$0xff] }
 0x400   : > { %v3369_v34 = vpop.xlane.xlu1 %3368  ;;  %v4949_v5 = vadd.f32 %v13546_v13, %v4686_v6  ;;  %v4424_v57 = vmul.f32 %v9003_v24, %v17650_v29  ;;  %v3661_v59 = vmul.f32 0.03125, %v2985_v44  ;;  %v13871_v36 = vsub.f32 %v17651_v38, %v2292_v63  ;;  %v17655_v44 = vld [vmem:[#allocation281_spill] sm:$0xff]  ;;  %v17656_v29 = vld [vmem:[#allocation299_spill] sm:$0xff] }
 0x401   : > { %9016 = vrsqrt.f32 %v4044_v0  ;;  %v3789_v14 = vmul.f32 0.03125, %v3369_v34  ;;  %8689 = vmatmul.mubr.msk.f32.gmra.mxu1 %vm458_vm0, %v5077_v25  ;;  %v4815_v54 = vmul.f32 %v13533_v49, %v4552_v46  ;;  %v13876_v24 = vsel %vm458_vm0, %v2802_v37, 0.0  ;;  %v17653_v34 = vld [vmem:[#allocation15_spill] sm:$0xff] }
 0x402   : > { %v9005_v62 = vpop.eup %9004  ;;  %17652 = vst [vmem:[#allocation288_spill] sm:$0xff] %v13871_v36  ;;  %9018 = vrsqrt.f32 %v3916_v3  ;;  %8497 = vmatmul.mubr.msk.f32.gmra.mxu0 %vm458_vm0, %v4949_v5  ;;  %v4687_v6 = vmul.f32 %v13533_v49, %v4424_v57  ;;  %v3917_v19 = vadd.f32 1e-05, %v3661_v59  ;;  %v17654_v25 = vld [vmem:[#allocation107_spill] sm:$0xff]  ;;  %v2295_v3 = vmul.f32 0.03125, %v17656_v29  ;;  %v2988_v5 = vpop.xlane.xlu0 %2987 }
 0x403   : > { %v9007_v9 = vpop.eup %9006  ;;  %v4045_v0 = vadd.f32 1e-05, %v3789_v14  ;;  %2047 = vadd.xlane.f32.xlu1 %v17653_v34  ;;  %2044 = vadd.xlane.f32.xlu0 %v17654_v25  ;;  %v5078_v46 = vadd.f32 %v13546_v13, %v4815_v54  ;;  %v4553_v63 = vmul.f32 %v9005_v62, %v17655_v44  ;;  %v13886_v11 = vsel %vm458_vm0, %v2803_v35, 0.0  ;;  %v17658_v62 = vld [vmem:[#allocation248_spill] sm:$0xff]  ;;  %v17659_v44 = vld [vmem:[#allocation294_spill] sm:$0xff] }
 0x404   : > { %v3372_v38 = vpop.xlane.xlu1 %3371  ;;  %v4950_v57 = vadd.f32 %v13546_v13, %v4687_v6  ;;  %v4425_v37 = vmul.f32 %v9007_v9, %v17657_v58  ;;  %v3662_v59 = vmul.f32 0.03125, %v2988_v5  ;;  %v2294_v25 = vmul.f32 0.03125, %v17658_v62  ;;  %v17663_v62 = vld [vmem:[#allocation233_spill] sm:$0xff] }
 0x405   : > { %9020 = vrsqrt.f32 %v4045_v0  ;;  %v3790_v14 = vmul.f32 0.03125, %v3372_v38  ;;  %8691 = vmatprep.mubr.msk.f32.mxu1 %vm458_vm0, %v5078_v46  ;;  %v4816_v54 = vmul.f32 %v13533_v49, %v4553_v63  ;;  %v2804_v58 = vmul.f32 %v13871_v36, %v13871_v36  ;;  %v17660_v63 = vld [vmem:[#allocation209_spill] sm:$0xff]  ;;  %v17661_v38 = vld [vmem:[#allocation355_spill] sm:$0xff] }
 0x406   : > { %v9009_v34 = vpop.eup %9008  ;;  %9022 = vrsqrt.f32 %v3917_v19  ;;  %8499 = vmatprep.mubr.msk.f32.mxu0 %vm458_vm0, %v4950_v57  ;;  %v4688_v6 = vmul.f32 %v13533_v49, %v4425_v37  ;;  %v3918_v0 = vadd.f32 1e-05, %v3662_v59  ;;  %v13900_v19 = vsub.f32 %v17661_v38, %v2295_v3  ;;  %v2991_v57 = vpop.xlane.xlu0 %2990 }
 0x407   : > { %v9011_v35 = vpop.eup %9010  ;;  %v4046_v9 = vadd.f32 1e-05, %v3790_v14  ;;  %3467 = vadd.xlane.f32.xlu1 %v13800_v18  ;;  %3083 = vadd.xlane.f32.xlu0 %v17659_v44  ;;  %v5079_v46 = vadd.f32 %v13546_v13, %v4816_v54  ;;  %v4554_v29 = vmul.f32 %v9009_v34, %v17660_v63  ;;  %v2805_v14 = vmul.f32 %v13862_v45, %v13862_v45  ;;  %v17664_v44 = vld [vmem:[#allocation356_spill] sm:$0xff] }
 0x408   : > { %17662 = vst [vmem:[#allocation22_spill] sm:$0xff] %v13900_v19  ;;  %v3375_v5 = vpop.xlane.xlu1 %3374  ;;  %v4951_v37 = vadd.f32 %v13546_v13, %v4688_v6  ;;  %v4426_v36 = vmul.f32 %v9011_v35, %v17663_v62  ;;  %v3663_v59 = vmul.f32 0.03125, %v2991_v57  ;;  %v13909_v3 = vsub.f32 %v17664_v44, %v2294_v25  ;;  %v17668_v57 = vld [vmem:[#allocation253_spill] sm:$0xff] }
 0x409   : > { %9024 = vrsqrt.f32 %v4046_v9  ;;  %v3791_v18 = vmul.f32 0.03125, %v3375_v5  ;;  %8692 = vmatmul.mubr.msk.f32.gmra.mxu1 %vm458_vm0, %v5079_v46  ;;  %v4817_v54 = vmul.f32 %v13533_v49, %v4554_v29  ;;  %v13914_v35 = vsel %vm458_vm0, %v2804_v58, 0.0  ;;  %v17666_v46 = vld [vmem:[#allocation238_spill] sm:$0xff]  ;;  %v17667_v5 = vld [vmem:[#allocation387_spill] sm:$0xff] }
 0x40a   : > { %v9013_v34 = vpop.eup %9012  ;;  %17665 = vst [vmem:[#allocation103_spill] sm:$0xff] %v13909_v3  ;;  %9026 = vrsqrt.f32 %v3918_v0  ;;  %8500 = vmatmul.mubr.msk.f32.gmra.mxu0 %vm458_vm0, %v4951_v37  ;;  %v4689_v6 = vmul.f32 %v13533_v49, %v4426_v36  ;;  %v3919_v38 = vadd.f32 1e-05, %v3663_v59  ;;  %v2297_v0 = vmul.f32 0.03125, %v17668_v57  ;;  %v2994_v37 = vpop.xlane.xlu0 %2993  ;;  %v17669_v36 = vld [vmem:[#allocation191_spill] sm:$0xff]  ;;  %v17672_v57 = vld [vmem:[#allocation25_spill] sm:$0xff] }
 0x40b   : > { %v9015_v63 = vpop.eup %9014  ;;  %v4047_v9 = vadd.f32 1e-05, %v3791_v18  ;;  %3470 = vadd.xlane.f32.xlu1 %v13810_v39  ;;  %3086 = vadd.xlane.f32.xlu0 %v17666_v46  ;;  %v5080_v29 = vadd.f32 %v13546_v13, %v4817_v54  ;;  %v4555_v25 = vmul.f32 %v9013_v34, %v17667_v5  ;;  %v13924_v44 = vsel %vm458_vm0, %v2805_v14, 0.0  ;;  %v13930_v59 = vld [vmem:[%s16000_s5] ss:$0 sm:$0xff]  ;;  %v17671_v5 = vld [vmem:[#allocation23_spill] sm:$0xff] }
 0x40c   : > { %v3378_v62 = vpop.xlane.xlu1 %3377  ;;  %v4952_v49 = vadd.f32 %v13546_v13, %v4689_v6  ;;  %v4427_v58 = vmul.f32 %v9015_v63, %v17669_v36  ;;  %v3664_v39 = vmul.f32 0.03125, %v2994_v37  ;;  %v17670_v46 = vld [vmem:[#allocation242_spill] sm:$0xff]  ;;  %v2806_v6 = vmul.f32 %v13909_v3, %v13909_v3  ;;  %v17673_v37 = vld [vmem:[#allocation357_spill] sm:$0xff] }
 0x40d   : > { %9028 = vrsqrt.f32 %v4047_v9  ;;  %v3792_v18 = vmul.f32 0.03125, %v3378_v62  ;;  %8694 = vmatprep.mubr.msk.f32.mxu1 %vm458_vm0, %v5080_v29  ;;  %v4818_v54 = vmul.f32 %v13930_v59, %v4555_v25  ;;  %v2296_v13 = vmul.f32 0.03125, %v17670_v46  ;;  %v13943_v25 = vld [vmem:[%s16001_s6] ss:$0 sm:$0xff] }
 0x40e   : > { %v9017_v34 = vpop.eup %9016  ;;  %9030 = vrsqrt.f32 %v3919_v38  ;;  %8502 = vmatprep.mubr.msk.f32.mxu0 %vm458_vm0, %v4952_v49  ;;  %v4690_v14 = vmul.f32 %v13930_v59, %v4427_v58  ;;  %v3920_v29 = vadd.f32 1e-05, %v3664_v39  ;;  %v13948_v49 = vsub.f32 %v17673_v37, %v2297_v0  ;;  %v2997_v58 = vpop.xlane.xlu0 %2996  ;;  %v17675_v39 = vld [vmem:[#allocation246_spill] sm:$0xff] }
 0x40f   : > { %v9019_v63 = vpop.eup %9018  ;;  %v4048_v9 = vadd.f32 1e-05, %v3792_v18  ;;  %2053 = vadd.xlane.f32.xlu1 %v17671_v5  ;;  %2050 = vadd.xlane.f32.xlu0 %v17672_v57  ;;  %v5081_v38 = vadd.f32 %v13943_v25, %v4818_v54  ;;  %v4556_v62 = vmul.f32 %v9017_v34, %v13194_v2  ;;  %v2807_v5 = vmul.f32 %v13900_v19, %v13900_v19  ;;  %v17676_v34 = vld [vmem:[#allocation358_spill] sm:$0xff] }
 0x410   : > { %17674 = vst [vmem:[#allocation292_spill] sm:$0xff] %v13948_v49  ;;  %v3381_v36 = vpop.xlane.xlu1 %3380  ;;  %v4953_v18 = vadd.f32 %v13943_v25, %v4690_v14  ;;  %v4428_v46 = vmul.f32 %v9019_v63, %v17675_v39  ;;  %v3665_v3 = vmul.f32 0.03125, %v2997_v58  ;;  %v13957_v0 = vsub.f32 %v17676_v34, %v2296_v13  ;;  %v17678_v58 = vld [vmem:[#allocation94_spill] sm:$0xff]  ;;  %v17679_v34 = vld [vmem:[#allocation251_spill] sm:$0xff] }
 0x411   : > { %9032 = vrsqrt.f32 %v4048_v9  ;;  %v3793_v57 = vmul.f32 0.03125, %v3381_v36  ;;  %8695 = vmatmul.mubr.msk.f32.gmra.mxu1 %vm458_vm0, %v5081_v38  ;;  %v4819_v54 = vmul.f32 %v13930_v59, %v4556_v62  ;;  %v13962_v63 = vsel %vm458_vm0, %v2806_v6, 0.0  ;;  %v17677_v38 = vld [vmem:[#allocation258_spill] sm:$0xff] }
 0x412   : > { %v9021_v2 = vpop.eup %9020  ;;  %9034 = vrsqrt.f32 %v3920_v29  ;;  %8503 = vmatmul.mubr.msk.f32.gmra.mxu0 %vm458_vm0, %v4953_v18  ;;  %v4691_v14 = vmul.f32 %v13930_v59, %v4428_v46  ;;  %v3921_v36 = vadd.f32 1e-05, %v3665_v3  ;;  %v2299_v29 = vmul.f32 0.03125, %v17678_v58  ;;  %v3000_v18 = vpop.xlane.xlu0 %2999  ;;  %v17681_v58 = vld [vmem:[#allocation250_spill] sm:$0xff] }
 0x413   : > { %v9023_v37 = vpop.eup %9022  ;;  %v4049_v9 = vadd.f32 1e-05, %v3793_v57  ;;  %3473 = vadd.xlane.f32.xlu1 %v13838_v50  ;;  %3089 = vadd.xlane.f32.xlu0 %v17677_v38  ;;  %v5082_v62 = vadd.f32 %v13943_v25, %v4819_v54  ;;  %v4557_v13 = vmul.f32 %v9021_v2, %v13181_v23  ;;  %v13972_v19 = vsel %vm458_vm0, %v2807_v5, 0.0  ;;  %v17680_v23 = vld [vmem:[#allocation247_spill] sm:$0xff] }
 0x414   : > { %v3384_v39 = vpop.xlane.xlu1 %3383  ;;  %v4954_v46 = vadd.f32 %v13943_v25, %v4691_v14  ;;  %v4429_v6 = vmul.f32 %v9023_v37, %v17679_v34  ;;  %v3666_v50 = vmul.f32 0.03125, %v3000_v18  ;;  %v2298_v2 = vmul.f32 0.03125, %v17680_v23 }
 0x415   : > { %9036 = vrsqrt.f32 %v4049_v9  ;;  %v3794_v3 = vmul.f32 0.03125, %v3384_v39  ;;  %8697 = vmatprep.mubr.msk.f32.mxu1 %vm458_vm0, %v5082_v62  ;;  %v4820_v57 = vmul.f32 %v13930_v59, %v4557_v13  ;;  %v2808_v37 = vmul.f32 %v13957_v0, %v13957_v0  ;;  %v17682_v39 = vld [vmem:[#allocation359_spill] sm:$0xff] }
 0x416   : > { %v9025_v54 = vpop.eup %9024  ;;  %9038 = vrsqrt.f32 %v3921_v36  ;;  %8505 = vmatprep.mubr.msk.f32.mxu0 %vm458_vm0, %v4954_v46  ;;  %v4692_v14 = vmul.f32 %v13930_v59, %v4429_v6  ;;  %v3922_v9 = vadd.f32 1e-05, %v3666_v50  ;;  %v13986_v36 = vsub.f32 %v17682_v39, %v2299_v29  ;;  %v3003_v46 = vpop.xlane.xlu0 %3002  ;;  %v17683_v6 = vld [vmem:[#allocation245_spill] sm:$0xff] }
 0x417   : > { %v9027_v5 = vpop.eup %9026  ;;  %v4050_v38 = vadd.f32 1e-05, %v3794_v3  ;;  %3476 = vadd.xlane.f32.xlu1 %v13848_v27  ;;  %3092 = vadd.xlane.f32.xlu0 %v17681_v58  ;;  %v5083_v62 = vadd.f32 %v13943_v25, %v4820_v57  ;;  %v4558_v13 = vmul.f32 %v9025_v54, %v13225_v56  ;;  %v2809_v3 = vmul.f32 %v13948_v49, %v13948_v49  ;;  %v17684_v54 = vld [vmem:[#allocation360_spill] sm:$0xff] }
 0x418   : > { %v3387_v18 = vpop.xlane.xlu1 %3386  ;;  %v4955_v34 = vadd.f32 %v13943_v25, %v4692_v14  ;;  %v4430_v23 = vmul.f32 %v9027_v5, %v17683_v6  ;;  %v3667_v50 = vmul.f32 0.03125, %v3003_v46  ;;  %v13995_v29 = vsub.f32 %v17684_v54, %v2298_v2  ;;  %v17687_v46 = vld [vmem:[#allocation98_spill] sm:$0xff] }
 0x419   : > { %9040 = vrsqrt.f32 %v4050_v38  ;;  %v3795_v27 = vmul.f32 0.03125, %v3387_v18  ;;  %8698 = vmatmul.mubr.msk.f32.gmra.mxu1 %vm458_vm0, %v5083_v62  ;;  %v4821_v57 = vmul.f32 %v13930_v59, %v4558_v13  ;;  %v14000_v5 = vsel %vm458_vm0, %v2808_v37, 0.0  ;;  %v17685_v18 = vld [vmem:[#allocation164_spill] sm:$0xff]  ;;  %v17686_v62 = vld [vmem:[#allocation137_spill] sm:$0xff]  ;;  %v17688_v54 = vld [vmem:[#allocation262_spill] sm:$0xff] }
 0x41a   : > { %v9029_v56 = vpop.eup %9028  ;;  %9042 = vrsqrt.f32 %v3922_v9  ;;  %8506 = vmatmul.mubr.msk.f32.gmra.mxu0 %vm458_vm0, %v4955_v34  ;;  %v4693_v14 = vmul.f32 %v13930_v59, %v4430_v23  ;;  %v3923_v39 = vadd.f32 1e-05, %v3667_v50  ;;  %v2301_v9 = vmul.f32 0.03125, %v17687_v46  ;;  %v3006_v34 = vpop.xlane.xlu0 %3005  ;;  %v17690_v46 = vld [vmem:[#allocation270_spill] sm:$0xff] }
 0x41b   : > { %v9031_v58 = vpop.eup %9030  ;;  %v4051_v38 = vadd.f32 1e-05, %v3795_v27  ;;  %2059 = vadd.xlane.f32.xlu1 %v17685_v18  ;;  %2056 = vadd.xlane.f32.xlu0 %v17686_v62  ;;  %v5084_v13 = vadd.f32 %v13943_v25, %v4821_v57  ;;  %v4559_v2 = vmul.f32 %v9029_v56, %v13216_v51  ;;  %v14010_v49 = vsel %vm458_vm0, %v2809_v3, 0.0  ;;  %v17689_v51 = vld [vmem:[#allocation101_spill] sm:$0xff] }
 0x41c   : > { %v3390_v6 = vpop.xlane.xlu1 %3389  ;;  %v4956_v23 = vadd.f32 %v13943_v25, %v4693_v14  ;;  %v4431_v37 = vmul.f32 %v9031_v58, %v17688_v54  ;;  %v3668_v50 = vmul.f32 0.03125, %v3006_v34  ;;  %v2300_v56 = vmul.f32 0.03125, %v17689_v51 }
 0x41d   : > { %9044 = vrsqrt.f32 %v4051_v38  ;;  %v3796_v27 = vmul.f32 0.03125, %v3390_v6  ;;  %8700 = vmatprep.mubr.msk.f32.mxu1 %vm458_vm0, %v5084_v13  ;;  %v4822_v57 = vmul.f32 %v13930_v59, %v4559_v2  ;;  %v2810_v58 = vmul.f32 %v13995_v29, %v13995_v29  ;;  %v17691_v6 = vld [vmem:[#allocation361_spill] sm:$0xff] }
 0x41e   : > { %v9033_v18 = vpop.eup %9032  ;;  %9046 = vrsqrt.f32 %v3923_v39  ;;  %8508 = vmatprep.mubr.msk.f32.mxu0 %vm458_vm0, %v4956_v23  ;;  %v4694_v14 = vmul.f32 %v13930_v59, %v4431_v37  ;;  %v3924_v38 = vadd.f32 1e-05, %v3668_v50  ;;  %v14024_v39 = vsub.f32 %v17691_v6, %v2301_v9  ;;  %v3009_v23 = vpop.xlane.xlu0 %3008  ;;  %v17693_v37 = vld [vmem:[#allocation130_spill] sm:$0xff] }
 0x41f   : > { %v9035_v3 = vpop.eup %9034  ;;  %v4052_v62 = vadd.f32 1e-05, %v3796_v27  ;;  %3479 = vadd.xlane.f32.xlu1 %v13876_v24  ;;  %3095 = vadd.xlane.f32.xlu0 %v17690_v46  ;;  %v5085_v13 = vadd.f32 %v13943_v25, %v4822_v57  ;;  %v4560_v2 = vmul.f32 %v9033_v18, %v13257_v53  ;;  %v2811_v27 = vmul.f32 %v13986_v36, %v13986_v36  ;;  %v17694_v18 = vld [vmem:[#allocation362_spill] sm:$0xff] }
 0x420   : > { %17692 = vst [vmem:[#allocation9_spill] sm:$0xff] %v14024_v39  ;;  %v3393_v34 = vpop.xlane.xlu1 %3392  ;;  %v4957_v54 = vadd.f32 %v13943_v25, %v4694_v14  ;;  %v4432_v51 = vmul.f32 %v9035_v3, %v17693_v37  ;;  %v3669_v50 = vmul.f32 0.03125, %v3009_v23  ;;  %v14033_v9 = vsub.f32 %v17694_v18, %v2300_v56 }
 0x421   : > { %9048 = vrsqrt.f32 %v4052_v62  ;;  %v3797_v24 = vmul.f32 0.03125, %v3393_v34  ;;  %8701 = vmatmul.mubr.msk.f32.gmra.mxu1 %vm458_vm0, %v5085_v13  ;;  %v4823_v57 = vmul.f32 %v13930_v59, %v4560_v2  ;;  %v14038_v3 = vsel %vm458_vm0, %v2810_v58, 0.0  ;;  %v17696_v13 = vld [vmem:[#allocation266_spill] sm:$0xff]  ;;  %v17697_v34 = vld [vmem:[#allocation328_spill] sm:$0xff]  ;;  %v17698_v58 = vld [vmem:[#allocation249_spill] sm:$0xff] }
 0x422   : > { %v9037_v53 = vpop.eup %9036  ;;  %17695 = vst [vmem:[#allocation293_spill] sm:$0xff] %v14033_v9  ;;  %9050 = vrsqrt.f32 %v3924_v38  ;;  %8509 = vmatmul.mubr.msk.f32.gmra.mxu0 %vm458_vm0, %v4957_v54  ;;  %v4695_v14 = vmul.f32 %v13930_v59, %v4432_v51  ;;  %v3925_v6 = vadd.f32 1e-05, %v3669_v50  ;;  %v2303_v38 = vmul.f32 0.03125, %v17697_v34  ;;  %v3012_v54 = vpop.xlane.xlu0 %3011  ;;  %v17700_v34 = vld [vmem:[#allocation169_spill] sm:$0xff] }
 0x423   : > { %v9039_v46 = vpop.eup %9038  ;;  %v4053_v62 = vadd.f32 1e-05, %v3797_v24  ;;  %3482 = vadd.xlane.f32.xlu1 %v13886_v11  ;;  %3098 = vadd.xlane.f32.xlu0 %v17696_v13  ;;  %v5086_v2 = vadd.f32 %v13943_v25, %v4823_v57  ;;  %v4561_v56 = vmul.f32 %v9037_v53, %v13248_v47  ;;  %v14048_v24 = vsel %vm458_vm0, %v2811_v27, 0.0  ;;  %v17699_v53 = vld [vmem:[#allocation256_spill] sm:$0xff] }
 0x424   : > { %v3396_v23 = vpop.xlane.xlu1 %3395  ;;  %v4958_v37 = vadd.f32 %v13943_v25, %v4695_v14  ;;  %v4433_v51 = vmul.f32 %v9039_v46, %v17698_v58  ;;  %v3670_v50 = vmul.f32 0.03125, %v3012_v54  ;;  %v2302_v18 = vmul.f32 0.03125, %v17699_v53  ;;  %v17702_v54 = vld [vmem:[#allocation363_spill] sm:$0xff] }
 0x425   : > { %9052 = vrsqrt.f32 %v4053_v62  ;;  %v3798_v11 = vmul.f32 0.03125, %v3396_v23  ;;  %8703 = vmatprep.mubr.msk.f32.mxu1 %vm458_vm0, %v5086_v2  ;;  %v4824_v57 = vmul.f32 %v13930_v59, %v4561_v56  ;;  %v2812_v27 = vmul.f32 %v14033_v9, %v14033_v9  ;;  %v17701_v2 = vld [vmem:[#allocation221_spill] sm:$0xff] }
 0x426   : > { %v9041_v47 = vpop.eup %9040  ;;  %9054 = vrsqrt.f32 %v3925_v6  ;;  %8511 = vmatprep.mubr.msk.f32.mxu0 %vm458_vm0, %v4958_v37  ;;  %v4696_v14 = vmul.f32 %v13930_v59, %v4433_v51  ;;  %v3926_v13 = vadd.f32 1e-05, %v3670_v50  ;;  %v14063_v6 = vld [vmem:[%s16003_s8] ss:$0 sm:$0xff]  ;;  %v14068_v37 = vsub.f32 %v17702_v54, %v2303_v38  ;;  %v3015_v51 = vpop.xlane.xlu0 %3014  ;;  %v17703_v50 = vld [vmem:[#allocation257_spill] sm:$0xff] }
 0x427   : > { %v9043_v46 = vpop.eup %9042  ;;  %v4054_v62 = vadd.f32 1e-05, %v3798_v11  ;;  %2065 = vadd.xlane.f32.xlu1 %v17700_v34  ;;  %2062 = vadd.xlane.f32.xlu0 %v17701_v2  ;;  %v5087_v56 = vadd.f32 %v13943_v25, %v4824_v57  ;;  %v4562_v23 = vmul.f32 %v9041_v47, %v13289_v48  ;;  %v2813_v34 = vmul.f32 %v14024_v39, %v14024_v39  ;;  %v17704_v47 = vld [vmem:[#allocation364_spill] sm:$0xff]  ;;  %v17705_v39 = vld [vmem:[#allocation399_spill] sm:$0xff] }
 0x428   : > { %v3399_v58 = vpop.xlane.xlu1 %3398  ;;  %v4959_v11 = vadd.f32 %v13943_v25, %v4696_v14  ;;  %v4434_v53 = vmul.f32 %v9043_v46, %v17703_v50  ;;  %v3671_v9 = vmul.f32 0.03125, %v3015_v51  ;;  %v8633_v48 = vpop.f32.mrf.mxu1  ;;  %v14084_v14 = vsub.f32 %v17704_v47, %v2302_v18 }
 0x429   : > { %9056 = vrsqrt.f32 %v4054_v62  ;;  %v3799_v2 = vmul.f32 0.03125, %v3399_v58  ;;  %8704 = vmatmul.mubr.msk.f32.gmra.mxu1 %vm458_vm0, %v5087_v56  ;;  %v4825_v38 = vmul.f32 %v13930_v59, %v4562_v23  ;;  %v8441_v46 = vpop.f32.mrf.mxu0  ;;  %v6657_v62 = vadd.f32 %v8633_v48, %v14063_v6 }
 0x42a   : > { %v9045_v57 = vpop.eup %9044  ;;  %9058 = vrsqrt.f32 %v3926_v13  ;;  %8512 = vmatmul.mubr.msk.f32.gmra.mxu0 %vm458_vm0, %v4959_v11  ;;  %v4697_v54 = vmul.f32 %v13930_v59, %v4434_v53  ;;  %v3927_v50 = vadd.f32 1e-05, %v3671_v9  ;;  %v6017_v56 = vadd.f32 %v8441_v46, %v14063_v6  ;;  %v6651_v23 = vpop.f32.mrf.mxu1 }
 0x42b   : > { %v9047_v58 = vpop.eup %9046  ;;  %v4055_v51 = vadd.f32 1e-05, %v3799_v2  ;;  %3485 = vadd.xlane.f32.xlu1 %v13914_v35  ;;  %3101 = vadd.xlane.f32.xlu0 %v17705_v39  ;;  %v5088_v18 = vadd.f32 %v13943_v25, %v4825_v38  ;;  %7355 = vst.msk [vmem:[%s14079_s20 + $0x208] sm:$0xff] %vm458_vm0, %v6657_v62  ;;  %v6652_v13 = vadd.f32 %v14063_v6, %v6651_v23  ;;  %v6011_v11 = vpop.f32.mrf.mxu0  ;;  %v17706_v2 = vld [vmem:[#allocation310_spill] sm:$0xff]  ;;  %v14104_v46 = vsel %vm458_vm0, %v2812_v27, 0.0  ;;  %v17708_v27 = vld [vmem:[#allocation269_spill] sm:$0xff] }
 0x42c   : > { %v3402_v53 = vpop.xlane.xlu1 %3401  ;;  %v4960_v48 = vadd.f32 %v13943_v25, %v4697_v54  ;;  %v4435_v9 = vmul.f32 %v9047_v58, %v17706_v2  ;;  %v4563_v47 = vmul.f32 %v9045_v57, %v13280_v4  ;;  %7291 = vst.msk [vmem:[%s14079_s20 + $0x8] sm:$0xff] %vm458_vm0, %v6017_v56  ;;  %v6012_v35 = vadd.f32 %v14063_v6, %v6011_v11  ;;  %v3018_v38 = vpop.xlane.xlu0 %3017  ;;  %v17709_v2 = vld [vmem:[#allocation265_spill] sm:$0xff] }
 0x42d   : > { %9060 = vrsqrt.f32 %v4055_v51  ;;  %v3800_v39 = vmul.f32 0.03125, %v3402_v53  ;;  %8706 = vmatprep.mubr.msk.f32.mxu1 %vm458_vm0, %v5088_v18  ;;  %7354 = vst.msk [vmem:[%s14079_s20 + $0x200] sm:$0xff] %vm458_vm0, %v6652_v13  ;;  %v3672_v54 = vmul.f32 0.03125, %v3018_v38  ;;  %v17707_v51 = vld [vmem:[#allocation261_spill] sm:$0xff]  ;;  %v14120_v18 = vsel %vm458_vm0, %v2813_v34, 0.0 }
 0x42e   : > { %v9049_v62 = vpop.eup %9048  ;;  %9062 = vrsqrt.f32 %v3927_v50  ;;  %8514 = vmatprep.mubr.msk.f32.mxu0 %vm458_vm0, %v4960_v48  ;;  %v4698_v4 = vmul.f32 %v13930_v59, %v4435_v9  ;;  %v4826_v57 = vmul.f32 %v13930_v59, %v4563_v47  ;;  %v14112_v56 = vmul.f32 0.03125, %v17707_v51  ;;  %7290 = vst.msk [vmem:[%s14079_s20] sm:$0xff] %vm458_vm0, %v6012_v35  ;;  %v17710_v47 = vld [vmem:[#allocation263_spill] sm:$0xff] }
 0x42f   : > { %v9051_v58 = vpop.eup %9050  ;;  %v4056_v23 = vadd.f32 1e-05, %v3800_v39  ;;  %3488 = vadd.xlane.f32.xlu1 %v13924_v44  ;;  %3104 = vadd.xlane.f32.xlu0 %v17708_v27  ;;  %v4564_v50 = vmul.f32 %v9049_v62, %v13321_v33  ;;  %v3928_v13 = vadd.f32 1e-05, %v3672_v54  ;;  %v2304_v35 = vmul.f32 0.03125, %v17710_v47 }
 0x430   : > { %v3405_v11 = vpop.xlane.xlu1 %3404  ;;  %v4961_v53 = vadd.f32 %v13943_v25, %v4698_v4  ;;  %v5089_v48 = vadd.f32 %v13943_v25, %v4826_v57  ;;  %v4436_v9 = vmul.f32 %v9051_v58, %v17709_v2  ;;  %v3021_v44 = vpop.xlane.xlu0 %3020 }
 0x431   : > { %9064 = vrsqrt.f32 %v4056_v23  ;;  %v3801_v39 = vmul.f32 0.03125, %v3405_v11  ;;  %v8636_v38 = vpop.f32.mrf.mxu1  ;;  %v4827_v51 = vmul.f32 %v13930_v59, %v4564_v50  ;;  %v3673_v34 = vmul.f32 0.03125, %v3021_v44  ;;  %v8444_v62 = vpop.f32.mrf.mxu0  ;;  %v17711_v50 = vld [vmem:[#allocation225_spill] sm:$0xff]  ;;  %v17713_v44 = vld [vmem:[#allocation271_spill] sm:$0xff] }
 0x432   : > { %v9053_v33 = vpop.eup %9052  ;;  %9066 = vrsqrt.f32 %v3928_v13  ;;  %8515 = vmatmul.mubr.msk.f32.gmra.mxu0 %vm458_vm0, %v4961_v53  ;;  %v6667_v54 = vadd.f32 %v8636_v38, %v14063_v6  ;;  %8707 = vmatmul.mubr.msk.f32.gmra.mxu1 %vm458_vm0, %v5089_v48  ;;  %v4699_v4 = vmul.f32 %v13930_v59, %v4436_v9  ;;  %v6027_v23 = vadd.f32 %v8444_v62, %v14063_v6  ;;  %v17712_v13 = vld [vmem:[#allocation174_spill] sm:$0xff] }
 0x433   : > { %v9055_v57 = vpop.eup %9054  ;;  %v4057_v58 = vadd.f32 1e-05, %v3801_v39  ;;  %v6661_v27 = vpop.f32.mrf.mxu1  ;;  %2071 = vadd.xlane.f32.xlu1 %v17711_v50  ;;  %2068 = vadd.xlane.f32.xlu0 %v17712_v13  ;;  %v5090_v11 = vadd.f32 %v13943_v25, %v4827_v51  ;;  %v4565_v53 = vmul.f32 %v9053_v33, %v13312_v26  ;;  %v3929_v2 = vadd.f32 1e-05, %v3673_v34 }
 0x434   : > { %7357 = vst.msk [vmem:[%s14079_s20 + $0x218] sm:$0xff] %vm458_vm0, %v6667_v54  ;;  %v6662_v48 = vadd.f32 %v14063_v6, %v6661_v27  ;;  %v6021_v9 = vpop.f32.mrf.mxu0  ;;  %v3408_v47 = vpop.xlane.xlu1 %3407  ;;  %v4962_v39 = vadd.f32 %v13943_v25, %v4699_v4  ;;  %v4437_v38 = vmul.f32 %v9055_v57, %v17713_v44  ;;  %7293 = vst.msk [vmem:[%s14079_s20 + $0x18] sm:$0xff] %vm458_vm0, %v6027_v23  ;;  %v17714_v27 = vld [vmem:[#allocation175_spill] sm:$0xff] }
 0x435   : > { %9068 = vrsqrt.f32 %v4057_v58  ;;  %v6022_v51 = vadd.f32 %v14063_v6, %v6021_v9  ;;  %v3802_v62 = vmul.f32 0.03125, %v3408_v47  ;;  %v3024_v26 = vpop.xlane.xlu0 %3023  ;;  %8709 = vmatprep.mubr.msk.f32.mxu1 %vm458_vm0, %v5090_v11  ;;  %v4828_v33 = vmul.f32 %v13930_v59, %v4565_v53  ;;  %v17715_v53 = vld [vmem:[#allocation365_spill] sm:$0xff] }
 0x436   : > { %v9057_v34 = vpop.eup %9056  ;;  %9070 = vrsqrt.f32 %v3929_v2  ;;  %7356 = vst.msk [vmem:[%s14079_s20 + $0x210] sm:$0xff] %vm458_vm0, %v6662_v48  ;;  %v3674_v54 = vmul.f32 0.03125, %v3024_v26  ;;  %8517 = vmatprep.mubr.msk.f32.mxu0 %vm458_vm0, %v4962_v39  ;;  %v4700_v4 = vmul.f32 %v13930_v59, %v4437_v38  ;;  %v2814_v57 = vmul.f32 %v14084_v14, %v14084_v14  ;;  %v17716_v39 = vld [vmem:[#allocation134_spill] sm:$0xff] }
 0x437   : > { %v9059_v58 = vpop.eup %9058  ;;  %7292 = vst.msk [vmem:[%s14079_s20 + $0x10] sm:$0xff] %vm458_vm0, %v6022_v51  ;;  %v4058_v23 = vadd.f32 1e-05, %v3802_v62  ;;  %3491 = vadd.xlane.f32.xlu1 %v13962_v63  ;;  %3107 = vadd.xlane.f32.xlu0 %v17714_v27  ;;  %v5091_v50 = vadd.f32 %v13943_v25, %v4828_v33  ;;  %v4566_v13 = vmul.f32 %v9057_v34, %v13353_v1  ;;  %v17717_v63 = vld [vmem:[#allocation366_spill] sm:$0xff] }
 0x438   : > { %v2815_v11 = vmul.f32 %v14068_v37, %v14068_v37  ;;  %v14162_v2 = vsub.f32 %v17715_v53, %v14112_v56  ;;  %v3930_v48 = vadd.f32 1e-05, %v3674_v54  ;;  %v3411_v9 = vpop.xlane.xlu1 %3410  ;;  %v4963_v47 = vadd.f32 %v13943_v25, %v4700_v4  ;;  %v8639_v1 = vpop.f32.mrf.mxu1 }
 0x439   : > { %v4438_v44 = vmul.f32 %v9059_v58, %v17716_v39  ;;  %v14167_v38 = vsub.f32 %v17717_v63, %v2304_v35  ;;  %9072 = vrsqrt.f32 %v4058_v23  ;;  %v3803_v51 = vmul.f32 0.03125, %v3411_v9  ;;  %v3027_v62 = vpop.xlane.xlu0 %3026  ;;  %8710 = vmatmul.mubr.msk.f32.gmra.mxu1 %vm458_vm0, %v5091_v50  ;;  %v8447_v34 = vpop.f32.mrf.mxu0  ;;  %v17718_v50 = vld [vmem:[#allocation268_spill] sm:$0xff]  ;;  %v17719_v63 = vld [vmem:[#allocation286_spill] sm:$0xff] }
 0x43a   : > { %v4829_v26 = vmul.f32 %v13930_v59, %v4566_v13  ;;  %v9061_v33 = vpop.eup %9060  ;;  %9074 = vrsqrt.f32 %v3930_v48  ;;  %v3675_v56 = vmul.f32 0.03125, %v3027_v62  ;;  %8518 = vmatmul.mubr.msk.f32.gmra.mxu0 %vm458_vm0, %v4963_v47  ;;  %v6677_v54 = vadd.f32 %v8639_v1, %v14063_v6  ;;  %v6671_v27 = vpop.f32.mrf.mxu1 }
 0x43b   : > { %v4701_v35 = vmul.f32 %v13930_v59, %v4438_v44  ;;  %v9063_v4 = vpop.eup %9062  ;;  %v4059_v58 = vadd.f32 1e-05, %v3803_v51  ;;  %v6037_v23 = vadd.f32 %v8447_v34, %v14063_v6  ;;  %3494 = vadd.xlane.f32.xlu1 %v13972_v19  ;;  %3110 = vadd.xlane.f32.xlu0 %v17718_v50  ;;  %v4567_v53 = vmul.f32 %v9061_v33, %v13344_v52  ;;  %v6031_v47 = vpop.f32.mrf.mxu0 }
 0x43c   : > { %v5092_v13 = vadd.f32 %v13943_v25, %v4829_v26  ;;  %v3931_v48 = vadd.f32 1e-05, %v3675_v56  ;;  %7359 = vst.msk [vmem:[%s14079_s20 + $0x228] sm:$0xff] %vm458_vm0, %v6677_v54  ;;  %v6672_v9 = vadd.f32 %v14063_v6, %v6671_v27  ;;  %v3414_v39 = vpop.xlane.xlu1 %3413  ;;  %v4439_v51 = vmul.f32 %v9063_v4, %v17719_v63  ;;  %v17720_v4 = vld [vmem:[#allocation396_spill] sm:$0xff] }
 0x43d   : > { %v4964_v44 = vadd.f32 %v13943_v25, %v4701_v35  ;;  %9076 = vrsqrt.f32 %v4059_v58  ;;  %7295 = vst.msk [vmem:[%s14079_s20 + $0x28] sm:$0xff] %vm458_vm0, %v6037_v23  ;;  %v6032_v19 = vadd.f32 %v14063_v6, %v6031_v47  ;;  %v3804_v62 = vmul.f32 0.03125, %v3414_v39  ;;  %v3030_v52 = vpop.xlane.xlu0 %3029  ;;  %v17721_v58 = vld [vmem:[#allocation228_spill] sm:$0xff] }
 0x43e   : > { %8712 = vmatprep.mubr.msk.f32.mxu1 %vm458_vm0, %v5092_v13  ;;  %v4830_v1 = vmul.f32 %v13930_v59, %v4567_v53  ;;  %v9065_v26 = vpop.eup %9064  ;;  %9078 = vrsqrt.f32 %v3931_v48  ;;  %7358 = vst.msk [vmem:[%s14079_s20 + $0x220] sm:$0xff] %vm458_vm0, %v6672_v9  ;;  %v3676_v33 = vmul.f32 0.03125, %v3030_v52  ;;  %v4702_v56 = vmul.f32 %v13930_v59, %v4439_v51  ;;  %v17722_v13 = vld [vmem:[#allocation117_spill] sm:$0xff]  ;;  %v17723_v47 = vld [vmem:[#allocation88_spill] sm:$0xff] }
 0x43f   : > { %8520 = vmatprep.mubr.msk.f32.mxu0 %vm458_vm0, %v4964_v44  ;;  %v14194_v34 = vsel %vm458_vm0, %v2814_v57, 0.0  ;;  %v9067_v54 = vpop.eup %9066  ;;  %7294 = vst.msk [vmem:[%s14079_s20 + $0x20] sm:$0xff] %vm458_vm0, %v6032_v19  ;;  %v4060_v35 = vadd.f32 1e-05, %v3804_v62  ;;  %2077 = vadd.xlane.f32.xlu1 %v17720_v4  ;;  %v4568_v27 = vmul.f32 %v9065_v26, %v13385_v40  ;;  %v14203_v50 = vsel %vm458_vm0, %v2815_v11, 0.0  ;;  %v17724_v44 = vld [vmem:[#allocation275_spill] sm:$0xff] }
 0x440   : > { %2074 = vadd.xlane.f32.xlu0 %v17721_v58  ;;  %v5093_v23 = vadd.f32 %v13943_v25, %v4830_v1  ;;  %v2307_v53 = vmul.f32 0.03125, %v17722_v13  ;;  %v3932_v48 = vadd.f32 1e-05, %v3676_v33  ;;  %v3417_v57 = vpop.xlane.xlu1 %3416  ;;  %v4965_v9 = vadd.f32 %v13943_v25, %v4702_v56  ;;  %v8642_v62 = vpop.f32.mrf.mxu1  ;;  %v17725_v58 = vld [vmem:[#allocation192_spill] sm:$0xff] }
 0x441   : > { %v4440_v39 = vmul.f32 %v9067_v54, %v17723_v47  ;;  %v2306_v63 = vmul.f32 0.03125, %v17724_v44  ;;  %9080 = vrsqrt.f32 %v4060_v35  ;;  %v3805_v51 = vmul.f32 0.03125, %v3417_v57  ;;  %v3033_v19 = vpop.xlane.xlu0 %3032  ;;  %v8450_v1 = vpop.f32.mrf.mxu0 }
 0x442   : > { %8713 = vmatmul.mubr.msk.f32.gmra.mxu1 %vm458_vm0, %v5093_v23  ;;  %v4831_v40 = vmul.f32 %v13930_v59, %v4568_v27  ;;  %v9069_v11 = vpop.eup %9068  ;;  %9082 = vrsqrt.f32 %v3932_v48  ;;  %v3677_v52 = vmul.f32 0.03125, %v3033_v19  ;;  %8521 = vmatmul.mubr.msk.f32.gmra.mxu0 %vm458_vm0, %v4965_v9  ;;  %v6687_v26 = vadd.f32 %v8642_v62, %v14063_v6  ;;  %v6681_v4 = vpop.f32.mrf.mxu1 }
 0x443   : > { %v4703_v33 = vmul.f32 %v13930_v59, %v4440_v39  ;;  %v9071_v56 = vpop.eup %9070  ;;  %v4061_v54 = vadd.f32 1e-05, %v3805_v51  ;;  %v6047_v35 = vadd.f32 %v8450_v1, %v14063_v6  ;;  %3497 = vadd.xlane.f32.xlu1 %v14000_v5  ;;  %v4569_v27 = vmul.f32 %v9069_v11, %v13376_v21  ;;  %v6041_v57 = vpop.f32.mrf.mxu0  ;;  %v17726_v39 = vld [vmem:[#allocation307_spill] sm:$0xff] }
 0x444   : > { %3113 = vadd.xlane.f32.xlu0 %v17725_v58  ;;  %v5094_v23 = vadd.f32 %v13943_v25, %v4831_v40  ;;  %v3933_v13 = vadd.f32 1e-05, %v3677_v52  ;;  %7361 = vst.msk [vmem:[%s14079_s20 + $0x238] sm:$0xff] %vm458_vm0, %v6687_v26  ;;  %v6682_v48 = vadd.f32 %v14063_v6, %v6681_v4  ;;  %v3420_v9 = vpop.xlane.xlu1 %3419  ;;  %v4441_v44 = vmul.f32 %v9071_v56, %v17726_v39  ;;  %v17728_v4 = vld [vmem:[#allocation367_spill] sm:$0xff] }
 0x445   : > { %v4966_v47 = vadd.f32 %v13943_v25, %v4703_v33  ;;  %9084 = vrsqrt.f32 %v4061_v54  ;;  %7297 = vst.msk [vmem:[%s14079_s20 + $0x38] sm:$0xff] %vm458_vm0, %v6047_v35  ;;  %v6042_v5 = vadd.f32 %v14063_v6, %v6041_v57  ;;  %v3806_v51 = vmul.f32 0.03125, %v3420_v9  ;;  %v3036_v21 = vpop.xlane.xlu0 %3035  ;;  %v17727_v33 = vld [vmem:[#allocation193_spill] sm:$0xff]  ;;  %v17730_v9 = vld [vmem:[#allocation368_spill] sm:$0xff] }
 0x446   : > { %8715 = vmatprep.mubr.msk.f32.mxu1 %vm458_vm0, %v5094_v23  ;;  %v4832_v19 = vmul.f32 %v13930_v59, %v4569_v27  ;;  %v9073_v62 = vpop.eup %9072  ;;  %9086 = vrsqrt.f32 %v3933_v13  ;;  %7360 = vst.msk [vmem:[%s14079_s20 + $0x230] sm:$0xff] %vm458_vm0, %v6682_v48  ;;  %v3678_v40 = vmul.f32 0.03125, %v3036_v21  ;;  %v4704_v11 = vmul.f32 %v13930_v59, %v4441_v44  ;;  %v17729_v48 = vld [vmem:[#allocation157_spill] sm:$0xff] }
 0x447   : > { %8523 = vmatprep.mubr.msk.f32.mxu0 %vm458_vm0, %v4966_v47  ;;  %v2816_v52 = vmul.f32 %v14167_v38, %v14167_v38  ;;  %v9075_v1 = vpop.eup %9074  ;;  %7296 = vst.msk [vmem:[%s14079_s20 + $0x30] sm:$0xff] %vm458_vm0, %v6042_v5  ;;  %v4062_v26 = vadd.f32 1e-05, %v3806_v51  ;;  %3500 = vadd.xlane.f32.xlu1 %v14010_v49  ;;  %v4570_v54 = vmul.f32 %v9073_v62, %v13417_v12 }
 0x448   : > { %3116 = vadd.xlane.f32.xlu0 %v17727_v33  ;;  %v5095_v56 = vadd.f32 %v13943_v25, %v4832_v19  ;;  %v2817_v35 = vmul.f32 %v14162_v2, %v14162_v2  ;;  %v14244_v58 = vsub.f32 %v17728_v4, %v2307_v53  ;;  %v3934_v23 = vadd.f32 1e-05, %v3678_v40  ;;  %v3423_v27 = vpop.xlane.xlu1 %3422  ;;  %v8645_v44 = vpop.f32.mrf.mxu1 }
 0x449   : > { %v4967_v13 = vadd.f32 %v13943_v25, %v4704_v11  ;;  %v4442_v57 = vmul.f32 %v9075_v1, %v17729_v48  ;;  %v14249_v49 = vsub.f32 %v17730_v9, %v2306_v63  ;;  %9088 = vrsqrt.f32 %v4062_v26  ;;  %v3039_v39 = vpop.xlane.xlu0 %3038  ;;  %v8453_v51 = vpop.f32.mrf.mxu0  ;;  %v17731_v1 = vld [vmem:[#allocation18_spill] sm:$0xff] }
 0x44a   : > { %v3807_v47 = vmul.f32 0.03125, %v3423_v27  ;;  %8716 = vmatmul.mubr.msk.f32.gmra.mxu1 %vm458_vm0, %v5095_v56  ;;  %v4833_v12 = vmul.f32 %v13930_v59, %v4570_v54  ;;  %v9077_v5 = vpop.eup %9076  ;;  %9090 = vrsqrt.f32 %v3934_v23  ;;  %v3679_v53 = vmul.f32 0.03125, %v3039_v39  ;;  %v6691_v11 = vpop.f32.mrf.mxu1 }
 0x44b   : > { %8524 = vmatmul.mubr.msk.f32.gmra.mxu0 %vm458_vm0, %v4967_v13  ;;  %v6697_v21 = vadd.f32 %v8645_v44, %v14063_v6  ;;  %v4705_v63 = vmul.f32 %v13930_v59, %v4442_v57  ;;  %v9079_v19 = vpop.eup %9078  ;;  %v6057_v40 = vadd.f32 %v8453_v51, %v14063_v6  ;;  %3503 = vadd.xlane.f32.xlu1 %v14038_v3  ;;  %v6051_v4 = vpop.f32.mrf.mxu0  ;;  %v17732_v13 = vld [vmem:[#allocation322_spill] sm:$0xff]  ;;  %v17733_v51 = vld [vmem:[#allocation197_spill] sm:$0xff] }
 0x44c   : > { %v4063_v62 = vadd.f32 1e-05, %v3807_v47  ;;  %3119 = vadd.xlane.f32.xlu0 %v17731_v1  ;;  %v5096_v26 = vadd.f32 %v13943_v25, %v4833_v12  ;;  %v4571_v33 = vmul.f32 %v9077_v5, %v13408_v28  ;;  %v3935_v56 = vadd.f32 1e-05, %v3679_v53  ;;  %v3426_v23 = vpop.xlane.xlu1 %3425 }
 0x44d   : > { %7363 = vst.msk [vmem:[%s14079_s20 + $0x248] sm:$0xff] %vm458_vm0, %v6697_v21  ;;  %v6692_v54 = vadd.f32 %v14063_v6, %v6691_v11  ;;  %v4968_v27 = vadd.f32 %v13943_v25, %v4705_v63  ;;  %v4443_v48 = vmul.f32 %v9079_v19, %v17732_v13  ;;  %7299 = vst.msk [vmem:[%s14079_s20 + $0x48] sm:$0xff] %vm458_vm0, %v6057_v40  ;;  %v3808_v57 = vmul.f32 0.03125, %v3426_v23  ;;  %v3042_v28 = vpop.xlane.xlu0 %3041 }
 0x44e   : > { %9092 = vrsqrt.f32 %v4063_v62  ;;  %v6052_v3 = vadd.f32 %v14063_v6, %v6051_v4  ;;  %8718 = vmatprep.mubr.msk.f32.mxu1 %vm458_vm0, %v5096_v26  ;;  %v4834_v9 = vmul.f32 %v13930_v59, %v4571_v33  ;;  %v9081_v47 = vpop.eup %9080  ;;  %v3680_v39 = vmul.f32 0.03125, %v3042_v28  ;;  %v17734_v62 = vld [vmem:[#allocation274_spill] sm:$0xff] }
 0x44f   : > { %9094 = vrsqrt.f32 %v3935_v56  ;;  %7362 = vst.msk [vmem:[%s14079_s20 + $0x240] sm:$0xff] %vm458_vm0, %v6692_v54  ;;  %8526 = vmatprep.mubr.msk.f32.mxu0 %vm458_vm0, %v4968_v27  ;;  %v4706_v44 = vmul.f32 %v13930_v59, %v4443_v48  ;;  %v14276_v12 = vsel %vm458_vm0, %v2816_v52, 0.0  ;;  %v9083_v5 = vpop.eup %9082  ;;  %v4064_v53 = vadd.f32 1e-05, %v3808_v57  ;;  %3506 = vadd.xlane.f32.xlu1 %v14048_v24  ;;  %v17735_v26 = vld [vmem:[#allocation170_spill] sm:$0xff] }
 0x450   : > { %7298 = vst.msk [vmem:[%s14079_s20 + $0x40] sm:$0xff] %vm458_vm0, %v6052_v3  ;;  %3122 = vadd.xlane.f32.xlu0 %v17733_v51  ;;  %v5097_v21 = vadd.f32 %v13943_v25, %v4834_v9  ;;  %v4572_v63 = vmul.f32 %v9081_v47, %v13449_v16  ;;  %v14285_v19 = vsel %vm458_vm0, %v2817_v35, 0.0  ;;  %v2309_v40 = vmul.f32 0.03125, %v17734_v62  ;;  %v3429_v52 = vpop.xlane.xlu1 %3428  ;;  %v17736_v56 = vld [vmem:[#allocation126_spill] sm:$0xff]  ;;  %v8648_v23 = vpop.f32.mrf.mxu1 }
 0x451   : > { %v3936_v11 = vadd.f32 1e-05, %v3680_v39  ;;  %v4969_v1 = vadd.f32 %v13943_v25, %v4706_v44  ;;  %v4444_v33 = vmul.f32 %v9083_v5, %v17735_v26  ;;  %v2308_v54 = vmul.f32 0.03125, %v17736_v56  ;;  %v3045_v4 = vpop.xlane.xlu0 %3044  ;;  %v8456_v13 = vpop.f32.mrf.mxu0  ;;  %v17737_v39 = vld [vmem:[#allocation276_spill] sm:$0xff] }
 0x452   : > { %9096 = vrsqrt.f32 %v4064_v53  ;;  %v3809_v24 = vmul.f32 0.03125, %v3429_v52  ;;  %8719 = vmatmul.mubr.msk.f32.gmra.mxu1 %vm458_vm0, %v5097_v21  ;;  %v4835_v16 = vmul.f32 %v13930_v59, %v4572_v63  ;;  %v9085_v35 = vpop.eup %9084  ;;  %v3681_v27 = vmul.f32 0.03125, %v3045_v4  ;;  %v6701_v47 = vpop.f32.mrf.mxu1 }
 0x453   : > { %9098 = vrsqrt.f32 %v3936_v11  ;;  %8527 = vmatmul.mubr.msk.f32.gmra.mxu0 %vm458_vm0, %v4969_v1  ;;  %v6707_v48 = vadd.f32 %v8648_v23, %v14063_v6  ;;  %v4707_v3 = vmul.f32 %v13930_v59, %v4444_v33  ;;  %v9087_v57 = vpop.eup %9086  ;;  %v6067_v9 = vadd.f32 %v8456_v13, %v14063_v6  ;;  %3509 = vadd.xlane.f32.xlu1 %v14104_v46  ;;  %v6061_v21 = vpop.f32.mrf.mxu0  ;;  %v17738_v11 = vld [vmem:[#allocation273_spill] sm:$0xff] }
 0x454   : > { %v4065_v28 = vadd.f32 1e-05, %v3809_v24  ;;  %3125 = vadd.xlane.f32.xlu0 %v17737_v39  ;;  %v5098_v44 = vadd.f32 %v13943_v25, %v4835_v16  ;;  %v4573_v5 = vmul.f32 %v9085_v35, %v13440_v30  ;;  %v3937_v53 = vadd.f32 1e-05, %v3681_v27  ;;  %v3432_v63 = vpop.xlane.xlu1 %3431  ;;  %v17739_v35 = vld [vmem:[#allocation277_spill] sm:$0xff]  ;;  %v17741_v39 = vld [vmem:[#allocation339_spill] sm:$0xff] }
 0x455   : > { %7365 = vst.msk [vmem:[%s14079_s20 + $0x258] sm:$0xff] %vm458_vm0, %v6707_v48  ;;  %v6702_v51 = vadd.f32 %v14063_v6, %v6701_v47  ;;  %v4970_v62 = vadd.f32 %v13943_v25, %v4707_v3  ;;  %v4445_v52 = vmul.f32 %v9087_v57, %v17738_v11  ;;  %7301 = vst.msk [vmem:[%s14079_s20 + $0x58] sm:$0xff] %vm458_vm0, %v6067_v9  ;;  %v3810_v1 = vmul.f32 0.03125, %v3432_v63  ;;  %v3048_v30 = vpop.xlane.xlu0 %3047  ;;  %v17740_v3 = vld [vmem:[#allocation369_spill] sm:$0xff] }
 0x456   : > { %9100 = vrsqrt.f32 %v4065_v28  ;;  %v6062_v46 = vadd.f32 %v14063_v6, %v6061_v21  ;;  %8721 = vmatprep.mubr.msk.f32.mxu1 %vm458_vm0, %v5098_v44  ;;  %v4836_v26 = vmul.f32 %v13930_v59, %v4573_v5  ;;  %v9089_v33 = vpop.eup %9088  ;;  %v3682_v56 = vmul.f32 0.03125, %v3048_v30  ;;  %v17742_v5 = vld [vmem:[#allocation370_spill] sm:$0xff] }
 0x457   : > { %9102 = vrsqrt.f32 %v3937_v53  ;;  %7364 = vst.msk [vmem:[%s14079_s20 + $0x250] sm:$0xff] %vm458_vm0, %v6702_v51  ;;  %8529 = vmatprep.mubr.msk.f32.mxu0 %vm458_vm0, %v4970_v62  ;;  %v4708_v24 = vmul.f32 %v13930_v59, %v4445_v52  ;;  %v2818_v4 = vmul.f32 %v14249_v49, %v14249_v49  ;;  %v9091_v23 = vpop.eup %9090  ;;  %v4066_v16 = vadd.f32 1e-05, %v3810_v1  ;;  %3512 = vadd.xlane.f32.xlu1 %v14120_v18 }
 0x458   : > { %7300 = vst.msk [vmem:[%s14079_s20 + $0x50] sm:$0xff] %vm458_vm0, %v6062_v46  ;;  %3128 = vadd.xlane.f32.xlu0 %v17739_v35  ;;  %v5099_v27 = vadd.f32 %v13943_v25, %v4836_v26  ;;  %v4574_v13 = vmul.f32 %v9089_v33, %v13481_v41  ;;  %v2819_v48 = vmul.f32 %v14244_v58, %v14244_v58  ;;  %v3938_v28 = vadd.f32 1e-05, %v3682_v56  ;;  %v3435_v9 = vpop.xlane.xlu1 %3434  ;;  %v8651_v21 = vpop.f32.mrf.mxu1  ;;  %v17743_v26 = vld [vmem:[#allocation213_spill] sm:$0xff] }
 0x459   : > { %v14326_v57 = vsub.f32 %v17740_v3, %v2309_v40  ;;  %v4971_v47 = vadd.f32 %v13943_v25, %v4708_v24  ;;  %v4446_v44 = vmul.f32 %v9091_v23, %v17741_v39  ;;  %v14331_v18 = vsub.f32 %v17742_v5, %v2308_v54  ;;  %v3051_v51 = vpop.xlane.xlu0 %3050  ;;  %v8459_v62 = vpop.f32.mrf.mxu0  ;;  %v14340_v54 = vld [vmem:[%s16000_s5] ss:$0 sm:$0xff] }
 0x45a   : > { %9104 = vrsqrt.f32 %v4066_v16  ;;  %v3811_v53 = vmul.f32 0.03125, %v3435_v9  ;;  %8722 = vmatmul.mubr.msk.f32.gmra.mxu1 %vm458_vm0, %v5099_v27  ;;  %v4837_v41 = vmul.f32 %v13930_v59, %v4574_v13  ;;  %v3683_v40 = vmul.f32 0.03125, %v3051_v51  ;;  %v6711_v30 = vpop.f32.mrf.mxu1  ;;  %v14354_v27 = vld [vmem:[%s16001_s6] ss:$0 sm:$0xff]  ;;  %v17744_v13 = vld [vmem:[#allocation335_spill] sm:$0xff] }
 0x45b   : > { %v9093_v63 = vpop.eup %9092  ;;  %9106 = vrsqrt.f32 %v3938_v28  ;;  %8530 = vmatmul.mubr.msk.f32.gmra.mxu0 %vm458_vm0, %v4971_v47  ;;  %v6717_v11 = vadd.f32 %v8651_v21, %v14063_v6  ;;  %v4709_v52 = vmul.f32 %v14340_v54, %v4446_v44  ;;  %v6077_v59 = vadd.f32 %v8459_v62, %v14063_v6  ;;  %3515 = vadd.xlane.f32.xlu1 %v14194_v34  ;;  %v6071_v16 = vpop.f32.mrf.mxu0  ;;  %v17745_v21 = vld [vmem:[#allocation208_spill] sm:$0xff]  ;;  %v17746_v62 = vld [vmem:[#allocation291_spill] sm:$0xff] }
 0x45c   : > { %v9095_v46 = vpop.eup %9094  ;;  %v4067_v1 = vadd.f32 1e-05, %v3811_v53  ;;  %3131 = vadd.xlane.f32.xlu0 %v17743_v26  ;;  %v5100_v33 = vadd.f32 %v13943_v25, %v4837_v41  ;;  %v4575_v56 = vmul.f32 %v9093_v63, %v13472_v7  ;;  %v3939_v24 = vadd.f32 1e-05, %v3683_v40  ;;  %v3438_v35 = vpop.xlane.xlu1 %3437 }
 0x45d   : > { %7367 = vst.msk [vmem:[%s14079_s20 + $0x268] sm:$0xff] %vm458_vm0, %v6717_v11  ;;  %v6712_v23 = vadd.f32 %v14063_v6, %v6711_v30  ;;  %v4972_v34 = vadd.f32 %v14354_v27, %v4709_v52  ;;  %v4447_v3 = vmul.f32 %v9095_v46, %v17744_v13  ;;  %7303 = vst.msk [vmem:[%s14079_s20 + $0x68] sm:$0xff] %vm458_vm0, %v6077_v59  ;;  %v3812_v25 = vmul.f32 0.03125, %v3438_v35  ;;  %v3054_v28 = vpop.xlane.xlu0 %3053  ;;  %v17748_v30 = vld [vmem:[#allocation398_spill] sm:$0xff] }
 0x45e   : > { %9108 = vrsqrt.f32 %v4067_v1  ;;  %v6072_v7 = vadd.f32 %v14063_v6, %v6071_v16  ;;  %8724 = vmatprep.mubr.msk.f32.mxu1 %vm458_vm0, %v5100_v33  ;;  %v4838_v9 = vmul.f32 %v14340_v54, %v4575_v56  ;;  %v3684_v39 = vmul.f32 0.03125, %v3054_v28  ;;  %v17747_v1 = vld [vmem:[#allocation14_spill] sm:$0xff] }
 0x45f   : > { %v9097_v47 = vpop.eup %9096  ;;  %9110 = vrsqrt.f32 %v3939_v24  ;;  %7366 = vst.msk [vmem:[%s14079_s20 + $0x260] sm:$0xff] %vm458_vm0, %v6712_v23  ;;  %8532 = vmatprep.mubr.msk.f32.mxu0 %vm458_vm0, %v4972_v34  ;;  %v4710_v44 = vmul.f32 %v14340_v54, %v4447_v3  ;;  %v14368_v5 = vsel %vm458_vm0, %v2818_v4, 0.0  ;;  %v4068_v51 = vadd.f32 1e-05, %v3812_v25  ;;  %3518 = vadd.xlane.f32.xlu1 %v14203_v50  ;;  %v17749_v25 = vld [vmem:[#allocation24_spill] sm:$0xff] }
 0x460   : > { %v9099_v53 = vpop.eup %9098  ;;  %7302 = vst.msk [vmem:[%s14079_s20 + $0x60] sm:$0xff] %vm458_vm0, %v6072_v7  ;;  %3134 = vadd.xlane.f32.xlu0 %v17745_v21  ;;  %v5101_v41 = vadd.f32 %v14354_v27, %v4838_v9  ;;  %v4576_v63 = vmul.f32 %v9097_v47, %v13515_v8  ;;  %v14377_v40 = vsel %vm458_vm0, %v2819_v48, 0.0  ;;  %v2311_v11 = vmul.f32 0.03125, %v17746_v62  ;;  %v3441_v4 = vpop.xlane.xlu1 %3440  ;;  %v17750_v21 = vld [vmem:[#allocation8_spill] sm:$0xff] }
 0x461   : > { %v3940_v52 = vadd.f32 1e-05, %v3684_v39  ;;  %v4973_v46 = vadd.f32 %v14354_v27, %v4710_v44  ;;  %v4448_v59 = vmul.f32 %v9099_v53, %v17747_v1  ;;  %v2310_v26 = vmul.f32 0.03125, %v17748_v30  ;;  %v3057_v33 = vpop.xlane.xlu0 %3056  ;;  %v8654_v56 = vpop.f32.mrf.mxu1 }
 0x462   : > { %9112 = vrsqrt.f32 %v4068_v51  ;;  %v3813_v50 = vmul.f32 0.03125, %v3441_v4  ;;  %8725 = vmatmul.mubr.msk.f32.gmra.mxu1 %vm458_vm0, %v5101_v41  ;;  %v4839_v8 = vmul.f32 %v14340_v54, %v4576_v63  ;;  %v3685_v24 = vmul.f32 0.03125, %v3057_v33  ;;  %v8462_v23 = vpop.f32.mrf.mxu0 }
 0x463   : > { %v9101_v48 = vpop.eup %9100  ;;  %9114 = vrsqrt.f32 %v3940_v52  ;;  %8533 = vmatmul.mubr.msk.f32.gmra.mxu0 %vm458_vm0, %v4973_v46  ;;  %v6727_v16 = vadd.f32 %v8654_v56, %v14063_v6  ;;  %v4711_v35 = vmul.f32 %v14340_v54, %v4448_v59  ;;  %v6087_v3 = vadd.f32 %v8462_v23, %v14063_v6  ;;  %v6721_v7 = vpop.f32.mrf.mxu1  ;;  %3521 = vadd.xlane.f32.xlu1 %v14276_v12 }
 0x464   : > { %v9103_v34 = vpop.eup %9102  ;;  %v4069_v13 = vadd.f32 1e-05, %v3813_v50  ;;  %3137 = vadd.xlane.f32.xlu0 %v17749_v25  ;;  %v5102_v28 = vadd.f32 %v14354_v27, %v4839_v8  ;;  %v4577_v9 = vmul.f32 %v9101_v48, %v13506_v17  ;;  %v3941_v47 = vadd.f32 1e-05, %v3685_v24  ;;  %v6081_v44 = vpop.f32.mrf.mxu0  ;;  %v17751_v50 = vld [vmem:[#allocation389_spill] sm:$0xff]  ;;  %v17752_v48 = vld [vmem:[#allocation371_spill] sm:$0xff] }
 0x465   : > { %7369 = vst.msk [vmem:[%s14079_s20 + $0x278] sm:$0xff] %vm458_vm0, %v6727_v16  ;;  %v6722_v39 = vadd.f32 %v14063_v6, %v6721_v7  ;;  %v3444_v53 = vpop.xlane.xlu1 %3443  ;;  %v4974_v51 = vadd.f32 %v14354_v27, %v4711_v35  ;;  %v4449_v41 = vmul.f32 %v9103_v34, %v17750_v21  ;;  %7305 = vst.msk [vmem:[%s14079_s20 + $0x78] sm:$0xff] %vm458_vm0, %v6087_v3  ;;  %v3060_v17 = vpop.xlane.xlu0 %3059  ;;  %v17753_v34 = vld [vmem:[#allocation28_spill] sm:$0xff] }
 0x466   : > { %9116 = vrsqrt.f32 %v4069_v13  ;;  %v6082_v12 = vadd.f32 %v14063_v6, %v6081_v44  ;;  %v3814_v63 = vmul.f32 0.03125, %v3444_v53  ;;  %8727 = vmatprep.mubr.msk.f32.mxu1 %vm458_vm0, %v5102_v28  ;;  %v4840_v62 = vmul.f32 %v14340_v54, %v4577_v9 }
 0x467   : > { %v9105_v52 = vpop.eup %9104  ;;  %9118 = vrsqrt.f32 %v3941_v47  ;;  %7368 = vst.msk [vmem:[%s14079_s20 + $0x270] sm:$0xff] %vm458_vm0, %v6722_v39  ;;  %v3686_v4 = vmul.f32 0.03125, %v3060_v17  ;;  %8535 = vmatprep.mubr.msk.f32.mxu0 %vm458_vm0, %v4974_v51  ;;  %v4712_v46 = vmul.f32 %v14340_v54, %v4449_v41  ;;  %v2820_v1 = vmul.f32 %v14331_v18, %v14331_v18  ;;  %3524 = vadd.xlane.f32.xlu1 %v14285_v19  ;;  %v17754_v19 = vld [vmem:[#allocation372_spill] sm:$0xff]  ;;  %v17755_v41 = vld [vmem:[#allocation146_spill] sm:$0xff] }
 0x468   : > { %v9107_v59 = vpop.eup %9106  ;;  %7304 = vst.msk [vmem:[%s14079_s20 + $0x70] sm:$0xff] %vm458_vm0, %v6082_v12  ;;  %v4070_v30 = vadd.f32 1e-05, %v3814_v63  ;;  %3140 = vadd.xlane.f32.xlu0 %v17751_v50  ;;  %v5103_v33 = vadd.f32 %v14354_v27, %v4840_v62  ;;  %v4578_v56 = vmul.f32 %v9105_v52, %v13560_v61  ;;  %v14417_v8 = vmul.f32 %v14326_v57, %v14326_v57  ;;  %v8657_v61 = vpop.f32.mrf.mxu1 }
 0x469   : > { %v14420_v24 = vsub.f32 %v17752_v48, %v2311_v11  ;;  %v3942_v23 = vadd.f32 1e-05, %v3686_v4  ;;  %v3447_v16 = vpop.xlane.xlu1 %3446  ;;  %v4975_v35 = vadd.f32 %v14354_v27, %v4712_v46  ;;  %v4450_v13 = vmul.f32 %v9107_v59, %v17753_v34  ;;  %v3063_v25 = vpop.xlane.xlu0 %3062  ;;  %v17756_v59 = vld [vmem:[#allocation119_spill] sm:$0xff]  ;;  %v17757_v34 = vld [vmem:[#allocation144_spill] sm:$0xff] }
 0x46a   : > { %v14425_v3 = vsub.f32 %v17754_v19, %v2310_v26  ;;  %9120 = vrsqrt.f32 %v4070_v30  ;;  %v3815_v7 = vmul.f32 0.03125, %v3447_v16  ;;  %8728 = vmatmul.mubr.msk.f32.gmra.mxu1 %vm458_vm0, %v5103_v33  ;;  %v4841_v28 = vmul.f32 %v14340_v54, %v4578_v56  ;;  %v8465_v47 = vpop.f32.mrf.mxu0  ;;  %v6731_v21 = vpop.f32.mrf.mxu1  ;;  %v17758_v19 = vld [vmem:[#allocation40_spill] sm:$0xff] }
 0x46b   : > { %v9109_v9 = vpop.eup %9108  ;;  %9122 = vrsqrt.f32 %v3942_v23  ;;  %v3687_v11 = vmul.f32 0.03125, %v3063_v25  ;;  %8536 = vmatmul.mubr.msk.f32.gmra.mxu0 %vm458_vm0, %v4975_v35  ;;  %v6737_v39 = vadd.f32 %v8657_v61, %v14063_v6  ;;  %v4713_v26 = vmul.f32 %v14340_v54, %v4450_v13  ;;  %3527 = vadd.xlane.f32.xlu1 %v14368_v5  ;;  %v17759_v61 = vld [vmem:[#allocation303_spill] sm:$0xff] }
 0x46c   : > { %v9111_v44 = vpop.eup %9110  ;;  %v4071_v53 = vadd.f32 1e-05, %v3815_v7  ;;  %v6097_v51 = vadd.f32 %v8465_v47, %v14063_v6  ;;  %3143 = vadd.xlane.f32.xlu0 %v17755_v41  ;;  %v5104_v12 = vadd.f32 %v14354_v27, %v4841_v28  ;;  %v4579_v63 = vmul.f32 %v9109_v9, %v13551_v43  ;;  %v6091_v52 = vpop.f32.mrf.mxu0  ;;  %v17760_v47 = vld [vmem:[#allocation153_spill] sm:$0xff] }
 0x46d   : > { %v3943_v17 = vadd.f32 1e-05, %v3687_v11  ;;  %7371 = vst.msk [vmem:[%s14079_s20 + $0x288] sm:$0xff] %vm458_vm0, %v6737_v39  ;;  %v6732_v62 = vadd.f32 %v14063_v6, %v6731_v21  ;;  %v3450_v4 = vpop.xlane.xlu1 %3449  ;;  %v4976_v46 = vadd.f32 %v14354_v27, %v4713_v26  ;;  %v4451_v30 = vmul.f32 %v9111_v44, %v17756_v59  ;;  %v3066_v43 = vpop.xlane.xlu0 %3065  ;;  %v17761_v59 = vld [vmem:[#allocation160_spill] sm:$0xff] }
 0x46e   : > { %9124 = vrsqrt.f32 %v4071_v53  ;;  %7307 = vst.msk [vmem:[%s14079_s20 + $0x88] sm:$0xff] %vm458_vm0, %v6097_v51  ;;  %v6092_v5 = vadd.f32 %v14063_v6, %v6091_v52  ;;  %v3816_v50 = vmul.f32 0.03125, %v3450_v4  ;;  %8730 = vmatprep.mubr.msk.f32.mxu1 %vm458_vm0, %v5104_v12  ;;  %v4842_v33 = vmul.f32 %v14340_v54, %v4579_v63  ;;  %v14472_v12 = vld [vmem:[%s16003_s8] ss:$0 sm:$0xff] }
 0x46f   : > { %v9113_v56 = vpop.eup %9112  ;;  %9126 = vrsqrt.f32 %v3943_v17  ;;  %7370 = vst.msk [vmem:[%s14079_s20 + $0x280] sm:$0xff] %vm458_vm0, %v6732_v62  ;;  %v3688_v48 = vmul.f32 0.03125, %v3066_v43  ;;  %8538 = vmatprep.mubr.msk.f32.mxu0 %vm458_vm0, %v4976_v46  ;;  %v4714_v23 = vmul.f32 %v14340_v54, %v4451_v30  ;;  %v3532_v16 = vsel %vm458_vm0, %v2820_v1, 0.0  ;;  %3530 = vadd.xlane.f32.xlu1 %v14377_v40 }
 0x470   : > { %v9115_v35 = vpop.eup %9114  ;;  %v14453_v6 = vmul.f32 0.03125, %v17757_v34  ;;  %7306 = vst.msk [vmem:[%s14079_s20 + $0x80] sm:$0xff] %vm458_vm0, %v6092_v5  ;;  %v4072_v13 = vadd.f32 1e-05, %v3816_v50  ;;  %3146 = vadd.xlane.f32.xlu0 %v17758_v19  ;;  %v5105_v7 = vadd.f32 %v14354_v27, %v4842_v33  ;;  %v4580_v25 = vmul.f32 %v9113_v56, %v13593_v55  ;;  %v8660_v53 = vpop.f32.mrf.mxu1 }
 0x471   : > { %v2312_v28 = vmul.f32 0.03125, %v17759_v61  ;;  %v3944_v9 = vadd.f32 1e-05, %v3688_v48  ;;  %v3453_v11 = vpop.xlane.xlu1 %3452  ;;  %v4977_v1 = vadd.f32 %v14354_v27, %v4714_v23  ;;  %v4452_v39 = vmul.f32 %v9115_v35, %v17760_v47  ;;  %v3069_v44 = vpop.xlane.xlu0 %3068  ;;  %v17762_v23 = vld [vmem:[#allocation34_spill] sm:$0xff]  ;;  %v17763_v61 = vld [vmem:[#allocation121_spill] sm:$0xff] }
 0x472   : > { %9128 = vrsqrt.f32 %v4072_v13  ;;  %v3817_v26 = vmul.f32 0.03125, %v3453_v11  ;;  %8731 = vmatmul.mubr.msk.f32.gmra.mxu1 %vm458_vm0, %v5105_v7  ;;  %v4843_v40 = vmul.f32 %v14340_v54, %v4580_v25  ;;  %v2822_v51 = vmul.f32 %v14425_v3, %v14425_v3  ;;  %v8468_v41 = vpop.f32.mrf.mxu0  ;;  %v6741_v46 = vpop.f32.mrf.mxu1 }
 0x473   : > { %v9117_v55 = vpop.eup %9116  ;;  %9130 = vrsqrt.f32 %v3944_v9  ;;  %v3689_v21 = vmul.f32 0.03125, %v3069_v44  ;;  %8539 = vmatmul.mubr.msk.f32.gmra.mxu0 %vm458_vm0, %v4977_v1  ;;  %v6747_v63 = vadd.f32 %v14472_v12, %v8660_v53  ;;  %v4715_v17 = vmul.f32 %v14340_v54, %v4452_v39  ;;  %3533 = vadd.xlane.f32.xlu1 %v3532_v16  ;;  %v17764_v1 = vld [vmem:[#allocation279_spill] sm:$0xff]  ;;  %v17765_v39 = vld [vmem:[#allocation390_spill] sm:$0xff]  ;;  %v17766_v53 = vld [vmem:[#allocation125_spill] sm:$0xff] }
 0x474   : > { %v9119_v62 = vpop.eup %9118  ;;  %v4073_v52 = vadd.f32 1e-05, %v3817_v26  ;;  %v6107_v4 = vadd.f32 %v14472_v12, %v8468_v41  ;;  %3149 = vadd.xlane.f32.xlu0 %v17761_v59  ;;  %v5106_v30 = vadd.f32 %v14354_v27, %v4843_v40  ;;  %v4581_v5 = vmul.f32 %v9117_v55, %v13584_v22  ;;  %v6101_v33 = vpop.f32.mrf.mxu0  ;;  %v17767_v40 = vld [vmem:[#allocation373_spill] sm:$0xff] }
 0x475   : > { %v3945_v50 = vadd.f32 1e-05, %v3689_v21  ;;  %7373 = vst.msk [vmem:[%s14079_s20 + $0x298] sm:$0xff] %vm458_vm0, %v6747_v63  ;;  %v6742_v43 = vadd.f32 %v14472_v12, %v6741_v46  ;;  %v14483_v56 = vpop.xlane.xlu1 %2035  ;;  %v4978_v48 = vadd.f32 %v14354_v27, %v4715_v17  ;;  %v4453_v35 = vmul.f32 %v9119_v62, %v17762_v23  ;;  %v14490_v22 = vpop.xlane.xlu0 %2032  ;;  %v17768_v21 = vld [vmem:[#allocation374_spill] sm:$0xff] }
 0x476   : > { %9132 = vrsqrt.f32 %v4073_v52  ;;  %7309 = vst.msk [vmem:[%s14079_s20 + $0x98] sm:$0xff] %vm458_vm0, %v6107_v4  ;;  %v6102_v16 = vadd.f32 %v14472_v12, %v6101_v33  ;;  %8733 = vmatprep.mubr.msk.f32.mxu1 %vm458_vm0, %v5106_v30  ;;  %v4844_v34 = vmul.f32 %v14340_v54, %v4581_v5  ;;  %v2823_v13 = vmul.f32 %v14420_v24, %v14420_v24  ;;  %v17769_v62 = vld [vmem:[#allocation46_spill] sm:$0xff] }
 0x477   : > { %v9121_v19 = vpop.eup %9120  ;;  %9134 = vrsqrt.f32 %v3945_v50  ;;  %7372 = vst.msk [vmem:[%s14079_s20 + $0x290] sm:$0xff] %vm458_vm0, %v6742_v43  ;;  %8541 = vmatprep.mubr.msk.f32.mxu0 %vm458_vm0, %v4978_v48  ;;  %v3535_v7 = vsel %vm458_vm0, %v14417_v8, 0.0  ;;  %v4716_v25 = vmul.f32 %v14340_v54, %v4453_v35  ;;  %v14504_v9 = vsel %vm458_vm0, %v17763_v61, 0.0  ;;  %v17770_v50 = vld [vmem:[#allocation314_spill] sm:$0xff] }
 0x478   : > { %v9123_v11 = vpop.eup %9122  ;;  %v2196_v47 = vmul.f32 0.03125, %v17764_v1  ;;  %7308 = vst.msk [vmem:[%s14079_s20 + $0x90] sm:$0xff] %vm458_vm0, %v6102_v16  ;;  %3536 = vadd.xlane.f32.xlu1 %v3535_v7  ;;  %3152 = vadd.xlane.f32.xlu0 %v17765_v39  ;;  %v5107_v26 = vadd.f32 %v14354_v27, %v4844_v34  ;;  %v4582_v44 = vmul.f32 %v9121_v19, %v13625_v31  ;;  %v8663_v59 = vpop.f32.mrf.mxu1  ;;  %v3538_v31 = vsel %vm458_vm0, %v2822_v51, 0.0 }
 0x479   : > { %v14514_v8 = vmul.f32 %v17766_v53, %v17766_v53  ;;  %v14518_v55 = vsub.f32 %v17767_v40, %v14453_v6  ;;  %v14521_v41 = vsub.f32 %v17768_v21, %v2312_v28  ;;  %v3456_v63 = vpop.xlane.xlu1 %3455  ;;  %v4979_v17 = vadd.f32 %v14354_v27, %v4716_v25  ;;  %v3072_v46 = vpop.xlane.xlu0 %3071 }
 0x47a   : > { %v4454_v52 = vmul.f32 %v9123_v11, %v17769_v62  ;;  %v3818_v4 = vmul.f32 0.03125, %v3456_v63  ;;  %8734 = vmatmul.mubr.msk.f32.gmra.mxu1 %vm458_vm0, %v5107_v26  ;;  %v4845_v30 = vmul.f32 %v14340_v54, %v4582_v44  ;;  %v3541_v6 = vsel %vm458_vm0, %v2823_v13, 0.0  ;;  %v8471_v33 = vpop.f32.mrf.mxu0  ;;  %v6751_v34 = vpop.f32.mrf.mxu1  ;;  %v17771_v13 = vld [vmem:[#allocation203_spill] sm:$0xff]  ;;  %v17772_v26 = vld [vmem:[#allocation45_spill] sm:$0xff] }
 0x47b   : > { %v9125_v5 = vpop.eup %9124  ;;  %v2314_v28 = vmul.f32 0.03125, %v17770_v50  ;;  %v3690_v43 = vmul.f32 0.03125, %v3072_v46  ;;  %8542 = vmatmul.mubr.msk.f32.gmra.mxu0 %vm458_vm0, %v4979_v17  ;;  %v6757_v48 = vadd.f32 %v14472_v12, %v8663_v59  ;;  %v6117_v51 = vadd.f32 %v14472_v12, %v8471_v33  ;;  %v17773_v59 = vld [vmem:[#allocation131_spill] sm:$0xff]  ;;  %v17776_v33 = vld [vmem:[#allocation152_spill] sm:$0xff] }
 0x47c   : > { %v4717_v23 = vmul.f32 %v14340_v54, %v4454_v52  ;;  %v9127_v35 = vpop.eup %9126  ;;  %v4074_v16 = vadd.f32 1e-05, %v3818_v4  ;;  %3539 = vadd.xlane.f32.xlu1 %v3538_v31  ;;  %3155 = vadd.xlane.f32.xlu0 %v17771_v13  ;;  %v5108_v19 = vadd.f32 %v14354_v27, %v4845_v30  ;;  %v4583_v7 = vmul.f32 %v9125_v5, %v13616_v10  ;;  %v6111_v11 = vpop.f32.mrf.mxu0  ;;  %v17775_v5 = vld [vmem:[#allocation177_spill] sm:$0xff] }
 0x47d   : > { %v3946_v25 = vadd.f32 1e-05, %v3690_v43  ;;  %7375 = vst.msk [vmem:[%s14079_s20 + $0x2a8] sm:$0xff] %vm458_vm0, %v6757_v48  ;;  %v6752_v61 = vadd.f32 %v14472_v12, %v6751_v34  ;;  %v3459_v1 = vpop.xlane.xlu1 %3458  ;;  %v4455_v44 = vmul.f32 %v9127_v35, %v17772_v26  ;;  %7311 = vst.msk [vmem:[%s14079_s20 + $0xa8] sm:$0xff] %vm458_vm0, %v6117_v51  ;;  %v6112_v40 = vadd.f32 %v14472_v12, %v6111_v11  ;;  %v3075_v10 = vpop.xlane.xlu0 %3074  ;;  %v17777_v51 = vld [vmem:[#allocation56_spill] sm:$0xff]  ;;  %v17778_v34 = vld [vmem:[#allocation377_spill] sm:$0xff] }
 0x47e   : > { %v4980_v39 = vadd.f32 %v14354_v27, %v4717_v23  ;;  %9136 = vrsqrt.f32 %v4074_v16  ;;  %v3819_v21 = vmul.f32 0.03125, %v3459_v1  ;;  %8736 = vmatprep.mubr.msk.f32.mxu1 %vm458_vm0, %v5108_v19  ;;  %v4846_v63 = vmul.f32 %v14340_v54, %v4583_v7  ;;  %v17779_v26 = vld [vmem:[#allocation290_spill] sm:$0xff] }
 0x47f   : > { %v9129_v17 = vpop.eup %9128  ;;  %9138 = vrsqrt.f32 %v3946_v25  ;;  %7374 = vst.msk [vmem:[%s14079_s20 + $0x2a0] sm:$0xff] %vm458_vm0, %v6752_v61  ;;  %v3691_v62 = vmul.f32 0.03125, %v3075_v10  ;;  %v4718_v52 = vmul.f32 %v14340_v54, %v4455_v44  ;;  %v2824_v4 = vmul.f32 %v14521_v41, %v14521_v41  ;;  %7310 = vst.msk [vmem:[%s14079_s20 + $0xa0] sm:$0xff] %vm458_vm0, %v6112_v40  ;;  %v17780_v10 = vld [vmem:[#allocation230_spill] sm:$0xff] }
 0x480   : > { %8544 = vmatprep.mubr.msk.f32.mxu0 %vm458_vm0, %v4980_v39  ;;  %v9131_v46 = vpop.eup %9130  ;;  %v14554_v31 = vsub.f32 %v17773_v59, %v2196_v47  ;;  %v4075_v30 = vadd.f32 1e-05, %v3819_v21  ;;  %3542 = vadd.xlane.f32.xlu1 %v3541_v6  ;;  %v5109_v50 = vadd.f32 %v14354_v27, %v4846_v63  ;;  %v4584_v43 = vmul.f32 %v9129_v17, %v13657_v15  ;;  %v8666_v19 = vpop.f32.mrf.mxu1 }
 0x481   : > { %3158 = vadd.xlane.f32.xlu0 %v17775_v5  ;;  %v2315_v48 = vmul.f32 0.03125, %v17776_v33  ;;  %v3947_v23 = vadd.f32 1e-05, %v3691_v62  ;;  %v14562_v35 = vpop.xlane.xlu1 %2041  ;;  %v4981_v16 = vadd.f32 %v14354_v27, %v4718_v52  ;;  %v4456_v47 = vmul.f32 %v9131_v46, %v17777_v51  ;;  %v14569_v6 = vpop.xlane.xlu0 %2038  ;;  %v17781_v62 = vld [vmem:[#allocation376_spill] sm:$0xff] }
 0x482   : > { %17774 = vst [vmem:[#allocation13_spill] sm:$0xff] %v14554_v31  ;;  %v14567_v13 = vsub.f32 %v17778_v34, %v2314_v28  ;;  %9140 = vrsqrt.f32 %v4075_v30  ;;  %8737 = vmatmul.mubr.msk.f32.gmra.mxu1 %vm458_vm0, %v5109_v50  ;;  %v4847_v15 = vmul.f32 %v14340_v54, %v4584_v43  ;;  %v2825_v7 = vmul.f32 %v14518_v55, %v14518_v55  ;;  %v8474_v61 = vpop.f32.mrf.mxu0  ;;  %v6761_v21 = vpop.f32.mrf.mxu1  ;;  %v17782_v5 = vld [vmem:[#allocation224_spill] sm:$0xff]  ;;  %v17783_v43 = vld [vmem:[#allocation87_spill] sm:$0xff] }
 0x483   : > { %v9133_v25 = vpop.eup %9132  ;;  %9142 = vrsqrt.f32 %v3947_v23  ;;  %8545 = vmatmul.mubr.msk.f32.gmra.mxu0 %vm458_vm0, %v4981_v16  ;;  %v6767_v28 = vadd.f32 %v14472_v12, %v8666_v19  ;;  %v3544_v11 = vsel %vm458_vm0, %v2824_v4, 0.0  ;;  %v4719_v1 = vmul.f32 %v14340_v54, %v4456_v47 }
 0x484   : > { %v9135_v39 = vpop.eup %9134  ;;  %v2199_v44 = vmul.f32 0.03125, %v17779_v26  ;;  %v6127_v40 = vadd.f32 %v14472_v12, %v8474_v61  ;;  %3545 = vadd.xlane.f32.xlu1 %v3544_v11  ;;  %v5110_v63 = vadd.f32 %v14354_v27, %v4847_v15  ;;  %v14585_v17 = vsel %vm458_vm0, %v14514_v8, 0.0  ;;  %v6121_v46 = vpop.f32.mrf.mxu0  ;;  %v17784_v15 = vld [vmem:[#allocation143_spill] sm:$0xff] }
 0x485   : > { %3161 = vadd.xlane.f32.xlu0 %v17780_v10  ;;  %v14588_v52 = vsub.f32 %v17781_v62, %v2315_v48  ;;  %7377 = vst.msk [vmem:[%s14079_s20 + $0x2b8] sm:$0xff] %vm458_vm0, %v6767_v28  ;;  %v6762_v4 = vadd.f32 %v14472_v12, %v6761_v21  ;;  %v3462_v59 = vpop.xlane.xlu1 %3461  ;;  %v4982_v30 = vadd.f32 %v14354_v27, %v4719_v1  ;;  %v2316_v33 = vmul.f32 0.03125, %v17783_v43  ;;  %v3078_v48 = vpop.xlane.xlu0 %3077  ;;  %v17788_v21 = vld [vmem:[#allocation84_spill] sm:$0xff] }
 0x486   : > { %v4457_v50 = vmul.f32 %v9135_v39, %v17782_v5  ;;  %7313 = vst.msk [vmem:[%s14079_s20 + $0xb8] sm:$0xff] %vm458_vm0, %v6127_v40  ;;  %v6122_v8 = vadd.f32 %v14472_v12, %v6121_v46  ;;  %v3820_v23 = vmul.f32 0.03125, %v3462_v59  ;;  %8739 = vmatprep.mubr.msk.f32.mxu1 %vm458_vm0, %v5110_v63  ;;  %v4585_v16 = vmul.f32 %v9133_v25, %v13648_v42  ;;  %v17786_v42 = vld [vmem:[#allocation73_spill] sm:$0xff] }
 0x487   : > { %7376 = vst.msk [vmem:[%s14079_s20 + $0x2b0] sm:$0xff] %vm458_vm0, %v6762_v4  ;;  %v3692_v51 = vmul.f32 0.03125, %v3078_v48  ;;  %8547 = vmatprep.mubr.msk.f32.mxu0 %vm458_vm0, %v4982_v30  ;;  %v3547_v47 = vsel %vm458_vm0, %v2825_v7, 0.0  ;;  %v2826_v19 = vmul.f32 %v14567_v13, %v14567_v13  ;;  %v14609_v61 = vsub.f32 %v17784_v15, %v2199_v44  ;;  %v17787_v7 = vld [vmem:[#allocation330_spill] sm:$0xff] }
 0x488   : > { %v4720_v34 = vmul.f32 %v14340_v54, %v4457_v50  ;;  %7312 = vst.msk [vmem:[%s14079_s20 + $0xb0] sm:$0xff] %vm458_vm0, %v6122_v8  ;;  %v4076_v28 = vadd.f32 1e-05, %v3820_v23  ;;  %3548 = vadd.xlane.f32.xlu1 %v3547_v47  ;;  %v4848_v25 = vmul.f32 %v14340_v54, %v4585_v16  ;;  %v2708_v11 = vmul.f32 %v14554_v31, %v14554_v31  ;;  %v8669_v4 = vpop.f32.mrf.mxu1 }
 0x489   : > { %17785 = vst [vmem:[#allocation128_spill] sm:$0xff] %v14609_v61  ;;  %3164 = vadd.xlane.f32.xlu0 %v17786_v42  ;;  %v2317_v1 = vmul.f32 0.03125, %v17787_v7  ;;  %v3948_v39 = vadd.f32 1e-05, %v3692_v51  ;;  %v3465_v26 = vpop.xlane.xlu1 %3464  ;;  %v2827_v44 = vmul.f32 %v14588_v52, %v14588_v52  ;;  %v14622_v10 = vsub.f32 %v17788_v21, %v2316_v33  ;;  %v3081_v62 = vpop.xlane.xlu0 %3080  ;;  %v17789_v33 = vld [vmem:[#allocation295_spill] sm:$0xff] }
 0x48a   : > { %v4983_v40 = vadd.f32 %v14354_v27, %v4720_v34  ;;  %9144 = vrsqrt.f32 %v4076_v28  ;;  %v3821_v63 = vmul.f32 0.03125, %v3465_v26  ;;  %v5111_v46 = vadd.f32 %v14354_v27, %v4848_v25  ;;  %v8477_v5 = vpop.f32.mrf.mxu0  ;;  %v6771_v51 = vpop.f32.mrf.mxu1  ;;  %v17790_v34 = vld [vmem:[#allocation83_spill] sm:$0xff]  ;;  %v17791_v25 = vld [vmem:[#allocation72_spill] sm:$0xff] }
 0x48b   : > { %v9137_v59 = vpop.eup %9136  ;;  %9146 = vrsqrt.f32 %v3948_v39  ;;  %v3693_v30 = vmul.f32 0.03125, %v3081_v62  ;;  %v6777_v50 = vadd.f32 %v14472_v12, %v8669_v4  ;;  %v3550_v43 = vsel %vm458_vm0, %v2826_v19, 0.0  ;;  %v17792_v39 = vld [vmem:[#allocation235_spill] sm:$0xff] }
 0x48c   : > { %8548 = vmatmul.mubr.msk.f32.gmra.mxu0 %vm458_vm0, %v4983_v40  ;;  %v9139_v8 = vpop.eup %9138  ;;  %v2198_v23 = vmul.f32 0.03125, %v17789_v33  ;;  %v4077_v48 = vadd.f32 1e-05, %v3821_v63  ;;  %v6137_v16 = vadd.f32 %v14472_v12, %v8477_v5  ;;  %8740 = vmatmul.mubr.msk.f32.gmra.mxu1 %vm458_vm0, %v5111_v46  ;;  %v4586_v47 = vmul.f32 %v9137_v59, %v13689_v60  ;;  %v6131_v42 = vpop.f32.mrf.mxu0  ;;  %v17793_v40 = vld [vmem:[#allocation188_spill] sm:$0xff] }
 0x48d   : > { %3551 = vadd.xlane.f32.xlu1 %v3550_v43  ;;  %v14633_v15 = vsub.f32 %v17790_v34, %v2317_v1  ;;  %v3949_v28 = vadd.f32 1e-05, %v3693_v30  ;;  %7379 = vst.msk [vmem:[%s14079_s20 + $0x2c8] sm:$0xff] %vm458_vm0, %v6777_v50  ;;  %v6772_v19 = vadd.f32 %v14472_v12, %v6771_v51  ;;  %3167 = vadd.xlane.f32.xlu0 %v17791_v25  ;;  %v14639_v7 = vpop.xlane.xlu1 %2047  ;;  %v2318_v21 = vmul.f32 0.03125, %v17793_v40  ;;  %v14646_v1 = vpop.xlane.xlu0 %2044  ;;  %v17797_v51 = vld [vmem:[#allocation102_spill] sm:$0xff] }
 0x48e   : > { %v4458_v26 = vmul.f32 %v9139_v8, %v17792_v39  ;;  %9148 = vrsqrt.f32 %v4077_v48  ;;  %7315 = vst.msk [vmem:[%s14079_s20 + $0xc8] sm:$0xff] %vm458_vm0, %v6137_v16  ;;  %v6132_v60 = vadd.f32 %v14472_v12, %v6131_v42  ;;  %v4849_v63 = vmul.f32 %v14340_v54, %v4586_v47  ;;  %v17796_v48 = vld [vmem:[#allocation332_spill] sm:$0xff]  ;;  %v17799_v42 = vld [vmem:[#allocation379_spill] sm:$0xff] }
 0x48f   : > { %v9141_v62 = vpop.eup %9140  ;;  %9150 = vrsqrt.f32 %v3949_v28  ;;  %7378 = vst.msk [vmem:[%s14079_s20 + $0x2c0] sm:$0xff] %vm458_vm0, %v6772_v19  ;;  %v3553_v4 = vsel %vm458_vm0, %v2827_v44, 0.0  ;;  %v2828_v59 = vmul.f32 %v14622_v10, %v14622_v10  ;;  %v14660_v43 = vsel %vm458_vm0, %v2708_v11, 0.0  ;;  %v17794_v44 = vld [vmem:[#allocation149_spill] sm:$0xff]  ;;  %v17798_v28 = vld [vmem:[#allocation76_spill] sm:$0xff] }
 0x490   : > { %v4721_v46 = vmul.f32 %v14340_v54, %v4458_v26  ;;  %v9143_v30 = vpop.eup %9142  ;;  %7314 = vst.msk [vmem:[%s14079_s20 + $0xc0] sm:$0xff] %vm458_vm0, %v6132_v60  ;;  %v5112_v5 = vadd.f32 %v14354_v27, %v4849_v63  ;;  %v4587_v50 = vmul.f32 %v9141_v62, %v13680_v20  ;;  %v2711_v8 = vmul.f32 %v14609_v61, %v14609_v61  ;;  %v8672_v39 = vpop.f32.mrf.mxu1 }
 0x491   : > { %3554 = vadd.xlane.f32.xlu1 %v3553_v4  ;;  %v14665_v33 = vsub.f32 %v17794_v44, %v2198_v23  ;;  %v2319_v16 = vmul.f32 0.03125, %v17796_v48  ;;  %3170 = vadd.xlane.f32.xlu0 %v17797_v51  ;;  %v3468_v47 = vpop.xlane.xlu1 %3467  ;;  %v4459_v19 = vmul.f32 %v9143_v30, %v17798_v28  ;;  %v14672_v20 = vsub.f32 %v17799_v42, %v2318_v21  ;;  %v3084_v25 = vpop.xlane.xlu0 %3083  ;;  %v17800_v4 = vld [vmem:[#allocation306_spill] sm:$0xff]  ;;  %v17802_v28 = vld [vmem:[#allocation227_spill] sm:$0xff] }
 0x492   : > { %v4984_v34 = vadd.f32 %v14354_v27, %v4721_v46  ;;  %v3822_v11 = vmul.f32 0.03125, %v3468_v47  ;;  %8742 = vmatprep.mubr.msk.f32.mxu1 %vm458_vm0, %v5112_v5  ;;  %v4850_v23 = vmul.f32 %v14340_v54, %v4587_v50  ;;  %v2829_v26 = vmul.f32 %v14633_v15, %v14633_v15  ;;  %v8480_v60 = vpop.f32.mrf.mxu0  ;;  %v6781_v50 = vpop.f32.mrf.mxu1  ;;  %v17801_v48 = vld [vmem:[#allocation378_spill] sm:$0xff] }
 0x493   : > { %17795 = vst [vmem:[#allocation6_spill] sm:$0xff] %v14665_v33  ;;  %v3694_v40 = vmul.f32 0.03125, %v3084_v25  ;;  %v6787_v63 = vadd.f32 %v14472_v12, %v8672_v39  ;;  %v3556_v21 = vsel %vm458_vm0, %v2828_v59, 0.0  ;;  %v4722_v62 = vmul.f32 %v14340_v54, %v4459_v19 }
 0x494   : > { %8550 = vmatprep.mubr.msk.f32.mxu0 %vm458_vm0, %v4984_v34  ;;  %v2201_v46 = vmul.f32 0.03125, %v17800_v4  ;;  %v4078_v30 = vadd.f32 1e-05, %v3822_v11  ;;  %v6147_v5 = vadd.f32 %v14472_v12, %v8480_v60  ;;  %v5113_v44 = vadd.f32 %v14354_v27, %v4850_v23  ;;  %v6141_v34 = vpop.f32.mrf.mxu0 }
 0x495   : > { %3557 = vadd.xlane.f32.xlu1 %v3556_v21  ;;  %v14686_v51 = vsub.f32 %v17801_v48, %v2319_v16  ;;  %v3950_v47 = vadd.f32 1e-05, %v3694_v40  ;;  %7381 = vst.msk [vmem:[%s14079_s20 + $0x2d8] sm:$0xff] %vm458_vm0, %v6787_v63  ;;  %v6782_v59 = vadd.f32 %v14472_v12, %v6781_v50  ;;  %3173 = vadd.xlane.f32.xlu0 %v17802_v28  ;;  %v3471_v19 = vpop.xlane.xlu1 %3470  ;;  %v3087_v25 = vpop.xlane.xlu0 %3086  ;;  %v2320_v40 = vmul.f32 0.03125, %v14490_v22 }
 0x496   : > { %v4985_v42 = vadd.f32 %v14354_v27, %v4722_v62  ;;  %9152 = vrsqrt.f32 %v4078_v30  ;;  %7317 = vst.msk [vmem:[%s14079_s20 + $0xd8] sm:$0xff] %vm458_vm0, %v6147_v5  ;;  %v6142_v11 = vadd.f32 %v14472_v12, %v6141_v34  ;;  %v3823_v16 = vmul.f32 0.03125, %v3471_v19  ;;  %8743 = vmatmul.mubr.msk.f32.gmra.mxu1 %vm458_vm0, %v5113_v44  ;;  %v17803_v5 = vld [vmem:[#allocation161_spill] sm:$0xff] }
 0x497   : > { %v2830_v39 = vmul.f32 %v14672_v20, %v14672_v20  ;;  %v9145_v23 = vpop.eup %9144  ;;  %9154 = vrsqrt.f32 %v3950_v47  ;;  %7380 = vst.msk [vmem:[%s14079_s20 + $0x2d0] sm:$0xff] %vm458_vm0, %v6782_v59  ;;  %v3695_v60 = vmul.f32 0.03125, %v3087_v25  ;;  %v3559_v63 = vsel %vm458_vm0, %v2829_v26, 0.0  ;;  %v17805_v26 = vld [vmem:[#allocation397_spill] sm:$0xff] }
 0x498   : > { %8551 = vmatmul.mubr.msk.f32.gmra.mxu0 %vm458_vm0, %v4985_v42  ;;  %v9147_v21 = vpop.eup %9146  ;;  %7316 = vst.msk [vmem:[%s14079_s20 + $0xd0] sm:$0xff] %vm458_vm0, %v6142_v11  ;;  %v4079_v62 = vadd.f32 1e-05, %v3823_v16  ;;  %v4588_v4 = vmul.f32 %v9145_v23, %v13721_v32  ;;  %v2710_v30 = vmul.f32 %v14665_v33, %v14665_v33  ;;  %v14710_v22 = vsel %vm458_vm0, %v2711_v8, 0.0  ;;  %v17806_v59 = vld [vmem:[#allocation69_spill] sm:$0xff]  ;;  %v8675_v28 = vpop.f32.mrf.mxu1  ;;  %v17807_v42 = vld [vmem:[#allocation91_spill] sm:$0xff] }
 0x499   : > { %3560 = vadd.xlane.f32.xlu1 %v3559_v63  ;;  %v14713_v50 = vsub.f32 %v17803_v5, %v2201_v46  ;;  %v2321_v44 = vmul.f32 0.03125, %v14483_v56  ;;  %v3951_v48 = vadd.f32 1e-05, %v3695_v60  ;;  %3176 = vadd.xlane.f32.xlu0 %v17805_v26  ;;  %v14717_v47 = vpop.xlane.xlu1 %2053  ;;  %v4460_v34 = vmul.f32 %v9147_v21, %v17806_v59  ;;  %v14720_v32 = vpop.xlane.xlu0 %2050  ;;  %v17808_v63 = vld [vmem:[#allocation311_spill] sm:$0xff]  ;;  %v17809_v5 = vld [vmem:[#allocation386_spill] sm:$0xff] }
 0x49a   : > { %9156 = vrsqrt.f32 %v4079_v62  ;;  %v3562_v19 = vsel %vm458_vm0, %v2830_v39, 0.0  ;;  %v4851_v8 = vmul.f32 %v14340_v54, %v4588_v4  ;;  %v2831_v46 = vmul.f32 %v14686_v51, %v14686_v51  ;;  %v8483_v16 = vpop.f32.mrf.mxu0  ;;  %v6791_v62 = vpop.f32.mrf.mxu1 }
 0x49b   : > { %17804 = vst [vmem:[#allocation31_spill] sm:$0xff] %v14713_v50  ;;  %v9149_v56 = vpop.eup %9148  ;;  %v14727_v11 = vsub.f32 %v17807_v42, %v2320_v40  ;;  %9158 = vrsqrt.f32 %v3951_v48  ;;  %v6797_v25 = vadd.f32 %v14472_v12, %v8675_v28  ;;  %v4723_v23 = vmul.f32 %v14340_v54, %v4460_v34  ;;  %v17810_v40 = vld [vmem:[#allocation380_spill] sm:$0xff]  ;;  %v17811_v28 = vld [vmem:[#allocation243_spill] sm:$0xff] }
 0x49c   : > { %v9151_v60 = vpop.eup %9150  ;;  %v2200_v39 = vmul.f32 0.03125, %v17808_v63  ;;  %v6157_v21 = vadd.f32 %v14472_v12, %v8483_v16  ;;  %v5114_v4 = vadd.f32 %v14354_v27, %v4851_v8  ;;  %v4589_v26 = vmul.f32 %v9149_v56, %v17809_v5  ;;  %v6151_v34 = vpop.f32.mrf.mxu0 }
 0x49d   : > { %3563 = vadd.xlane.f32.xlu1 %v3562_v19  ;;  %v14736_v48 = vsub.f32 %v17810_v40, %v2321_v44  ;;  %7383 = vst.msk [vmem:[%s14079_s20 + $0x2e8] sm:$0xff] %vm458_vm0, %v6797_v25  ;;  %v6792_v59 = vadd.f32 %v14472_v12, %v6791_v62  ;;  %3179 = vadd.xlane.f32.xlu0 %v17811_v28  ;;  %v3474_v42 = vpop.xlane.xlu1 %3473  ;;  %v17812_v19 = vld [vmem:[#allocation211_spill] sm:$0xff]  ;;  %v2322_v8 = vmul.f32 0.03125, %v14569_v6  ;;  %v3090_v5 = vpop.xlane.xlu0 %3089  ;;  %v17815_v28 = vld [vmem:[#allocation154_spill] sm:$0xff] }
 0x49e   : > { %v4986_v16 = vadd.f32 %v14354_v27, %v4723_v23  ;;  %v4461_v63 = vmul.f32 %v9151_v60, %v17812_v19  ;;  %7319 = vst.msk [vmem:[%s14079_s20 + $0xe8] sm:$0xff] %vm458_vm0, %v6157_v21  ;;  %v6152_v44 = vadd.f32 %v14472_v12, %v6151_v34  ;;  %v3824_v56 = vmul.f32 0.03125, %v3474_v42  ;;  %8745 = vmatprep.mubr.msk.f32.mxu1 %vm458_vm0, %v5114_v4  ;;  %v17816_v19 = vld [vmem:[#allocation381_spill] sm:$0xff] }
 0x49f   : > { %v4852_v25 = vmul.f32 %v14340_v54, %v4589_v26  ;;  %7382 = vst.msk [vmem:[%s14079_s20 + $0x2e0] sm:$0xff] %vm458_vm0, %v6792_v59  ;;  %v3696_v62 = vmul.f32 0.03125, %v3090_v5  ;;  %v3565_v23 = vsel %vm458_vm0, %v2831_v46, 0.0  ;;  %v2832_v6 = vmul.f32 %v14727_v11, %v14727_v11  ;;  %v17813_v59 = vld [vmem:[#allocation167_spill] sm:$0xff] }
 0x4a0   : > { %8553 = vmatprep.mubr.msk.f32.mxu0 %vm458_vm0, %v4986_v16  ;;  %v4724_v60 = vmul.f32 %v14340_v54, %v4461_v63  ;;  %7318 = vst.msk [vmem:[%s14079_s20 + $0xe0] sm:$0xff] %vm458_vm0, %v6152_v44  ;;  %v4080_v21 = vadd.f32 1e-05, %v3824_v56  ;;  %v14761_v26 = vsel %vm458_vm0, %v2710_v30, 0.0  ;;  %v2713_v40 = vmul.f32 %v14713_v50, %v14713_v50  ;;  %v8678_v56 = vpop.f32.mrf.mxu1 }
 0x4a1   : > { %3566 = vadd.xlane.f32.xlu1 %v3565_v23  ;;  %v5115_v4 = vadd.f32 %v14354_v27, %v4852_v25  ;;  %v14766_v34 = vsub.f32 %v17813_v59, %v2200_v39  ;;  %v2323_v54 = vmul.f32 0.03125, %v14562_v35  ;;  %v3952_v46 = vadd.f32 1e-05, %v3696_v62  ;;  %3182 = vadd.xlane.f32.xlu0 %v17815_v28  ;;  %v3477_v42 = vpop.xlane.xlu1 %3476  ;;  %v3093_v44 = vpop.xlane.xlu0 %3092 }
 0x4a2   : > { %v4987_v16 = vadd.f32 %v14354_v27, %v4724_v60  ;;  %v14772_v63 = vsub.f32 %v17816_v19, %v2322_v8  ;;  %9160 = vrsqrt.f32 %v4080_v21  ;;  %v3825_v30 = vmul.f32 0.03125, %v3477_v42  ;;  %v8486_v25 = vpop.f32.mrf.mxu0  ;;  %v17817_v60 = vld [vmem:[#allocation321_spill] sm:$0xff]  ;;  %v6801_v28 = vpop.f32.mrf.mxu1  ;;  %v17818_v42 = vld [vmem:[#allocation20_spill] sm:$0xff] }
 0x4a3   : > { %17814 = vst [vmem:[#allocation116_spill] sm:$0xff] %v14766_v34  ;;  %8746 = vmatmul.mubr.msk.f32.gmra.mxu1 %vm458_vm0, %v5115_v4  ;;  %v2833_v39 = vmul.f32 %v14736_v48, %v14736_v48  ;;  %v9153_v5 = vpop.eup %9152  ;;  %9162 = vrsqrt.f32 %v3952_v46  ;;  %v3697_v35 = vmul.f32 0.03125, %v3093_v44  ;;  %v6807_v62 = vadd.f32 %v14472_v12, %v8678_v56  ;;  %v17819_v46 = vld [vmem:[#allocation7_spill] sm:$0xff]  ;;  %v17820_v56 = vld [vmem:[#allocation189_spill] sm:$0xff] }
 0x4a4   : > { %8554 = vmatmul.mubr.msk.f32.gmra.mxu0 %vm458_vm0, %v4987_v16  ;;  %v3568_v8 = vsel %vm458_vm0, %v2832_v6, 0.0  ;;  %v9155_v23 = vpop.eup %9154  ;;  %v2203_v21 = vmul.f32 0.03125, %v17817_v60  ;;  %v4081_v59 = vadd.f32 1e-05, %v3825_v30  ;;  %v6167_v4 = vadd.f32 %v14472_v12, %v8486_v25  ;;  %v6161_v16 = vpop.f32.mrf.mxu0  ;;  %v17821_v30 = vld [vmem:[#allocation278_spill] sm:$0xff] }
 0x4a5   : > { %3569 = vadd.xlane.f32.xlu1 %v3568_v8  ;;  %v4590_v19 = vmul.f32 %v9153_v5, %v17818_v42  ;;  %v14784_v44 = vsub.f32 %v17819_v46, %v2323_v54  ;;  %v3953_v50 = vadd.f32 1e-05, %v3697_v35  ;;  %7385 = vst.msk [vmem:[%s14079_s20 + $0x2f8] sm:$0xff] %vm458_vm0, %v6807_v62  ;;  %v6802_v6 = vadd.f32 %v14472_v12, %v6801_v28  ;;  %v14790_v60 = vpop.xlane.xlu1 %2059  ;;  %v14796_v5 = vpop.xlane.xlu0 %2056  ;;  %v14801_v35 = vld [vmem:[%s16000_s5] ss:$0 sm:$0xff]  ;;  %v17822_v46 = vld [vmem:[#allocation280_spill] sm:$0xff] }
 0x4a6   : > { %3185 = vadd.xlane.f32.xlu0 %v17820_v56  ;;  %v4462_v25 = vmul.f32 %v9155_v23, %v17821_v30  ;;  %9164 = vrsqrt.f32 %v4081_v59  ;;  %7321 = vst.msk [vmem:[%s14079_s20 + $0xf8] sm:$0xff] %vm458_vm0, %v6167_v4  ;;  %v6162_v54 = vadd.f32 %v14472_v12, %v6161_v16  ;;  %v2834_v8 = vmul.f32 %v14772_v63, %v14772_v63  ;;  %v17825_v30 = vld [vmem:[#allocation110_spill] sm:$0xff] }
 0x4a7   : > { %v4853_v62 = vmul.f32 %v14801_v35, %v4590_v19  ;;  %v9157_v28 = vpop.eup %9156  ;;  %v2324_v23 = vmul.f32 0.03125, %v14646_v1  ;;  %9166 = vrsqrt.f32 %v3953_v50  ;;  %7384 = vst.msk [vmem:[%s14079_s20 + $0x2f0] sm:$0xff] %vm458_vm0, %v6802_v6  ;;  %v3571_v59 = vsel %vm458_vm0, %v2833_v39, 0.0  ;;  %v17823_v50 = vld [vmem:[#allocation179_spill] sm:$0xff] }
 0x4a8   : > { %v4725_v4 = vmul.f32 %v14801_v35, %v4462_v25  ;;  %v9159_v42 = vpop.eup %9158  ;;  %7320 = vst.msk [vmem:[%s14079_s20 + $0xf0] sm:$0xff] %vm458_vm0, %v6162_v54  ;;  %v4591_v16 = vmul.f32 %v9157_v28, %v17822_v46  ;;  %v2712_v56 = vmul.f32 %v14766_v34, %v14766_v34  ;;  %v14818_v1 = vsel %vm458_vm0, %v2713_v40, 0.0 }
 0x4a9   : > { %3572 = vadd.xlane.f32.xlu1 %v3571_v59  ;;  %v5116_v19 = vadd.f32 %v14354_v27, %v4853_v62  ;;  %v14821_v6 = vsub.f32 %v17823_v50, %v2203_v21  ;;  %v2325_v39 = vmul.f32 0.03125, %v14639_v7  ;;  %v3480_v25 = vpop.xlane.xlu1 %3479  ;;  %v14828_v27 = vld [vmem:[%s16001_s6] ss:$0 sm:$0xff]  ;;  %v17826_v62 = vld [vmem:[#allocation244_spill] sm:$0xff]  ;;  %v3096_v40 = vpop.xlane.xlu0 %3095  ;;  %v3574_v21 = vsel %vm458_vm0, %v2834_v8, 0.0 }
 0x4aa   : > { %3188 = vadd.xlane.f32.xlu0 %v17825_v30  ;;  %v4988_v54 = vadd.f32 %v14828_v27, %v4725_v4  ;;  %v4463_v28 = vmul.f32 %v9159_v42, %v17826_v62  ;;  %v3826_v59 = vmul.f32 0.03125, %v3480_v25  ;;  %v8681_v7 = vpop.f32.mrf.mxu1  ;;  %v4854_v46 = vmul.f32 %v14801_v35, %v4591_v16  ;;  %v17827_v42 = vld [vmem:[#allocation384_spill] sm:$0xff]  ;;  %v8489_v25 = vpop.f32.mrf.mxu0 }
 0x4ab   : > { %17824 = vst [vmem:[#allocation296_spill] sm:$0xff] %v14821_v6  ;;  %8748 = vmatprep.mubr.msk.f32.mxu1 %vm458_vm0, %v5116_v19  ;;  %v2835_v4 = vmul.f32 %v14784_v44, %v14784_v44  ;;  %v14845_v50 = vsub.f32 %v17827_v42, %v2324_v23  ;;  %v3698_v30 = vmul.f32 0.03125, %v3096_v40  ;;  %v6817_v62 = vadd.f32 %v14472_v12, %v8681_v7  ;;  %v17828_v19 = vld [vmem:[#allocation325_spill] sm:$0xff]  ;;  %v17829_v23 = vld [vmem:[#allocation383_spill] sm:$0xff] }
 0x4ac   : > { %8556 = vmatprep.mubr.msk.f32.mxu0 %vm458_vm0, %v4988_v54  ;;  %v4726_v34 = vmul.f32 %v14801_v35, %v4463_v28  ;;  %v2202_v61 = vmul.f32 0.03125, %v17828_v19  ;;  %v4082_v8 = vadd.f32 1e-05, %v3826_v59  ;;  %v6177_v16 = vadd.f32 %v14472_v12, %v8489_v25  ;;  %v6811_v33 = vpop.f32.mrf.mxu1  ;;  %v6171_v54 = vpop.f32.mrf.mxu0  ;;  %v17831_v19 = vld [vmem:[#allocation284_spill] sm:$0xff] }
 0x4ad   : > { %3575 = vadd.xlane.f32.xlu1 %v3574_v21  ;;  %v5117_v53 = vadd.f32 %v14828_v27, %v4854_v46  ;;  %v14854_v42 = vsub.f32 %v17829_v23, %v2325_v39  ;;  %v3954_v40 = vadd.f32 1e-05, %v3698_v30  ;;  %7483 = vst.msk [vmem:[%s14837_s16 + $0x208] sm:$0xff] %vm458_vm0, %v6817_v62  ;;  %v6812_v28 = vadd.f32 %v14472_v12, %v6811_v33  ;;  %v3483_v7 = vpop.xlane.xlu1 %3482  ;;  %v3099_v30 = vpop.xlane.xlu0 %3098  ;;  %v17832_v23 = vld [vmem:[#allocation185_spill] sm:$0xff] }
 0x4ae   : > { %3191 = vadd.xlane.f32.xlu0 %v14504_v9  ;;  %v4989_v59 = vadd.f32 %v14828_v27, %v4726_v34  ;;  %v2326_v21 = vmul.f32 0.03125, %v14720_v32  ;;  %9168 = vrsqrt.f32 %v4082_v8  ;;  %7419 = vst.msk [vmem:[%s14837_s16 + $0x8] sm:$0xff] %vm458_vm0, %v6177_v16  ;;  %v6172_v39 = vadd.f32 %v14472_v12, %v6171_v54 }
 0x4af   : > { %17830 = vst [vmem:[#allocation129_spill] sm:$0xff] %v14854_v42  ;;  %v3827_v46 = vmul.f32 0.03125, %v3483_v7  ;;  %8749 = vmatmul.mubr.msk.f32.gmra.mxu1 %vm458_vm0, %v5117_v53  ;;  %v9161_v25 = vpop.eup %9160  ;;  %9170 = vrsqrt.f32 %v3954_v40  ;;  %7482 = vst.msk [vmem:[%s14837_s16 + $0x200] sm:$0xff] %vm458_vm0, %v6812_v28  ;;  %v3699_v9 = vmul.f32 0.03125, %v3099_v30  ;;  %v3577_v33 = vsel %vm458_vm0, %v2835_v4, 0.0  ;;  %v17834_v28 = vld [vmem:[#allocation139_spill] sm:$0xff] }
 0x4b0   : > { %8557 = vmatmul.mubr.msk.f32.gmra.mxu0 %vm458_vm0, %v4989_v59  ;;  %v2836_v32 = vmul.f32 %v14845_v50, %v14845_v50  ;;  %v9163_v34 = vpop.eup %9162  ;;  %7418 = vst.msk [vmem:[%s14837_s16] sm:$0xff] %vm458_vm0, %v6172_v39  ;;  %v4592_v8 = vmul.f32 %v9161_v25, %v17831_v19  ;;  %v14876_v53 = vsel %vm458_vm0, %v2712_v56, 0.0  ;;  %v2715_v16 = vmul.f32 %v14821_v6, %v14821_v6  ;;  %v17835_v59 = vld [vmem:[#allocation93_spill] sm:$0xff] }
 0x4b1   : > { %v4083_v62 = vadd.f32 1e-05, %v3827_v46  ;;  %3578 = vadd.xlane.f32.xlu1 %v3577_v33  ;;  %v14881_v40 = vsub.f32 %v17832_v23, %v2202_v61  ;;  %v2327_v4 = vmul.f32 0.03125, %v14717_v47  ;;  %v3955_v54 = vadd.f32 1e-05, %v3699_v9  ;;  %v14885_v7 = vpop.xlane.xlu1 %2065  ;;  %v17836_v46 = vld [vmem:[#allocation115_spill] sm:$0xff]  ;;  %v14891_v56 = vpop.xlane.xlu0 %2062 }
 0x4b2   : > { %3194 = vadd.xlane.f32.xlu0 %v17834_v28  ;;  %v4464_v39 = vmul.f32 %v9163_v34, %v17835_v59  ;;  %v14889_v30 = vsub.f32 %v17836_v46, %v2326_v21  ;;  %v8684_v25 = vpop.f32.mrf.mxu1  ;;  %v4855_v33 = vmul.f32 %v14801_v35, %v4592_v8  ;;  %v2837_v61 = vmul.f32 %v14854_v42, %v14854_v42  ;;  %v8492_v9 = vpop.f32.mrf.mxu0  ;;  %v17837_v23 = vld [vmem:[#allocation331_spill] sm:$0xff]  ;;  %v17838_v6 = vld [vmem:[#allocation285_spill] sm:$0xff] }
 0x4b3   : > { %17833 = vst [vmem:[#allocation297_spill] sm:$0xff] %v14881_v40  ;;  %9172 = vrsqrt.f32 %v4083_v62  ;;  %v9165_v47 = vpop.eup %9164  ;;  %v6827_v19 = vadd.f32 %v14472_v12, %v8684_v25  ;;  %v3580_v34 = vsel %vm458_vm0, %v2836_v32, 0.0  ;;  %v2205_v28 = vmul.f32 0.03125, %v17837_v23 }
 0x4b4   : > { %9174 = vrsqrt.f32 %v3955_v54  ;;  %v4727_v21 = vmul.f32 %v14801_v35, %v4464_v39  ;;  %v9167_v62 = vpop.eup %9166  ;;  %v6187_v59 = vadd.f32 %v14472_v12, %v8492_v9  ;;  %v6821_v8 = vpop.f32.mrf.mxu1  ;;  %v5118_v46 = vadd.f32 %v14828_v27, %v4855_v33  ;;  %v17839_v54 = vld [vmem:[#allocation111_spill] sm:$0xff] }
 0x4b5   : > { %3581 = vadd.xlane.f32.xlu1 %v3580_v34  ;;  %v4593_v42 = vmul.f32 %v9165_v47, %v17838_v6  ;;  %v14904_v31 = vsub.f32 %v17839_v54, %v2327_v4  ;;  %7485 = vst.msk [vmem:[%s14837_s16 + $0x218] sm:$0xff] %vm458_vm0, %v6827_v19  ;;  %v6181_v32 = vpop.f32.mrf.mxu0  ;;  %v6822_v39 = vadd.f32 %v14472_v12, %v6821_v8  ;;  %v3486_v25 = vpop.xlane.xlu1 %3485  ;;  %v17840_v34 = vld [vmem:[#allocation239_spill] sm:$0xff]  ;;  %v17841_v54 = vld [vmem:[#allocation196_spill] sm:$0xff] }
 0x4b6   : > { %3197 = vadd.xlane.f32.xlu0 %v14660_v43  ;;  %v4990_v9 = vadd.f32 %v14828_v27, %v4727_v21  ;;  %v4465_v23 = vmul.f32 %v9167_v62, %v17840_v34  ;;  %7421 = vst.msk [vmem:[%s14837_s16 + $0x18] sm:$0xff] %vm458_vm0, %v6187_v59  ;;  %v6182_v6 = vadd.f32 %v14472_v12, %v6181_v32  ;;  %v3828_v4 = vmul.f32 0.03125, %v3486_v25  ;;  %v3102_v33 = vpop.xlane.xlu0 %3101 }
 0x4b7   : > { %8751 = vmatprep.mubr.msk.f32.mxu1 %vm458_vm0, %v5118_v46  ;;  %v4856_v47 = vmul.f32 %v14801_v35, %v4593_v42  ;;  %v2838_v19 = vmul.f32 %v14889_v30, %v14889_v30  ;;  %v2328_v43 = vmul.f32 0.03125, %v14796_v5  ;;  %7484 = vst.msk [vmem:[%s14837_s16 + $0x210] sm:$0xff] %vm458_vm0, %v6822_v39  ;;  %v3700_v21 = vmul.f32 0.03125, %v3102_v33  ;;  %v17843_v33 = vld [vmem:[#allocation141_spill] sm:$0xff] }
 0x4b8   : > { %8559 = vmatprep.mubr.msk.f32.mxu0 %vm458_vm0, %v4990_v9  ;;  %v3583_v62 = vsel %vm458_vm0, %v2837_v61, 0.0  ;;  %v4728_v59 = vmul.f32 %v14801_v35, %v4465_v23  ;;  %7420 = vst.msk [vmem:[%s14837_s16 + $0x10] sm:$0xff] %vm458_vm0, %v6182_v6  ;;  %v4084_v8 = vadd.f32 1e-05, %v3828_v4  ;;  %v2714_v46 = vmul.f32 %v14881_v40, %v14881_v40 }
 0x4b9   : > { %3584 = vadd.xlane.f32.xlu1 %v3583_v62  ;;  %v5119_v42 = vadd.f32 %v14828_v27, %v4856_v47  ;;  %v14931_v5 = vsel %vm458_vm0, %v2715_v16, 0.0  ;;  %v14934_v32 = vsub.f32 %v17841_v54, %v2205_v28  ;;  %v2329_v39 = vmul.f32 0.03125, %v14790_v60  ;;  %v3489_v25 = vpop.xlane.xlu1 %3488  ;;  %v8687_v6 = vpop.f32.mrf.mxu1 }
 0x4ba   : > { %v3956_v61 = vadd.f32 1e-05, %v3700_v21  ;;  %3200 = vadd.xlane.f32.xlu0 %v14585_v17  ;;  %v4991_v9 = vadd.f32 %v14828_v27, %v4728_v59  ;;  %9176 = vrsqrt.f32 %v4084_v8  ;;  %v3829_v34 = vmul.f32 0.03125, %v3489_v25  ;;  %v3105_v23 = vpop.xlane.xlu0 %3104  ;;  %v8495_v47 = vpop.f32.mrf.mxu0  ;;  %v17844_v59 = vld [vmem:[#allocation333_spill] sm:$0xff] }
 0x4bb   : > { %17842 = vst [vmem:[#allocation29_spill] sm:$0xff] %v14934_v32  ;;  %8752 = vmatmul.mubr.msk.f32.gmra.mxu1 %vm458_vm0, %v5119_v42  ;;  %v3586_v16 = vsel %vm458_vm0, %v2838_v19, 0.0  ;;  %v2839_v28 = vmul.f32 %v14904_v31, %v14904_v31  ;;  %v9169_v4 = vpop.eup %9168  ;;  %v14944_v60 = vsub.f32 %v17843_v33, %v2328_v43  ;;  %v3701_v17 = vmul.f32 0.03125, %v3105_v23  ;;  %v6831_v54 = vpop.f32.mrf.mxu1  ;;  %v17845_v25 = vld [vmem:[#allocation289_spill] sm:$0xff] }
 0x4bc   : > { %9178 = vrsqrt.f32 %v3956_v61  ;;  %8560 = vmatmul.mubr.msk.f32.gmra.mxu0 %vm458_vm0, %v4991_v9  ;;  %v6837_v21 = vadd.f32 %v14472_v12, %v8687_v6  ;;  %v9171_v62 = vpop.eup %9170  ;;  %v2204_v8 = vmul.f32 0.03125, %v17844_v59  ;;  %v4085_v19 = vadd.f32 1e-05, %v3829_v34  ;;  %v17846_v43 = vld [vmem:[#allocation133_spill] sm:$0xff]  ;;  %v6191_v9 = vpop.f32.mrf.mxu0  ;;  %v17847_v34 = vld [vmem:[#allocation106_spill] sm:$0xff] }
 0x4bd   : > { %v6197_v42 = vadd.f32 %v14472_v12, %v8495_v47  ;;  %3587 = vadd.xlane.f32.xlu1 %v3586_v16  ;;  %v4594_v40 = vmul.f32 %v9169_v4, %v17845_v25  ;;  %v14952_v33 = vsub.f32 %v17846_v43, %v2329_v39  ;;  %v3957_v61 = vadd.f32 1e-05, %v3701_v17  ;;  %v14958_v6 = vpop.xlane.xlu1 %2071  ;;  %v17851_v43 = vld [vmem:[#allocation172_spill] sm:$0xff] }
 0x4be   : > { %7487 = vst.msk [vmem:[%s14837_s16 + $0x228] sm:$0xff] %vm458_vm0, %v6837_v21  ;;  %v6832_v23 = vadd.f32 %v14472_v12, %v6831_v54  ;;  %3203 = vadd.xlane.f32.xlu0 %v14761_v26  ;;  %v4466_v47 = vmul.f32 %v9171_v62, %v17847_v34  ;;  %v2330_v16 = vmul.f32 0.03125, %v14891_v56  ;;  %9180 = vrsqrt.f32 %v4085_v19  ;;  %v2069_v4 = vpop.xlane.xlu0 %2068  ;;  %v17848_v19 = vld [vmem:[#allocation120_spill] sm:$0xff] }
 0x4bf   : > { %7423 = vst.msk [vmem:[%s14837_s16 + $0x28] sm:$0xff] %vm458_vm0, %v6197_v42  ;;  %v6192_v39 = vadd.f32 %v14472_v12, %v6191_v9  ;;  %v4857_v17 = vmul.f32 %v14801_v35, %v4594_v40  ;;  %9182 = vrsqrt.f32 %v3957_v61  ;;  %v3589_v26 = vsel %vm458_vm0, %v2839_v28, 0.0  ;;  %v17849_v28 = vld [vmem:[#allocation201_spill] sm:$0xff] }
 0x4c0   : > { %v9173_v21 = vpop.eup %9172  ;;  %7486 = vst.msk [vmem:[%s14837_s16 + $0x220] sm:$0xff] %vm458_vm0, %v6832_v23  ;;  %v4729_v59 = vmul.f32 %v14801_v35, %v4466_v47  ;;  %v2840_v62 = vmul.f32 %v14944_v60, %v14944_v60  ;;  %v14977_v40 = vsel %vm458_vm0, %v2714_v46, 0.0  ;;  %v2717_v42 = vmul.f32 %v14934_v32, %v14934_v32  ;;  %v17852_v47 = vld [vmem:[#allocation216_spill] sm:$0xff] }
 0x4c1   : > { %v9175_v56 = vpop.eup %9174  ;;  %v4595_v54 = vmul.f32 %v9173_v21, %v17848_v19  ;;  %7422 = vst.msk [vmem:[%s14837_s16 + $0x20] sm:$0xff] %vm458_vm0, %v6192_v39  ;;  %3590 = vadd.xlane.f32.xlu1 %v3589_v26  ;;  %v5120_v12 = vadd.f32 %v14828_v27, %v4857_v17  ;;  %v14982_v25 = vsub.f32 %v17849_v28, %v2204_v8  ;;  %v2331_v9 = vmul.f32 0.03125, %v14885_v7  ;;  %v3492_v23 = vpop.xlane.xlu1 %3491 }
 0x4c2   : > { %v4467_v61 = vmul.f32 %v9175_v56, %v17851_v43  ;;  %3206 = vadd.xlane.f32.xlu0 %v14710_v22  ;;  %v4992_v34 = vadd.f32 %v14828_v27, %v4729_v59  ;;  %v14989_v39 = vsub.f32 %v17852_v47, %v2330_v16  ;;  %v3830_v46 = vmul.f32 0.03125, %v3492_v23  ;;  %v3108_v17 = vpop.xlane.xlu0 %3107  ;;  %v8690_v21 = vpop.f32.mrf.mxu1  ;;  %v14999_v22 = vld [vmem:[%s16003_s8] ss:$0 sm:$0xff] }
 0x4c3   : > { %17850 = vst [vmem:[#allocation32_spill] sm:$0xff] %v14982_v25  ;;  %8754 = vmatprep.mubr.msk.f32.mxu1 %vm458_vm0, %v5120_v12  ;;  %v4858_v8 = vmul.f32 %v14801_v35, %v4595_v54  ;;  %v2841_v26 = vmul.f32 %v14952_v33, %v14952_v33  ;;  %v3702_v7 = vmul.f32 0.03125, %v3108_v17  ;;  %v8498_v56 = vpop.f32.mrf.mxu0  ;;  %v6847_v16 = vadd.f32 %v14999_v22, %v8690_v21  ;;  %v17853_v54 = vld [vmem:[#allocation342_spill] sm:$0xff] }
 0x4c4   : > { %8562 = vmatprep.mubr.msk.f32.mxu0 %vm458_vm0, %v4992_v34  ;;  %v3592_v59 = vsel %vm458_vm0, %v2840_v62, 0.0  ;;  %v4730_v19 = vmul.f32 %v14801_v35, %v4467_v61  ;;  %v2207_v12 = vmul.f32 0.03125, %v17853_v54  ;;  %v4086_v28 = vadd.f32 1e-05, %v3830_v46  ;;  %v6841_v23 = vpop.f32.mrf.mxu1  ;;  %v17854_v47 = vld [vmem:[#allocation50_spill] sm:$0xff] }
 0x4c5   : > { %v6207_v43 = vadd.f32 %v14999_v22, %v8498_v56  ;;  %3593 = vadd.xlane.f32.xlu1 %v3592_v59  ;;  %v5121_v34 = vadd.f32 %v14828_v27, %v4858_v8  ;;  %v15008_v17 = vsub.f32 %v17854_v47, %v2331_v9  ;;  %v3958_v32 = vadd.f32 1e-05, %v3702_v7  ;;  %7489 = vst.msk [vmem:[%s14837_s16 + $0x238] sm:$0xff] %vm458_vm0, %v6847_v16  ;;  %v6201_v62 = vpop.f32.mrf.mxu0  ;;  %v3495_v21 = vpop.xlane.xlu1 %3494 }
 0x4c6   : > { %v6842_v61 = vadd.f32 %v14999_v22, %v6841_v23  ;;  %3209 = vadd.xlane.f32.xlu0 %v14876_v53  ;;  %v4993_v46 = vadd.f32 %v14828_v27, %v4730_v19  ;;  %9184 = vrsqrt.f32 %v4086_v28  ;;  %v6202_v8 = vadd.f32 %v14999_v22, %v6201_v62  ;;  %v3111_v56 = vpop.xlane.xlu0 %3110 }
 0x4c7   : > { %7425 = vst.msk [vmem:[%s14837_s16 + $0x38] sm:$0xff] %vm458_vm0, %v6207_v43  ;;  %v3831_v9 = vmul.f32 0.03125, %v3495_v21  ;;  %8755 = vmatmul.mubr.msk.f32.gmra.mxu1 %vm458_vm0, %v5121_v34  ;;  %v2842_v7 = vmul.f32 %v14989_v39, %v14989_v39  ;;  %v9177_v16 = vpop.eup %9176  ;;  %v2332_v59 = vmul.f32 0.03125, %v2069_v4  ;;  %9186 = vrsqrt.f32 %v3958_v32  ;;  %v17855_v43 = vld [vmem:[#allocation288_spill] sm:$0xff] }
 0x4c8   : > { %7488 = vst.msk [vmem:[%s14837_s16 + $0x230] sm:$0xff] %vm458_vm0, %v6842_v61  ;;  %v3703_v53 = vmul.f32 0.03125, %v3111_v56  ;;  %8563 = vmatmul.mubr.msk.f32.gmra.mxu0 %vm458_vm0, %v4993_v46  ;;  %v3595_v19 = vsel %vm458_vm0, %v2841_v26, 0.0  ;;  %7424 = vst.msk [vmem:[%s14837_s16 + $0x30] sm:$0xff] %vm458_vm0, %v6202_v8  ;;  %v4596_v23 = vmul.f32 %v9177_v16, %v17855_v43  ;;  %v2716_v34 = vmul.f32 %v14982_v25, %v14982_v25  ;;  %v17856_v32 = vld [vmem:[#allocation212_spill] sm:$0xff]  ;;  %v17858_v61 = vld [vmem:[#allocation122_spill] sm:$0xff] }
 0x4c9   : > { %v9179_v54 = vpop.eup %9178  ;;  %v4087_v28 = vadd.f32 1e-05, %v3831_v9  ;;  %3596 = vadd.xlane.f32.xlu1 %v3595_v19  ;;  %v15031_v4 = vsel %vm458_vm0, %v2717_v42, 0.0  ;;  %v15034_v47 = vsub.f32 %v17856_v32, %v2207_v12  ;;  %v2078_v26 = vpop.xlane.xlu1 %2077  ;;  %v2843_v46 = vmul.f32 %v15008_v17, %v15008_v17 }
 0x4ca   : > { %v3959_v62 = vadd.f32 1e-05, %v3703_v53  ;;  %3212 = vadd.xlane.f32.xlu0 %v14818_v1  ;;  %v4468_v21 = vmul.f32 %v9179_v54, %v17858_v61  ;;  %v2333_v8 = vmul.f32 0.03125, %v14958_v6  ;;  %v2075_v9 = vpop.xlane.xlu0 %2074  ;;  %v8693_v56 = vpop.f32.mrf.mxu1  ;;  %v3598_v42 = vsel %vm458_vm0, %v2842_v7, 0.0  ;;  %v17859_v53 = vld [vmem:[#allocation183_spill] sm:$0xff]  ;;  %v17860_v6 = vld [vmem:[#allocation346_spill] sm:$0xff] }
 0x4cb   : > { %17857 = vst [vmem:[#allocation108_spill] sm:$0xff] %v15034_v47  ;;  %9188 = vrsqrt.f32 %v4087_v28  ;;  %v4859_v16 = vmul.f32 %v14801_v35, %v4596_v23  ;;  %v9181_v12 = vpop.eup %9180  ;;  %v15044_v19 = vsub.f32 %v17859_v53, %v2332_v59  ;;  %v8501_v1 = vpop.f32.mrf.mxu0  ;;  %v6857_v54 = vadd.f32 %v14999_v22, %v8693_v56  ;;  %v17861_v59 = vld [vmem:[#allocation205_spill] sm:$0xff] }
 0x4cc   : > { %9190 = vrsqrt.f32 %v3959_v62  ;;  %v4731_v43 = vmul.f32 %v14801_v35, %v4468_v21  ;;  %v9183_v32 = vpop.eup %9182  ;;  %v2206_v28 = vmul.f32 0.03125, %v17860_v6  ;;  %v4597_v61 = vmul.f32 %v9181_v12, %v13862_v45  ;;  %v6851_v23 = vpop.f32.mrf.mxu1  ;;  %v17862_v12 = vld [vmem:[#allocation159_spill] sm:$0xff] }
 0x4cd   : > { %v6217_v7 = vadd.f32 %v14999_v22, %v8501_v1  ;;  %3599 = vadd.xlane.f32.xlu1 %v3598_v42  ;;  %v5122_v25 = vadd.f32 %v14828_v27, %v4859_v16  ;;  %v4469_v62 = vmul.f32 %v9183_v32, %v17861_v59  ;;  %v2334_v53 = vmul.f32 0.03125, %v2075_v9  ;;  %7491 = vst.msk [vmem:[%s14837_s16 + $0x248] sm:$0xff] %vm458_vm0, %v6857_v54  ;;  %v6211_v56 = vpop.f32.mrf.mxu0  ;;  %v3498_v6 = vpop.xlane.xlu1 %3497  ;;  %v17863_v59 = vld [vmem:[#allocation229_spill] sm:$0xff] }
 0x4ce   : > { %v6852_v21 = vadd.f32 %v14999_v22, %v6851_v23  ;;  %3215 = vadd.xlane.f32.xlu0 %v14977_v40  ;;  %v4994_v45 = vadd.f32 %v14828_v27, %v4731_v43  ;;  %v15059_v1 = vsub.f32 %v17862_v12, %v2333_v8  ;;  %v6212_v42 = vadd.f32 %v14999_v22, %v6211_v56  ;;  %v3114_v9 = vpop.xlane.xlu0 %3113 }
 0x4cf   : > { %7427 = vst.msk [vmem:[%s14837_s16 + $0x48] sm:$0xff] %vm458_vm0, %v6217_v7  ;;  %v3832_v16 = vmul.f32 0.03125, %v3498_v6  ;;  %8757 = vmatprep.mubr.msk.f32.mxu1 %vm458_vm0, %v5122_v25  ;;  %v4860_v54 = vmul.f32 %v14801_v35, %v4597_v61  ;;  %v3704_v40 = vmul.f32 0.03125, %v3114_v9  ;;  %v3601_v43 = vsel %vm458_vm0, %v2843_v46, 0.0  ;;  %v17864_v6 = vld [vmem:[#allocation217_spill] sm:$0xff] }
 0x4d0   : > { %7490 = vst.msk [vmem:[%s14837_s16 + $0x240] sm:$0xff] %vm458_vm0, %v6852_v21  ;;  %8565 = vmatprep.mubr.msk.f32.mxu0 %vm458_vm0, %v4994_v45  ;;  %v4732_v8 = vmul.f32 %v14801_v35, %v4469_v62  ;;  %v2844_v32 = vmul.f32 %v15044_v19, %v15044_v19  ;;  %v2335_v7 = vmul.f32 0.03125, %v2078_v26  ;;  %7426 = vst.msk [vmem:[%s14837_s16 + $0x40] sm:$0xff] %vm458_vm0, %v6212_v42  ;;  %v3220_v61 = vsel %vm458_vm0, %v2716_v34, 0.0 }
 0x4d1   : > { %v4088_v23 = vadd.f32 1e-05, %v3832_v16  ;;  %3602 = vadd.xlane.f32.xlu1 %v3601_v43  ;;  %v5123_v25 = vadd.f32 %v14828_v27, %v4860_v54  ;;  %v15078_v56 = vsub.f32 %v17863_v59, %v2334_v53  ;;  %v3960_v21 = vadd.f32 1e-05, %v3704_v40  ;;  %v3501_v46 = vpop.xlane.xlu1 %3500  ;;  %v8696_v34 = vpop.f32.mrf.mxu1  ;;  %v17865_v43 = vld [vmem:[#allocation393_spill] sm:$0xff] }
 0x4d2   : > { %3218 = vadd.xlane.f32.xlu0 %v14931_v5  ;;  %v4995_v62 = vadd.f32 %v14828_v27, %v4732_v8  ;;  %v15084_v26 = vmul.f32 %v15034_v47, %v15034_v47  ;;  %v15087_v45 = vsub.f32 %v17864_v6, %v2206_v28  ;;  %v3833_v12 = vmul.f32 0.03125, %v3501_v46  ;;  %v3117_v42 = vpop.xlane.xlu0 %3116  ;;  %v8504_v9 = vpop.f32.mrf.mxu0  ;;  %v17866_v46 = vld [vmem:[#allocation103_spill] sm:$0xff] }
 0x4d3   : > { %9192 = vrsqrt.f32 %v4088_v23  ;;  %8758 = vmatmul.mubr.msk.f32.gmra.mxu1 %vm458_vm0, %v5123_v25  ;;  %v2845_v53 = vmul.f32 %v15059_v1, %v15059_v1  ;;  %v9185_v5 = vpop.eup %9184  ;;  %v3705_v16 = vmul.f32 0.03125, %v3117_v42  ;;  %v6867_v54 = vadd.f32 %v14999_v22, %v8696_v34  ;;  %v6861_v59 = vpop.f32.mrf.mxu1  ;;  %v17867_v34 = vld [vmem:[#allocation298_spill] sm:$0xff] }
 0x4d4   : > { %9194 = vrsqrt.f32 %v3960_v21  ;;  %8566 = vmatmul.mubr.msk.f32.gmra.mxu0 %vm458_vm0, %v4995_v62  ;;  %v3604_v28 = vsel %vm458_vm0, %v2844_v32, 0.0  ;;  %v9187_v40 = vpop.eup %9186  ;;  %v15096_v8 = vsub.f32 %v17865_v43, %v2335_v7  ;;  %v4089_v23 = vadd.f32 1e-05, %v3833_v12  ;;  %v6221_v62 = vpop.f32.mrf.mxu0 }
 0x4d5   : > { %v6227_v25 = vadd.f32 %v14999_v22, %v8504_v9  ;;  %3605 = vadd.xlane.f32.xlu1 %v3604_v28  ;;  %v4598_v21 = vmul.f32 %v9185_v5, %v17866_v46  ;;  %v3961_v6 = vadd.f32 1e-05, %v3705_v16  ;;  %7493 = vst.msk [vmem:[%s14837_s16 + $0x258] sm:$0xff] %vm458_vm0, %v6867_v54  ;;  %v6862_v42 = vadd.f32 %v14999_v22, %v6861_v59  ;;  %v3504_v32 = vpop.xlane.xlu1 %3503  ;;  %v17868_v59 = vld [vmem:[#allocation22_spill] sm:$0xff] }
 0x4d6   : > { %3221 = vadd.xlane.f32.xlu0 %v3220_v61  ;;  %v4470_v47 = vmul.f32 %v9187_v40, %v17867_v34  ;;  %v2846_v7 = vmul.f32 %v15078_v56, %v15078_v56  ;;  %9196 = vrsqrt.f32 %v4089_v23  ;;  %v6222_v12 = vadd.f32 %v14999_v22, %v6221_v62  ;;  %v3120_v16 = vpop.xlane.xlu0 %3119 }
 0x4d7   : > { %7429 = vst.msk [vmem:[%s14837_s16 + $0x58] sm:$0xff] %vm458_vm0, %v6227_v25  ;;  %v3834_v5 = vmul.f32 0.03125, %v3504_v32  ;;  %v4861_v9 = vmul.f32 %v14801_v35, %v4598_v21  ;;  %9198 = vrsqrt.f32 %v3961_v6  ;;  %7492 = vst.msk [vmem:[%s14837_s16 + $0x250] sm:$0xff] %vm458_vm0, %v6862_v42  ;;  %v3706_v61 = vmul.f32 0.03125, %v3120_v16  ;;  %v17869_v6 = vld [vmem:[#allocation264_spill] sm:$0xff] }
 0x4d8   : > { %v9189_v54 = vpop.eup %9188  ;;  %v3607_v28 = vsel %vm458_vm0, %v2845_v53, 0.0  ;;  %v4733_v40 = vmul.f32 %v14801_v35, %v4470_v47  ;;  %7428 = vst.msk [vmem:[%s14837_s16 + $0x50] sm:$0xff] %vm458_vm0, %v6222_v12  ;;  %v2718_v21 = vmul.f32 %v15087_v45, %v15087_v45  ;;  %v2847_v32 = vmul.f32 %v15096_v8, %v15096_v8 }
 0x4d9   : > { %v9191_v43 = vpop.eup %9190  ;;  %v4599_v23 = vmul.f32 %v9189_v54, %v17868_v59  ;;  %v4090_v25 = vadd.f32 1e-05, %v3834_v5  ;;  %3608 = vadd.xlane.f32.xlu1 %v3607_v28  ;;  %v5124_v46 = vadd.f32 %v14828_v27, %v4861_v9  ;;  %v3962_v42 = vadd.f32 1e-05, %v3706_v61  ;;  %v3507_v53 = vpop.xlane.xlu1 %3506 }
 0x4da   : > { %v4471_v62 = vmul.f32 %v9191_v43, %v17869_v6  ;;  %3224 = vadd.xlane.f32.xlu0 %v15031_v4  ;;  %v4996_v47 = vadd.f32 %v14828_v27, %v4733_v40  ;;  %v3835_v34 = vmul.f32 0.03125, %v3507_v53  ;;  %v3123_v12 = vpop.xlane.xlu0 %3122  ;;  %v8699_v5 = vpop.f32.mrf.mxu1  ;;  %v3610_v16 = vsel %vm458_vm0, %v2846_v7, 0.0 }
 0x4db   : > { %9200 = vrsqrt.f32 %v4090_v25  ;;  %8760 = vmatprep.mubr.msk.f32.mxu1 %vm458_vm0, %v5124_v46  ;;  %v4862_v9 = vmul.f32 %v14801_v35, %v4599_v23  ;;  %v3707_v54 = vmul.f32 0.03125, %v3123_v12  ;;  %v8507_v4 = vpop.f32.mrf.mxu0  ;;  %v6877_v61 = vadd.f32 %v14999_v22, %v8699_v5 }
 0x4dc   : > { %9202 = vrsqrt.f32 %v3962_v42  ;;  %8568 = vmatprep.mubr.msk.f32.mxu0 %vm458_vm0, %v4996_v47  ;;  %v4734_v28 = vmul.f32 %v14801_v35, %v4471_v62  ;;  %v4091_v40 = vadd.f32 1e-05, %v3835_v34  ;;  %v6237_v43 = vadd.f32 %v14999_v22, %v8507_v4  ;;  %v6871_v59 = vpop.f32.mrf.mxu1 }
 0x4dd   : > { %v3226_v25 = vsel %vm458_vm0, %v2718_v21, 0.0  ;;  %3611 = vadd.xlane.f32.xlu1 %v3610_v16  ;;  %v5125_v7 = vadd.f32 %v14828_v27, %v4862_v9  ;;  %v3963_v23 = vadd.f32 1e-05, %v3707_v54  ;;  %7495 = vst.msk [vmem:[%s14837_s16 + $0x268] sm:$0xff] %vm458_vm0, %v6877_v61  ;;  %v6231_v46 = vpop.f32.mrf.mxu0  ;;  %v6872_v6 = vadd.f32 %v14999_v22, %v6871_v59  ;;  %v3510_v42 = vpop.xlane.xlu1 %3509 }
 0x4de   : > { %3227 = vadd.xlane.f32.xlu0 %v3226_v25  ;;  %v4997_v62 = vadd.f32 %v14828_v27, %v4734_v28  ;;  %9204 = vrsqrt.f32 %v4091_v40  ;;  %7431 = vst.msk [vmem:[%s14837_s16 + $0x68] sm:$0xff] %vm458_vm0, %v6237_v43  ;;  %v6232_v21 = vadd.f32 %v14999_v22, %v6231_v46  ;;  %v3836_v53 = vmul.f32 0.03125, %v3510_v42  ;;  %v3126_v47 = vpop.xlane.xlu0 %3125  ;;  %v17870_v40 = vld [vmem:[#allocation158_spill] sm:$0xff] }
 0x4df   : > { %8761 = vmatmul.mubr.msk.f32.gmra.mxu1 %vm458_vm0, %v5125_v7  ;;  %9206 = vrsqrt.f32 %v3963_v23  ;;  %7494 = vst.msk [vmem:[%s14837_s16 + $0x260] sm:$0xff] %vm458_vm0, %v6872_v6  ;;  %v3708_v12 = vmul.f32 0.03125, %v3126_v47  ;;  %v3613_v5 = vsel %vm458_vm0, %v2847_v32, 0.0  ;;  %v3229_v54 = vsel %vm458_vm0, %v15084_v26, 0.0 }
 0x4e0   : > { %v9193_v34 = vpop.eup %9192  ;;  %8569 = vmatmul.mubr.msk.f32.gmra.mxu0 %vm458_vm0, %v4997_v62  ;;  %7430 = vst.msk [vmem:[%s14837_s16 + $0x60] sm:$0xff] %vm458_vm0, %v6232_v21  ;;  %v4092_v9 = vadd.f32 1e-05, %v3836_v53  ;;  %v17871_v62 = vld [vmem:[#allocation292_spill] sm:$0xff] }
 0x4e1   : > { %v9195_v16 = vpop.eup %9194  ;;  %3614 = vadd.xlane.f32.xlu1 %v3613_v5  ;;  %v4600_v4 = vmul.f32 %v9193_v34, %v13957_v0  ;;  %v3964_v61 = vadd.f32 1e-05, %v3708_v12  ;;  %v3513_v28 = vpop.xlane.xlu1 %3512  ;;  %v17872_v5 = vld [vmem:[#allocation319_spill] sm:$0xff] }
 0x4e2   : > { %3230 = vadd.xlane.f32.xlu0 %v3229_v54  ;;  %v4472_v43 = vmul.f32 %v9195_v16, %v17870_v40  ;;  %9208 = vrsqrt.f32 %v4092_v9  ;;  %v3837_v59 = vmul.f32 0.03125, %v3513_v28  ;;  %v3129_v25 = vpop.xlane.xlu0 %3128  ;;  %v8702_v7 = vpop.f32.mrf.mxu1 }
 0x4e3   : > { %v4863_v32 = vmul.f32 %v14801_v35, %v4600_v4  ;;  %v9197_v23 = vpop.eup %9196  ;;  %9210 = vrsqrt.f32 %v3964_v61  ;;  %v3709_v46 = vmul.f32 0.03125, %v3129_v25  ;;  %v8510_v6 = vpop.f32.mrf.mxu0  ;;  %v6887_v26 = vadd.f32 %v14999_v22, %v8702_v7 }
 0x4e4   : > { %v4735_v0 = vmul.f32 %v14801_v35, %v4472_v43  ;;  %v9199_v42 = vpop.eup %9198  ;;  %v4601_v21 = vmul.f32 %v9197_v23, %v17871_v62  ;;  %v4093_v53 = vadd.f32 1e-05, %v3837_v59  ;;  %v6247_v47 = vadd.f32 %v14999_v22, %v8510_v6  ;;  %v6881_v34 = vpop.f32.mrf.mxu1 }
 0x4e5   : > { %v5126_v12 = vadd.f32 %v14828_v27, %v4863_v32  ;;  %v4473_v16 = vmul.f32 %v9199_v42, %v17872_v5  ;;  %v3965_v9 = vadd.f32 1e-05, %v3709_v46  ;;  %7497 = vst.msk [vmem:[%s14837_s16 + $0x278] sm:$0xff] %vm458_vm0, %v6887_v26  ;;  %v6241_v54 = vpop.f32.mrf.mxu0  ;;  %v6882_v4 = vadd.f32 %v14999_v22, %v6881_v34  ;;  %v3516_v61 = vpop.xlane.xlu1 %3515 }
 0x4e6   : > { %v4998_v28 = vadd.f32 %v14828_v27, %v4735_v0  ;;  %9212 = vrsqrt.f32 %v4093_v53  ;;  %7433 = vst.msk [vmem:[%s14837_s16 + $0x78] sm:$0xff] %vm458_vm0, %v6247_v47  ;;  %v6242_v40 = vadd.f32 %v14999_v22, %v6241_v54  ;;  %v3838_v43 = vmul.f32 0.03125, %v3516_v61  ;;  %v3132_v59 = vpop.xlane.xlu0 %3131  ;;  %v17873_v53 = vld [vmem:[#allocation327_spill] sm:$0xff] }
 0x4e7   : > { %8763 = vmatprep.mubr.msk.f32.mxu1 %vm458_vm0, %v5126_v12  ;;  %v4864_v25 = vmul.f32 %v14801_v35, %v4601_v21  ;;  %9214 = vrsqrt.f32 %v3965_v9  ;;  %7496 = vst.msk [vmem:[%s14837_s16 + $0x270] sm:$0xff] %vm458_vm0, %v6882_v4  ;;  %v3710_v32 = vmul.f32 0.03125, %v3132_v59  ;;  %v4736_v23 = vmul.f32 %v14801_v35, %v4473_v16 }
 0x4e8   : > { %v9201_v7 = vpop.eup %9200  ;;  %8571 = vmatprep.mubr.msk.f32.mxu0 %vm458_vm0, %v4998_v28  ;;  %7432 = vst.msk [vmem:[%s14837_s16 + $0x70] sm:$0xff] %vm458_vm0, %v6242_v40  ;;  %v4094_v6 = vadd.f32 1e-05, %v3838_v43 }
 0x4e9   : > { %v9203_v46 = vpop.eup %9202  ;;  %v5127_v26 = vadd.f32 %v14828_v27, %v4864_v25  ;;  %v4602_v0 = vmul.f32 %v9201_v7, %v13995_v29  ;;  %v3966_v42 = vadd.f32 1e-05, %v3710_v32  ;;  %v3519_v62 = vpop.xlane.xlu1 %3518  ;;  %v4999_v21 = vadd.f32 %v14828_v27, %v4736_v23  ;;  %v17874_v32 = vld [vmem:[#allocation162_spill] sm:$0xff] }
 0x4ea   : > { %v4474_v47 = vmul.f32 %v9203_v46, %v17873_v53  ;;  %9216 = vrsqrt.f32 %v4094_v6  ;;  %v3839_v34 = vmul.f32 0.03125, %v3519_v62  ;;  %v3135_v12 = vpop.xlane.xlu0 %3134  ;;  %v8705_v5 = vpop.f32.mrf.mxu1 }
 0x4eb   : > { %8764 = vmatmul.mubr.msk.f32.gmra.mxu1 %vm458_vm0, %v5127_v26  ;;  %v4865_v16 = vmul.f32 %v14801_v35, %v4602_v0  ;;  %v9205_v9 = vpop.eup %9204  ;;  %9218 = vrsqrt.f32 %v3966_v42  ;;  %v3711_v54 = vmul.f32 0.03125, %v3135_v12  ;;  %v8513_v4 = vpop.f32.mrf.mxu0  ;;  %8572 = vmatmul.mubr.msk.f32.gmra.mxu0 %vm458_vm0, %v4999_v21  ;;  %v6897_v29 = vadd.f32 %v14999_v22, %v8705_v5 }
 0x4ec   : > { %v4737_v61 = vmul.f32 %v14801_v35, %v4474_v47  ;;  %v9207_v28 = vpop.eup %9206  ;;  %v4603_v40 = vmul.f32 %v9205_v9, %v13986_v36  ;;  %v4095_v43 = vadd.f32 1e-05, %v3839_v34  ;;  %v6257_v59 = vadd.f32 %v14999_v22, %v8513_v4  ;;  %v6891_v25 = vpop.f32.mrf.mxu1 }
 0x4ed   : > { %v5128_v7 = vadd.f32 %v14828_v27, %v4865_v16  ;;  %v4475_v23 = vmul.f32 %v9207_v28, %v17874_v32  ;;  %v3967_v46 = vadd.f32 1e-05, %v3711_v54  ;;  %7499 = vst.msk [vmem:[%s14837_s16 + $0x288] sm:$0xff] %vm458_vm0, %v6897_v29  ;;  %v6251_v6 = vpop.f32.mrf.mxu0  ;;  %v6892_v26 = vadd.f32 %v14999_v22, %v6891_v25  ;;  %v3522_v0 = vpop.xlane.xlu1 %3521  ;;  %v17875_v54 = vld [vmem:[#allocation293_spill] sm:$0xff] }
 0x4ee   : > { %v5000_v42 = vadd.f32 %v14828_v27, %v4737_v61  ;;  %9220 = vrsqrt.f32 %v4095_v43  ;;  %7435 = vst.msk [vmem:[%s14837_s16 + $0x88] sm:$0xff] %vm458_vm0, %v6257_v59  ;;  %v6252_v36 = vadd.f32 %v14999_v22, %v6251_v6  ;;  %v3840_v62 = vmul.f32 0.03125, %v3522_v0  ;;  %v3138_v21 = vpop.xlane.xlu0 %3137 }
 0x4ef   : > { %8766 = vmatprep.mubr.msk.f32.mxu1 %vm458_vm0, %v5128_v7  ;;  %v4866_v53 = vmul.f32 %v14801_v35, %v4603_v40  ;;  %v9209_v47 = vpop.eup %9208  ;;  %9222 = vrsqrt.f32 %v3967_v46  ;;  %7498 = vst.msk [vmem:[%s14837_s16 + $0x280] sm:$0xff] %vm458_vm0, %v6892_v26  ;;  %v3712_v34 = vmul.f32 0.03125, %v3138_v21  ;;  %v4738_v12 = vmul.f32 %v14801_v35, %v4475_v23  ;;  %v17876_v40 = vld [vmem:[#allocation180_spill] sm:$0xff] }
 0x4f0   : > { %8574 = vmatprep.mubr.msk.f32.mxu0 %vm458_vm0, %v5000_v42  ;;  %v9211_v5 = vpop.eup %9210  ;;  %7434 = vst.msk [vmem:[%s14837_s16 + $0x80] sm:$0xff] %vm458_vm0, %v6252_v36  ;;  %v4096_v16 = vadd.f32 1e-05, %v3840_v62  ;;  %v4604_v4 = vmul.f32 %v9209_v47, %v17875_v54  ;;  %v17877_v42 = vld [vmem:[#allocation9_spill] sm:$0xff] }
 0x4f1   : > { %v5129_v9 = vadd.f32 %v14828_v27, %v4866_v53  ;;  %v3968_v29 = vadd.f32 1e-05, %v3712_v34  ;;  %v3525_v61 = vpop.xlane.xlu1 %3524  ;;  %v5001_v28 = vadd.f32 %v14828_v27, %v4738_v12  ;;  %v4476_v43 = vmul.f32 %v9211_v5, %v17876_v40  ;;  %v17878_v47 = vld [vmem:[#allocation329_spill] sm:$0xff] }
 0x4f2   : > { %9224 = vrsqrt.f32 %v4096_v16  ;;  %v3841_v59 = vmul.f32 0.03125, %v3525_v61  ;;  %v3141_v25 = vpop.xlane.xlu0 %3140  ;;  %v4867_v7 = vmul.f32 %v14801_v35, %v4604_v4  ;;  %v8516_v46 = vpop.f32.mrf.mxu0 }
 0x4f3   : > { %8767 = vmatmul.mubr.msk.f32.gmra.mxu1 %vm458_vm0, %v5129_v9  ;;  %v9213_v32 = vpop.eup %9212  ;;  %9226 = vrsqrt.f32 %v3968_v29  ;;  %v3713_v23 = vmul.f32 0.03125, %v3141_v25  ;;  %8575 = vmatmul.mubr.msk.f32.gmra.mxu0 %vm458_vm0, %v5001_v28  ;;  %v8708_v6 = vpop.f32.mrf.mxu1  ;;  %v4739_v26 = vmul.f32 %v14801_v35, %v4476_v43  ;;  %v6267_v21 = vadd.f32 %v14999_v22, %v8516_v46  ;;  %v15225_v28 = vld [vmem:[%s16000_s5] ss:$0 sm:$0xff] }
 0x4f4   : > { %v9215_v0 = vpop.eup %9214  ;;  %v4605_v36 = vmul.f32 %v9213_v32, %v17877_v42  ;;  %v4097_v62 = vadd.f32 1e-05, %v3841_v59  ;;  %v6907_v53 = vadd.f32 %v14999_v22, %v8708_v6  ;;  %v6261_v5 = vpop.f32.mrf.mxu0  ;;  %v5130_v54 = vadd.f32 %v14828_v27, %v4867_v7  ;;  %v17879_v42 = vld [vmem:[#allocation338_spill] sm:$0xff] }
 0x4f5   : > { %v4477_v34 = vmul.f32 %v9215_v0, %v17878_v47  ;;  %v3969_v12 = vadd.f32 1e-05, %v3713_v23  ;;  %v6901_v16 = vpop.f32.mrf.mxu1  ;;  %v5002_v9 = vadd.f32 %v14828_v27, %v4739_v26  ;;  %7437 = vst.msk [vmem:[%s14837_s16 + $0x98] sm:$0xff] %vm458_vm0, %v6267_v21  ;;  %v6262_v35 = vadd.f32 %v14999_v22, %v6261_v5  ;;  %v3528_v29 = vpop.xlane.xlu1 %3527 }
 0x4f6   : > { %9228 = vrsqrt.f32 %v4097_v62  ;;  %7501 = vst.msk [vmem:[%s14837_s16 + $0x298] sm:$0xff] %vm458_vm0, %v6907_v53  ;;  %v6902_v4 = vadd.f32 %v14999_v22, %v6901_v16  ;;  %v3144_v61 = vpop.xlane.xlu0 %3143  ;;  %v4868_v40 = vmul.f32 %v15225_v28, %v4605_v36  ;;  %v3842_v59 = vmul.f32 0.03125, %v3528_v29  ;;  %8769 = vmatprep.mubr.msk.f32.mxu1 %vm458_vm0, %v5130_v54 }
 0x4f7   : > { %v9217_v43 = vpop.eup %9216  ;;  %9230 = vrsqrt.f32 %v3969_v12  ;;  %v3714_v25 = vmul.f32 0.03125, %v3144_v61  ;;  %8577 = vmatprep.mubr.msk.f32.mxu0 %vm458_vm0, %v5002_v9  ;;  %v4740_v7 = vmul.f32 %v15225_v28, %v4477_v34  ;;  %7436 = vst.msk [vmem:[%s14837_s16 + $0x90] sm:$0xff] %vm458_vm0, %v6262_v35 }
 0x4f8   : > { %v9219_v32 = vpop.eup %9218  ;;  %7500 = vst.msk [vmem:[%s14837_s16 + $0x290] sm:$0xff] %vm458_vm0, %v6902_v4  ;;  %v5131_v23 = vadd.f32 %v14828_v27, %v4868_v40  ;;  %v4606_v46 = vmul.f32 %v9217_v43, %v14084_v14  ;;  %v4098_v6 = vadd.f32 1e-05, %v3842_v59  ;;  %v17880_v4 = vld [vmem:[#allocation204_spill] sm:$0xff] }
 0x4f9   : > { %v3970_v26 = vadd.f32 1e-05, %v3714_v25  ;;  %v5003_v0 = vadd.f32 %v14828_v27, %v4740_v7  ;;  %v4478_v36 = vmul.f32 %v9219_v32, %v17879_v42  ;;  %v3531_v62 = vpop.xlane.xlu1 %3530  ;;  %v8711_v14 = vpop.f32.mrf.mxu1  ;;  %v15250_v25 = vld [vmem:[%s16001_s6] ss:$0 sm:$0xff] }
 0x4fa   : > { %v3147_v21 = vpop.xlane.xlu0 %3146  ;;  %8770 = vmatmul.mubr.msk.f32.gmra.mxu1 %vm458_vm0, %v5131_v23  ;;  %v4869_v53 = vmul.f32 %v15225_v28, %v4606_v46  ;;  %9232 = vrsqrt.f32 %v4098_v6  ;;  %v3843_v34 = vmul.f32 0.03125, %v3531_v62  ;;  %v8519_v5 = vpop.f32.mrf.mxu0  ;;  %v6917_v35 = vadd.f32 %v14999_v22, %v8711_v14  ;;  %v17881_v14 = vld [vmem:[#allocation16_spill] sm:$0xff] }
 0x4fb   : > { %v9221_v47 = vpop.eup %9220  ;;  %v3715_v12 = vmul.f32 0.03125, %v3147_v21  ;;  %8578 = vmatmul.mubr.msk.f32.gmra.mxu0 %vm458_vm0, %v5003_v0  ;;  %v4741_v27 = vmul.f32 %v15225_v28, %v4478_v36  ;;  %9234 = vrsqrt.f32 %v3970_v26  ;;  %v6277_v54 = vadd.f32 %v14999_v22, %v8519_v5  ;;  %v6911_v59 = vpop.f32.mrf.mxu1 }
 0x4fc   : > { %v9223_v16 = vpop.eup %9222  ;;  %v4607_v9 = vmul.f32 %v9221_v47, %v14068_v37  ;;  %v4099_v61 = vadd.f32 1e-05, %v3843_v34  ;;  %v6271_v43 = vpop.f32.mrf.mxu0  ;;  %7503 = vst.msk [vmem:[%s14837_s16 + $0x2a8] sm:$0xff] %vm458_vm0, %v6917_v35  ;;  %v6912_v32 = vadd.f32 %v14999_v22, %v6911_v59  ;;  %v5132_v6 = vadd.f32 %v15250_v25, %v4869_v53 }
 0x4fd   : > { %v4479_v29 = vmul.f32 %v9223_v16, %v17880_v4  ;;  %v3971_v40 = vadd.f32 1e-05, %v3715_v12  ;;  %v5004_v7 = vadd.f32 %v15250_v25, %v4741_v27  ;;  %7439 = vst.msk [vmem:[%s14837_s16 + $0xa8] sm:$0xff] %vm458_vm0, %v6277_v54  ;;  %v6272_v37 = vadd.f32 %v14999_v22, %v6271_v43  ;;  %v3534_v23 = vpop.xlane.xlu1 %3533 }
 0x4fe   : > { %v3150_v46 = vpop.xlane.xlu0 %3149  ;;  %v4870_v26 = vmul.f32 %v15225_v28, %v4607_v9  ;;  %9236 = vrsqrt.f32 %v4099_v61  ;;  %v3844_v42 = vmul.f32 0.03125, %v3534_v23  ;;  %7502 = vst.msk [vmem:[%s14837_s16 + $0x2a0] sm:$0xff] %vm458_vm0, %v6912_v32  ;;  %8772 = vmatprep.mubr.msk.f32.mxu1 %vm458_vm0, %v5132_v6  ;;  %v17882_v32 = vld [vmem:[#allocation10_spill] sm:$0xff] }
 0x4ff   : > { %v9225_v0 = vpop.eup %9224  ;;  %v3716_v36 = vmul.f32 0.03125, %v3150_v46  ;;  %8580 = vmatprep.mubr.msk.f32.mxu0 %vm458_vm0, %v5004_v7  ;;  %v4742_v62 = vmul.f32 %v15225_v28, %v4479_v29  ;;  %9238 = vrsqrt.f32 %v3971_v40  ;;  %7438 = vst.msk [vmem:[%s14837_s16 + $0xa0] sm:$0xff] %vm458_vm0, %v6272_v37 }
 0x500   : > { %v9227_v21 = vpop.eup %9226  ;;  %v5133_v53 = vadd.f32 %v15250_v25, %v4870_v26  ;;  %v4608_v47 = vmul.f32 %v9225_v0, %v14167_v38  ;;  %v4100_v34 = vadd.f32 1e-05, %v3844_v42 }
 0x501   : > { %v3972_v12 = vadd.f32 1e-05, %v3716_v36  ;;  %v5005_v5 = vadd.f32 %v15250_v25, %v4742_v62  ;;  %v4480_v27 = vmul.f32 %v9227_v21, %v17881_v14  ;;  %v3537_v16 = vpop.xlane.xlu1 %3536 }
 0x502   : > { %v3153_v9 = vpop.xlane.xlu0 %3152  ;;  %8773 = vmatmul.mubr.msk.f32.gmra.mxu1 %vm458_vm0, %v5133_v53  ;;  %v4871_v54 = vmul.f32 %v15225_v28, %v4608_v47  ;;  %9240 = vrsqrt.f32 %v4100_v34  ;;  %v3845_v4 = vmul.f32 0.03125, %v3537_v16  ;;  %v8522_v61 = vpop.f32.mrf.mxu0 }
 0x503   : > { %v9229_v35 = vpop.eup %9228  ;;  %v3717_v29 = vmul.f32 0.03125, %v3153_v9  ;;  %8581 = vmatmul.mubr.msk.f32.gmra.mxu0 %vm458_vm0, %v5005_v5  ;;  %v8714_v38 = vpop.f32.mrf.mxu1  ;;  %v4743_v40 = vmul.f32 %v15225_v28, %v4480_v27  ;;  %9242 = vrsqrt.f32 %v3972_v12  ;;  %v6287_v7 = vadd.f32 %v14999_v22, %v8522_v61 }
 0x504   : > { %v9231_v43 = vpop.eup %9230  ;;  %v4609_v59 = vmul.f32 %v9229_v35, %v14162_v2  ;;  %v6927_v37 = vadd.f32 %v14999_v22, %v8714_v38  ;;  %v4101_v46 = vadd.f32 1e-05, %v3845_v4  ;;  %v6281_v26 = vpop.f32.mrf.mxu0  ;;  %v5134_v53 = vadd.f32 %v15250_v25, %v4871_v54  ;;  %v17883_v38 = vld [vmem:[#allocation124_spill] sm:$0xff] }
 0x505   : > { %v4481_v23 = vmul.f32 %v9231_v43, %v17882_v32  ;;  %v3973_v6 = vadd.f32 1e-05, %v3717_v29  ;;  %v6921_v0 = vpop.f32.mrf.mxu1  ;;  %v5006_v42 = vadd.f32 %v15250_v25, %v4743_v40  ;;  %7441 = vst.msk [vmem:[%s14837_s16 + $0xb8] sm:$0xff] %vm458_vm0, %v6287_v7  ;;  %v6282_v2 = vadd.f32 %v14999_v22, %v6281_v26  ;;  %v3540_v62 = vpop.xlane.xlu1 %3539 }
 0x506   : > { %7505 = vst.msk [vmem:[%s14837_s16 + $0x2b8] sm:$0xff] %vm458_vm0, %v6927_v37  ;;  %v6922_v36 = vadd.f32 %v14999_v22, %v6921_v0  ;;  %v3156_v21 = vpop.xlane.xlu0 %3155  ;;  %v4872_v47 = vmul.f32 %v15225_v28, %v4609_v59  ;;  %9244 = vrsqrt.f32 %v4101_v46  ;;  %v3846_v34 = vmul.f32 0.03125, %v3540_v62  ;;  %8775 = vmatprep.mubr.msk.f32.mxu1 %vm458_vm0, %v5134_v53  ;;  %v17884_v53 = vld [vmem:[#allocation135_spill] sm:$0xff] }
 0x507   : > { %v3718_v12 = vmul.f32 0.03125, %v3156_v21  ;;  %8583 = vmatprep.mubr.msk.f32.mxu0 %vm458_vm0, %v5006_v42  ;;  %v4744_v5 = vmul.f32 %v15225_v28, %v4481_v23  ;;  %v9233_v14 = vpop.eup %9232  ;;  %9246 = vrsqrt.f32 %v3973_v6  ;;  %7440 = vst.msk [vmem:[%s14837_s16 + $0xb0] sm:$0xff] %vm458_vm0, %v6282_v2 }
 0x508   : > { %7504 = vst.msk [vmem:[%s14837_s16 + $0x2b0] sm:$0xff] %vm458_vm0, %v6922_v36  ;;  %v5135_v27 = vadd.f32 %v15250_v25, %v4872_v47  ;;  %v9235_v16 = vpop.eup %9234  ;;  %v4102_v9 = vadd.f32 1e-05, %v3846_v34  ;;  %v4610_v4 = vmul.f32 %v9233_v14, %v14249_v49 }
 0x509   : > { %v3974_v54 = vadd.f32 1e-05, %v3718_v12  ;;  %v5007_v35 = vadd.f32 %v15250_v25, %v4744_v5  ;;  %v3543_v29 = vpop.xlane.xlu1 %3542  ;;  %v4482_v40 = vmul.f32 %v9235_v16, %v17883_v38 }
 0x50a   : > { %v3159_v61 = vpop.xlane.xlu0 %3158  ;;  %8776 = vmatmul.mubr.msk.f32.gmra.mxu1 %vm458_vm0, %v5135_v27  ;;  %9248 = vrsqrt.f32 %v4102_v9  ;;  %v3847_v43 = vmul.f32 0.03125, %v3543_v29  ;;  %v8717_v37 = vpop.f32.mrf.mxu1  ;;  %v4873_v32 = vmul.f32 %v15225_v28, %v4610_v4 }
 0x50b   : > { %v3719_v59 = vmul.f32 0.03125, %v3159_v61  ;;  %v8525_v7 = vpop.f32.mrf.mxu0  ;;  %8584 = vmatmul.mubr.msk.f32.gmra.mxu0 %vm458_vm0, %v5007_v35  ;;  %v9237_v23 = vpop.eup %9236  ;;  %9250 = vrsqrt.f32 %v3974_v54  ;;  %v6937_v46 = vadd.f32 %v14999_v22, %v8717_v37  ;;  %v4745_v6 = vmul.f32 %v15225_v28, %v4482_v40  ;;  %v17885_v37 = vld [vmem:[#allocation151_spill] sm:$0xff] }
 0x50c   : > { %v6297_v49 = vadd.f32 %v14999_v22, %v8525_v7  ;;  %v9239_v26 = vpop.eup %9238  ;;  %v4611_v0 = vmul.f32 %v9237_v23, %v14244_v58  ;;  %v4103_v42 = vadd.f32 1e-05, %v3847_v43  ;;  %v6931_v62 = vpop.f32.mrf.mxu1  ;;  %v5136_v21 = vadd.f32 %v15250_v25, %v4873_v32 }
 0x50d   : > { %v3975_v2 = vadd.f32 1e-05, %v3719_v59  ;;  %v6291_v36 = vpop.f32.mrf.mxu0  ;;  %v4483_v47 = vmul.f32 %v9239_v26, %v17884_v53  ;;  %7507 = vst.msk [vmem:[%s14837_s16 + $0x2c8] sm:$0xff] %vm458_vm0, %v6937_v46  ;;  %v6932_v12 = vadd.f32 %v14999_v22, %v6931_v62  ;;  %v3546_v5 = vpop.xlane.xlu1 %3545  ;;  %v5008_v14 = vadd.f32 %v15250_v25, %v4745_v6 }
 0x50e   : > { %7443 = vst.msk [vmem:[%s14837_s16 + $0xc8] sm:$0xff] %vm458_vm0, %v6297_v49  ;;  %v6292_v34 = vadd.f32 %v14999_v22, %v6291_v36  ;;  %v3162_v58 = vpop.xlane.xlu0 %3161  ;;  %9252 = vrsqrt.f32 %v4103_v42  ;;  %v3848_v27 = vmul.f32 0.03125, %v3546_v5  ;;  %8778 = vmatprep.mubr.msk.f32.mxu1 %vm458_vm0, %v5136_v21  ;;  %v4874_v9 = vmul.f32 %v15225_v28, %v4611_v0  ;;  %v17886_v5 = vld [vmem:[#allocation42_spill] sm:$0xff] }
 0x50f   : > { %v3720_v16 = vmul.f32 0.03125, %v3162_v58  ;;  %v9241_v54 = vpop.eup %9240  ;;  %9254 = vrsqrt.f32 %v3975_v2  ;;  %7506 = vst.msk [vmem:[%s14837_s16 + $0x2c0] sm:$0xff] %vm458_vm0, %v6932_v12  ;;  %8586 = vmatprep.mubr.msk.f32.mxu0 %vm458_vm0, %v5008_v14  ;;  %v4746_v35 = vmul.f32 %v15225_v28, %v4483_v47 }
 0x510   : > { %7442 = vst.msk [vmem:[%s14837_s16 + $0xc0] sm:$0xff] %vm458_vm0, %v6292_v34  ;;  %v9243_v4 = vpop.eup %9242  ;;  %v4104_v29 = vadd.f32 1e-05, %v3848_v27  ;;  %v5137_v38 = vadd.f32 %v15250_v25, %v4874_v9  ;;  %v4612_v40 = vmul.f32 %v9241_v54, %v14331_v18 }
 0x511   : > { %v3976_v61 = vadd.f32 1e-05, %v3720_v16  ;;  %v3549_v43 = vpop.xlane.xlu1 %3548  ;;  %v5009_v7 = vadd.f32 %v15250_v25, %v4746_v35  ;;  %v4484_v32 = vmul.f32 %v9243_v4, %v17885_v37 }
 0x512   : > { %v3165_v59 = vpop.xlane.xlu0 %3164  ;;  %9256 = vrsqrt.f32 %v4104_v29  ;;  %v3849_v23 = vmul.f32 0.03125, %v3549_v43  ;;  %v8720_v6 = vpop.f32.mrf.mxu1  ;;  %8779 = vmatmul.mubr.msk.f32.gmra.mxu1 %vm458_vm0, %v5137_v38  ;;  %v4875_v26 = vmul.f32 %v15225_v28, %v4612_v40 }
 0x513   : > { %v3721_v49 = vmul.f32 0.03125, %v3165_v59  ;;  %v8528_v46 = vpop.f32.mrf.mxu0  ;;  %v9245_v0 = vpop.eup %9244  ;;  %9258 = vrsqrt.f32 %v3976_v61  ;;  %8587 = vmatmul.mubr.msk.f32.gmra.mxu0 %vm458_vm0, %v5009_v7  ;;  %v6947_v42 = vadd.f32 %v14999_v22, %v8720_v6  ;;  %v4747_v2 = vmul.f32 %v15225_v28, %v4484_v32 }
 0x514   : > { %v6307_v18 = vadd.f32 %v14999_v22, %v8528_v46  ;;  %v9247_v36 = vpop.eup %9246  ;;  %v4613_v62 = vmul.f32 %v9245_v0, %v14326_v57  ;;  %v4105_v21 = vadd.f32 1e-05, %v3849_v23  ;;  %v6941_v34 = vpop.f32.mrf.mxu1  ;;  %v5138_v12 = vadd.f32 %v15250_v25, %v4875_v26  ;;  %v17887_v23 = vld [vmem:[#allocation220_spill] sm:$0xff] }
 0x515   : > { %v3977_v53 = vadd.f32 1e-05, %v3721_v49  ;;  %v6301_v47 = vpop.f32.mrf.mxu0  ;;  %v4485_v58 = vmul.f32 %v9247_v36, %v17886_v5  ;;  %7509 = vst.msk [vmem:[%s14837_s16 + $0x2d8] sm:$0xff] %vm458_vm0, %v6947_v42  ;;  %v6942_v27 = vadd.f32 %v14999_v22, %v6941_v34  ;;  %v5010_v9 = vadd.f32 %v15250_v25, %v4747_v2 }
 0x516   : > { %7445 = vst.msk [vmem:[%s14837_s16 + $0xd8] sm:$0xff] %vm458_vm0, %v6307_v18  ;;  %v6302_v14 = vadd.f32 %v14999_v22, %v6301_v47  ;;  %v3552_v16 = vpop.xlane.xlu1 %3551  ;;  %v3168_v57 = vpop.xlane.xlu0 %3167  ;;  %9260 = vrsqrt.f32 %v4105_v21  ;;  %8781 = vmatprep.mubr.msk.f32.mxu1 %vm458_vm0, %v5138_v12  ;;  %v4876_v4 = vmul.f32 %v15225_v28, %v4613_v62 }
 0x517   : > { %v3850_v54 = vmul.f32 0.03125, %v3552_v16  ;;  %v3722_v35 = vmul.f32 0.03125, %v3168_v57  ;;  %v9249_v29 = vpop.eup %9248  ;;  %9262 = vrsqrt.f32 %v3977_v53  ;;  %7508 = vst.msk [vmem:[%s14837_s16 + $0x2d0] sm:$0xff] %vm458_vm0, %v6942_v27  ;;  %8589 = vmatprep.mubr.msk.f32.mxu0 %vm458_vm0, %v5010_v9  ;;  %v4748_v22 = vmul.f32 %v15225_v28, %v4485_v58 }
 0x518   : > { %7444 = vst.msk [vmem:[%s14837_s16 + $0xd0] sm:$0xff] %vm458_vm0, %v6302_v14  ;;  %v9251_v61 = vpop.eup %9250  ;;  %v5139_v43 = vadd.f32 %v15250_v25, %v4876_v4  ;;  %v4614_v59 = vmul.f32 %v9249_v29, %v14425_v3  ;;  %v15361_v3 = vld [vmem:[%s16003_s8] ss:$0 sm:$0xff]  ;;  %v17888_v14 = vld [vmem:[#allocation181_spill] sm:$0xff] }
 0x519   : > { %v4106_v38 = vadd.f32 1e-05, %v3850_v54  ;;  %v3978_v40 = vadd.f32 1e-05, %v3722_v35  ;;  %v5011_v32 = vadd.f32 %v15250_v25, %v4748_v22  ;;  %v4486_v49 = vmul.f32 %v9251_v61, %v17887_v23 }
 0x51a   : > { %v3555_v7 = vpop.xlane.xlu1 %3554  ;;  %v3171_v37 = vpop.xlane.xlu0 %3170  ;;  %8782 = vmatmul.mubr.msk.f32.gmra.mxu1 %vm458_vm0, %v5139_v43  ;;  %v4877_v18 = vmul.f32 %v15225_v28, %v4614_v59 }
 0x51b   : > { %9264 = vrsqrt.f32 %v4106_v38  ;;  %v3851_v46 = vmul.f32 0.03125, %v3555_v7  ;;  %v3723_v6 = vmul.f32 0.03125, %v3171_v37  ;;  %v8531_v26 = vpop.f32.mrf.mxu0  ;;  %v8723_v0 = vpop.f32.mrf.mxu1  ;;  %8590 = vmatmul.mubr.msk.f32.gmra.mxu0 %vm458_vm0, %v5011_v32  ;;  %v4749_v62 = vmul.f32 %v15225_v28, %v4486_v49  ;;  %v17889_v49 = vld [vmem:[#allocation190_spill] sm:$0xff] }
 0x51c   : > { %v9253_v42 = vpop.eup %9252  ;;  %9266 = vrsqrt.f32 %v3978_v40  ;;  %v6317_v2 = vadd.f32 %v15361_v3, %v8531_v26  ;;  %v6957_v36 = vadd.f32 %v15361_v3, %v8723_v0  ;;  %v5140_v58 = vadd.f32 %v15250_v25, %v4877_v18 }
 0x51d   : > { %v9255_v21 = vpop.eup %9254  ;;  %v4615_v53 = vmul.f32 %v9253_v42, %v14420_v24  ;;  %v4107_v47 = vadd.f32 1e-05, %v3851_v46  ;;  %v3979_v34 = vadd.f32 1e-05, %v3723_v6  ;;  %v6311_v12 = vpop.f32.mrf.mxu0  ;;  %v5012_v54 = vadd.f32 %v15250_v25, %v4749_v62 }
 0x51e   : > { %v6951_v5 = vpop.f32.mrf.mxu1  ;;  %v4487_v27 = vmul.f32 %v9255_v21, %v17888_v14  ;;  %7447 = vst.msk [vmem:[%s14837_s16 + $0xe8] sm:$0xff] %vm458_vm0, %v6317_v2  ;;  %7511 = vst.msk [vmem:[%s14837_s16 + $0x2e8] sm:$0xff] %vm458_vm0, %v6957_v36  ;;  %v6312_v16 = vadd.f32 %v15361_v3, %v6311_v12  ;;  %v3558_v9 = vpop.xlane.xlu1 %3557  ;;  %8784 = vmatprep.mubr.msk.f32.mxu1 %vm458_vm0, %v5140_v58  ;;  %v17890_v14 = vld [vmem:[#allocation219_spill] sm:$0xff] }
 0x51f   : > { %v6952_v57 = vadd.f32 %v15361_v3, %v6951_v5  ;;  %v3174_v24 = vpop.xlane.xlu0 %3173  ;;  %9268 = vrsqrt.f32 %v4107_v47  ;;  %v3852_v35 = vmul.f32 0.03125, %v3558_v9  ;;  %v4878_v29 = vmul.f32 %v15225_v28, %v4615_v53  ;;  %v9257_v22 = vpop.eup %9256  ;;  %8592 = vmatprep.mubr.msk.f32.mxu0 %vm458_vm0, %v5012_v54 }
 0x520   : > { %v3724_v4 = vmul.f32 0.03125, %v3174_v24  ;;  %9270 = vrsqrt.f32 %v3979_v34  ;;  %7446 = vst.msk [vmem:[%s14837_s16 + $0xe0] sm:$0xff] %vm458_vm0, %v6312_v16  ;;  %v4750_v61 = vmul.f32 %v15225_v28, %v4487_v27  ;;  %v9259_v38 = vpop.eup %9258  ;;  %v4616_v7 = vmul.f32 %v9257_v22, %v14521_v41 }
 0x521   : > { %7510 = vst.msk [vmem:[%s14837_s16 + $0x2e0] sm:$0xff] %vm458_vm0, %v6952_v57  ;;  %v4108_v40 = vadd.f32 1e-05, %v3852_v35  ;;  %v5141_v59 = vadd.f32 %v15250_v25, %v4878_v29  ;;  %v4488_v46 = vmul.f32 %v9259_v38, %v17889_v49 }
 0x522   : > { %v3980_v43 = vadd.f32 1e-05, %v3724_v4  ;;  %v3561_v37 = vpop.xlane.xlu1 %3560  ;;  %v5013_v23 = vadd.f32 %v15250_v25, %v4750_v61  ;;  %v8726_v18 = vpop.f32.mrf.mxu1  ;;  %v4879_v42 = vmul.f32 %v15225_v28, %v4616_v7 }
 0x523   : > { %v3177_v32 = vpop.xlane.xlu0 %3176  ;;  %9272 = vrsqrt.f32 %v4108_v40  ;;  %v3853_v6 = vmul.f32 0.03125, %v3561_v37  ;;  %v8534_v0 = vpop.f32.mrf.mxu0  ;;  %8785 = vmatmul.mubr.msk.f32.gmra.mxu1 %vm458_vm0, %v5141_v59  ;;  %v6967_v36 = vadd.f32 %v15361_v3, %v8726_v18  ;;  %v4751_v62 = vmul.f32 %v15225_v28, %v4488_v46 }
 0x524   : > { %v3725_v26 = vmul.f32 0.03125, %v3177_v32  ;;  %v9261_v2 = vpop.eup %9260  ;;  %9274 = vrsqrt.f32 %v3980_v43  ;;  %v6327_v41 = vadd.f32 %v15361_v3, %v8534_v0  ;;  %8593 = vmatmul.mubr.msk.f32.gmra.mxu0 %vm458_vm0, %v5013_v23  ;;  %v6961_v5 = vpop.f32.mrf.mxu1  ;;  %v5142_v58 = vadd.f32 %v15250_v25, %v4879_v42  ;;  %v17891_v23 = vld [vmem:[#allocation86_spill] sm:$0xff] }
 0x525   : > { %v9263_v21 = vpop.eup %9262  ;;  %v4617_v53 = vmul.f32 %v9261_v2, %v14518_v55  ;;  %v4109_v47 = vadd.f32 1e-05, %v3853_v6  ;;  %v6321_v12 = vpop.f32.mrf.mxu0  ;;  %7513 = vst.msk [vmem:[%s14837_s16 + $0x2f8] sm:$0xff] %vm458_vm0, %v6967_v36  ;;  %v6962_v57 = vadd.f32 %v15361_v3, %v6961_v5  ;;  %v5014_v24 = vadd.f32 %v15250_v25, %v4751_v62  ;;  %v17892_v5 = vld [vmem:[#allocation199_spill] sm:$0xff] }
 0x526   : > { %v3981_v34 = vadd.f32 1e-05, %v3725_v26  ;;  %v4489_v27 = vmul.f32 %v9263_v21, %v17890_v14  ;;  %7449 = vst.msk [vmem:[%s14837_s16 + $0xf8] sm:$0xff] %vm458_vm0, %v6327_v41  ;;  %v6322_v16 = vadd.f32 %v15361_v3, %v6321_v12  ;;  %v3564_v9 = vpop.xlane.xlu1 %3563  ;;  %8787 = vmatprep.mubr.msk.f32.mxu1 %vm458_vm0, %v5142_v58 }
 0x527   : > { %v3180_v55 = vpop.xlane.xlu0 %3179  ;;  %9276 = vrsqrt.f32 %v4109_v47  ;;  %v3854_v54 = vmul.f32 0.03125, %v3564_v9  ;;  %v4880_v4 = vmul.f32 %v15225_v28, %v4617_v53  ;;  %7512 = vst.msk [vmem:[%s14837_s16 + $0x2f0] sm:$0xff] %vm458_vm0, %v6962_v57  ;;  %8595 = vmatprep.mubr.msk.f32.mxu0 %vm458_vm0, %v5014_v24 }
 0x528   : > { %v3726_v35 = vmul.f32 0.03125, %v3180_v55  ;;  %v9265_v29 = vpop.eup %9264  ;;  %9278 = vrsqrt.f32 %v3981_v34  ;;  %7448 = vst.msk [vmem:[%s14837_s16 + $0xf0] sm:$0xff] %vm458_vm0, %v6322_v16  ;;  %v4752_v22 = vmul.f32 %v15225_v28, %v4489_v27 }
 0x529   : > { %v9267_v61 = vpop.eup %9266  ;;  %v4110_v38 = vadd.f32 1e-05, %v3854_v54  ;;  %v5143_v43 = vadd.f32 %v15250_v25, %v4880_v4  ;;  %v4618_v59 = vmul.f32 %v9265_v29, %v14567_v13 }
 0x52a   : > { %v3982_v40 = vadd.f32 1e-05, %v3726_v35  ;;  %v3567_v7 = vpop.xlane.xlu1 %3566  ;;  %v5015_v32 = vadd.f32 %v15250_v25, %v4752_v22  ;;  %v4490_v49 = vmul.f32 %v9267_v61, %v17891_v23  ;;  %v8729_v0 = vpop.f32.mrf.mxu1 }
 0x52b   : > { %v3183_v37 = vpop.xlane.xlu0 %3182  ;;  %9280 = vrsqrt.f32 %v4110_v38  ;;  %v3855_v46 = vmul.f32 0.03125, %v3567_v7  ;;  %v8537_v26 = vpop.f32.mrf.mxu0  ;;  %8788 = vmatmul.mubr.msk.f32.gmra.mxu1 %vm458_vm0, %v5143_v43  ;;  %v4881_v18 = vmul.f32 %v15225_v28, %v4618_v59  ;;  %v6977_v2 = vadd.f32 %v15361_v3, %v8729_v0  ;;  %v17893_v7 = vld [vmem:[#allocation267_spill] sm:$0xff] }
 0x52c   : > { %v3727_v6 = vmul.f32 0.03125, %v3183_v37  ;;  %v9269_v42 = vpop.eup %9268  ;;  %9282 = vrsqrt.f32 %v3982_v40  ;;  %v6337_v13 = vadd.f32 %v15361_v3, %v8537_v26  ;;  %8596 = vmatmul.mubr.msk.f32.gmra.mxu0 %vm458_vm0, %v5015_v32  ;;  %v4753_v41 = vmul.f32 %v15225_v28, %v4490_v49  ;;  %v6971_v34 = vpop.f32.mrf.mxu1 }
 0x52d   : > { %v9271_v36 = vpop.eup %9270  ;;  %v4619_v62 = vmul.f32 %v9269_v42, %v14588_v52  ;;  %v4111_v21 = vadd.f32 1e-05, %v3855_v46  ;;  %v6331_v47 = vpop.f32.mrf.mxu0  ;;  %v5144_v12 = vadd.f32 %v15250_v25, %v4881_v18  ;;  %7387 = vst.msk [vmem:[%s14079_s20 + $0x308] sm:$0xff] %vm458_vm0, %v6977_v2  ;;  %v6972_v27 = vadd.f32 %v15361_v3, %v6971_v34 }
 0x52e   : > { %v3983_v53 = vadd.f32 1e-05, %v3727_v6  ;;  %v4491_v58 = vmul.f32 %v9271_v36, %v17892_v5  ;;  %7323 = vst.msk [vmem:[%s14079_s20 + $0x108] sm:$0xff] %vm458_vm0, %v6337_v13  ;;  %v6332_v14 = vadd.f32 %v15361_v3, %v6331_v47  ;;  %v3570_v16 = vpop.xlane.xlu1 %3569  ;;  %v5016_v57 = vadd.f32 %v15250_v25, %v4753_v41 }
 0x52f   : > { %v3186_v52 = vpop.xlane.xlu0 %3185  ;;  %9284 = vrsqrt.f32 %v4111_v21  ;;  %v3856_v9 = vmul.f32 0.03125, %v3570_v16  ;;  %8790 = vmatprep.mubr.msk.f32.mxu1 %vm458_vm0, %v5144_v12  ;;  %v4882_v24 = vmul.f32 %v15225_v28, %v4619_v62  ;;  %7386 = vst.msk [vmem:[%s14079_s20 + $0x300] sm:$0xff] %vm458_vm0, %v6972_v27 }
 0x530   : > { %v3728_v55 = vmul.f32 0.03125, %v3186_v52  ;;  %v9273_v54 = vpop.eup %9272  ;;  %9286 = vrsqrt.f32 %v3983_v53  ;;  %7322 = vst.msk [vmem:[%s14079_s20 + $0x100] sm:$0xff] %vm458_vm0, %v6332_v14  ;;  %8598 = vmatprep.mubr.msk.f32.mxu0 %vm458_vm0, %v5016_v57  ;;  %v4754_v35 = vmul.f32 %v15225_v28, %v4491_v58  ;;  %v17894_v53 = vld [vmem:[#allocation241_spill] sm:$0xff] }
 0x531   : > { %v9275_v4 = vpop.eup %9274  ;;  %v4112_v29 = vadd.f32 1e-05, %v3856_v9  ;;  %v5145_v61 = vadd.f32 %v15250_v25, %v4882_v24  ;;  %v4620_v38 = vmul.f32 %v9273_v54, %v14622_v10 }
 0x532   : > { %v3984_v22 = vadd.f32 1e-05, %v3728_v55  ;;  %v3573_v40 = vpop.xlane.xlu1 %3572  ;;  %v5017_v59 = vadd.f32 %v15250_v25, %v4754_v35  ;;  %v4492_v37 = vmul.f32 %v9275_v4, %v17893_v7  ;;  %v8732_v46 = vpop.f32.mrf.mxu1 }
 0x533   : > { %v3189_v43 = vpop.xlane.xlu0 %3188  ;;  %9288 = vrsqrt.f32 %v4112_v29  ;;  %v3857_v32 = vmul.f32 0.03125, %v3573_v40  ;;  %v8540_v49 = vpop.f32.mrf.mxu0  ;;  %8791 = vmatmul.mubr.msk.f32.gmra.mxu1 %vm458_vm0, %v5145_v61  ;;  %v4883_v6 = vmul.f32 %v15225_v28, %v4620_v38  ;;  %v6987_v0 = vadd.f32 %v15361_v3, %v8732_v46  ;;  %v17895_v61 = vld [vmem:[#allocation136_spill] sm:$0xff] }
 0x534   : > { %v3729_v23 = vmul.f32 0.03125, %v3189_v43  ;;  %v9277_v26 = vpop.eup %9276  ;;  %9290 = vrsqrt.f32 %v3984_v22  ;;  %v6347_v10 = vadd.f32 %v15361_v3, %v8540_v49  ;;  %8599 = vmatmul.mubr.msk.f32.gmra.mxu0 %vm458_vm0, %v5017_v59  ;;  %v4755_v18 = vmul.f32 %v15225_v28, %v4492_v37  ;;  %v6981_v62 = vpop.f32.mrf.mxu1 }
 0x535   : > { %v9279_v42 = vpop.eup %9278  ;;  %v4621_v13 = vmul.f32 %v9277_v26, %v14633_v15  ;;  %v4113_v2 = vadd.f32 1e-05, %v3857_v32  ;;  %v6341_v36 = vpop.f32.mrf.mxu0  ;;  %v5146_v21 = vadd.f32 %v15250_v25, %v4883_v6  ;;  %7389 = vst.msk [vmem:[%s14079_s20 + $0x318] sm:$0xff] %vm458_vm0, %v6987_v0  ;;  %v6982_v12 = vadd.f32 %v15361_v3, %v6981_v62 }
 0x536   : > { %v3985_v41 = vadd.f32 1e-05, %v3729_v23  ;;  %v4493_v47 = vmul.f32 %v9279_v42, %v17894_v53  ;;  %7325 = vst.msk [vmem:[%s14079_s20 + $0x118] sm:$0xff] %vm458_vm0, %v6347_v10  ;;  %v6342_v34 = vadd.f32 %v15361_v3, %v6341_v36  ;;  %v3576_v5 = vpop.xlane.xlu1 %3575  ;;  %v5018_v58 = vadd.f32 %v15250_v25, %v4755_v18 }
 0x537   : > { %v3192_v15 = vpop.xlane.xlu0 %3191  ;;  %9292 = vrsqrt.f32 %v4113_v2  ;;  %v3858_v14 = vmul.f32 0.03125, %v3576_v5  ;;  %8793 = vmatprep.mubr.msk.f32.mxu1 %vm458_vm0, %v5146_v21  ;;  %v4884_v16 = vmul.f32 %v15225_v28, %v4621_v13  ;;  %7388 = vst.msk [vmem:[%s14079_s20 + $0x310] sm:$0xff] %vm458_vm0, %v6982_v12  ;;  %v17896_v13 = vld [vmem:[#allocation234_spill] sm:$0xff] }
 0x538   : > { %v3730_v27 = vmul.f32 0.03125, %v3192_v15  ;;  %v9281_v52 = vpop.eup %9280  ;;  %9294 = vrsqrt.f32 %v3985_v41  ;;  %7324 = vst.msk [vmem:[%s14079_s20 + $0x110] sm:$0xff] %vm458_vm0, %v6342_v34  ;;  %8601 = vmatprep.mubr.msk.f32.mxu0 %vm458_vm0, %v5018_v58  ;;  %v4756_v57 = vmul.f32 %v15225_v28, %v4493_v47 }
 0x539   : > { %v9283_v9 = vpop.eup %9282  ;;  %v4114_v55 = vadd.f32 1e-05, %v3858_v14  ;;  %v5147_v54 = vadd.f32 %v15250_v25, %v4884_v16  ;;  %v4622_v35 = vmul.f32 %v9281_v52, %v14672_v20 }
 0x53a   : > { %v3986_v24 = vadd.f32 1e-05, %v3730_v27  ;;  %v3579_v4 = vpop.xlane.xlu1 %3578  ;;  %v5019_v22 = vadd.f32 %v15250_v25, %v4756_v57  ;;  %v4494_v38 = vmul.f32 %v9283_v9, %v17895_v61  ;;  %v8735_v7 = vpop.f32.mrf.mxu1 }
 0x53b   : > { %v3195_v29 = vpop.xlane.xlu0 %3194  ;;  %9296 = vrsqrt.f32 %v4114_v55  ;;  %v3859_v40 = vmul.f32 0.03125, %v3579_v4  ;;  %v8543_v59 = vpop.f32.mrf.mxu0  ;;  %8794 = vmatmul.mubr.msk.f32.gmra.mxu1 %vm458_vm0, %v5147_v54  ;;  %v4885_v37 = vmul.f32 %v15225_v28, %v4622_v35  ;;  %v6997_v23 = vadd.f32 %v15361_v3, %v8735_v7  ;;  %v17897_v55 = vld [vmem:[#allocation255_spill] sm:$0xff] }
 0x53c   : > { %v3731_v43 = vmul.f32 0.03125, %v3195_v29  ;;  %v9285_v32 = vpop.eup %9284  ;;  %9298 = vrsqrt.f32 %v3986_v24  ;;  %v6357_v20 = vadd.f32 %v15361_v3, %v8543_v59  ;;  %8602 = vmatmul.mubr.msk.f32.gmra.mxu0 %vm458_vm0, %v5019_v22  ;;  %v4757_v49 = vmul.f32 %v15225_v28, %v4494_v38  ;;  %v6991_v18 = vpop.f32.mrf.mxu1 }
 0x53d   : > { %v9287_v46 = vpop.eup %9286  ;;  %v4623_v6 = vmul.f32 %v9285_v32, %v14686_v51  ;;  %v4115_v26 = vadd.f32 1e-05, %v3859_v40  ;;  %v6351_v0 = vpop.f32.mrf.mxu0  ;;  %v5148_v42 = vadd.f32 %v15250_v25, %v4885_v37  ;;  %7391 = vst.msk [vmem:[%s14079_s20 + $0x328] sm:$0xff] %vm458_vm0, %v6997_v23  ;;  %v6992_v36 = vadd.f32 %v15361_v3, %v6991_v18 }
 0x53e   : > { %v3987_v10 = vadd.f32 1e-05, %v3731_v43  ;;  %v4495_v2 = vmul.f32 %v9287_v46, %v17896_v13  ;;  %7327 = vst.msk [vmem:[%s14079_s20 + $0x128] sm:$0xff] %vm458_vm0, %v6357_v20  ;;  %v6352_v41 = vadd.f32 %v15361_v3, %v6351_v0  ;;  %v3582_v62 = vpop.xlane.xlu1 %3581  ;;  %v5020_v21 = vadd.f32 %v15250_v25, %v4757_v49  ;;  %v17898_v49 = vld [vmem:[#allocation252_spill] sm:$0xff] }
 0x53f   : > { %v3198_v51 = vpop.xlane.xlu0 %3197  ;;  %9300 = vrsqrt.f32 %v4115_v26  ;;  %v3860_v53 = vmul.f32 0.03125, %v3582_v62  ;;  %8796 = vmatprep.mubr.msk.f32.mxu1 %vm458_vm0, %v5148_v42  ;;  %v4886_v34 = vmul.f32 %v15225_v28, %v4623_v6  ;;  %7390 = vst.msk [vmem:[%s14079_s20 + $0x320] sm:$0xff] %vm458_vm0, %v6992_v36 }
 0x540   : > { %v3732_v47 = vmul.f32 0.03125, %v3198_v51  ;;  %v9289_v12 = vpop.eup %9288  ;;  %9302 = vrsqrt.f32 %v3987_v10  ;;  %7326 = vst.msk [vmem:[%s14079_s20 + $0x120] sm:$0xff] %vm458_vm0, %v6352_v41  ;;  %8604 = vmatprep.mubr.msk.f32.mxu0 %vm458_vm0, %v5020_v21  ;;  %v4758_v5 = vmul.f32 %v15225_v28, %v4495_v2 }
 0x541   : > { %v9291_v15 = vpop.eup %9290  ;;  %v4116_v58 = vadd.f32 1e-05, %v3860_v53  ;;  %v5149_v27 = vadd.f32 %v15250_v25, %v4886_v34  ;;  %v4624_v16 = vmul.f32 %v9289_v12, %v14727_v11 }
 0x542   : > { %v3988_v14 = vadd.f32 1e-05, %v3732_v47  ;;  %v3585_v52 = vpop.xlane.xlu1 %3584  ;;  %v5021_v9 = vadd.f32 %v15250_v25, %v4758_v5  ;;  %v4496_v24 = vmul.f32 %v9291_v15, %v17897_v55  ;;  %v8738_v29 = vpop.f32.mrf.mxu1  ;;  %v17899_v5 = vld [vmem:[#allocation114_spill] sm:$0xff] }
 0x543   : > { %v3201_v57 = vpop.xlane.xlu0 %3200  ;;  %9304 = vrsqrt.f32 %v4116_v58  ;;  %v3861_v54 = vmul.f32 0.03125, %v3585_v52  ;;  %v8546_v4 = vpop.f32.mrf.mxu0  ;;  %8797 = vmatmul.mubr.msk.f32.gmra.mxu1 %vm458_vm0, %v5149_v27  ;;  %v4887_v22 = vmul.f32 %v15225_v28, %v4624_v16  ;;  %v7007_v38 = vadd.f32 %v15361_v3, %v8738_v29 }
 0x544   : > { %v3733_v35 = vmul.f32 0.03125, %v3201_v57  ;;  %v9293_v61 = vpop.eup %9292  ;;  %9306 = vrsqrt.f32 %v3988_v14  ;;  %v6367_v11 = vadd.f32 %v15361_v3, %v8546_v4  ;;  %8605 = vmatmul.mubr.msk.f32.gmra.mxu0 %vm458_vm0, %v5021_v9  ;;  %v4759_v40 = vmul.f32 %v15225_v28, %v4496_v24  ;;  %v7001_v20 = vpop.f32.mrf.mxu1 }
 0x545   : > { %v9295_v43 = vpop.eup %9294  ;;  %v4625_v59 = vmul.f32 %v9293_v61, %v14736_v48  ;;  %v4117_v7 = vadd.f32 1e-05, %v3861_v54  ;;  %v6361_v32 = vpop.f32.mrf.mxu0  ;;  %v5150_v23 = vadd.f32 %v15250_v25, %v4887_v22  ;;  %7393 = vst.msk [vmem:[%s14079_s20 + $0x338] sm:$0xff] %vm458_vm0, %v7007_v38  ;;  %v7002_v26 = vadd.f32 %v15361_v3, %v7001_v20  ;;  %v17900_v22 = vld [vmem:[#allocation166_spill] sm:$0xff] }
 0x546   : > { %v3989_v37 = vadd.f32 1e-05, %v3733_v35  ;;  %v4497_v46 = vmul.f32 %v9295_v43, %v17898_v49  ;;  %7329 = vst.msk [vmem:[%s14079_s20 + $0x138] sm:$0xff] %vm458_vm0, %v6367_v11  ;;  %v6362_v6 = vadd.f32 %v15361_v3, %v6361_v32  ;;  %v3588_v10 = vpop.xlane.xlu1 %3587  ;;  %v5022_v0 = vadd.f32 %v15250_v25, %v4759_v40 }
 0x547   : > { %v3204_v48 = vpop.xlane.xlu0 %3203  ;;  %9308 = vrsqrt.f32 %v4117_v7  ;;  %v3862_v18 = vmul.f32 0.03125, %v3588_v10  ;;  %8799 = vmatprep.mubr.msk.f32.mxu1 %vm458_vm0, %v5150_v23  ;;  %v4888_v13 = vmul.f32 %v15225_v28, %v4625_v59  ;;  %7392 = vst.msk [vmem:[%s14079_s20 + $0x330] sm:$0xff] %vm458_vm0, %v7002_v26 }
 0x548   : > { %v3734_v42 = vmul.f32 0.03125, %v3204_v48  ;;  %v9297_v2 = vpop.eup %9296  ;;  %9310 = vrsqrt.f32 %v3989_v37  ;;  %7328 = vst.msk [vmem:[%s14079_s20 + $0x130] sm:$0xff] %vm458_vm0, %v6362_v6  ;;  %8607 = vmatprep.mubr.msk.f32.mxu0 %vm458_vm0, %v5022_v0  ;;  %v4760_v41 = vmul.f32 %v15225_v28, %v4497_v46  ;;  %v15548_v37 = vld [vmem:[%s16000_s5] ss:$0 sm:$0xff] }
 0x549   : > { %v9299_v36 = vpop.eup %9298  ;;  %v4118_v62 = vadd.f32 1e-05, %v3862_v18  ;;  %v5151_v21 = vadd.f32 %v15250_v25, %v4888_v13  ;;  %v4626_v53 = vmul.f32 %v9297_v2, %v14772_v63 }
 0x54a   : > { %v3990_v51 = vadd.f32 1e-05, %v3734_v42  ;;  %v3591_v47 = vpop.xlane.xlu1 %3590  ;;  %v5023_v12 = vadd.f32 %v15250_v25, %v4760_v41  ;;  %v4498_v15 = vmul.f32 %v9299_v36, %v17899_v5  ;;  %v17901_v42 = vld [vmem:[#allocation13_spill] sm:$0xff] }
 0x54b   : > { %v3207_v34 = vpop.xlane.xlu0 %3206  ;;  %9312 = vrsqrt.f32 %v4118_v62  ;;  %v3863_v58 = vmul.f32 0.03125, %v3591_v47  ;;  %8800 = vmatmul.mubr.msk.f32.gmra.mxu1 %vm458_vm0, %v5151_v21  ;;  %v4889_v16 = vmul.f32 %v15225_v28, %v4626_v53  ;;  %v17902_v53 = vld [vmem:[#allocation129_spill] sm:$0xff] }
 0x54c   : > { %v3735_v14 = vmul.f32 0.03125, %v3207_v34  ;;  %v8549_v27 = vpop.f32.mrf.mxu0  ;;  %v9301_v52 = vpop.eup %9300  ;;  %9314 = vrsqrt.f32 %v3990_v51  ;;  %8608 = vmatmul.mubr.msk.f32.gmra.mxu0 %vm458_vm0, %v5023_v12  ;;  %v4761_v9 = vmul.f32 %v15225_v28, %v4498_v15  ;;  %v15570_v34 = vld [vmem:[%s16001_s6] ss:$0 sm:$0xff]  ;;  %v17903_v5 = vld [vmem:[#allocation125_spill] sm:$0xff] }
 0x54d   : > { %v6377_v57 = vadd.f32 %v15361_v3, %v8549_v27  ;;  %v8741_v63 = vpop.f32.mrf.mxu1  ;;  %v9303_v55 = vpop.eup %9302  ;;  %v4627_v24 = vmul.f32 %v9301_v52, %v14784_v44  ;;  %v4119_v54 = vadd.f32 1e-05, %v3863_v58  ;;  %v5152_v28 = vadd.f32 %v15250_v25, %v4889_v16 }
 0x54e   : > { %v3991_v35 = vadd.f32 1e-05, %v3735_v14  ;;  %v7017_v4 = vadd.f32 %v15361_v3, %v8741_v63  ;;  %v6371_v29 = vpop.f32.mrf.mxu0  ;;  %v4499_v61 = vmul.f32 %v9303_v55, %v17900_v22  ;;  %v3594_v40 = vpop.xlane.xlu1 %3593  ;;  %v5024_v43 = vadd.f32 %v15250_v25, %v4761_v9 }
 0x54f   : > { %7331 = vst.msk [vmem:[%s14079_s20 + $0x148] sm:$0xff] %vm458_vm0, %v6377_v57  ;;  %v6372_v11 = vadd.f32 %v15361_v3, %v6371_v29  ;;  %v7011_v38 = vpop.f32.mrf.mxu1  ;;  %9316 = vrsqrt.f32 %v4119_v54  ;;  %v3864_v59 = vmul.f32 0.03125, %v3594_v40  ;;  %v3210_v7 = vpop.xlane.xlu0 %3209  ;;  %v4890_v32 = vmul.f32 %v15548_v37, %v4627_v24  ;;  %8802 = vmatprep.mubr.msk.f32.mxu1 %vm458_vm0, %v5152_v28 }
 0x550   : > { %7395 = vst.msk [vmem:[%s14079_s20 + $0x348] sm:$0xff] %vm458_vm0, %v7017_v4  ;;  %v7012_v44 = vadd.f32 %v15361_v3, %v7011_v38  ;;  %v9305_v20 = vpop.eup %9304  ;;  %9318 = vrsqrt.f32 %v3991_v35  ;;  %v3736_v23 = vmul.f32 0.03125, %v3210_v7  ;;  %8610 = vmatprep.mubr.msk.f32.mxu0 %vm458_vm0, %v5024_v43  ;;  %v4762_v49 = vmul.f32 %v15548_v37, %v4499_v61 }
 0x551   : > { %7330 = vst.msk [vmem:[%s14079_s20 + $0x140] sm:$0xff] %vm458_vm0, %v6372_v11  ;;  %v9307_v46 = vpop.eup %9306  ;;  %v4120_v6 = vadd.f32 1e-05, %v3864_v59  ;;  %v5153_v26 = vadd.f32 %v15250_v25, %v4890_v32  ;;  %v4628_v10 = vmul.f32 %v9305_v20, %v14845_v50  ;;  %v17904_v32 = vld [vmem:[#allocation6_spill] sm:$0xff] }
 0x552   : > { %7394 = vst.msk [vmem:[%s14079_s20 + $0x340] sm:$0xff] %vm458_vm0, %v7012_v44  ;;  %v3992_v48 = vadd.f32 1e-05, %v3736_v23  ;;  %v3597_v0 = vpop.xlane.xlu1 %3596  ;;  %v5025_v18 = vadd.f32 %v15250_v25, %v4762_v49  ;;  %v4500_v13 = vmul.f32 %v9307_v46, %v17901_v42  ;;  %v17905_v42 = vld [vmem:[#allocation128_spill] sm:$0xff] }
 0x553   : > { %9320 = vrsqrt.f32 %v4120_v6  ;;  %v3865_v2 = vmul.f32 0.03125, %v3597_v0  ;;  %v3213_v41 = vpop.xlane.xlu0 %3212  ;;  %8803 = vmatmul.mubr.msk.f32.gmra.mxu1 %vm458_vm0, %v5153_v26  ;;  %v4891_v36 = vmul.f32 %v15548_v37, %v4628_v10 }
 0x554   : > { %v9309_v62 = vpop.eup %9308  ;;  %9322 = vrsqrt.f32 %v3992_v48  ;;  %v3737_v51 = vmul.f32 0.03125, %v3213_v41  ;;  %8611 = vmatmul.mubr.msk.f32.gmra.mxu0 %vm458_vm0, %v5025_v18  ;;  %v4763_v50 = vmul.f32 %v15548_v37, %v4500_v13 }
 0x555   : > { %v9311_v21 = vpop.eup %9310  ;;  %v4629_v47 = vmul.f32 %v9309_v62, %v17902_v53  ;;  %v4121_v25 = vadd.f32 1e-05, %v3865_v2  ;;  %v5154_v12 = vadd.f32 %v15570_v34, %v4891_v36 }
 0x556   : > { %v4501_v15 = vmul.f32 %v9311_v21, %v17903_v5  ;;  %v3993_v58 = vadd.f32 1e-05, %v3737_v51  ;;  %v3600_v14 = vpop.xlane.xlu1 %3599  ;;  %v5026_v27 = vadd.f32 %v15570_v34, %v4763_v50  ;;  %v8744_v16 = vpop.f32.mrf.mxu1 }
 0x557   : > { %9324 = vrsqrt.f32 %v4121_v25  ;;  %v3866_v52 = vmul.f32 0.03125, %v3600_v14  ;;  %v3216_v57 = vpop.xlane.xlu0 %3215  ;;  %v7027_v9 = vadd.f32 %v15361_v3, %v8744_v16  ;;  %8805 = vmatprep.mubr.msk.f32.mxu1 %vm458_vm0, %v5154_v12  ;;  %v4892_v55 = vmul.f32 %v15548_v37, %v4629_v47  ;;  %v17906_v16 = vld [vmem:[#allocation116_spill] sm:$0xff] }
 0x558   : > { %v8552_v63 = vpop.f32.mrf.mxu0  ;;  %v9313_v24 = vpop.eup %9312  ;;  %9326 = vrsqrt.f32 %v3993_v58  ;;  %v3738_v54 = vmul.f32 0.03125, %v3216_v57  ;;  %8613 = vmatprep.mubr.msk.f32.mxu0 %vm458_vm0, %v5026_v27  ;;  %v4764_v29 = vmul.f32 %v15548_v37, %v4501_v15 }
 0x559   : > { %v6387_v35 = vadd.f32 %v15361_v3, %v8552_v63  ;;  %v7021_v4 = vpop.f32.mrf.mxu1  ;;  %v9315_v22 = vpop.eup %9314  ;;  %v4122_v61 = vadd.f32 1e-05, %v3866_v52  ;;  %7397 = vst.msk [vmem:[%s14079_s20 + $0x358] sm:$0xff] %vm458_vm0, %v7027_v9  ;;  %v5155_v40 = vadd.f32 %v15570_v34, %v4892_v55  ;;  %v4630_v43 = vmul.f32 %v9313_v24, %v14889_v30 }
 0x55a   : > { %v6381_v11 = vpop.f32.mrf.mxu0  ;;  %v7022_v38 = vadd.f32 %v15361_v3, %v7021_v4  ;;  %v3994_v28 = vadd.f32 1e-05, %v3738_v54  ;;  %v3603_v59 = vpop.xlane.xlu1 %3602  ;;  %v5027_v7 = vadd.f32 %v15570_v34, %v4764_v29  ;;  %v4502_v20 = vmul.f32 %v9315_v22, %v17904_v32 }
 0x55b   : > { %7333 = vst.msk [vmem:[%s14079_s20 + $0x158] sm:$0xff] %vm458_vm0, %v6387_v35  ;;  %v6382_v44 = vadd.f32 %v15361_v3, %v6381_v11  ;;  %9328 = vrsqrt.f32 %v4122_v61  ;;  %v3867_v23 = vmul.f32 0.03125, %v3603_v59  ;;  %v3219_v49 = vpop.xlane.xlu0 %3218  ;;  %8806 = vmatmul.mubr.msk.f32.gmra.mxu1 %vm458_vm0, %v5155_v40  ;;  %v4893_v46 = vmul.f32 %v15548_v37, %v4630_v43 }
 0x55c   : > { %7396 = vst.msk [vmem:[%s14079_s20 + $0x350] sm:$0xff] %vm458_vm0, %v7022_v38  ;;  %v9317_v30 = vpop.eup %9316  ;;  %9330 = vrsqrt.f32 %v3994_v28  ;;  %v3739_v6 = vmul.f32 0.03125, %v3219_v49  ;;  %8614 = vmatmul.mubr.msk.f32.gmra.mxu0 %vm458_vm0, %v5027_v7  ;;  %v4765_v26 = vmul.f32 %v15548_v37, %v4502_v20  ;;  %v17907_v28 = vld [vmem:[#allocation31_spill] sm:$0xff] }
 0x55d   : > { %7332 = vst.msk [vmem:[%s14079_s20 + $0x150] sm:$0xff] %vm458_vm0, %v6382_v44  ;;  %v9319_v10 = vpop.eup %9318  ;;  %v4631_v48 = vmul.f32 %v9317_v30, %v14904_v31  ;;  %v4123_v0 = vadd.f32 1e-05, %v3867_v23  ;;  %v5156_v18 = vadd.f32 %v15570_v34, %v4893_v46 }
 0x55e   : > { %v4503_v13 = vmul.f32 %v9319_v10, %v17905_v42  ;;  %v3995_v2 = vadd.f32 1e-05, %v3739_v6  ;;  %v3606_v41 = vpop.xlane.xlu1 %3605  ;;  %v5028_v36 = vadd.f32 %v15570_v34, %v4765_v26 }
 0x55f   : > { %9332 = vrsqrt.f32 %v4123_v0  ;;  %v3868_v62 = vmul.f32 0.03125, %v3606_v41  ;;  %v3222_v51 = vpop.xlane.xlu0 %3221  ;;  %8808 = vmatprep.mubr.msk.f32.mxu1 %vm458_vm0, %v5156_v18  ;;  %v4894_v50 = vmul.f32 %v15548_v37, %v4631_v48 }
 0x560   : > { %v9321_v21 = vpop.eup %9320  ;;  %9334 = vrsqrt.f32 %v3995_v2  ;;  %v3740_v53 = vmul.f32 0.03125, %v3222_v51  ;;  %8616 = vmatprep.mubr.msk.f32.mxu0 %vm458_vm0, %v5028_v36  ;;  %v4766_v31 = vmul.f32 %v15548_v37, %v4503_v13  ;;  %v17908_v2 = vld [vmem:[#allocation297_spill] sm:$0xff] }
 0x561   : > { %v9323_v47 = vpop.eup %9322  ;;  %v4124_v25 = vadd.f32 1e-05, %v3868_v62  ;;  %v5157_v12 = vadd.f32 %v15570_v34, %v4894_v50  ;;  %v4632_v5 = vmul.f32 %v9321_v21, %v14944_v60 }
 0x562   : > { %v3996_v15 = vadd.f32 1e-05, %v3740_v53  ;;  %v3609_v58 = vpop.xlane.xlu1 %3608  ;;  %v5029_v14 = vadd.f32 %v15570_v34, %v4766_v31  ;;  %v4504_v52 = vmul.f32 %v9323_v47, %v17906_v16 }
 0x563   : > { %v8747_v27 = vpop.f32.mrf.mxu1  ;;  %9336 = vrsqrt.f32 %v4124_v25  ;;  %v3869_v57 = vmul.f32 0.03125, %v3609_v58  ;;  %v3225_v63 = vpop.xlane.xlu0 %3224  ;;  %8809 = vmatmul.mubr.msk.f32.gmra.mxu1 %vm458_vm0, %v5157_v12  ;;  %v4895_v24 = vmul.f32 %v15548_v37, %v4632_v5  ;;  %v17909_v12 = vld [vmem:[#allocation296_spill] sm:$0xff] }
 0x564   : > { %v8555_v9 = vpop.f32.mrf.mxu0  ;;  %v7037_v55 = vadd.f32 %v15361_v3, %v8747_v27  ;;  %v9325_v54 = vpop.eup %9324  ;;  %9338 = vrsqrt.f32 %v3996_v15  ;;  %v3741_v60 = vmul.f32 0.03125, %v3225_v63  ;;  %8617 = vmatmul.mubr.msk.f32.gmra.mxu0 %vm458_vm0, %v5029_v14  ;;  %v4767_v29 = vmul.f32 %v15548_v37, %v4504_v52 }
 0x565   : > { %v6397_v35 = vadd.f32 %v15361_v3, %v8555_v9  ;;  %v7031_v4 = vpop.f32.mrf.mxu1  ;;  %v9327_v22 = vpop.eup %9326  ;;  %v4633_v61 = vmul.f32 %v9325_v54, %v14952_v33  ;;  %v4125_v11 = vadd.f32 1e-05, %v3869_v57  ;;  %v5158_v43 = vadd.f32 %v15570_v34, %v4895_v24 }
 0x566   : > { %7399 = vst.msk [vmem:[%s14079_s20 + $0x368] sm:$0xff] %vm458_vm0, %v7037_v55  ;;  %v6391_v38 = vpop.f32.mrf.mxu0  ;;  %v7032_v40 = vadd.f32 %v15361_v3, %v7031_v4  ;;  %v4505_v44 = vmul.f32 %v9327_v22, %v17907_v28  ;;  %v3997_v59 = vadd.f32 1e-05, %v3741_v60  ;;  %v3612_v32 = vpop.xlane.xlu1 %3611  ;;  %v5030_v20 = vadd.f32 %v15570_v34, %v4767_v29  ;;  %v17910_v22 = vld [vmem:[#allocation32_spill] sm:$0xff]  ;;  %v17911_v28 = vld [vmem:[#allocation29_spill] sm:$0xff] }
 0x567   : > { %7335 = vst.msk [vmem:[%s14079_s20 + $0x168] sm:$0xff] %vm458_vm0, %v6397_v35  ;;  %v6392_v7 = vadd.f32 %v15361_v3, %v6391_v38  ;;  %9340 = vrsqrt.f32 %v4125_v11  ;;  %v3870_v33 = vmul.f32 0.03125, %v3612_v32  ;;  %v3228_v23 = vpop.xlane.xlu0 %3227  ;;  %8811 = vmatprep.mubr.msk.f32.mxu1 %vm458_vm0, %v5158_v43  ;;  %v4896_v49 = vmul.f32 %v15548_v37, %v4633_v61 }
 0x568   : > { %7398 = vst.msk [vmem:[%s14079_s20 + $0x360] sm:$0xff] %vm458_vm0, %v7032_v40  ;;  %v9329_v46 = vpop.eup %9328  ;;  %9342 = vrsqrt.f32 %v3997_v59  ;;  %v3742_v30 = vmul.f32 0.03125, %v3228_v23  ;;  %8619 = vmatprep.mubr.msk.f32.mxu0 %vm458_vm0, %v5030_v20  ;;  %v4768_v6 = vmul.f32 %v15548_v37, %v4505_v44 }
 0x569   : > { %7334 = vst.msk [vmem:[%s14079_s20 + $0x160] sm:$0xff] %vm458_vm0, %v6392_v7  ;;  %v9331_v26 = vpop.eup %9330  ;;  %v4126_v10 = vadd.f32 1e-05, %v3870_v33  ;;  %v5159_v48 = vadd.f32 %v15570_v34, %v4896_v49  ;;  %v4634_v0 = vmul.f32 %v9329_v46, %v14989_v39 }
 0x56a   : > { %v3998_v18 = vadd.f32 1e-05, %v3742_v30  ;;  %v3615_v42 = vpop.xlane.xlu1 %3614  ;;  %v5031_v13 = vadd.f32 %v15570_v34, %v4768_v6  ;;  %v4506_v41 = vmul.f32 %v9331_v26, %v17908_v2  ;;  %v15686_v26 = vld [vmem:[%s16003_s8] ss:$0 sm:$0xff] }
 0x56b   : > { %9344 = vrsqrt.f32 %v4126_v10  ;;  %v3871_v36 = vmul.f32 0.03125, %v3615_v42  ;;  %v3231_v62 = vpop.xlane.xlu0 %3230  ;;  %8812 = vmatmul.mubr.msk.f32.gmra.mxu1 %vm458_vm0, %v5159_v48  ;;  %v4897_v51 = vmul.f32 %v15548_v37, %v4634_v0 }
 0x56c   : > { %v9333_v50 = vpop.eup %9332  ;;  %9346 = vrsqrt.f32 %v3998_v18  ;;  %v3743_v21 = vmul.f32 0.03125, %v3231_v62  ;;  %8620 = vmatmul.mubr.msk.f32.gmra.mxu0 %vm458_vm0, %v5031_v13  ;;  %v4769_v39 = vmul.f32 %v15548_v37, %v4506_v41  ;;  %v17912_v62 = vld [vmem:[#allocation108_spill] sm:$0xff] }
 0x56d   : > { %v9335_v53 = vpop.eup %9334  ;;  %v4635_v31 = vmul.f32 %v9333_v50, %v15008_v17  ;;  %v4127_v47 = vadd.f32 1e-05, %v3871_v36  ;;  %v5160_v25 = vadd.f32 %v15570_v34, %v4897_v51 }
 0x56e   : > { %v4507_v5 = vmul.f32 %v9335_v53, %v17909_v12  ;;  %v3999_v15 = vadd.f32 1e-05, %v3743_v21  ;;  %v5032_v58 = vadd.f32 %v15570_v34, %v4769_v39 }
 0x56f   : > { %v8750_v14 = vpop.f32.mrf.mxu1  ;;  %9348 = vrsqrt.f32 %v4127_v47  ;;  %8814 = vmatprep.mubr.msk.f32.mxu1 %vm458_vm0, %v5160_v25  ;;  %v4898_v52 = vmul.f32 %v15548_v37, %v4635_v31 }
 0x570   : > { %v8558_v27 = vpop.f32.mrf.mxu0  ;;  %v7047_v16 = vadd.f32 %v15361_v3, %v8750_v14  ;;  %v9337_v17 = vpop.eup %9336  ;;  %9350 = vrsqrt.f32 %v3999_v15  ;;  %8622 = vmatprep.mubr.msk.f32.mxu0 %vm458_vm0, %v5032_v58  ;;  %v4770_v9 = vmul.f32 %v15548_v37, %v4507_v5 }
 0x571   : > { %v6407_v57 = vadd.f32 %v15361_v3, %v8558_v27  ;;  %v7041_v63 = vpop.f32.mrf.mxu1  ;;  %v9339_v55 = vpop.eup %9338  ;;  %v5161_v60 = vadd.f32 %v15570_v34, %v4898_v52  ;;  %v4636_v35 = vmul.f32 %v9337_v17, %v15044_v19 }
 0x572   : > { %7401 = vst.msk [vmem:[%s14079_s20 + $0x378] sm:$0xff] %vm458_vm0, %v7047_v16  ;;  %v6401_v24 = vpop.f32.mrf.mxu0  ;;  %v7042_v54 = vadd.f32 %v15361_v3, %v7041_v63  ;;  %v5033_v29 = vadd.f32 %v15570_v34, %v4770_v9  ;;  %v4508_v61 = vmul.f32 %v9339_v55, %v17910_v22 }
 0x573   : > { %7337 = vst.msk [vmem:[%s14079_s20 + $0x178] sm:$0xff] %vm458_vm0, %v6407_v57  ;;  %v6402_v4 = vadd.f32 %v15361_v3, %v6401_v24  ;;  %8815 = vmatmul.mubr.msk.f32.gmra.mxu1 %vm458_vm0, %v5161_v60  ;;  %v4899_v11 = vmul.f32 %v15548_v37, %v4636_v35 }
 0x574   : > { %7400 = vst.msk [vmem:[%s14079_s20 + $0x370] sm:$0xff] %vm458_vm0, %v7042_v54  ;;  %v9341_v38 = vpop.eup %9340  ;;  %8623 = vmatmul.mubr.msk.f32.gmra.mxu0 %vm458_vm0, %v5033_v29  ;;  %v4771_v19 = vmul.f32 %v15548_v37, %v4508_v61 }
 0x575   : > { %7336 = vst.msk [vmem:[%s14079_s20 + $0x170] sm:$0xff] %vm458_vm0, %v6402_v4  ;;  %v9343_v40 = vpop.eup %9342  ;;  %v4637_v3 = vmul.f32 %v9341_v38, %v15059_v1  ;;  %v5162_v43 = vadd.f32 %v15570_v34, %v4899_v11 }
 0x576   : > { %v4509_v44 = vmul.f32 %v9343_v40, %v17911_v28  ;;  %v5034_v59 = vadd.f32 %v15570_v34, %v4771_v19 }
 0x577   : > { %8817 = vmatprep.mubr.msk.f32.mxu1 %vm458_vm0, %v5162_v43  ;;  %v4900_v7 = vmul.f32 %v15548_v37, %v4637_v3 }
 0x578   : > { %v9345_v32 = vpop.eup %9344  ;;  %8625 = vmatprep.mubr.msk.f32.mxu0 %vm458_vm0, %v5034_v59  ;;  %v4772_v20 = vmul.f32 %v15548_v37, %v4509_v44 }
 0x579   : > { %v9347_v33 = vpop.eup %9346  ;;  %v5163_v23 = vadd.f32 %v15570_v34, %v4900_v7  ;;  %v4638_v1 = vmul.f32 %v9345_v32, %v15078_v56 }
 0x57a   : > { %v5035_v49 = vadd.f32 %v15570_v34, %v4772_v20  ;;  %v4510_v30 = vmul.f32 %v9347_v33, %v15087_v45 }
 0x57b   : > { %v8753_v46 = vpop.f32.mrf.mxu1  ;;  %8818 = vmatmul.mubr.msk.f32.gmra.mxu1 %vm458_vm0, %v5163_v23  ;;  %v4901_v48 = vmul.f32 %v15548_v37, %v4638_v1 }
 0x57c   : > { %v8561_v6 = vpop.f32.mrf.mxu0  ;;  %v7057_v10 = vadd.f32 %v15686_v26, %v8753_v46  ;;  %v9349_v56 = vpop.eup %9348  ;;  %8626 = vmatmul.mubr.msk.f32.gmra.mxu0 %vm458_vm0, %v5035_v49  ;;  %v4773_v18 = vmul.f32 %v15548_v37, %v4510_v30 }
 0x57d   : > { %v6417_v0 = vadd.f32 %v15686_v26, %v8561_v6  ;;  %v7051_v45 = vpop.f32.mrf.mxu1  ;;  %v9351_v42 = vpop.eup %9350  ;;  %v4639_v13 = vmul.f32 %v9349_v56, %v15096_v8  ;;  %v5164_v36 = vadd.f32 %v15570_v34, %v4901_v48 }
 0x57e   : > { %7403 = vst.msk [vmem:[%s14079_s20 + $0x388] sm:$0xff] %vm458_vm0, %v7057_v10  ;;  %v6411_v2 = vpop.f32.mrf.mxu0  ;;  %v7052_v41 = vadd.f32 %v15686_v26, %v7051_v45  ;;  %v4511_v51 = vmul.f32 %v9351_v42, %v17912_v62  ;;  %v5036_v21 = vadd.f32 %v15570_v34, %v4773_v18 }
 0x57f   : > { %7339 = vst.msk [vmem:[%s14079_s20 + $0x188] sm:$0xff] %vm458_vm0, %v6417_v0  ;;  %v6412_v50 = vadd.f32 %v15686_v26, %v6411_v2  ;;  %8820 = vmatprep.mubr.msk.f32.mxu1 %vm458_vm0, %v5164_v36  ;;  %v4902_v8 = vmul.f32 %v15548_v37, %v4639_v13 }
 0x580   : > { %7402 = vst.msk [vmem:[%s14079_s20 + $0x380] sm:$0xff] %vm458_vm0, %v7052_v41  ;;  %8628 = vmatprep.mubr.msk.f32.mxu0 %vm458_vm0, %v5036_v21  ;;  %v4774_v39 = vmul.f32 %v15548_v37, %v4511_v51 }
 0x581   : > { %7338 = vst.msk [vmem:[%s14079_s20 + $0x180] sm:$0xff] %vm458_vm0, %v6412_v50  ;;  %v5165_v53 = vadd.f32 %v15570_v34, %v4902_v8 }
 0x582   : > { %v5037_v31 = vadd.f32 %v15570_v34, %v4774_v39 }
 0x583   : > { %8821 = vmatmul.mubr.msk.f32.gmra.mxu1 %vm458_vm0, %v5165_v53 }
 0x584   : > { %8629 = vmatmul.mubr.msk.f32.gmra.mxu0 %vm458_vm0, %v5037_v31 }
 0x587   : > { %v8756_v47 = vpop.f32.mrf.mxu1 }
 0x588   : > { %v8564_v25 = vpop.f32.mrf.mxu0  ;;  %v7067_v12 = vadd.f32 %v15686_v26, %v8756_v47 }
 0x589   : > { %v6427_v5 = vadd.f32 %v15686_v26, %v8564_v25  ;;  %v7061_v15 = vpop.f32.mrf.mxu1 }
 0x58a   : > { %7405 = vst.msk [vmem:[%s14079_s20 + $0x398] sm:$0xff] %vm458_vm0, %v7067_v12  ;;  %v6421_v37 = vpop.f32.mrf.mxu0  ;;  %v7062_v58 = vadd.f32 %v15686_v26, %v7061_v15 }
 0x58b   : > { %7341 = vst.msk [vmem:[%s14079_s20 + $0x198] sm:$0xff] %vm458_vm0, %v6427_v5  ;;  %v6422_v34 = vadd.f32 %v15686_v26, %v6421_v37 }
 0x58c   : > { %7404 = vst.msk [vmem:[%s14079_s20 + $0x390] sm:$0xff] %vm458_vm0, %v7062_v58 }
 0x58d   : > { %7340 = vst.msk [vmem:[%s14079_s20 + $0x190] sm:$0xff] %vm458_vm0, %v6422_v34 }
 0x593   : > { %v8759_v14 = vpop.f32.mrf.mxu1 }
 0x594   : > { %v8567_v27 = vpop.f32.mrf.mxu0  ;;  %v7077_v16 = vadd.f32 %v15686_v26, %v8759_v14 }
 0x595   : > { %v6437_v52 = vadd.f32 %v15686_v26, %v8567_v27  ;;  %v7071_v17 = vpop.f32.mrf.mxu1 }
 0x596   : > { %7407 = vst.msk [vmem:[%s14079_s20 + $0x3a8] sm:$0xff] %vm458_vm0, %v7077_v16  ;;  %v6431_v57 = vpop.f32.mrf.mxu0  ;;  %v7072_v63 = vadd.f32 %v15686_v26, %v7071_v17 }
 0x597   : > { %7343 = vst.msk [vmem:[%s14079_s20 + $0x1a8] sm:$0xff] %vm458_vm0, %v6437_v52  ;;  %v6432_v9 = vadd.f32 %v15686_v26, %v6431_v57 }
 0x598   : > { %7406 = vst.msk [vmem:[%s14079_s20 + $0x3a0] sm:$0xff] %vm458_vm0, %v7072_v63 }
 0x599   : > { %7342 = vst.msk [vmem:[%s14079_s20 + $0x1a0] sm:$0xff] %vm458_vm0, %v6432_v9 }
 0x59f   : > { %v8762_v55 = vpop.f32.mrf.mxu1 }
 0x5a0   : > { %v8570_v24 = vpop.f32.mrf.mxu0  ;;  %v7087_v54 = vadd.f32 %v15686_v26, %v8762_v55 }
 0x5a1   : > { %v6447_v60 = vadd.f32 %v15686_v26, %v8570_v24  ;;  %v7081_v35 = vpop.f32.mrf.mxu1 }
 0x5a2   : > { %7409 = vst.msk [vmem:[%s14079_s20 + $0x3b8] sm:$0xff] %vm458_vm0, %v7087_v54  ;;  %v6441_v4 = vpop.f32.mrf.mxu0  ;;  %v7082_v29 = vadd.f32 %v15686_v26, %v7081_v35 }
 0x5a3   : > { %7345 = vst.msk [vmem:[%s14079_s20 + $0x1b8] sm:$0xff] %vm458_vm0, %v6447_v60  ;;  %v6442_v22 = vadd.f32 %v15686_v26, %v6441_v4 }
 0x5a4   : > { %7408 = vst.msk [vmem:[%s14079_s20 + $0x3b0] sm:$0xff] %vm458_vm0, %v7082_v29 }
 0x5a5   : > { %7344 = vst.msk [vmem:[%s14079_s20 + $0x1b0] sm:$0xff] %vm458_vm0, %v6442_v22 }
 0x5ab   : > { %v8765_v61 = vpop.f32.mrf.mxu1  ;;  %v8573_v11 = vpop.f32.mrf.mxu0 }
 0x5ac   : > { %v7097_v38 = vadd.f32 %v15686_v26, %v8765_v61  ;;  %v6457_v19 = vadd.f32 %v15686_v26, %v8573_v11 }
 0x5ad   : > { %v7091_v40 = vpop.f32.mrf.mxu1  ;;  %v6451_v3 = vpop.f32.mrf.mxu0 }
 0x5ae   : > { %7411 = vst.msk [vmem:[%s14079_s20 + $0x3c8] sm:$0xff] %vm458_vm0, %v7097_v38  ;;  %v7092_v43 = vadd.f32 %v15686_v26, %v7091_v40  ;;  %7347 = vst.msk [vmem:[%s14079_s20 + $0x1c8] sm:$0xff] %vm458_vm0, %v6457_v19  ;;  %v6452_v28 = vadd.f32 %v15686_v26, %v6451_v3 }
 0x5b0   : > { %7410 = vst.msk [vmem:[%s14079_s20 + $0x3c0] sm:$0xff] %vm458_vm0, %v7092_v43  ;;  %7346 = vst.msk [vmem:[%s14079_s20 + $0x1c0] sm:$0xff] %vm458_vm0, %v6452_v28 }
 0x5b3   : > { %v8768_v44 = vpop.f32.mrf.mxu1  ;;  %v8576_v59 = vpop.f32.mrf.mxu0 }
 0x5b4   : > { %v7107_v7 = vadd.f32 %v15686_v26, %v8768_v44  ;;  %v6467_v32 = vadd.f32 %v15686_v26, %v8576_v59 }
 0x5b5   : > { %v7101_v20 = vpop.f32.mrf.mxu1  ;;  %v6461_v33 = vpop.f32.mrf.mxu0 }
 0x5b6   : > { %7413 = vst.msk [vmem:[%s14079_s20 + $0x3d8] sm:$0xff] %vm458_vm0, %v7107_v7  ;;  %v7102_v23 = vadd.f32 %v15686_v26, %v7101_v20  ;;  %7349 = vst.msk [vmem:[%s14079_s20 + $0x1d8] sm:$0xff] %vm458_vm0, %v6467_v32  ;;  %v6462_v1 = vadd.f32 %v15686_v26, %v6461_v33 }
 0x5b8   : > { %7412 = vst.msk [vmem:[%s14079_s20 + $0x3d0] sm:$0xff] %vm458_vm0, %v7102_v23  ;;  %7348 = vst.msk [vmem:[%s14079_s20 + $0x1d0] sm:$0xff] %vm458_vm0, %v6462_v1 }
 0x5ba   : > { %v8771_v49 = vpop.f32.mrf.mxu1 }
 0x5bb   : > { %v8579_v46 = vpop.f32.mrf.mxu0  ;;  %v7117_v30 = vadd.f32 %v15686_v26, %v8771_v49 }
 0x5bc   : > { %v6477_v6 = vadd.f32 %v15686_v26, %v8579_v46  ;;  %v7111_v10 = vpop.f32.mrf.mxu1 }
 0x5bd   : > { %7415 = vst.msk [vmem:[%s14079_s20 + $0x3e8] sm:$0xff] %vm458_vm0, %v7117_v30  ;;  %v6471_v48 = vpop.f32.mrf.mxu0  ;;  %v7112_v56 = vadd.f32 %v15686_v26, %v7111_v10 }
 0x5be   : > { %7351 = vst.msk [vmem:[%s14079_s20 + $0x1e8] sm:$0xff] %vm458_vm0, %v6477_v6  ;;  %v6472_v0 = vadd.f32 %v15686_v26, %v6471_v48 }
 0x5bf   : > { %7414 = vst.msk [vmem:[%s14079_s20 + $0x3e0] sm:$0xff] %vm458_vm0, %v7112_v56 }
 0x5c0   : > { %7350 = vst.msk [vmem:[%s14079_s20 + $0x1e0] sm:$0xff] %vm458_vm0, %v6472_v0 }
 0x5c2   : > { %v8774_v45 = vpop.f32.mrf.mxu1 }
 0x5c3   : > { %v8582_v18 = vpop.f32.mrf.mxu0  ;;  %v7127_v42 = vadd.f32 %v15686_v26, %v8774_v45 }
 0x5c4   : > { %v6487_v13 = vadd.f32 %v15686_v26, %v8582_v18  ;;  %v7121_v2 = vpop.f32.mrf.mxu1 }
 0x5c5   : > { %7417 = vst.msk [vmem:[%s14079_s20 + $0x3f8] sm:$0xff] %vm458_vm0, %v7127_v42  ;;  %v6481_v41 = vpop.f32.mrf.mxu0  ;;  %v7122_v36 = vadd.f32 %v15686_v26, %v7121_v2 }
 0x5c6   : > { %7353 = vst.msk [vmem:[%s14079_s20 + $0x1f8] sm:$0xff] %vm458_vm0, %v6487_v13  ;;  %v6482_v62 = vadd.f32 %v15686_v26, %v6481_v41 }
 0x5c7   : > { %7416 = vst.msk [vmem:[%s14079_s20 + $0x3f0] sm:$0xff] %vm458_vm0, %v7122_v36 }
 0x5c8   : > { %7352 = vst.msk [vmem:[%s14079_s20 + $0x1f0] sm:$0xff] %vm458_vm0, %v6482_v62 }
 0x5ca   : > { %v8777_v51 = vpop.f32.mrf.mxu1 }
 0x5cb   : > { %v8585_v50 = vpop.f32.mrf.mxu0  ;;  %v7137_v21 = vadd.f32 %v15686_v26, %v8777_v51 }
 0x5cc   : > { %v6497_v8 = vadd.f32 %v15686_v26, %v8585_v50  ;;  %v7131_v39 = vpop.f32.mrf.mxu1 }
 0x5cd   : > { %7515 = vst.msk [vmem:[%s14837_s16 + $0x308] sm:$0xff] %vm458_vm0, %v7137_v21  ;;  %v6491_v53 = vpop.f32.mrf.mxu0  ;;  %v7132_v31 = vadd.f32 %v15686_v26, %v7131_v39 }
 0x5ce   : > { %7451 = vst.msk [vmem:[%s14837_s16 + $0x108] sm:$0xff] %vm458_vm0, %v6497_v8  ;;  %v6492_v47 = vadd.f32 %v15686_v26, %v6491_v53 }
 0x5cf   : > { %7514 = vst.msk [vmem:[%s14837_s16 + $0x300] sm:$0xff] %vm458_vm0, %v7132_v31 }
 0x5d0   : > { %7450 = vst.msk [vmem:[%s14837_s16 + $0x100] sm:$0xff] %vm458_vm0, %v6492_v47 }
 0x5d2   : > { %v8780_v25 = vpop.f32.mrf.mxu1 }
 0x5d3   : > { %v8588_v12 = vpop.f32.mrf.mxu0  ;;  %v7147_v5 = vadd.f32 %v15686_v26, %v8780_v25 }
 0x5d4   : > { %v6507_v15 = vadd.f32 %v15686_v26, %v8588_v12  ;;  %v7141_v37 = vpop.f32.mrf.mxu1 }
 0x5d5   : > { %7517 = vst.msk [vmem:[%s14837_s16 + $0x318] sm:$0xff] %vm458_vm0, %v7147_v5  ;;  %v6501_v58 = vpop.f32.mrf.mxu0  ;;  %v7142_v34 = vadd.f32 %v15686_v26, %v7141_v37 }
 0x5d6   : > { %7453 = vst.msk [vmem:[%s14837_s16 + $0x118] sm:$0xff] %vm458_vm0, %v6507_v15  ;;  %v6502_v14 = vadd.f32 %v15686_v26, %v6501_v58 }
 0x5d7   : > { %7516 = vst.msk [vmem:[%s14837_s16 + $0x310] sm:$0xff] %vm458_vm0, %v7142_v34 }
 0x5d8   : > { %7452 = vst.msk [vmem:[%s14837_s16 + $0x110] sm:$0xff] %vm458_vm0, %v6502_v14 }
 0x5da   : > { %v8783_v27 = vpop.f32.mrf.mxu1 }
 0x5db   : > { %v8591_v16 = vpop.f32.mrf.mxu0  ;;  %v7157_v52 = vadd.f32 %v15686_v26, %v8783_v27 }
 0x5dc   : > { %v6517_v17 = vadd.f32 %v15686_v26, %v8591_v16  ;;  %v7151_v57 = vpop.f32.mrf.mxu1 }
 0x5dd   : > { %7519 = vst.msk [vmem:[%s14837_s16 + $0x328] sm:$0xff] %vm458_vm0, %v7157_v52  ;;  %v6511_v63 = vpop.f32.mrf.mxu0  ;;  %v7152_v9 = vadd.f32 %v15686_v26, %v7151_v57 }
 0x5de   : > { %7455 = vst.msk [vmem:[%s14837_s16 + $0x128] sm:$0xff] %vm458_vm0, %v6517_v17  ;;  %v6512_v55 = vadd.f32 %v15686_v26, %v6511_v63 }
 0x5df   : > { %7518 = vst.msk [vmem:[%s14837_s16 + $0x320] sm:$0xff] %vm458_vm0, %v7152_v9 }
 0x5e0   : > { %7454 = vst.msk [vmem:[%s14837_s16 + $0x120] sm:$0xff] %vm458_vm0, %v6512_v55 }
 0x5e3   : > { %v8786_v24 = vpop.f32.mrf.mxu1 }
 0x5e4   : > { %v8594_v54 = vpop.f32.mrf.mxu0  ;;  %v7167_v60 = vadd.f32 %v15686_v26, %v8786_v24 }
 0x5e5   : > { %v6527_v35 = vadd.f32 %v15686_v26, %v8594_v54  ;;  %v7161_v4 = vpop.f32.mrf.mxu1 }
 0x5e6   : > { %7521 = vst.msk [vmem:[%s14837_s16 + $0x338] sm:$0xff] %vm458_vm0, %v7167_v60  ;;  %v6521_v29 = vpop.f32.mrf.mxu0  ;;  %v7162_v22 = vadd.f32 %v15686_v26, %v7161_v4 }
 0x5e7   : > { %7457 = vst.msk [vmem:[%s14837_s16 + $0x138] sm:$0xff] %vm458_vm0, %v6527_v35  ;;  %v6522_v61 = vadd.f32 %v15686_v26, %v6521_v29 }
 0x5e8   : > { %7520 = vst.msk [vmem:[%s14837_s16 + $0x330] sm:$0xff] %vm458_vm0, %v7162_v22 }
 0x5e9   : > { %7456 = vst.msk [vmem:[%s14837_s16 + $0x130] sm:$0xff] %vm458_vm0, %v6522_v61 }
 0x5eb   : > { %v8789_v11 = vpop.f32.mrf.mxu1 }
 0x5ec   : > { %v8597_v38 = vpop.f32.mrf.mxu0  ;;  %v7177_v19 = vadd.f32 %v15686_v26, %v8789_v11 }
 0x5ed   : > { %v6537_v40 = vadd.f32 %v15686_v26, %v8597_v38  ;;  %v7171_v3 = vpop.f32.mrf.mxu1 }
 0x5ee   : > { %7523 = vst.msk [vmem:[%s14837_s16 + $0x348] sm:$0xff] %vm458_vm0, %v7177_v19  ;;  %v6531_v43 = vpop.f32.mrf.mxu0  ;;  %v7172_v28 = vadd.f32 %v15686_v26, %v7171_v3 }
 0x5ef   : > { %7459 = vst.msk [vmem:[%s14837_s16 + $0x148] sm:$0xff] %vm458_vm0, %v6537_v40  ;;  %v6532_v44 = vadd.f32 %v15686_v26, %v6531_v43 }
 0x5f0   : > { %7522 = vst.msk [vmem:[%s14837_s16 + $0x340] sm:$0xff] %vm458_vm0, %v7172_v28 }
 0x5f1   : > { %7458 = vst.msk [vmem:[%s14837_s16 + $0x140] sm:$0xff] %vm458_vm0, %v6532_v44 }
 0x5f3   : > { %v8792_v59 = vpop.f32.mrf.mxu1 }
 0x5f4   : > { %v8600_v7 = vpop.f32.mrf.mxu0  ;;  %v7187_v32 = vadd.f32 %v15686_v26, %v8792_v59 }
 0x5f5   : > { %v6547_v20 = vadd.f32 %v15686_v26, %v8600_v7  ;;  %v7181_v33 = vpop.f32.mrf.mxu1 }
 0x5f6   : > { %7525 = vst.msk [vmem:[%s14837_s16 + $0x358] sm:$0xff] %vm458_vm0, %v7187_v32  ;;  %v6541_v23 = vpop.f32.mrf.mxu0  ;;  %v7182_v1 = vadd.f32 %v15686_v26, %v7181_v33 }
 0x5f7   : > { %7461 = vst.msk [vmem:[%s14837_s16 + $0x158] sm:$0xff] %vm458_vm0, %v6547_v20  ;;  %v6542_v49 = vadd.f32 %v15686_v26, %v6541_v23 }
 0x5f8   : > { %7524 = vst.msk [vmem:[%s14837_s16 + $0x350] sm:$0xff] %vm458_vm0, %v7182_v1 }
 0x5f9   : > { %7460 = vst.msk [vmem:[%s14837_s16 + $0x150] sm:$0xff] %vm458_vm0, %v6542_v49 }
 0x5fb   : > { %v8795_v46 = vpop.f32.mrf.mxu1 }
 0x5fc   : > { %v8603_v30 = vpop.f32.mrf.mxu0  ;;  %v7197_v6 = vadd.f32 %v15686_v26, %v8795_v46 }
 0x5fd   : > { %v6557_v10 = vadd.f32 %v15686_v26, %v8603_v30  ;;  %v7191_v48 = vpop.f32.mrf.mxu1 }
 0x5fe   : > { %7527 = vst.msk [vmem:[%s14837_s16 + $0x368] sm:$0xff] %vm458_vm0, %v7197_v6  ;;  %v6551_v56 = vpop.f32.mrf.mxu0  ;;  %v7192_v0 = vadd.f32 %v15686_v26, %v7191_v48 }
 0x5ff   : > { %7463 = vst.msk [vmem:[%s14837_s16 + $0x168] sm:$0xff] %vm458_vm0, %v6557_v10  ;;  %v6552_v45 = vadd.f32 %v15686_v26, %v6551_v56 }
 0x600   : > { %7526 = vst.msk [vmem:[%s14837_s16 + $0x360] sm:$0xff] %vm458_vm0, %v7192_v0 }
 0x601   : > { %7462 = vst.msk [vmem:[%s14837_s16 + $0x160] sm:$0xff] %vm458_vm0, %v6552_v45 }
 0x603   : > { %v8798_v18 = vpop.f32.mrf.mxu1 }
 0x604   : > { %v8606_v42 = vpop.f32.mrf.mxu0  ;;  %v7207_v13 = vadd.f32 %v15686_v26, %v8798_v18 }
 0x605   : > { %v6567_v2 = vadd.f32 %v15686_v26, %v8606_v42  ;;  %v7201_v41 = vpop.f32.mrf.mxu1 }
 0x606   : > { %7529 = vst.msk [vmem:[%s14837_s16 + $0x378] sm:$0xff] %vm458_vm0, %v7207_v13  ;;  %v6561_v36 = vpop.f32.mrf.mxu0  ;;  %v7202_v62 = vadd.f32 %v15686_v26, %v7201_v41 }
 0x607   : > { %7465 = vst.msk [vmem:[%s14837_s16 + $0x178] sm:$0xff] %vm458_vm0, %v6567_v2  ;;  %v6562_v51 = vadd.f32 %v15686_v26, %v6561_v36 }
 0x608   : > { %7528 = vst.msk [vmem:[%s14837_s16 + $0x370] sm:$0xff] %vm458_vm0, %v7202_v62 }
 0x609   : > { %7464 = vst.msk [vmem:[%s14837_s16 + $0x170] sm:$0xff] %vm458_vm0, %v6562_v51 }
 0x60b   : > { %v8801_v50 = vpop.f32.mrf.mxu1 }
 0x60c   : > { %v8609_v21 = vpop.f32.mrf.mxu0  ;;  %v7217_v8 = vadd.f32 %v15686_v26, %v8801_v50 }
 0x60d   : > { %v6577_v39 = vadd.f32 %v15686_v26, %v8609_v21  ;;  %v7211_v53 = vpop.f32.mrf.mxu1 }
 0x60e   : > { %7531 = vst.msk [vmem:[%s14837_s16 + $0x388] sm:$0xff] %vm458_vm0, %v7217_v8  ;;  %v6571_v31 = vpop.f32.mrf.mxu0  ;;  %v7212_v47 = vadd.f32 %v15686_v26, %v7211_v53 }
 0x60f   : > { %7467 = vst.msk [vmem:[%s14837_s16 + $0x188] sm:$0xff] %vm458_vm0, %v6577_v39  ;;  %v6572_v25 = vadd.f32 %v15686_v26, %v6571_v31 }
 0x610   : > { %7530 = vst.msk [vmem:[%s14837_s16 + $0x380] sm:$0xff] %vm458_vm0, %v7212_v47 }
 0x611   : > { %7466 = vst.msk [vmem:[%s14837_s16 + $0x180] sm:$0xff] %vm458_vm0, %v6572_v25 }
 0x613   : > { %v8804_v12 = vpop.f32.mrf.mxu1 }
 0x614   : > { %v8612_v5 = vpop.f32.mrf.mxu0  ;;  %v7227_v15 = vadd.f32 %v15686_v26, %v8804_v12 }
 0x615   : > { %v6587_v37 = vadd.f32 %v15686_v26, %v8612_v5  ;;  %v7221_v58 = vpop.f32.mrf.mxu1 }
 0x616   : > { %7533 = vst.msk [vmem:[%s14837_s16 + $0x398] sm:$0xff] %vm458_vm0, %v7227_v15  ;;  %v6581_v34 = vpop.f32.mrf.mxu0  ;;  %v7222_v14 = vadd.f32 %v15686_v26, %v7221_v58 }
 0x617   : > { %7469 = vst.msk [vmem:[%s14837_s16 + $0x198] sm:$0xff] %vm458_vm0, %v6587_v37  ;;  %v6582_v27 = vadd.f32 %v15686_v26, %v6581_v34 }
 0x618   : > { %7532 = vst.msk [vmem:[%s14837_s16 + $0x390] sm:$0xff] %vm458_vm0, %v7222_v14 }
 0x619   : > { %7468 = vst.msk [vmem:[%s14837_s16 + $0x190] sm:$0xff] %vm458_vm0, %v6582_v27 }
 0x61b   : > { %v8807_v16 = vpop.f32.mrf.mxu1 }
 0x61c   : > { %v8615_v52 = vpop.f32.mrf.mxu0  ;;  %v7237_v17 = vadd.f32 %v15686_v26, %v8807_v16 }
 0x61d   : > { %v6597_v57 = vadd.f32 %v15686_v26, %v8615_v52  ;;  %v7231_v63 = vpop.f32.mrf.mxu1 }
 0x61e   : > { %7535 = vst.msk [vmem:[%s14837_s16 + $0x3a8] sm:$0xff] %vm458_vm0, %v7237_v17  ;;  %v6591_v9 = vpop.f32.mrf.mxu0  ;;  %v7232_v55 = vadd.f32 %v15686_v26, %v7231_v63 }
 0x61f   : > { %7471 = vst.msk [vmem:[%s14837_s16 + $0x1a8] sm:$0xff] %vm458_vm0, %v6597_v57  ;;  %v6592_v24 = vadd.f32 %v15686_v26, %v6591_v9 }
 0x620   : > { %7534 = vst.msk [vmem:[%s14837_s16 + $0x3a0] sm:$0xff] %vm458_vm0, %v7232_v55 }
 0x621   : > { %7470 = vst.msk [vmem:[%s14837_s16 + $0x1a0] sm:$0xff] %vm458_vm0, %v6592_v24 }
 0x623   : > { %v8810_v54 = vpop.f32.mrf.mxu1 }
 0x624   : > { %v8618_v60 = vpop.f32.mrf.mxu0  ;;  %v7247_v35 = vadd.f32 %v15686_v26, %v8810_v54 }
 0x625   : > { %v6607_v4 = vadd.f32 %v15686_v26, %v8618_v60  ;;  %v7241_v29 = vpop.f32.mrf.mxu1 }
 0x626   : > { %7537 = vst.msk [vmem:[%s14837_s16 + $0x3b8] sm:$0xff] %vm458_vm0, %v7247_v35  ;;  %v6601_v22 = vpop.f32.mrf.mxu0  ;;  %v7242_v61 = vadd.f32 %v15686_v26, %v7241_v29 }
 0x627   : > { %7473 = vst.msk [vmem:[%s14837_s16 + $0x1b8] sm:$0xff] %vm458_vm0, %v6607_v4  ;;  %v6602_v11 = vadd.f32 %v15686_v26, %v6601_v22 }
 0x628   : > { %7536 = vst.msk [vmem:[%s14837_s16 + $0x3b0] sm:$0xff] %vm458_vm0, %v7242_v61 }
 0x629   : > { %7472 = vst.msk [vmem:[%s14837_s16 + $0x1b0] sm:$0xff] %vm458_vm0, %v6602_v11 }
 0x62b   : > { %v8813_v38 = vpop.f32.mrf.mxu1 }
 0x62c   : > { %v8621_v19 = vpop.f32.mrf.mxu0  ;;  %v7257_v40 = vadd.f32 %v15686_v26, %v8813_v38 }
 0x62d   : > { %v6617_v3 = vadd.f32 %v15686_v26, %v8621_v19  ;;  %v7251_v43 = vpop.f32.mrf.mxu1 }
 0x62e   : > { %7539 = vst.msk [vmem:[%s14837_s16 + $0x3c8] sm:$0xff] %vm458_vm0, %v7257_v40  ;;  %v6611_v28 = vpop.f32.mrf.mxu0  ;;  %v7252_v44 = vadd.f32 %v15686_v26, %v7251_v43 }
 0x62f   : > { %7475 = vst.msk [vmem:[%s14837_s16 + $0x1c8] sm:$0xff] %vm458_vm0, %v6617_v3  ;;  %v6612_v59 = vadd.f32 %v15686_v26, %v6611_v28 }
 0x630   : > { %7538 = vst.msk [vmem:[%s14837_s16 + $0x3c0] sm:$0xff] %vm458_vm0, %v7252_v44 }
 0x631   : > { %7474 = vst.msk [vmem:[%s14837_s16 + $0x1c0] sm:$0xff] %vm458_vm0, %v6612_v59 }
 0x633   : > { %v8816_v7 = vpop.f32.mrf.mxu1 }
 0x634   : > { %v8624_v32 = vpop.f32.mrf.mxu0  ;;  %v7267_v20 = vadd.f32 %v15686_v26, %v8816_v7 }
 0x635   : > { %v6627_v33 = vadd.f32 %v15686_v26, %v8624_v32  ;;  %v7261_v23 = vpop.f32.mrf.mxu1 }
 0x636   : > { %7541 = vst.msk [vmem:[%s14837_s16 + $0x3d8] sm:$0xff] %vm458_vm0, %v7267_v20  ;;  %v6621_v1 = vpop.f32.mrf.mxu0  ;;  %v7262_v49 = vadd.f32 %v15686_v26, %v7261_v23 }
 0x637   : > { %7477 = vst.msk [vmem:[%s14837_s16 + $0x1d8] sm:$0xff] %vm458_vm0, %v6627_v33  ;;  %v6622_v46 = vadd.f32 %v15686_v26, %v6621_v1 }
 0x638   : > { %7540 = vst.msk [vmem:[%s14837_s16 + $0x3d0] sm:$0xff] %vm458_vm0, %v7262_v49 }
 0x639   : > { %7476 = vst.msk [vmem:[%s14837_s16 + $0x1d0] sm:$0xff] %vm458_vm0, %v6622_v46 }
 0x63b   : > { %v8819_v30 = vpop.f32.mrf.mxu1 }
 0x63c   : > { %v8627_v6 = vpop.f32.mrf.mxu0  ;;  %v7277_v10 = vadd.f32 %v15686_v26, %v8819_v30 }
 0x63d   : > { %v6637_v48 = vadd.f32 %v15686_v26, %v8627_v6  ;;  %v7271_v56 = vpop.f32.mrf.mxu1 }
 0x63e   : > { %7543 = vst.msk [vmem:[%s14837_s16 + $0x3e8] sm:$0xff] %vm458_vm0, %v7277_v10  ;;  %v6631_v0 = vpop.f32.mrf.mxu0  ;;  %v7272_v45 = vadd.f32 %v15686_v26, %v7271_v56 }
 0x63f   : > { %7479 = vst.msk [vmem:[%s14837_s16 + $0x1e8] sm:$0xff] %vm458_vm0, %v6637_v48  ;;  %v6632_v18 = vadd.f32 %v15686_v26, %v6631_v0 }
 0x640   : > { %7542 = vst.msk [vmem:[%s14837_s16 + $0x3e0] sm:$0xff] %vm458_vm0, %v7272_v45 }
 0x641   : > { %7478 = vst.msk [vmem:[%s14837_s16 + $0x1e0] sm:$0xff] %vm458_vm0, %v6632_v18 }
 0x643   : > { %v8822_v42 = vpop.f32.mrf.mxu1 }
 0x644   : > { %v8630_v13 = vpop.f32.mrf.mxu0  ;;  %v7287_v2 = vadd.f32 %v15686_v26, %v8822_v42 }
 0x645   : > { %v6647_v41 = vadd.f32 %v15686_v26, %v8630_v13  ;;  %v7281_v36 = vpop.f32.mrf.mxu1 }
 0x646   : > { %7545 = vst.msk [vmem:[%s14837_s16 + $0x3f8] sm:$0xff] %vm458_vm0, %v7287_v2  ;;  %v6641_v62 = vpop.f32.mrf.mxu0  ;;  %v7282_v51 = vadd.f32 %v15686_v26, %v7281_v36 }
 0x647   : > { %7481 = vst.msk [vmem:[%s14837_s16 + $0x1f8] sm:$0xff] %vm458_vm0, %v6647_v41  ;;  %v6642_v50 = vadd.f32 %v15686_v26, %v6641_v62 }
 0x648   : > { %7544 = vst.msk [vmem:[%s14837_s16 + $0x3f0] sm:$0xff] %vm458_vm0, %v7282_v51 }
 0x649   : > { %7480 = vst.msk [vmem:[%s14837_s16 + $0x1f0] sm:$0xff] %vm458_vm0, %v6642_v50 }
 0x64a PF: > { %s21_s13 = sadd.s32 1, %s9374_s13  }
 0x64b   : > { %p18_p4 = scmp.ge.s32.totalorder %s21_s13, 4  }
 0x64d   :  { %20 = sbr.rel (!%p18_p4) target bundleno = 1 (0x1), region = 101 }

</bundles_post_ra>
